<compile_context>
chip_gen: v7x
topology: tpu7x:2x2x1
jax: 0.10.0
libtpu: 0.0.40
codegen_flags: <defaults>
</compile_context>

<pallas_src>
import functools

import jax
import jax.numpy as jnp
from jax.experimental import pallas as pl
from jax.experimental.pallas import tpu as pltpu


# ----------------------------------------------------------------------------
# Kernel
# ----------------------------------------------------------------------------
def mlp_kernel(xt_ref, w1_ref, b1_ref, w2_ref, b2_ref,
               w3_ref, b3_ref, w4_ref, b4_ref, o_ref, *, layer1_bf16):
    # xt_ref : (in_dim, tb)   batch on lanes (f32 in VMEM)
    # w1     : (128, in_dim)  w2: (32, 128)  w3: (16, 32)  w4: (16, 1)
    # b1..b3 : (out, 1)       b4: (1, 1)
    # o_ref  : (1, tb)        lane-dense output row
    l1_dtype = jnp.bfloat16 if layer1_bf16 else jnp.float32
    k_dim = xt_ref.shape[0]

    xt = xt_ref[...].astype(l1_dtype)          # (in_dim, tb)
    w1 = w1_ref[...].astype(l1_dtype)          # (128, in_dim)
    b1 = b1_ref[...].astype(l1_dtype)          # (128, 1)

    if k_dim <= 8:
        # Layer 1 on the VPU: K is tiny, an MXU matmul would waste the
        # contraction dim.  k_dim broadcast FMAs per output vreg; packed
        # bf16 on v6e/v7x halves the VALU work.
        acc = w1[:, 0:1] * xt[0:1, :]
        for k in range(1, k_dim):
            acc = acc + w1[:, k:k + 1] * xt[k:k + 1, :]
    else:
        acc = jnp.dot(w1.astype(jnp.bfloat16), xt.astype(jnp.bfloat16),
                      preferred_element_type=jnp.float32).astype(l1_dtype)
    # h1 in bf16: halves its VMEM traffic and feeds the bf16-native MXU.
    h1 = jnp.maximum(acc + b1, 0.0).astype(jnp.bfloat16)          # (128, tb)

    h2 = jnp.dot(w2_ref[...].astype(jnp.bfloat16), h1,
                 preferred_element_type=jnp.float32) + b2_ref[...]
    h2 = jnp.maximum(h2, 0.0).astype(jnp.bfloat16)                # (32, tb)

    h3 = jnp.dot(w3_ref[...].astype(jnp.bfloat16), h2,
                 preferred_element_type=jnp.float32) + b3_ref[...]
    h3 = jnp.maximum(h3, 0.0)                                     # (16, tb) f32

    # Single output feature: VPU multiply + sublane reduction (XLU) instead
    # of an M=1 MXU matmul.  Final layer kept in f32 for accuracy.
    logits = jnp.sum(h3 * w4_ref[...], axis=0, keepdims=True) + b4_ref[...]
    # sigmoid(x) = 0.5 * (tanh(0.5 * x) + 1): single EUP op, no divide.
    o_ref[...] = (0.5 * (jnp.tanh(0.5 * logits) + 1.0)).astype(o_ref.dtype)


# ----------------------------------------------------------------------------
# Pure-JAX reference (also the small-batch fallback path)
# ----------------------------------------------------------------------------
def reference_forward(x, params):
    """params in PyTorch layout (w: (out, in), b: (out,))."""
    w1, b1, w2, b2, w3, b3, w4, b4 = params
    h = jnp.maximum(x @ w1.T + b1, 0.0)
    h = jnp.maximum(h @ w2.T + b2, 0.0)
    h = jnp.maximum(h @ w3.T + b3, 0.0)
    return jax.nn.sigmoid(h @ w4.T + b4)


# ----------------------------------------------------------------------------
# Wrapper
# ----------------------------------------------------------------------------
@functools.lru_cache(maxsize=1)
def _tpu_config():
    """Returns (tensorcores_per_chip, layer1_bf16) from the device kind."""
    try:
        kind = jax.devices()[0].device_kind.lower()
    except Exception:
        kind = ""
    is_v7 = "v7" in kind
    is_v5e = ("v5" in kind) and (("lite" in kind) or ("v5e" in kind))
    n_tc = 2 if is_v7 else 1           # v5e/v6e: single TensorCore per chip
    layer1_bf16 = not is_v5e           # v5e VPU has no packed bf16
    return n_tc, layer1_bf16


def _cdiv(a, b):
    return -(-a // b)


def _round_up(a, b):
    return _cdiv(a, b) * b


@functools.partial(jax.jit, static_argnums=(2, 3))
def _forward_jit(x, params, tile_b, min_pallas_batch):
    w1, b1, w2, b2, w3, b3, w4, b4 = params
    B, in_dim = x.shape

    # Tiny batches: pallas_call fixed cost (grid setup, 9 input DMAs) exceeds
    # the whole fused MLP -- let (jitted) XLA handle it.
    if min_pallas_batch and B < min_pallas_batch:
        return reference_forward(x, params)

    assert tile_b % 128 == 0 and (tile_b & (tile_b - 1)) == 0, \
        "tile_b must be a power-of-two multiple of 128"

    n_tc, layer1_bf16 = _tpu_config()
    min_grid = n_tc                     # keep >= n_tc steps for megacore only

    # Large tile to amortize the ~0.35us/step pipeline overhead; shrink only
    # (a) to keep >= min_grid steps, (b) to avoid gross over-padding of small
    # ragged batches.
    tb = tile_b
    while tb > 128 and _cdiv(B, tb) < min_grid:
        tb //= 2
    while tb > 128 and tb >= 2 * _round_up(B, 128):
        tb //= 2
    grid_n = _cdiv(B, tb)
    # v7x: the 'parallel' axis shards over 2 TCs -- keep the grid even so
    # neither core idles on the last step (padded tile is sliced off below).
    if n_tc == 2 and grid_n > 1 and grid_n % 2 == 1:
        grid_n += 1
    B_pad = grid_n * tb

    # Feature-major input: batch on lanes.  Pad ragged batches with zeros.
    # (Under jit the transpose + pad fuse into one copy; callers that already
    # hold x feature-major could skip this entirely.)
    xt = x.T                                   # (in_dim, B)
    if B_pad != B:
        xt = jnp.pad(xt, ((0, 0), (0, B_pad - B)))

    # Biases as (out, 1) columns (broadcast over batch lanes); w4 as a
    # (16, 1) column for the VPU/XLU last layer.
    b1c, b2c, b3c = b1.reshape(-1, 1), b2.reshape(-1, 1), b3.reshape(-1, 1)
    w4c, b4c = w4.reshape(-1, 1), b4.reshape(1, 1)

    def full_spec(arr):
        # Whole array resident in VMEM; block index never changes.
        return pl.BlockSpec(arr.shape, lambda i: (0, 0))

    h1_dim, h2_dim, h3_dim = w1.shape[0], w2.shape[0], w3.shape[0]
    weight_bytes = 4 * (w1.size + b1.size + w2.size + b2.size
                        + w3.size + b3.size + w4.size + b4.size)
    cost = pl.CostEstimate(
        flops=2 * B_pad * (in_dim * h1_dim + h1_dim * h2_dim
                           + h2_dim * h3_dim + h3_dim),
        transcendentals=B_pad,
        bytes_accessed=B_pad * in_dim * 4 + B_pad * 4 + weight_bytes,
    )

    kernel = functools.partial(mlp_kernel, layer1_bf16=layer1_bf16)

    out_row = pl.pallas_call(
        kernel,
        out_shape=jax.ShapeDtypeStruct((1, B_pad), jnp.float32),
        grid_spec=pltpu.PrefetchScalarGridSpec(
            num_scalar_prefetch=0,
            grid=(grid_n,),
            in_specs=[
                pl.BlockSpec((in_dim, tb), lambda i: (0, i)),   # x tile
                full_spec(w1), full_spec(b1c),
                full_spec(w2), full_spec(b2c),
                full_spec(w3), full_spec(b3c),
                full_spec(w4c), full_spec(b4c),
            ],
            out_specs=pl.BlockSpec((1, tb), lambda i: (0, i)),
        ),
        compiler_params=pltpu.CompilerParams(
            dimension_semantics=("parallel",)),
        cost_estimate=cost,
    )(xt, w1, b1c, w2, b2c, w3, b3c, w4c, b4c)

    out = out_row.reshape(B_pad, 1)
    return out[:B] if B_pad != B else out


def func_model_forward(x, params, *, tile_b=8192, min_pallas_batch=2048):
    """x: (B, in_dim) f32 -> (B, 1) f32 sigmoid output."""
    return _forward_jit(x, params, tile_b, min_pallas_batch)


def init_params(key, in_dim=4):
    """PyTorch nn.Linear-style init: w (out,in), b (out,), U(+-1/sqrt(fan_in))."""
    dims = [(in_dim, 128), (128, 32), (32, 16), (16, 1)]
    params = []
    for fan_in, fan_out in dims:
        key, kw, kb = jax.random.split(key, 3)
        bound = 1.0 / (fan_in ** 0.5)
        w = jax.random.uniform(kw, (fan_out, fan_in), jnp.float32, -bound, bound)
        b = jax.random.uniform(kb, (fan_out,), jnp.float32, -bound, bound)
        params += [w, b]
    return tuple(params)


if __name__ == "__main__":
    key = jax.random.PRNGKey(0)
    key, kx1, kx2, kx3 = jax.random.split(key, 4)
    in_dim = 4
    params = init_params(key, in_dim)

    # 1) Aligned batch through the Pallas path (bf16 MXU -> loose tolerance).
    B1 = 4096
    x1 = jax.random.normal(kx1, (B1, in_dim), jnp.float32)
    out1 = jax.block_until_ready(func_model_forward(x1, params))
    ref1 = reference_forward(x1, params)
    assert out1.shape == (B1, 1)
    assert float(jnp.max(jnp.abs(out1 - ref1))) < 3e-2

    # 2) Ragged batch with Pallas forced (gate disabled): zero-pad + slice.
    B2 = 300
    x2 = jax.random.normal(kx2, (B2, in_dim), jnp.float32)
    out2 = jax.block_until_ready(
        func_model_forward(x2, params, min_pallas_batch=0))
    ref2 = reference_forward(x2, params)
    assert out2.shape == (B2, 1)
    assert float(jnp.max(jnp.abs(out2 - ref2))) < 3e-2

    # 3) Small batch: jitted plain-XLA fallback (exact f32 path).
    B3 = 8
    x3 = jax.random.normal(kx3, (B3, in_dim), jnp.float32)
    out3 = jax.block_until_ready(func_model_forward(x3, params))
    ref3 = reference_forward(x3, params)
    assert out3.shape == (B3, 1)
    assert jnp.allclose(out3, ref3, atol=1e-5, rtol=1e-5)

    print("KERNEL_OK")
</pallas_src>

<mosaic_0001>
module attributes {stable_mosaic.version = 11 : i64} {
  func.func @mlp_kernel(%arg0: i32, %arg1: memref<4x4096xf32, #tpu.memory_space<vmem>>, %arg2: memref<128x4xf32, #tpu.memory_space<vmem>>, %arg3: memref<128x1xf32, #tpu.memory_space<vmem>>, %arg4: memref<32x128xf32, #tpu.memory_space<vmem>>, %arg5: memref<32x1xf32, #tpu.memory_space<vmem>>, %arg6: memref<16x32xf32, #tpu.memory_space<vmem>>, %arg7: memref<16x1xf32, #tpu.memory_space<vmem>>, %arg8: memref<16x1xf32, #tpu.memory_space<vmem>>, %arg9: memref<1x1xf32, #tpu.memory_space<vmem>>, %arg10: memref<1x4096xf32, #tpu.memory_space<vmem>>) attributes {dimension_semantics = [#tpu.dimension_semantics<parallel>], iteration_bounds = array<i64: 1>, scalar_prefetch = 0 : i64, scratch_operands = 0 : i64, tpu.core_type = #tpu.core_type<tc>, window_params = [{transform_indices = @transform_0, window_bounds = array<i64: 4, 4096>}, {pipeline_mode = #tpu.pipeline_mode<synchronous>, transform_indices = @transform_1, window_bounds = array<i64: 128, 4>}, {pipeline_mode = #tpu.pipeline_mode<synchronous>, transform_indices = @transform_2, window_bounds = array<i64: 128, 1>}, {pipeline_mode = #tpu.pipeline_mode<synchronous>, transform_indices = @transform_3, window_bounds = array<i64: 32, 128>}, {pipeline_mode = #tpu.pipeline_mode<synchronous>, transform_indices = @transform_4, window_bounds = array<i64: 32, 1>}, {pipeline_mode = #tpu.pipeline_mode<synchronous>, transform_indices = @transform_5, window_bounds = array<i64: 16, 32>}, {pipeline_mode = #tpu.pipeline_mode<synchronous>, transform_indices = @transform_6, window_bounds = array<i64: 16, 1>}, {pipeline_mode = #tpu.pipeline_mode<synchronous>, transform_indices = @transform_7, window_bounds = array<i64: 16, 1>}, {pipeline_mode = #tpu.pipeline_mode<synchronous>, transform_indices = @transform_8, window_bounds = array<i64: 1, 1>}, {transform_indices = @transform_9, window_bounds = array<i64: 1, 4096>}]} {
    %c0 = arith.constant 0 : index
    %c0_0 = arith.constant 0 : index
    %0 = vector.load %arg1[%c0, %c0_0] : memref<4x4096xf32, #tpu.memory_space<vmem>>, vector<4x4096xf32>
    %1 = arith.truncf %0 : vector<4x4096xf32> to vector<4x4096xbf16>
    %c0_1 = arith.constant 0 : index
    %c0_2 = arith.constant 0 : index
    %2 = vector.load %arg2[%c0_1, %c0_2] : memref<128x4xf32, #tpu.memory_space<vmem>>, vector<128x4xf32>
    %3 = arith.truncf %2 : vector<128x4xf32> to vector<128x4xbf16>
    %c0_3 = arith.constant 0 : index
    %c0_4 = arith.constant 0 : index
    %4 = vector.load %arg3[%c0_3, %c0_4] : memref<128x1xf32, #tpu.memory_space<vmem>>, vector<128x1xf32>
    %5 = arith.truncf %4 : vector<128x1xf32> to vector<128x1xbf16>
    %6 = vector.extract_strided_slice %3 {offsets = [0, 0], sizes = [128, 1], strides = [1, 1]} : vector<128x4xbf16> to vector<128x1xbf16>
    %7 = vector.extract_strided_slice %1 {offsets = [0, 0], sizes = [1, 4096], strides = [1, 1]} : vector<4x4096xbf16> to vector<1x4096xbf16>
    %8 = vector.broadcast %6 : vector<128x1xbf16> to vector<128x4096xbf16>
    %9 = vector.broadcast %7 : vector<1x4096xbf16> to vector<128x4096xbf16>
    %10 = arith.mulf %8, %9 : vector<128x4096xbf16>
    %11 = vector.extract_strided_slice %3 {offsets = [0, 1], sizes = [128, 1], strides = [1, 1]} : vector<128x4xbf16> to vector<128x1xbf16>
    %12 = vector.extract_strided_slice %1 {offsets = [1, 0], sizes = [1, 4096], strides = [1, 1]} : vector<4x4096xbf16> to vector<1x4096xbf16>
    %13 = vector.broadcast %11 : vector<128x1xbf16> to vector<128x4096xbf16>
    %14 = vector.broadcast %12 : vector<1x4096xbf16> to vector<128x4096xbf16>
    %15 = arith.mulf %13, %14 : vector<128x4096xbf16>
    %16 = arith.addf %10, %15 : vector<128x4096xbf16>
    %17 = vector.extract_strided_slice %3 {offsets = [0, 2], sizes = [128, 1], strides = [1, 1]} : vector<128x4xbf16> to vector<128x1xbf16>
    %18 = vector.extract_strided_slice %1 {offsets = [2, 0], sizes = [1, 4096], strides = [1, 1]} : vector<4x4096xbf16> to vector<1x4096xbf16>
    %19 = vector.broadcast %17 : vector<128x1xbf16> to vector<128x4096xbf16>
    %20 = vector.broadcast %18 : vector<1x4096xbf16> to vector<128x4096xbf16>
    %21 = arith.mulf %19, %20 : vector<128x4096xbf16>
    %22 = arith.addf %16, %21 : vector<128x4096xbf16>
    %23 = vector.extract_strided_slice %3 {offsets = [0, 3], sizes = [128, 1], strides = [1, 1]} : vector<128x4xbf16> to vector<128x1xbf16>
    %24 = vector.extract_strided_slice %1 {offsets = [3, 0], sizes = [1, 4096], strides = [1, 1]} : vector<4x4096xbf16> to vector<1x4096xbf16>
    %25 = vector.broadcast %23 : vector<128x1xbf16> to vector<128x4096xbf16>
    %26 = vector.broadcast %24 : vector<1x4096xbf16> to vector<128x4096xbf16>
    %27 = arith.mulf %25, %26 : vector<128x4096xbf16>
    %28 = arith.addf %22, %27 : vector<128x4096xbf16>
    %29 = vector.broadcast %5 : vector<128x1xbf16> to vector<128x4096xbf16>
    %30 = arith.addf %28, %29 : vector<128x4096xbf16>
    %cst = arith.constant 0.000000e+00 : bf16
    %31 = vector.broadcast %cst : bf16 to vector<128x4096xbf16>
    %32 = arith.maximumf %30, %31 : vector<128x4096xbf16>
    %c0_5 = arith.constant 0 : index
    %c0_6 = arith.constant 0 : index
    %33 = vector.load %arg4[%c0_5, %c0_6] : memref<32x128xf32, #tpu.memory_space<vmem>>, vector<32x128xf32>
    %34 = arith.truncf %33 : vector<32x128xf32> to vector<32x128xbf16>
    %cst_7 = arith.constant dense<0.000000e+00> : vector<32x4096xf32>
    %35 = tpu.matmul %34, %32, %cst_7 {dimension_numbers = #tpu.dot_dimension_numbers<[1], [0], [0], [1], [0, 0, 1, 1], [], []>} : vector<32x128xbf16>, vector<128x4096xbf16>, vector<32x4096xf32> -> vector<32x4096xf32>
    %c0_8 = arith.constant 0 : index
    %c0_9 = arith.constant 0 : index
    %36 = vector.load %arg5[%c0_8, %c0_9] : memref<32x1xf32, #tpu.memory_space<vmem>>, vector<32x1xf32>
    %37 = vector.broadcast %36 : vector<32x1xf32> to vector<32x4096xf32>
    %38 = arith.addf %35, %37 : vector<32x4096xf32>
    %cst_10 = arith.constant 0.000000e+00 : f32
    %39 = vector.broadcast %cst_10 : f32 to vector<32x4096xf32>
    %40 = arith.maximumf %38, %39 : vector<32x4096xf32>
    %41 = arith.truncf %40 : vector<32x4096xf32> to vector<32x4096xbf16>
    %c0_11 = arith.constant 0 : index
    %c0_12 = arith.constant 0 : index
    %42 = vector.load %arg6[%c0_11, %c0_12] : memref<16x32xf32, #tpu.memory_space<vmem>>, vector<16x32xf32>
    %43 = arith.truncf %42 : vector<16x32xf32> to vector<16x32xbf16>
    %cst_13 = arith.constant dense<0.000000e+00> : vector<16x4096xf32>
    %44 = tpu.matmul %43, %41, %cst_13 {dimension_numbers = #tpu.dot_dimension_numbers<[1], [0], [0], [1], [0, 0, 1, 1], [], []>} : vector<16x32xbf16>, vector<32x4096xbf16>, vector<16x4096xf32> -> vector<16x4096xf32>
    %c0_14 = arith.constant 0 : index
    %c0_15 = arith.constant 0 : index
    %45 = vector.load %arg7[%c0_14, %c0_15] : memref<16x1xf32, #tpu.memory_space<vmem>>, vector<16x1xf32>
    %46 = vector.broadcast %45 : vector<16x1xf32> to vector<16x4096xf32>
    %47 = arith.addf %44, %46 : vector<16x4096xf32>
    %cst_16 = arith.constant 0.000000e+00 : f32
    %48 = vector.broadcast %cst_16 : f32 to vector<16x4096xf32>
    %49 = arith.maximumf %47, %48 : vector<16x4096xf32>
    %c0_17 = arith.constant 0 : index
    %c0_18 = arith.constant 0 : index
    %50 = vector.load %arg8[%c0_17, %c0_18] : memref<16x1xf32, #tpu.memory_space<vmem>>, vector<16x1xf32>
    %51 = vector.broadcast %50 : vector<16x1xf32> to vector<16x4096xf32>
    %52 = arith.mulf %49, %51 : vector<16x4096xf32>
    %cst_19 = arith.constant dense<0.000000e+00> : vector<4096xf32>
    %53 = vector.multi_reduction <add>, %52, %cst_19 [0] : vector<16x4096xf32> to vector<4096xf32>
    %54 = vector.shape_cast %53 : vector<4096xf32> to vector<1x4096xf32>
    %c0_20 = arith.constant 0 : index
    %c0_21 = arith.constant 0 : index
    %55 = vector.load %arg9[%c0_20, %c0_21] : memref<1x1xf32, #tpu.memory_space<vmem>>, vector<1x1xf32>
    %56 = vector.broadcast %55 : vector<1x1xf32> to vector<1x4096xf32>
    %57 = arith.addf %54, %56 : vector<1x4096xf32>
    %cst_22 = arith.constant 5.000000e-01 : f32
    %58 = vector.broadcast %cst_22 : f32 to vector<1x4096xf32>
    %59 = arith.mulf %58, %57 : vector<1x4096xf32>
    %60 = math.tanh %59 : vector<1x4096xf32>
    %cst_23 = arith.constant 1.000000e+00 : f32
    %61 = vector.broadcast %cst_23 : f32 to vector<1x4096xf32>
    %62 = arith.addf %60, %61 : vector<1x4096xf32>
    %cst_24 = arith.constant 5.000000e-01 : f32
    %63 = vector.broadcast %cst_24 : f32 to vector<1x4096xf32>
    %64 = arith.mulf %63, %62 : vector<1x4096xf32>
    %c0_25 = arith.constant 0 : index
    %c0_26 = arith.constant 0 : index
    %65 = vector.load %arg10[%c0_25, %c0_26] : memref<1x4096xf32, #tpu.memory_space<vmem>>, vector<1x4096xf32>
    tpu.vector_store %arg10[%c0_25, %c0_26], %64 {strides = array<i32>} : memref<1x4096xf32, #tpu.memory_space<vmem>>, vector<1x4096xf32>,
    return
  }
  func.func @transform_0(%arg0: i32) -> (i32, i32) {
    %c0_i32 = arith.constant 0 : i32
    %c0_i32_0 = arith.constant 0 : i32
    return %c0_i32, %arg0 : i32, i32
  }
  func.func @transform_1(%arg0: i32) -> (i32, i32) {
    %c0_i32 = arith.constant 0 : i32
    %c0_i32_0 = arith.constant 0 : i32
    %c0_i32_1 = arith.constant 0 : i32
    return %c0_i32, %c0_i32_0 : i32, i32
  }
  func.func @transform_2(%arg0: i32) -> (i32, i32) {
    %c0_i32 = arith.constant 0 : i32
    %c0_i32_0 = arith.constant 0 : i32
    %c0_i32_1 = arith.constant 0 : i32
    return %c0_i32, %c0_i32_0 : i32, i32
  }
  func.func @transform_3(%arg0: i32) -> (i32, i32) {
    %c0_i32 = arith.constant 0 : i32
    %c0_i32_0 = arith.constant 0 : i32
    %c0_i32_1 = arith.constant 0 : i32
    return %c0_i32, %c0_i32_0 : i32, i32
  }
  func.func @transform_4(%arg0: i32) -> (i32, i32) {
    %c0_i32 = arith.constant 0 : i32
    %c0_i32_0 = arith.constant 0 : i32
    %c0_i32_1 = arith.constant 0 : i32
    return %c0_i32, %c0_i32_0 : i32, i32
  }
  func.func @transform_5(%arg0: i32) -> (i32, i32) {
    %c0_i32 = arith.constant 0 : i32
    %c0_i32_0 = arith.constant 0 : i32
    %c0_i32_1 = arith.constant 0 : i32
    return %c0_i32, %c0_i32_0 : i32, i32
  }
  func.func @transform_6(%arg0: i32) -> (i32, i32) {
    %c0_i32 = arith.constant 0 : i32
    %c0_i32_0 = arith.constant 0 : i32
    %c0_i32_1 = arith.constant 0 : i32
    return %c0_i32, %c0_i32_0 : i32, i32
  }
  func.func @transform_7(%arg0: i32) -> (i32, i32) {
    %c0_i32 = arith.constant 0 : i32
    %c0_i32_0 = arith.constant 0 : i32
    %c0_i32_1 = arith.constant 0 : i32
    return %c0_i32, %c0_i32_0 : i32, i32
  }
  func.func @transform_8(%arg0: i32) -> (i32, i32) {
    %c0_i32 = arith.constant 0 : i32
    %c0_i32_0 = arith.constant 0 : i32
    %c0_i32_1 = arith.constant 0 : i32
    return %c0_i32, %c0_i32_0 : i32, i32
  }
  func.func @transform_9(%arg0: i32) -> (i32, i32) {
    %c0_i32 = arith.constant 0 : i32
    %c0_i32_0 = arith.constant 0 : i32
    return %c0_i32, %arg0 : i32, i32
  }
}

</mosaic_0001>

<bundles_post_ra>
// kernel: _forward_jit.1
= control target key start
LH: loop header
LB: loop body
LE: loop exit
PB: predicated region body
PF: predicated region fallthrough
CT: control target
= control target key end

     0   :  { %s10717_s0 = inlined_call_operand.vmem [shape: f32[4,4096], index: 0, kind: input, shape index: {}]   ;;  %s10718_s1 = inlined_call_operand.vmem [shape: f32[128,4], index: 1, kind: input, shape index: {}]   ;;  %s10719_s2 = inlined_call_operand.vmem [shape: f32[128,1], index: 2, kind: input, shape index: {}]   ;;  %s10720_s3 = inlined_call_operand.vmem [shape: f32[32,128], index: 3, kind: input, shape index: {}]   ;;  %s10721_s4 = inlined_call_operand.vmem [shape: f32[32,1], index: 4, kind: input, shape index: {}]   ;;  %s10722_s5 = inlined_call_operand.vmem [shape: f32[16,32], index: 5, kind: input, shape index: {}]   ;;  %s10723_s6 = inlined_call_operand.vmem [shape: f32[16,1], index: 6, kind: input, shape index: {}]   ;;  %s10724_s7 = inlined_call_operand.vmem [shape: f32[16,1], index: 7, kind: input, shape index: {}]   ;;  %s10725_s8 = inlined_call_operand.<no memory space> [shape: f32[1,1], index: 8, kind: input, shape index: {}]   ;;  %s10726_s9 = inlined_call_operand.hbm [shape: f32[1,4096], index: 9, kind: output, shape index: {}]  }
   0x1   :  { %v14_v0 = vstv %s10725_s8 }
   0x2   :  { %15 = vst [vmem:[#allocation2] sm:$0x1] %v14_v0 }
   0x3   :  { %v132_v1 = vld [vmem:[%s10718_s1] sm:$0xff]  ;;  %v133_v2 = vld [vmem:[%s10718_s1 + $0x8] sm:$0xff]  ;;  %v6080_v4 = vmov 2   ;;  %v6081_v5 = vmov 1   ;;  %v134_v8 = vld [vmem:[%s10718_s1 + $0x10] sm:$0xff]  ;;  %v10727_v10 = vmov 0  }
   0x4   :  { %v136_v3 = vld [vmem:[%s10718_s1 + $0x20] sm:$0xff]  ;;  %5948 = vset.pattern.permute.xlu1 %v6080_v4  ;;  %5947 = vset.pattern.permute.xlu0 %v6081_v5  ;;  %v148_v6 = vpack.c.bf16 %v133_v2, %v132_v1  ;;  %v137_v7 = vld [vmem:[%s10718_s1 + $0x28] sm:$0xff]  ;;  %v135_v9 = vld [vmem:[%s10718_s1 + $0x18] sm:$0xff] }
   0x5   :  { %3426 = vmatprep.mubr.bf16.mxu0 %v10727_v10  ;;  %3479 = vmatprep.mubr.bf16.mxu1 %v10727_v10  ;;  %v150_v11 = vpack.c.bf16 %v137_v7, %v136_v3  ;;  %v149_v12 = vpack.c.bf16 %v135_v9, %v134_v8 }
   0x6   :  { %1469 = vperm.xlu1 %5948, %v148_v6   ;;  %701 = vperm.xlu0 %5947, %v148_v6  }
   0xa   :  { %5949 = vset.pattern.permute.xlu1 %v10727_v10  ;;  %709 = vperm.xlu0 %5947, %v150_v11  }
   0xb   :  { %187 = vperm.xlu1 %5949, %v149_v12  }
   0xe   :  { %5955 = vset.pattern.permute.xlu0 %v6080_v4 }
   0xf   :  { %5950 = vset.pattern.permute.xlu1 %v6081_v5  ;;  %1477 = vperm.xlu0 %5955, %v150_v11  }
  0x10   :  { %705 = vperm.xlu1 %5950, %v149_v12  }
  0x11   :  { %16 = vsyncpa [#allocation4], 0  ;;  %v6083_v13 = vmov 3   ;;  %v140_v14 = vld [vmem:[%s10718_s1 + $0x40] sm:$0xff]  ;;  %v141_v15 = vld [vmem:[%s10718_s1 + $0x48] sm:$0xff]  ;;  %v223_v55 = vlaneseq  ;;  %vm4449_vm0 = vcmask 261120  }
  0x12   :  { %v152_v16 = vpack.c.bf16 %v141_v15, %v140_v14  ;;  %v156_v17 = vld [vmem:[%s10719_s2] sm:$0xff]  ;;  %v157_v18 = vld [vmem:[%s10719_s2 + $0x8] sm:$0xff]  ;;  %v138_v23 = vld [vmem:[%s10718_s1 + $0x30] sm:$0xff] }
  0x13   :  { %5956 = vset.pattern.permute.xlu0 %v6083_v13  ;;  %v160_v19 = vld [vmem:[%s10719_s2 + $0x20] sm:$0xff]  ;;  %v161_v20 = vld [vmem:[%s10719_s2 + $0x28] sm:$0xff]  ;;  %v172_v21 = vpack.c.bf16 %v157_v18, %v156_v17  ;;  %v139_v24 = vld [vmem:[%s10718_s1 + $0x38] sm:$0xff]  ;;  %v6279_v61 = vshrl.u32 %v223_v55, 7 }
  0x14   :  { %5951 = vset.pattern.permute.xlu1 %v6080_v4  ;;  %2141 = vperm.xlu0 %5956, %v148_v6   ;;  %v174_v22 = vpack.c.bf16 %v161_v20, %v160_v19  ;;  %v142_v25 = vld [vmem:[%s10718_s1 + $0x50] sm:$0xff]  ;;  %v143_v26 = vld [vmem:[%s10718_s1 + $0x58] sm:$0xff]  ;;  %v151_v27 = vpack.c.bf16 %v139_v24, %v138_v23  ;;  %v144_v29 = vld [vmem:[%s10718_s1 + $0x60] sm:$0xff] }
  0x15   :  { %1473 = vperm.xlu1 %5951, %v149_v12   ;;  %v153_v28 = vpack.c.bf16 %v143_v26, %v142_v25  ;;  %v145_v30 = vld [vmem:[%s10718_s1 + $0x68] sm:$0xff]  ;;  %v164_v32 = vld [vmem:[%s10719_s2 + $0x40] sm:$0xff]  ;;  %v158_v34 = vld [vmem:[%s10719_s2 + $0x10] sm:$0xff]  ;;  %10965 = vst [vmem:[#allocation6_spill] sm:$0xff] %v6279_v61  ;;  %v6289_v8 = vsub.s32 0, %v6279_v61  ;;  %v6292_v9 = vsub.s32 1, %v6279_v61 }
  0x16   :  { %v154_v31 = vpack.c.bf16 %v145_v30, %v144_v29  ;;  %v165_v33 = vld [vmem:[%s10719_s2 + $0x48] sm:$0xff]  ;;  %v159_v35 = vld [vmem:[%s10719_s2 + $0x18] sm:$0xff]  ;;  %v146_v38 = vld [vmem:[%s10718_s1 + $0x70] sm:$0xff] }
  0x17   :  { %v176_v36 = vpack.c.bf16 %v165_v33, %v164_v32  ;;  %v173_v37 = vpack.c.bf16 %v159_v35, %v158_v34  ;;  %v147_v39 = vld [vmem:[%s10718_s1 + $0x78] sm:$0xff]  ;;  %v170_v41 = vld [vmem:[%s10719_s2 + $0x70] sm:$0xff]  ;;  %v4437_v48 = vld [vmem:[%s10723_s6] sm:$0xff]  ;;  %10966 = vst [vmem:[#allocation7_spill] sm:$0xff] %v6289_v8 }
  0x18   :  { %2149 = vperm.xlu0 %5956, %v150_v11   ;;  %v155_v40 = vpack.c.bf16 %v147_v39, %v146_v38  ;;  %v171_v42 = vld [vmem:[%s10719_s2 + $0x78] sm:$0xff]  ;;  %v3372_v44 = vld [vmem:[%s10721_s4 + $0x10] sm:$0xff]  ;;  %v5205_v49 = vld [vmem:[%s10724_s7] sm:$0xff]  ;;  %10967 = vst [vmem:[#allocation8_spill] sm:$0xff] %v6292_v9 }
  0x19   :  { %5952 = vset.pattern.permute.xlu1 %v10727_v10  ;;  %v179_v43 = vpack.c.bf16 %v171_v42, %v170_v41  ;;  %v162_v45 = vld [vmem:[%s10719_s2 + $0x30] sm:$0xff]  ;;  %v163_v46 = vld [vmem:[%s10719_s2 + $0x38] sm:$0xff]  ;;  %v5505_v50 = vld [vmem:[#allocation2] sm:$0x1] }
  0x1a   :  { %192 = vperm.xlu1 %5952, %v150_v11   ;;  %v175_v47 = vpack.c.bf16 %v163_v46, %v162_v45  ;;  %v166_v51 = vld [vmem:[%s10719_s2 + $0x50] sm:$0xff]  ;;  %v167_v52 = vld [vmem:[%s10719_s2 + $0x58] sm:$0xff]  ;;  %v36_v54 = vld [vmem:[%s10717_s0] sm:$0xff] }
  0x1b   :  { %v177_v53 = vpack.c.bf16 %v167_v52, %v166_v51  ;;  %v37_v56 = vld [vmem:[%s10717_s0 + $0x8] sm:$0xff]  ;;  %v68_v57 = vcombine.high %v36_v54, %v36_v54  ;;  %v168_v59 = vld [vmem:[%s10719_s2 + $0x60] sm:$0xff]  ;;  %v100_v62 = vpack.c.bf16 %v36_v54, %v36_v54  ;;  %v38_v63 = vld [vmem:[%s10717_s0 + $0x10] sm:$0xff] }
  0x1c   :  { %5958 = vset.pattern.permute.xlu0 %v10727_v10  ;;  %v69_v58 = vcombine.high %v37_v56, %v37_v56  ;;  %v169_v60 = vld [vmem:[%s10719_s2 + $0x68] sm:$0xff]  ;;  %v102_v1 = vpack.c.bf16 %v37_v56, %v37_v56  ;;  %v39_v2 = vld [vmem:[%s10717_s0 + $0x18] sm:$0xff]  ;;  %v70_v7 = vcombine.high %v38_v63, %v38_v63  ;;  %v104_v18 = vpack.c.bf16 %v38_v63, %v38_v63  ;;  %v3370_v20 = vld [vmem:[%s10721_s4] sm:$0xff] }
  0x1d   :  { %182 = vperm.xlu0 %5958, %v148_v6   ;;  %v101_v0 = vpack.c.bf16 %v68_v57, %v68_v57  ;;  %v178_v3 = vpack.c.bf16 %v169_v60, %v168_v59  ;;  %v732_v6 = vshrl.u32 %v100_v62, 16  ;;  %v221_v11 = vpack.i.b16 %v100_v62, %v100_v62  ;;  %v40_v25 = vld [vmem:[%s10717_s0 + $0x20] sm:$0xff]  ;;  %v3371_v38 = vld [vmem:[%s10721_s4 + $0x8] sm:$0xff]  ;;  %v3373_v55 = vld [vmem:[%s10721_s4 + $0x18] sm:$0xff] }
  0x1e   :  { %5953 = vset.pattern.permute.xlu1 %v6083_v13  ;;  %v235_v15 = vpack.i.b16 %v102_v1, %v102_v1  ;;  %v105_v19 = vpack.c.bf16 %v70_v7, %v70_v7  ;;  %v106_v33 = vpack.c.bf16 %v39_v2, %v39_v2 }
  0x1f   :  { %2145 = vperm.xlu1 %5953, %v149_v12   ;;  %v739_v12 = vshrl.u32 %v101_v0, 16  ;;  %v228_v14 = vpack.i.b16 %v101_v0, %v101_v0  ;;  %v733_v17 = vpack.i.b16 %v732_v6, %v732_v6  ;;  %v6302_v23 = vrot.slane %v221_v11, %v6292_v9 }
  0x20   :  { %v6305_v24 = vrot.slane %v235_v15, %v6289_v8  ;;  %v256_v41 = vpack.i.b16 %v105_v19, %v105_v19  ;;  %v774_v42 = vshrl.u32 %v106_v33, 16  ;;  %v6335_v45 = vrot.slane %v235_v15, %v6292_v9  ;;  %v4438_v15 = vld [vmem:[%s10723_s6 + $0x8] sm:$0xff] }
  0x21   :  { %202 = vperm.xlu0 %5958, %v152_v16   ;;  %v740_v26 = vpack.i.b16 %v739_v12, %v739_v12  ;;  %v6311_v30 = vrot.slane %v228_v14, %v6289_v8  ;;  %v6317_v34 = vrot.slane %v733_v17, %v6289_v8  ;;  %v6358_v60 = vrot.slane %v733_v17, %v6292_v9 }
  0x22   :  { %v6341_v51 = vrot.slane %v256_v41, %v6289_v8  ;;  %v775_v59 = vpack.i.b16 %v774_v42, %v774_v42 }
  0x23   :  { %5954 = vset.pattern.permute.xlu1 %v10727_v10  ;;  %v6349_v56 = vrot.slane %v740_v26, %v6292_v9 }
  0x24   :  { %2814 = vperm.xlu1 %5954, %v172_v21  }
  0x25   :  { %2824 = vperm.xlu0 %5958, %v174_v22   ;;  %v6299_v22 = vrot.slane %v221_v11, %v6289_v8 }
  0x28   :  { %197 = vperm.xlu1 %5954, %v151_v27  }
  0x29   :  { %207 = vperm.xlu0 %5958, %v153_v28  }
  0x2c   :  { %5957 = vset.pattern.permute.xlu1 %v6081_v5 }
  0x2d   :  { %713 = vperm.xlu1 %5957, %v151_v27   ;;  %212 = vperm.xlu0 %5958, %v154_v31  }
  0x31   :  { %5959 = vset.pattern.permute.xlu1 %v10727_v10  ;;  %2834 = vperm.xlu0 %5958, %v176_v36   ;;  %v760_v36 = vshrl.u32 %v104_v18, 16 }
  0x32   :  { %2819 = vperm.xlu1 %5959, %v173_v37   ;;  %v72_v37 = vcombine.high %v40_v25, %v40_v25 }
  0x34   :  { %v6343_v54 = vpack.c.bf16 %v72_v37, %v72_v37 }
  0x35   :  { %217 = vperm.xlu0 %5958, %v155_v40  }
  0x36   :  { %5960 = vset.pattern.permute.xlu1 %v6080_v4  ;;  %10968 = vst [vmem:[#allocation9_spill] sm:$0xff] %v6343_v54 }
  0x37   :  { %1481 = vperm.xlu1 %5960, %v151_v27  }
  0x39   :  { %5970 = vset.pattern.permute.xlu0 %v6083_v13 }
  0x3a   :  { %2157 = vperm.xlu0 %5970, %v152_v16  }
  0x3b   :  { %5961 = vset.pattern.permute.xlu1 %v6081_v5 }
  0x3c   :  { %717 = vperm.xlu1 %5961, %v152_v16  }
  0x3e   :  { %2165 = vperm.xlu0 %5970, %v154_v31  }
  0x40   :  { %5962 = vset.pattern.permute.xlu1 %v6083_v13 }
  0x41   :  { %2153 = vperm.xlu1 %5962, %v151_v27  }
  0x42   :  { %2169 = vperm.xlu0 %5970, %v155_v40  }
  0x45   :  { %5963 = vset.pattern.permute.xlu1 %v6080_v4 }
  0x46   :  { %1485 = vperm.xlu1 %5963, %v152_v16   ;;  %5975 = vset.pattern.permute.xlu0 %v10727_v10  ;;  %v746_v16 = vshrl.u32 %v102_v1, 16 }
  0x47   :  { %2849 = vperm.xlu0 %5975, %v179_v43   ;;  %v6329_v43 = vrot.slane %v740_v26, %v6289_v8  ;;  %v6422_v26 = vrot.slane %v775_v59, %v6292_v9 }
  0x48   :  { %v747_v32 = vpack.i.b16 %v746_v16, %v746_v16 }
  0x49   :  { %10984 = vst [vmem:[#allocation25_spill] sm:$0xff] %v6422_v26 }
  0x4a   :  { %5964 = vset.pattern.permute.xlu1 %v6081_v5  ;;  %v6361_v62 = vrot.slane %v747_v32, %v6292_v9 }
  0x4b   :  { %721 = vperm.xlu1 %5964, %v153_v28   ;;  %3386 = vperm.xlu0 %5975, %v3372_v44  }
  0x4c   :  { %10970 = vst [vmem:[#allocation11_spill] sm:$0xff] %v6361_v62 }
  0x4f   :  { %5965 = vset.pattern.permute.xlu1 %v10727_v10  ;;  %4441 = vperm.xlu0 %5975, %v4437_v48  }
  0x50   :  { %2829 = vperm.xlu1 %5965, %v175_v47   ;;  %v6338_v47 = vrot.slane %v747_v32, %v6289_v8 }
  0x53   :  { %5209 = vperm.xlu0 %5975, %v5205_v49   ;;  %v249_v49 = vpack.i.b16 %v104_v18, %v104_v18 }
  0x54   :  { %5966 = vset.pattern.permute.xlu1 %v6080_v4 }
  0x55   :  { %1489 = vperm.xlu1 %5966, %v153_v28   ;;  %v6367_v0 = vrot.slane %v249_v49, %v6289_v8  ;;  %v6382_v6 = vrot.slane %v249_v49, %v6292_v9 }
  0x57   :  { %5508 = vperm.xlu0 %5975, %v5505_v50   ;;  %v263_v50 = vpack.i.b16 %v106_v33, %v106_v33  ;;  %10971 = vst [vmem:[#allocation12_spill] sm:$0xff] %v6367_v0  ;;  %10973 = vst [vmem:[#allocation14_spill] sm:$0xff] %v6382_v6 }
  0x59   :  { %5967 = vset.pattern.permute.xlu1 %v6081_v5  ;;  %v6385_v7 = vrot.slane %v263_v50, %v6292_v9 }
  0x5a   :  { %725 = vperm.xlu1 %5967, %v154_v31  }
  0x5b   :  { %10974 = vst [vmem:[#allocation15_spill] sm:$0xff] %v6385_v7 }
  0x5e   :  { %5968 = vset.pattern.permute.xlu1 %v6083_v13  ;;  %v71_v13 = vcombine.high %v39_v2, %v39_v2 }
  0x5f   :  { %2161 = vperm.xlu1 %5968, %v153_v28   ;;  %v767_v28 = vshrl.u32 %v105_v19, 16 }
  0x60   :  { %v107_v29 = vpack.c.bf16 %v71_v13, %v71_v13  ;;  %v6398_v13 = vpack.i.b16 %v6343_v54, %v6343_v54 }
  0x61   :  { %v768_v46 = vpack.i.b16 %v767_v28, %v767_v28 }
  0x62   :  { %v781_v35 = vshrl.u32 %v107_v29, 16  ;;  %v270_v48 = vpack.i.b16 %v107_v29, %v107_v29  ;;  %10978 = vst [vmem:[#allocation19_spill] sm:$0xff] %v6398_v13  ;;  %v6428_v28 = vrot.slane %v6398_v13, %v6289_v8 }
  0x63   :  { %5969 = vset.pattern.permute.xlu1 %v6080_v4  ;;  %v6364_v63 = vrot.slane %v768_v46, %v6289_v8  ;;  %v6408_v17 = vrot.slane %v768_v46, %v6292_v9 }
  0x64   :  { %1493 = vperm.xlu1 %5969, %v154_v31   ;;  %v6314_v31 = vrot.slane %v228_v14, %v6292_v9  ;;  %v782_v52 = vpack.i.b16 %v781_v35, %v781_v35  ;;  %v6370_v1 = vrot.slane %v270_v48, %v6289_v8  ;;  %v6373_v2 = vrot.slane %v270_v48, %v6292_v9 }
  0x65   :  { %10986 = vst [vmem:[#allocation27_spill] sm:$0xff] %v6428_v28 }
  0x66   :  { %10972 = vst [vmem:[#allocation13_spill] sm:$0xff] %v6373_v2  ;;  %v6388_v11 = vrot.slane %v782_v52, %v6289_v8  ;;  %v6411_v18 = vrot.slane %v782_v52, %v6292_v9 }
  0x68   :  { %5971 = vset.pattern.permute.xlu1 %v6081_v5  ;;  %v103_v5 = vpack.c.bf16 %v69_v58, %v69_v58  ;;  %v6355_v58 = vrot.slane %v256_v41, %v6292_v9  ;;  %10975 = vst [vmem:[#allocation16_spill] sm:$0xff] %v6388_v11  ;;  %10981 = vst [vmem:[#allocation22_spill] sm:$0xff] %v6411_v18  ;;  %v5206_v41 = vld [vmem:[%s10724_s7 + $0x8] sm:$0xff] }
  0x69   :  { %729 = vperm.xlu1 %5971, %v155_v40  }
  0x6a   :  { %v242_v21 = vpack.i.b16 %v103_v5, %v103_v5  ;;  %10969 = vst [vmem:[#allocation10_spill] sm:$0xff] %v6355_v58 }
  0x6c   :  { %v6323_v39 = vrot.slane %v242_v21, %v6289_v8 }
  0x6d   :  { %5972 = vset.pattern.permute.xlu1 %v10727_v10 }
  0x6e   :  { %2839 = vperm.xlu1 %5972, %v177_v53   ;;  %v761_v53 = vpack.i.b16 %v760_v36, %v760_v36 }
  0x70   :  { %v6391_v12 = vrot.slane %v761_v53, %v6289_v8  ;;  %v6414_v19 = vrot.slane %v761_v53, %v6292_v9 }
  0x72   :  { %5973 = vset.pattern.permute.xlu1 %v6080_v4  ;;  %v753_v4 = vshrl.u32 %v103_v5, 16  ;;  %v3365_v5 = vld [vmem:[%s10720_s3 + $0x8] sm:$0xff]  ;;  %10976 = vst [vmem:[#allocation17_spill] sm:$0xff] %v6391_v12 }
  0x73   :  { %1497 = vperm.xlu1 %5973, %v155_v40   ;;  %v6326_v40 = vrot.slane %v242_v21, %v6292_v9 }
  0x74   :  { %v754_v27 = vpack.i.b16 %v753_v4, %v753_v4  ;;  %v6394_v4 = vrot.slane %v263_v50, %v6289_v8 }
  0x76   :  { %v6332_v44 = vrot.slane %v754_v27, %v6289_v8  ;;  %v6352_v57 = vrot.slane %v754_v27, %v6292_v9  ;;  %10977 = vst [vmem:[#allocation18_spill] sm:$0xff] %v6394_v4  ;;  %v6424_v27 = vpack.c.bf16 %v40_v25, %v40_v25 }
  0x77   :  { %5974 = vset.pattern.permute.xlu1 %v10727_v10 }
  0x78   :  { %2844 = vperm.xlu1 %5974, %v178_v3   ;;  %v3364_v3 = vld [vmem:[%s10720_s3] sm:$0xff]  ;;  %10985 = vst [vmem:[#allocation26_spill] sm:$0xff] %v6424_v27 }
  0x79   :  { %v6419_v21 = vpack.c.bf16 %v3365_v5, %v3364_v3  ;;  %v3367_v3 = vld [vmem:[%s10720_s3 + $0x18] sm:$0xff] }
  0x7b   :  { %10983 = vst [vmem:[#allocation24_spill] sm:$0xff] %v6419_v21 }
  0x7c   :  { %3376 = vperm.xlu1 %5974, %v3370_v20   ;;  %v6417_v20 = vrot.slane %v775_v59, %v6289_v8 }
  0x7e   :  { %10982 = vst [vmem:[#allocation23_spill] sm:$0xff] %v6417_v20 }
  0x80   :  { %3381 = vperm.xlu1 %5974, %v3371_v38  }
  0x84   :  { %3391 = vperm.xlu1 %5974, %v3373_v55   ;;  %v3366_v55 = vld [vmem:[%s10720_s3 + $0x10] sm:$0xff] }
  0x85   :  { %v6400_v14 = vpop.permute.xlu1 %1469  ;;  %v6405_v16 = vpop.permute.xlu0 %701  ;;  %v6505_v25 = vpack.c.bf16 %v3367_v3, %v3366_v55 }
  0x86   :  { %10979 = vst [vmem:[#allocation20_spill] sm:$0xff] %v6400_v14  ;;  %10980 = vst [vmem:[#allocation21_spill] sm:$0xff] %v6405_v16 }
  0x87   :  { %10990 = vst [vmem:[#allocation31_spill] sm:$0xff] %v6505_v25 }
  0x88   :  { %4446 = vperm.xlu1 %5974, %v4438_v15  }
  0x89   :  { %v6449_v42 = vpop.permute.xlu0 %709 }
  0x8a   :  { %10987 = vst [vmem:[#allocation28_spill] sm:$0xff] %v6449_v42  ;;  %v6459_v52 = vpop.permute.xlu1 %187 }
  0x8b   :  { %10988 = vst [vmem:[#allocation29_spill] sm:$0xff] %v6459_v52  ;;  %v477_v59 = vmul.bf16 %v6311_v30, %v6459_v52  ;;  %v479_v48 = vmul.bf16 %v6323_v39, %v6459_v52  ;;  %v476_v49 = vmul.bf16 %v6299_v22, %v6459_v52  ;;  %v478_v46 = vmul.bf16 %v6305_v24, %v6459_v52 }
  0x8c   :  { %5214 = vperm.xlu1 %5974, %v5206_v41   ;;  %v481_v10 = vmul.bf16 %v6341_v51, %v6459_v52  ;;  %v483_v38 = vmul.bf16 %v6370_v1, %v6459_v52  ;;  %v480_v41 = vmul.bf16 %v6367_v0, %v6459_v52  ;;  %v482_v36 = vmul.bf16 %v6394_v4, %v6459_v52 }
  0x8e   :  { %v6499_v35 = vpop.permute.xlu0 %1477 }
  0x8f   :  { %10989 = vst [vmem:[#allocation30_spill] sm:$0xff] %v6499_v35  ;;  %v6509_v29 = vpop.permute.xlu1 %705 }
  0x90   :  { %10991 = vst [vmem:[#allocation32_spill] sm:$0xff] %v6509_v29  ;;  %v989_v55 = vmul.bf16 %v6329_v43, %v6509_v29  ;;  %v991_v3 = vmul.bf16 %v6332_v44, %v6509_v29  ;;  %v988_v33 = vmul.bf16 %v6317_v34, %v6509_v29  ;;  %v990_v37 = vmul.bf16 %v6338_v47, %v6509_v29 }
  0x91   :  { %v993_v50 = vmul.bf16 %v6364_v63, %v6509_v29  ;;  %v995_v15 = vmul.bf16 %v6388_v11, %v6509_v29  ;;  %v992_v32 = vmul.bf16 %v6391_v12, %v6509_v29  ;;  %v994_v53 = vmul.bf16 %v6417_v20, %v6509_v29 }
  0x92   :  { %v1245_v5 = vadd.bf16 %v989_v55, %v477_v59  ;;  %v1247_v61 = vadd.bf16 %v991_v3, %v479_v48  ;;  %v1244_v52 = vadd.bf16 %v988_v33, %v476_v49  ;;  %v1246_v8 = vadd.bf16 %v990_v37, %v478_v46 }
  0x93   :  { %v6537_v9 = vpop.permute.xlu0 %2141  ;;  %v1249_v27 = vadd.bf16 %v993_v50, %v481_v10  ;;  %v1251_v28 = vadd.bf16 %v995_v15, %v483_v38  ;;  %v1248_v54 = vadd.bf16 %v992_v32, %v480_v41  ;;  %v1250_v48 = vadd.bf16 %v994_v53, %v482_v36 }
  0x94   :  { %10992 = vst [vmem:[#allocation33_spill] sm:$0xff] %v6537_v9  ;;  %v6539_v25 = vpop.permute.xlu1 %1473  ;;  %v2302_v38 = vmul.bf16 %v6361_v62, %v6537_v9  ;;  %v11001_v20 = vmul.bf16 %v6332_v44, %v6449_v42 }
  0x95   :  { %10993 = vst [vmem:[#allocation34_spill] sm:$0xff] %v6539_v25  ;;  %v1661_v49 = vmul.bf16 %v6314_v31, %v6539_v25  ;;  %v1663_v10 = vmul.bf16 %v6326_v40, %v6539_v25  ;;  %v1660_v32 = vmul.bf16 %v6302_v23, %v6539_v25  ;;  %v1662_v37 = vmul.bf16 %v6335_v45, %v6539_v25 }
  0x97   :  { %v6563_v53 = vpop.permute.xlu0 %2149  ;;  %v1917_v59 = vadd.bf16 %v1661_v49, %v1245_v5  ;;  %v1919_v15 = vadd.bf16 %v1663_v10, %v1247_v61  ;;  %v1916_v41 = vadd.bf16 %v1660_v32, %v1244_v52  ;;  %v6567_v3 = vadd.bf16 %v1662_v37, %v1246_v8 }
  0x98   :  { %10994 = vst [vmem:[#allocation35_spill] sm:$0xff] %v6563_v53  ;;  %v2365_v33 = vmul.bf16 %v6349_v56, %v6563_v53  ;;  %v2367_v46 = vmul.bf16 %v6352_v57, %v6563_v53  ;;  %v2364_v36 = vmul.bf16 %v6358_v60, %v6563_v53  ;;  %v1665_v61 = vmul.bf16 %v6355_v58, %v6539_v25 }
  0x99   :  { %v6575_v50 = vpop.permute.xlu1 %192  ;;  %v1667_v52 = vmul.bf16 %v6373_v2, %v6539_v25  ;;  %v1664_v8 = vmul.bf16 %v6382_v6, %v6539_v25  ;;  %v1666_v5 = vmul.bf16 %v6385_v7, %v6539_v25  ;;  %v2366_v55 = vmul.bf16 %v6361_v62, %v6563_v53 }
  0x9a   :  { %10995 = vst [vmem:[#allocation36_spill] sm:$0xff] %v6575_v50  ;;  %v509_v49 = vmul.bf16 %v6311_v30, %v6575_v50  ;;  %v511_v10 = vmul.bf16 %v6323_v39, %v6575_v50  ;;  %v508_v32 = vmul.bf16 %v6299_v22, %v6575_v50  ;;  %v510_v37 = vmul.bf16 %v6305_v24, %v6575_v50 }
  0x9b   :  { %v6595_v29 = vadd.bf16 %v1665_v61, %v1249_v27  ;;  %v6597_v21 = vadd.bf16 %v1667_v52, %v1251_v28  ;;  %v6599_v13 = vadd.bf16 %v1664_v8, %v1248_v54  ;;  %v11000_v7 = vmul.bf16 %v6329_v43, %v6449_v42 }
  0x9c   :  { %v6601_v25 = vpop.permute.xlu0 %182  ;;  %v1279_v26 = vadd.bf16 %v11001_v20, %v511_v10  ;;  %v11002_v50 = vmul.bf16 %v6317_v34, %v6449_v42  ;;  %v11003_v27 = vmul.bf16 %v6338_v47, %v6449_v42  ;;  %v11009_v42 = vmul.bf16 %v6329_v43, %v6405_v16 }
  0x9d   :  { %10996 = vst [vmem:[#allocation37_spill] sm:$0xff] %v6595_v29  ;;  %10997 = vst [vmem:[#allocation38_spill] sm:$0xff] %v6597_v21  ;;  %v1277_v6 = vadd.bf16 %v11000_v7, %v509_v49  ;;  %v445_v54 = vmul.bf16 %v6311_v30, %v6601_v25  ;;  %v447_v61 = vmul.bf16 %v6323_v39, %v6601_v25 }
  0x9e   :  { %10998 = vst [vmem:[#allocation39_spill] sm:$0xff] %v6599_v13  ;;  %10999 = vst [vmem:[#allocation40_spill] sm:$0xff] %v6601_v25  ;;  %v1276_v53 = vadd.bf16 %v11002_v50, %v508_v32  ;;  %v1278_v28 = vadd.bf16 %v11003_v27, %v510_v37  ;;  %v444_v7 = vmul.bf16 %v6299_v22, %v6601_v25  ;;  %v6623_v52 = vpop.permute.xlu1 %2145 }
  0x9f   :  { %v446_v20 = vmul.bf16 %v6305_v24, %v6601_v25  ;;  %11004 = vst [vmem:[#allocation41_spill] sm:$0xff] %v6623_v52  ;;  %v11005_v50 = vmul.bf16 %v6314_v31, %v6499_v35  ;;  %v11006_v49 = vmul.bf16 %v6326_v40, %v6499_v35  ;;  %v11007_v32 = vmul.bf16 %v6302_v23, %v6499_v35 }
  0xa0   :  { %v6634_v27 = vadd.bf16 %v1666_v5, %v1250_v48  ;;  %v1213_v13 = vadd.bf16 %v11009_v42, %v445_v54  ;;  %v11010_v21 = vmul.bf16 %v6332_v44, %v6405_v16  ;;  %v6648_v12 = vpop.permute.xlu0 %202  ;;  %v2333_v48 = vmul.bf16 %v6349_v56, %v6623_v52 }
  0xa1   :  { %v1949_v8 = vadd.bf16 %v11005_v50, %v1277_v6  ;;  %v1951_v10 = vadd.bf16 %v11006_v49, %v1279_v26  ;;  %v1948_v37 = vadd.bf16 %v11007_v32, %v1276_v53  ;;  %v11011_v6 = vmul.bf16 %v6317_v34, %v6405_v16  ;;  %11013 = vst [vmem:[#allocation43_spill] sm:$0xff] %v6648_v12 }
  0xa2   :  { %11008 = vst [vmem:[#allocation42_spill] sm:$0xff] %v6634_v27  ;;  %v1215_v29 = vadd.bf16 %v11010_v21, %v447_v61  ;;  %v11012_v26 = vmul.bf16 %v6338_v47, %v6405_v16  ;;  %v2335_v42 = vmul.bf16 %v6352_v57, %v6623_v52  ;;  %v2332_v53 = vmul.bf16 %v6358_v60, %v6623_v52 }
  0xa3   :  { %v1212_v50 = vadd.bf16 %v11011_v6, %v444_v7  ;;  %v11014_v21 = vmul.bf16 %v6335_v45, %v6499_v35  ;;  %v11015_v54 = vmul.bf16 %v6314_v31, %v6400_v14  ;;  %v11016_v7 = vmul.bf16 %v6326_v40, %v6400_v14 }
  0xa4   :  { %v1214_v49 = vadd.bf16 %v11012_v26, %v446_v20  ;;  %v11017_v32 = vmul.bf16 %v6302_v23, %v6400_v14  ;;  %v11018_v26 = vmul.bf16 %v6335_v45, %v6400_v14  ;;  %v6671_v2 = vadd.bf16 %v2333_v48, %v1917_v59 }
  0xa5   :  { %v1950_v5 = vadd.bf16 %v11014_v21, %v1278_v28  ;;  %v1885_v61 = vadd.bf16 %v11015_v54, %v1213_v13  ;;  %v1887_v20 = vadd.bf16 %v11016_v7, %v1215_v29  ;;  %v6673_v35 = vadd.bf16 %v2335_v42, %v1919_v15  ;;  %v6679_v21 = vpop.permute.xlu1 %2814 }
  0xa6   :  { %v1884_v6 = vadd.bf16 %v11017_v32, %v1212_v50  ;;  %v1886_v27 = vadd.bf16 %v11018_v26, %v1214_v49  ;;  %v6675_v28 = vadd.bf16 %v2332_v53, %v1916_v41  ;;  %v2334_v13 = vmul.bf16 %v6361_v62, %v6623_v52  ;;  %11019 = vst [vmem:[#allocation44_spill] sm:$0xff] %v6679_v21  ;;  %v6690_v41 = vpop.permute.xlu0 %2824 }
  0xa7   :  { %v11020_v29 = vmul.bf16 %v6349_v56, %v6537_v9  ;;  %v11021_v50 = vmul.bf16 %v6352_v57, %v6537_v9  ;;  %v11022_v59 = vmul.bf16 %v6358_v60, %v6537_v9  ;;  %11023 = vst [vmem:[#allocation45_spill] sm:$0xff] %v6690_v41  ;;  %v2621_v48 = vadd.bf16 %v2365_v33, %v1949_v8 }
  0xa8   :  { %v2558_v49 = vadd.bf16 %v2302_v38, %v1886_v27  ;;  %v2623_v42 = vadd.bf16 %v2367_v46, %v1951_v10  ;;  %v2620_v53 = vadd.bf16 %v2364_v36, %v1948_v37  ;;  %v2622_v32 = vadd.bf16 %v2366_v55, %v1950_v5 }
  0xa9   :  { %v2557_v54 = vadd.bf16 %v11020_v29, %v1885_v61  ;;  %v2559_v7 = vadd.bf16 %v11021_v50, %v1887_v20  ;;  %v2556_v15 = vadd.bf16 %v11022_v59, %v1884_v6  ;;  %v2917_v20 = vadd.bf16 %v6690_v41, %v2621_v48  ;;  %v6700_v33 = vpop.permute.xlu1 %197 }
  0xaa   :  { %v2854_v29 = vadd.bf16 %v6679_v21, %v2558_v49  ;;  %v2919_v50 = vadd.bf16 %v6690_v41, %v2623_v42  ;;  %v2916_v38 = vadd.bf16 %v6690_v41, %v2620_v53  ;;  %v2918_v27 = vadd.bf16 %v6690_v41, %v2622_v32  ;;  %11024 = vst [vmem:[#allocation46_spill] sm:$0xff] %v6700_v33  ;;  %v6706_v37 = vpop.permute.xlu0 %207 }
  0xab   :  { %v2853_v26 = vadd.bf16 %v6679_v21, %v2557_v54  ;;  %v2855_v62 = vadd.bf16 %v6679_v21, %v2559_v7  ;;  %v2852_v61 = vadd.bf16 %v6679_v21, %v2556_v15  ;;  %v11025_v46 = vmov 0   ;;  %11026 = vst [vmem:[#allocation47_spill] sm:$0xff] %v6706_v37 }
  0xac   :  { %v3110_v10 = vmax.bf16 %v11025_v46, %v2854_v29  ;;  %v2590_v5 = vadd.bf16 %v2334_v13, %v6567_v3  ;;  %v6710_v6 = vmax.bf16 %v11025_v46, %v2917_v20  ;;  %v6713_v54 = vmax.bf16 %v11025_v46, %v2919_v50 }
  0xad   :  { %v3109_v36 = vmax.bf16 %v11025_v46, %v2853_v26  ;;  %v3111_v55 = vmax.bf16 %v11025_v46, %v2855_v62  ;;  %v3108_v8 = vmax.bf16 %v11025_v46, %v2852_v61  ;;  %v6716_v7 = vmax.bf16 %v11025_v46, %v2916_v38  ;;  %v6739_v26 = vpop.permute.xlu1 %713 }
  0xae   :  { %v6719_v62 = vmax.bf16 %v11025_v46, %v2918_v27  ;;  %v541_v59 = vmul.bf16 %v6311_v30, %v6700_v33  ;;  %v543_v3 = vmul.bf16 %v6323_v39, %v6700_v33  ;;  %v540_v13 = vmul.bf16 %v6299_v22, %v6700_v33  ;;  %11027 = vst [vmem:[#allocation48_spill] sm:$0xff] %v6739_v26  ;;  %v6741_v61 = vpop.permute.xlu0 %212 }
  0xaf   :  { %3394 = vmatprep.subr.bf16.mxu0 %v3109_v36  ;;  %3447 = vmatprep.subr.bf16.mxu1 %v3111_v55  ;;  %v542_v15 = vmul.bf16 %v6305_v24, %v6700_v33  ;;  %11028 = vst [vmem:[#allocation49_spill] sm:$0xff] %v6741_v61  ;;  %v449_v50 = vmul.bf16 %v6341_v51, %v6601_v25 }
  0xb0   :  { %3395 = vmatpush1.bf16.msra.mxu0 %v3108_v8  ;;  %3448 = vmatpush1.bf16.msra.mxu1 %v3110_v10  ;;  %v451_v38 = vmul.bf16 %v6370_v1, %v6601_v25  ;;  %v1053_v27 = vmul.bf16 %v6329_v43, %v6739_v26  ;;  %v1055_v36 = vmul.bf16 %v6332_v44, %v6739_v26 }
  0xb1   :  { %v1052_v55 = vmul.bf16 %v6317_v34, %v6739_v26  ;;  %v1054_v8 = vmul.bf16 %v6338_v47, %v6739_v26  ;;  %v11030_v10 = vmul.bf16 %v6364_v63, %v6405_v16  ;;  %v11031_v20 = vmul.bf16 %v6388_v11, %v6405_v16 }
  0xb2   :  { %v1309_v53 = vadd.bf16 %v1053_v27, %v541_v59  ;;  %v1311_v42 = vadd.bf16 %v1055_v36, %v543_v3  ;;  %v6769_v33 = vpop.permute.xlu0 %2834  ;;  %v448_v32 = vmul.bf16 %v6367_v0, %v6601_v25  ;;  %v6779_v59 = vpop.permute.xlu1 %2819  ;;  %v450_v3 = vmul.bf16 %v6394_v4, %v6601_v25  ;;  %v11038_v4 = vld [vmem:[#allocation25_spill] sm:$0xff] }
  0xb3   :  { %v1308_v48 = vadd.bf16 %v1052_v55, %v540_v13  ;;  %11029 = vst [vmem:[#allocation50_spill] sm:$0xff] %v6769_v33  ;;  %v1310_v26 = vadd.bf16 %v1054_v8, %v542_v15  ;;  %v1217_v41 = vadd.bf16 %v11030_v10, %v449_v50  ;;  %v1219_v29 = vadd.bf16 %v11031_v20, %v451_v38  ;;  %v11034_v10 = vld [vmem:[#allocation13_spill] sm:$0xff] }
  0xb4   :  { %11032 = vst [vmem:[#allocation51_spill] sm:$0xff] %v6779_v59  ;;  %v2337_v13 = vmul.bf16 %v6408_v17, %v6623_v52  ;;  %v2339_v15 = vmul.bf16 %v6411_v18, %v6623_v52  ;;  %v2885_v20 = vadd.bf16 %v6779_v59, %v6671_v2  ;;  %v2887_v38 = vadd.bf16 %v6779_v59, %v6673_v35  ;;  %v11036_v50 = vld [vmem:[#allocation17_spill] sm:$0xff] }
  0xb5   :  { %v2884_v27 = vadd.bf16 %v6779_v59, %v6675_v28  ;;  %v2886_v36 = vadd.bf16 %v6779_v59, %v2590_v5  ;;  %v11033_v55 = vmul.bf16 %v6355_v58, %v6400_v14  ;;  %v11035_v49 = vmul.bf16 %v11034_v10, %v6400_v14 }
  0xb6   :  { %v11037_v61 = vmul.bf16 %v11036_v50, %v6405_v16  ;;  %v3141_v0 = vmax.bf16 %v11025_v46, %v2885_v20  ;;  %v3143_v28 = vmax.bf16 %v11025_v46, %v2887_v38  ;;  %v6822_v38 = vpop.permute.xlu1 %1481 }
  0xb7   :  { %v1889_v8 = vadd.bf16 %v11033_v55, %v1217_v41  ;;  %v1891_v25 = vadd.bf16 %v11035_v49, %v1219_v29  ;;  %v3140_v5 = vmax.bf16 %v11025_v46, %v2884_v27  ;;  %v3142_v11 = vmax.bf16 %v11025_v46, %v2886_v36  ;;  %v6811_v41 = vpop.permute.xlu0 %217  ;;  %v11045_v29 = vld [vmem:[#allocation14_spill] sm:$0xff] }
  0xb8   :  { %v1216_v2 = vadd.bf16 %v11037_v61, %v448_v32  ;;  %11039 = vst [vmem:[#allocation25_spill] sm:$0xff] %v6811_v41  ;;  %v11040_v61 = vld [vmem:[#allocation23_spill] sm:$0xff]  ;;  %3396 = vmatprep.subr.bf16.mxu0 %v3141_v0  ;;  %3449 = vmatprep.subr.bf16.mxu1 %v3143_v28  ;;  %v11043_v27 = vmul.bf16 %v6408_v17, %v6537_v9 }
  0xb9   :  { %v11041_v20 = vmul.bf16 %v11040_v61, %v6405_v16  ;;  %11042 = vst [vmem:[#allocation23_spill] sm:$0xff] %v6822_v38  ;;  %v11044_v49 = vmul.bf16 %v6411_v18, %v6537_v9  ;;  %v11046_v50 = vmul.bf16 %v11045_v29, %v6400_v14  ;;  %3397 = vmatpush1.bf16.msra.mxu0 %v3140_v5 }
  0xba   :  { %v2561_v36 = vadd.bf16 %v11043_v27, %v1889_v8  ;;  %3450 = vmatpush1.bf16.msra.mxu1 %v3142_v11  ;;  %v1727_v0 = vmul.bf16 %v6326_v40, %v6822_v38  ;;  %v1724_v28 = vmul.bf16 %v6302_v23, %v6822_v38  ;;  %3398 = vmatprep.subr.bf16.mxu0 %v6710_v6 }
  0xbb   :  { %v1218_v55 = vadd.bf16 %v11041_v20, %v450_v3  ;;  %v2563_v35 = vadd.bf16 %v11044_v49, %v1891_v25  ;;  %v1888_v32 = vadd.bf16 %v11046_v50, %v1216_v2  ;;  %v1725_v3 = vmul.bf16 %v6314_v31, %v6822_v38  ;;  %3451 = vmatprep.subr.bf16.mxu1 %v6713_v54  ;;  %v6846_v8 = vpop.permute.xlu0 %2157  ;;  %v6856_v41 = vpop.permute.xlu1 %717 }
  0xbc   :  { %v1726_v25 = vmul.bf16 %v6335_v45, %v6822_v38  ;;  %v2857_v11 = vadd.bf16 %v6679_v21, %v2561_v36  ;;  %11047 = vst [vmem:[#allocation14_spill] sm:$0xff] %v6846_v8  ;;  %v1983_v5 = vadd.bf16 %v1727_v0, %v1311_v42  ;;  %v11048_v20 = vmul.bf16 %v6414_v19, %v6537_v9 }
  0xbd   :  { %v1981_v2 = vadd.bf16 %v1725_v3, %v1309_v53  ;;  %v2859_v49 = vadd.bf16 %v6679_v21, %v2563_v35  ;;  %v1980_v27 = vadd.bf16 %v1724_v28, %v1308_v48  ;;  %11049 = vst [vmem:[#allocation52_spill] sm:$0xff] %v6856_v41  ;;  %3399 = vmatpush1.bf16.msra.mxu0 %v6716_v7  ;;  %v11050_v53 = vld [vmem:[#allocation11_spill] sm:$0xff] }
  0xbe   :  { %v2560_v6 = vadd.bf16 %v11048_v20, %v1888_v32  ;;  %v1982_v54 = vadd.bf16 %v1726_v25, %v1310_v26  ;;  %3452 = vmatpush1.bf16.msra.mxu1 %v6719_v62  ;;  %v6865_v48 = vmax.bf16 %v11025_v46, %v2857_v11  ;;  %v1085_v26 = vmul.bf16 %v6329_v43, %v6856_v41  ;;  %v11054_v28 = vld [vmem:[#allocation15_spill] sm:$0xff]  ;;  %v11056_v20 = vld [vmem:[#allocation37_spill] sm:$0xff] }
  0xbf   :  { %v1087_v32 = vmul.bf16 %v6332_v44, %v6856_v41  ;;  %v1084_v7 = vmul.bf16 %v6317_v34, %v6856_v41  ;;  %v1086_v62 = vmul.bf16 %v6338_v47, %v6856_v41  ;;  %v6875_v36 = vpop.permute.xlu0 %2165  ;;  %v6878_v3 = vmax.bf16 %v11025_v46, %v2859_v49  ;;  %v11060_v41 = vld [vmem:[#allocation38_spill] sm:$0xff] }
  0xc0   :  { %11051 = vst [vmem:[#allocation11_spill] sm:$0xff] %v6865_v48  ;;  %11052 = vst [vmem:[#allocation53_spill] sm:$0xff] %v6875_v36  ;;  %v2856_v0 = vadd.bf16 %v6679_v21, %v2560_v6  ;;  %v11055_v25 = vmul.bf16 %v11054_v28, %v6400_v14  ;;  %v2593_v35 = vadd.bf16 %v2337_v13, %v11056_v20 }
  0xc1   :  { %11053 = vst [vmem:[#allocation54_spill] sm:$0xff] %v6878_v3  ;;  %v11057_v42 = vmul.bf16 %v6311_v30, %v6648_v12  ;;  %v11058_v16 = vmul.bf16 %v6323_v39, %v6648_v12  ;;  %v11059_v49 = vmul.bf16 %v6299_v22, %v6648_v12  ;;  %v2595_v6 = vadd.bf16 %v2339_v15, %v11060_v41 }
  0xc2   :  { %v1890_v11 = vadd.bf16 %v11055_v25, %v1218_v55  ;;  %v11061_v14 = vmul.bf16 %v6305_v24, %v6648_v12  ;;  %v11063_v15 = vmul.bf16 %v11038_v4, %v6537_v9 }
  0xc3   :  { %v1341_v50 = vadd.bf16 %v1085_v26, %v11057_v42  ;;  %v1343_v48 = vadd.bf16 %v1087_v32, %v11058_v16  ;;  %v1340_v3 = vadd.bf16 %v1084_v7, %v11059_v49  ;;  %v6904_v16 = vpop.permute.xlu1 %2153  ;;  %v2891_v7 = vadd.bf16 %v6779_v59, %v2595_v6  ;;  %v6921_v32 = vpop.permute.xlu0 %2169 }
  0xc4   :  { %v1342_v55 = vadd.bf16 %v1086_v62, %v11061_v14  ;;  %11062 = vst [vmem:[#allocation37_spill] sm:$0xff] %v6904_v16  ;;  %v2562_v41 = vadd.bf16 %v11063_v15, %v1890_v11  ;;  %v2889_v14 = vadd.bf16 %v6779_v59, %v2593_v35  ;;  %v2397_v62 = vmul.bf16 %v6349_v56, %v6904_v16 }
  0xc5   :  { %v2399_v25 = vmul.bf16 %v6352_v57, %v6904_v16  ;;  %v2396_v20 = vmul.bf16 %v6358_v60, %v6904_v16  ;;  %v2398_v49 = vmul.bf16 %v11050_v53, %v6904_v16  ;;  %11064 = vst [vmem:[#allocation38_spill] sm:$0xff] %v6921_v32  ;;  %v6930_v15 = vmax.bf16 %v11025_v46, %v2856_v0 }
  0xc6   :  { %v6932_v26 = vadd.bf16 %v2397_v62, %v1981_v2  ;;  %v2858_v11 = vadd.bf16 %v6679_v21, %v2562_v41  ;;  %v6944_v35 = vmax.bf16 %v11025_v46, %v2889_v14  ;;  %v6947_v6 = vmax.bf16 %v11025_v46, %v2891_v7  ;;  %v11069_v2 = vld [vmem:[#allocation39_spill] sm:$0xff]  ;;  %v11071_v62 = vld [vmem:[#allocation42_spill] sm:$0xff] }
  0xc7   :  { %11065 = vst [vmem:[#allocation55_spill] sm:$0xff] %v6930_v15  ;;  %v6934_v42 = vadd.bf16 %v2399_v25, %v1983_v5  ;;  %v6936_v13 = vadd.bf16 %v2396_v20, %v1980_v27  ;;  %v6940_v12 = vadd.bf16 %v2398_v49, %v1982_v54  ;;  %v6949_v0 = vpop.permute.xlu1 %1485  ;;  %v11070_v5 = vmul.bf16 %v6414_v19, %v6623_v52  ;;  %v11073_v20 = vld [vmem:[#allocation36_spill] sm:$0xff]  ;;  %v11074_v14 = vld [vmem:[#allocation30_spill] sm:$0xff] }
  0xc8   :  { %11066 = vst [vmem:[#allocation56_spill] sm:$0xff] %v6944_v35  ;;  %11067 = vst [vmem:[#allocation57_spill] sm:$0xff] %v6947_v6  ;;  %v11072_v54 = vmul.bf16 %v11038_v4, %v6623_v52  ;;  %v513_v41 = vmul.bf16 %v6341_v51, %v11073_v20  ;;  %v1697_v49 = vmul.bf16 %v6355_v58, %v11074_v14  ;;  %v11075_v52 = vld [vmem:[#allocation28_spill] sm:$0xff]  ;;  %v11077_v35 = vld [vmem:[#allocation35_spill] sm:$0xff] }
  0xc9   :  { %11068 = vst [vmem:[#allocation58_spill] sm:$0xff] %v6949_v0  ;;  %v2592_v27 = vadd.bf16 %v11070_v5, %v11069_v2  ;;  %v1757_v7 = vmul.bf16 %v6314_v31, %v6949_v0  ;;  %v1759_v9 = vmul.bf16 %v6326_v40, %v6949_v0  ;;  %v1756_v2 = vmul.bf16 %v6302_v23, %v6949_v0 }
  0xca   :  { %v2594_v25 = vadd.bf16 %v11072_v54, %v11071_v62  ;;  %v1758_v5 = vmul.bf16 %v6335_v45, %v6949_v0  ;;  %v11076_v21 = vmul.bf16 %v6364_v63, %v11075_v52  ;;  %v2369_v15 = vmul.bf16 %v6408_v17, %v11077_v35 }
  0xcb   :  { %v2888_v62 = vadd.bf16 %v6779_v59, %v2592_v27  ;;  %v2013_v32 = vadd.bf16 %v1757_v7, %v1341_v50  ;;  %v2015_v36 = vadd.bf16 %v1759_v9, %v1343_v48  ;;  %v2012_v16 = vadd.bf16 %v1756_v2, %v1340_v3 }
  0xcc   :  { %v2890_v54 = vadd.bf16 %v6779_v59, %v2594_v25  ;;  %v1281_v6 = vadd.bf16 %v11076_v21, %v513_v41  ;;  %v2014_v58 = vadd.bf16 %v1758_v5, %v1342_v55  ;;  %v6979_v38 = vmax.bf16 %v11025_v46, %v2858_v11  ;;  %v6986_v59 = vpop.permute.xlu1 %721 }
  0xcd   :  { %v6982_v0 = vmax.bf16 %v11025_v46, %v2888_v62  ;;  %v515_v25 = vmul.bf16 %v6370_v1, %v11073_v20  ;;  %11080 = vst [vmem:[#allocation59_spill] sm:$0xff] %v6986_v59  ;;  %v11081_v21 = vmul.bf16 %v6349_v56, %v6846_v8  ;;  %v11082_v9 = vmul.bf16 %v6352_v57, %v6846_v8 }
  0xce   :  { %11078 = vst [vmem:[#allocation39_spill] sm:$0xff] %v6979_v38  ;;  %v1953_v27 = vadd.bf16 %v1697_v49, %v1281_v6  ;;  %v11083_v48 = vmul.bf16 %v6358_v60, %v6846_v8  ;;  %v11084_v55 = vmul.bf16 %v11050_v53, %v6846_v8  ;;  %v1117_v6 = vmul.bf16 %v6329_v43, %v6986_v59 }
  0xcf   :  { %11079 = vst [vmem:[#allocation42_spill] sm:$0xff] %v6982_v0  ;;  %v2685_v41 = vadd.bf16 %v11081_v21, %v2013_v32  ;;  %v2687_v50 = vadd.bf16 %v11082_v9, %v2015_v36  ;;  %v1119_v49 = vmul.bf16 %v6332_v44, %v6986_v59  ;;  %v1116_v32 = vmul.bf16 %v6317_v34, %v6986_v59 }
  0xd0   :  { %v2684_v3 = vadd.bf16 %v11083_v48, %v2012_v16  ;;  %v2686_v11 = vadd.bf16 %v11084_v55, %v2014_v58  ;;  %v1118_v36 = vmul.bf16 %v6338_v47, %v6986_v59  ;;  %v7012_v58 = vmax.bf16 %v11025_v46, %v2890_v54  ;;  %v7030_v0 = vpop.permute.xlu1 %2829 }
  0xd1   :  { %v2981_v7 = vadd.bf16 %v6769_v33, %v2685_v41  ;;  %v2983_v16 = vadd.bf16 %v6769_v33, %v2687_v50  ;;  %v11086_v62 = vmul.bf16 %v6311_v30, %v6706_v37  ;;  %v11087_v9 = vmul.bf16 %v6323_v39, %v6706_v37  ;;  %11090 = vst [vmem:[#allocation61_spill] sm:$0xff] %v7030_v0 }
  0xd2   :  { %v2980_v2 = vadd.bf16 %v6769_v33, %v2684_v3  ;;  %11085 = vst [vmem:[#allocation60_spill] sm:$0xff] %v7012_v58  ;;  %v2982_v5 = vadd.bf16 %v6769_v33, %v2686_v11  ;;  %v11088_v41 = vmul.bf16 %v6299_v22, %v6706_v37  ;;  %v11089_v11 = vmul.bf16 %v6305_v24, %v6706_v37 }
  0xd3   :  { %v1373_v21 = vadd.bf16 %v1117_v6, %v11086_v62  ;;  %v1375_v48 = vadd.bf16 %v1119_v49, %v11087_v9  ;;  %v3237_v50 = vmax.bf16 %v11025_v46, %v2981_v7  ;;  %v3239_v3 = vmax.bf16 %v11025_v46, %v2983_v16  ;;  %v11091_v62 = vld [vmem:[#allocation16_spill] sm:$0xff] }
  0xd4   :  { %v1372_v55 = vadd.bf16 %v1116_v32, %v11088_v41  ;;  %v3236_v54 = vmax.bf16 %v11025_v46, %v2980_v2  ;;  %v1374_v58 = vadd.bf16 %v1118_v36, %v11089_v11  ;;  %v2625_v6 = vadd.bf16 %v2369_v15, %v1953_v27  ;;  %v11093_v27 = vld [vmem:[#allocation45_spill] sm:$0xff]  ;;  %v11094_v11 = vld [vmem:[#allocation12_spill] sm:$0xff]  ;;  %v7063_v8 = vpop.permute.xlu1 %1489 }
  0xd5   :  { %v11092_v49 = vmul.bf16 %v11091_v62, %v11075_v52  ;;  %v1699_v32 = vmul.bf16 %v11034_v10, %v11074_v14  ;;  %v2371_v7 = vmul.bf16 %v6411_v18, %v11077_v35  ;;  %v2949_v16 = vadd.bf16 %v7030_v0, %v6932_v26 }
  0xd6   :  { %v2951_v2 = vadd.bf16 %v7030_v0, %v6934_v42  ;;  %v2948_v36 = vadd.bf16 %v7030_v0, %v6936_v13  ;;  %v2950_v15 = vadd.bf16 %v7030_v0, %v6940_v12  ;;  %v1696_v38 = vmul.bf16 %v11045_v29, %v11074_v14 }
  0xd7   :  { %v1283_v9 = vadd.bf16 %v11092_v49, %v515_v25  ;;  %v2921_v25 = vadd.bf16 %v11093_v27, %v2625_v6  ;;  %v512_v49 = vmul.bf16 %v11094_v11, %v11073_v20  ;;  %v3205_v26 = vmax.bf16 %v11025_v46, %v2949_v16 }
  0xd8   :  { %v3207_v59 = vmax.bf16 %v11025_v46, %v2951_v2  ;;  %v3204_v42 = vmax.bf16 %v11025_v46, %v2948_v36  ;;  %v3206_v13 = vmax.bf16 %v11025_v46, %v2950_v15  ;;  %v3238_v37 = vmax.bf16 %v11025_v46, %v2982_v5  ;;  %v11099_v2 = vld [vmem:[#allocation18_spill] sm:$0xff] }
  0xd9   :  { %v1955_v41 = vadd.bf16 %v1699_v32, %v1283_v9  ;;  %v7058_v12 = vmax.bf16 %v11025_v46, %v2921_v25  ;;  %v11096_v9 = vld [vmem:[#allocation17_spill] sm:$0xff]  ;;  %3400 = vmatprep.subr.bf16.mxu0 %v3205_v26  ;;  %v2368_v16 = vmul.bf16 %v6414_v19, %v11077_v35  ;;  %v514_v36 = vmul.bf16 %v11099_v2, %v11073_v20 }
  0xda   :  { %v11097_v32 = vmul.bf16 %v11096_v9, %v11075_v52  ;;  %11098 = vst [vmem:[#allocation17_spill] sm:$0xff] %v7063_v8  ;;  %3453 = vmatprep.subr.bf16.mxu1 %v3207_v59  ;;  %v1698_v5 = vmul.bf16 %v11054_v28, %v11074_v14  ;;  %3401 = vmatpush1.bf16.msra.mxu0 %v3204_v42  ;;  %v7088_v28 = vpop.permute.xlu1 %725 }
  0xdb   :  { %11095 = vst [vmem:[#allocation62_spill] sm:$0xff] %v7058_v12  ;;  %v2627_v6 = vadd.bf16 %v2371_v7, %v1955_v41  ;;  %3454 = vmatpush1.bf16.msra.mxu1 %v3206_v13  ;;  %v1789_v7 = vmul.bf16 %v6314_v31, %v7063_v8  ;;  %v1791_v15 = vmul.bf16 %v6326_v40, %v7063_v8  ;;  %11102 = vst [vmem:[#allocation63_spill] sm:$0xff] %v7088_v28 }
  0xdc   :  { %v1280_v33 = vadd.bf16 %v11097_v32, %v512_v49  ;;  %v1788_v59 = vmul.bf16 %v6302_v23, %v7063_v8  ;;  %3402 = vmatprep.subr.bf16.mxu0 %v3237_v50  ;;  %3455 = vmatprep.subr.bf16.mxu1 %v3239_v3  ;;  %v1790_v25 = vmul.bf16 %v6335_v45, %v7063_v8 }
  0xdd   :  { %v2923_v41 = vadd.bf16 %v11093_v27, %v2627_v6  ;;  %v2045_v26 = vadd.bf16 %v1789_v7, %v1373_v21  ;;  %v2047_v42 = vadd.bf16 %v1791_v15, %v1375_v48  ;;  %v2370_v32 = vmul.bf16 %v11038_v4, %v11077_v35  ;;  %v11104_v21 = vld [vmem:[#allocation48_spill] sm:$0xff] }
  0xde   :  { %v1952_v49 = vadd.bf16 %v1696_v38, %v1280_v33  ;;  %v2044_v13 = vadd.bf16 %v1788_v59, %v1372_v55  ;;  %v2046_v14 = vadd.bf16 %v1790_v25, %v1374_v58  ;;  %v11101_v50 = vmul.bf16 %v11040_v61, %v11075_v52  ;;  %3403 = vmatpush1.bf16.msra.mxu0 %v3236_v54  ;;  %v11103_v33 = vld [vmem:[#allocation46_spill] sm:$0xff]  ;;  %v11105_v55 = vld [vmem:[#allocation23_spill] sm:$0xff]  ;;  %v11107_v25 = vld [vmem:[#allocation37_spill] sm:$0xff] }
  0xdf   :  { %v7083_v20 = vmax.bf16 %v11025_v46, %v2923_v41  ;;  %3456 = vmatpush1.bf16.msra.mxu1 %v3238_v37  ;;  %v545_v38 = vmul.bf16 %v6341_v51, %v11103_v33  ;;  %v1057_v48 = vmul.bf16 %v6364_v63, %v11104_v21  ;;  %v11106_v58 = vld [vmem:[#allocation10_spill] sm:$0xff]  ;;  %v1151_v7 = vmul.bf16 %v6332_v44, %v7088_v28 }
  0xe0   :  { %v2624_v12 = vadd.bf16 %v2368_v16, %v1952_v49  ;;  %v1282_v3 = vadd.bf16 %v11101_v50, %v514_v36  ;;  %v1729_v6 = vmul.bf16 %v11106_v58, %v11105_v55  ;;  %v1149_v16 = vmul.bf16 %v6329_v43, %v7088_v28  ;;  %v11108_v49 = vld [vmem:[#allocation49_spill] sm:$0xff] }
  0xe1   :  { %11100 = vst [vmem:[#allocation18_spill] sm:$0xff] %v7083_v20  ;;  %v1148_v36 = vmul.bf16 %v6317_v34, %v7088_v28  ;;  %v1150_v37 = vmul.bf16 %v6338_v47, %v7088_v28  ;;  %v1313_v59 = vadd.bf16 %v1057_v48, %v545_v38  ;;  %v2401_v41 = vmul.bf16 %v6408_v17, %v11107_v25 }
  0xe2   :  { %v2920_v54 = vadd.bf16 %v11093_v27, %v2624_v12  ;;  %v1954_v15 = vadd.bf16 %v1698_v5, %v1282_v3  ;;  %v11109_v50 = vmul.bf16 %v6311_v30, %v11108_v49  ;;  %v11110_v52 = vmul.bf16 %v6323_v39, %v11108_v49 }
  0xe3   :  { %v11111_v8 = vmul.bf16 %v6299_v22, %v11108_v49  ;;  %v11112_v12 = vmul.bf16 %v6305_v24, %v11108_v49  ;;  %v1985_v48 = vadd.bf16 %v1729_v6, %v1313_v59 }
  0xe4   :  { %v1405_v35 = vadd.bf16 %v1149_v16, %v11109_v50  ;;  %v1407_v20 = vadd.bf16 %v1151_v7, %v11110_v52  ;;  %v7120_v3 = vmax.bf16 %v11025_v46, %v2920_v54  ;;  %v2626_v38 = vadd.bf16 %v2370_v32, %v1954_v15  ;;  %v7124_v50 = vpop.permute.xlu1 %2161 }
  0xe5   :  { %v1404_v58 = vadd.bf16 %v1148_v36, %v11111_v8  ;;  %v1406_v5 = vadd.bf16 %v1150_v37, %v11112_v12  ;;  %v547_v16 = vmul.bf16 %v6370_v1, %v11103_v33  ;;  %11114 = vst [vmem:[#allocation65_spill] sm:$0xff] %v7124_v50  ;;  %v1059_v52 = vmul.bf16 %v11091_v62, %v11104_v21 }
  0xe6   :  { %11113 = vst [vmem:[#allocation64_spill] sm:$0xff] %v7120_v3  ;;  %v1731_v8 = vmul.bf16 %v11034_v10, %v11105_v55  ;;  %v2403_v7 = vmul.bf16 %v6411_v18, %v11107_v25  ;;  %v544_v36 = vmul.bf16 %v11094_v11, %v11103_v33  ;;  %v2461_v32 = vmul.bf16 %v6349_v56, %v7124_v50 }
  0xe7   :  { %v2463_v6 = vmul.bf16 %v6352_v57, %v7124_v50  ;;  %v2460_v37 = vmul.bf16 %v6358_v60, %v7124_v50  ;;  %v2462_v54 = vmul.bf16 %v11050_v53, %v7124_v50  ;;  %v2922_v15 = vadd.bf16 %v11093_v27, %v2626_v38 }
  0xe8   :  { %v2657_v59 = vadd.bf16 %v2401_v41, %v1985_v48  ;;  %v1315_v12 = vadd.bf16 %v1059_v52, %v547_v16  ;;  %v1056_v3 = vmul.bf16 %v11096_v9, %v11104_v21  ;;  %v7145_v28 = vadd.bf16 %v2461_v32, %v2045_v26  ;;  %v7157_v41 = vpop.permute.xlu1 %1493 }
  0xe9   :  { %v7147_v49 = vadd.bf16 %v2463_v6, %v2047_v42  ;;  %v7149_v11 = vadd.bf16 %v2460_v37, %v2044_v13  ;;  %v7151_v18 = vadd.bf16 %v2462_v54, %v2046_v14  ;;  %v7154_v10 = vmax.bf16 %v11025_v46, %v2922_v15  ;;  %11116 = vst [vmem:[#allocation67_spill] sm:$0xff] %v7157_v41 }
  0xea   :  { %v2953_v50 = vadd.bf16 %v7030_v0, %v2657_v59  ;;  %v1987_v62 = vadd.bf16 %v1731_v8, %v1315_v12  ;;  %v1312_v38 = vadd.bf16 %v1056_v3, %v544_v36  ;;  %v1728_v48 = vmul.bf16 %v11045_v29, %v11105_v55 }
  0xeb   :  { %11115 = vst [vmem:[#allocation66_spill] sm:$0xff] %v7154_v10  ;;  %v2400_v26 = vmul.bf16 %v6414_v19, %v11107_v25  ;;  %v546_v42 = vmul.bf16 %v11099_v2, %v11103_v33  ;;  %v1058_v14 = vmul.bf16 %v11040_v61, %v11104_v21  ;;  %v1821_v13 = vmul.bf16 %v6314_v31, %v7157_v41  ;;  %v11117_v33 = vld [vmem:[#allocation15_spill] sm:$0xff] }
  0xec   :  { %v1823_v3 = vmul.bf16 %v6326_v40, %v7157_v41  ;;  %v1820_v16 = vmul.bf16 %v6302_v23, %v7157_v41  ;;  %v1822_v52 = vmul.bf16 %v6335_v45, %v7157_v41  ;;  %v7176_v8 = vmax.bf16 %v11025_v46, %v2953_v50  ;;  %v7183_v41 = vpop.permute.xlu1 %729  ;;  %v11119_v50 = vld [vmem:[#allocation53_spill] sm:$0xff] }
  0xed   :  { %v2659_v36 = vadd.bf16 %v2403_v7, %v1987_v62  ;;  %v1984_v32 = vadd.bf16 %v1728_v48, %v1312_v38  ;;  %v1314_v6 = vadd.bf16 %v1058_v14, %v546_v42  ;;  %v2077_v37 = vadd.bf16 %v1821_v13, %v1405_v35  ;;  %11118 = vst [vmem:[#allocation15_spill] sm:$0xff] %v7183_v41 }
  0xee   :  { %v2079_v54 = vadd.bf16 %v1823_v3, %v1407_v20  ;;  %v2076_v15 = vadd.bf16 %v1820_v16, %v1404_v58  ;;  %v2078_v59 = vadd.bf16 %v1822_v52, %v1406_v5  ;;  %v1730_v27 = vmul.bf16 %v11117_v33, %v11105_v55 }
  0xef   :  { %v2955_v12 = vadd.bf16 %v7030_v0, %v2659_v36  ;;  %v2656_v21 = vadd.bf16 %v2400_v26, %v1984_v32  ;;  %v2402_v10 = vmul.bf16 %v11038_v4, %v11107_v25  ;;  %v11120_v62 = vmul.bf16 %v6349_v56, %v11119_v50  ;;  %v11125_v36 = vld [vmem:[#allocation43_spill] sm:$0xff]  ;;  %v11139_v25 = vld [vmem:[#allocation22_spill] sm:$0xff] }
  0xf0   :  { %v11121_v35 = vmul.bf16 %v6352_v57, %v11119_v50  ;;  %v11122_v58 = vmul.bf16 %v6358_v60, %v11119_v50  ;;  %v11123_v38 = vmul.bf16 %v11050_v53, %v11119_v50  ;;  %v1181_v26 = vmul.bf16 %v6329_v43, %v7183_v41  ;;  %v11126_v43 = vld [vmem:[#allocation25_spill] sm:$0xff] }
  0xf1   :  { %v7188_v7 = vadd.bf16 %v11120_v62, %v2077_v37  ;;  %v1183_v42 = vmul.bf16 %v6332_v44, %v7183_v41  ;;  %v1180_v14 = vmul.bf16 %v6317_v34, %v7183_v41  ;;  %v1182_v13 = vmul.bf16 %v6338_v47, %v7183_v41  ;;  %v11133_v62 = vld [vmem:[#allocation58_spill] sm:$0xff] }
  0xf2   :  { %v7193_v20 = vadd.bf16 %v11121_v35, %v2079_v54  ;;  %v7198_v5 = vadd.bf16 %v11122_v58, %v2076_v15  ;;  %v7203_v48 = vadd.bf16 %v11123_v38, %v2078_v59  ;;  %v7214_v3 = vmax.bf16 %v11025_v46, %v2955_v12  ;;  %v11132_v12 = vld [vmem:[#allocation52_spill] sm:$0xff]  ;;  %v11134_v35 = vld [vmem:[#allocation10_spill] sm:$0xff] }
  0xf3   :  { %v2952_v16 = vadd.bf16 %v7030_v0, %v2656_v21  ;;  %v1986_v52 = vadd.bf16 %v1730_v27, %v1314_v6  ;;  %v577_v32 = vmul.bf16 %v6341_v51, %v11125_v36  ;;  %v11127_v37 = vmul.bf16 %v6311_v30, %v11126_v43  ;;  %v11136_v38 = vld [vmem:[#allocation14_spill] sm:$0xff] }
  0xf4   :  { %11124 = vst [vmem:[#allocation68_spill] sm:$0xff] %v7214_v3  ;;  %v11128_v44 = vmul.bf16 %v6323_v39, %v11126_v43  ;;  %v11129_v47 = vmul.bf16 %v6299_v22, %v11126_v43  ;;  %v11130_v59 = vmul.bf16 %v6305_v24, %v11126_v43  ;;  %v1089_v30 = vmul.bf16 %v6364_v63, %v11132_v12  ;;  %v7238_v39 = vpop.permute.xlu1 %2839  ;;  %v11137_v24 = vld [vmem:[#allocation16_spill] sm:$0xff] }
  0xf5   :  { %v1437_v54 = vadd.bf16 %v1181_v26, %v11127_v37  ;;  %v7232_v27 = vmax.bf16 %v11025_v46, %v2952_v16  ;;  %v2658_v6 = vadd.bf16 %v2402_v10, %v1986_v52  ;;  %v1761_v58 = vmul.bf16 %v11134_v35, %v11133_v62  ;;  %11135 = vst [vmem:[#allocation10_spill] sm:$0xff] %v7238_v39 }
  0xf6   :  { %v1439_v34 = vadd.bf16 %v1183_v42, %v11128_v44  ;;  %v1436_v15 = vadd.bf16 %v1180_v14, %v11129_v47  ;;  %v1438_v21 = vadd.bf16 %v1182_v13, %v11130_v59  ;;  %v2433_v22 = vmul.bf16 %v6408_v17, %v11136_v38  ;;  %v11138_v14 = vld [vmem:[#allocation13_spill] sm:$0xff] }
  0xf7   :  { %11131 = vst [vmem:[#allocation69_spill] sm:$0xff] %v7232_v27  ;;  %v579_v26 = vmul.bf16 %v6370_v1, %v11125_v36  ;;  %v1091_v42 = vmul.bf16 %v11137_v24, %v11132_v12  ;;  %v1763_v10 = vmul.bf16 %v11138_v14, %v11133_v62  ;;  %v3013_v13 = vadd.bf16 %v7238_v39, %v7145_v28 }
  0xf8   :  { %v3015_v16 = vadd.bf16 %v7238_v39, %v7147_v49  ;;  %v3012_v52 = vadd.bf16 %v7238_v39, %v7149_v11  ;;  %v3014_v37 = vadd.bf16 %v7238_v39, %v7151_v18  ;;  %v2954_v44 = vadd.bf16 %v7030_v0, %v2658_v6  ;;  %v11141_v6 = vld [vmem:[#allocation12_spill] sm:$0xff] }
  0xf9   :  { %v1345_v47 = vadd.bf16 %v1089_v30, %v577_v32  ;;  %v1347_v59 = vadd.bf16 %v1091_v42, %v579_v26  ;;  %v2435_v55 = vmul.bf16 %v11139_v25, %v11136_v38  ;;  %v3269_v41 = vmax.bf16 %v11025_v46, %v3013_v13  ;;  %v7268_v30 = vpop.permute.xlu1 %1497 }
  0xfa   :  { %v3271_v28 = vmax.bf16 %v11025_v46, %v3015_v16  ;;  %v3268_v43 = vmax.bf16 %v11025_v46, %v3012_v52  ;;  %v3270_v49 = vmax.bf16 %v11025_v46, %v3014_v37  ;;  %v7264_v11 = vmax.bf16 %v11025_v46, %v2954_v44  ;;  %11142 = vst [vmem:[#allocation13_spill] sm:$0xff] %v7268_v30 }
  0xfb   :  { %v2017_v27 = vadd.bf16 %v1761_v58, %v1345_v47  ;;  %v2019_v18 = vadd.bf16 %v1763_v10, %v1347_v59  ;;  %v576_v32 = vmul.bf16 %v11141_v6, %v11125_v36  ;;  %3404 = vmatprep.subr.bf16.mxu0 %v3269_v41  ;;  %v1088_v26 = vmul.bf16 %v11096_v9, %v11132_v12 }
  0xfc   :  { %11140 = vst [vmem:[#allocation16_spill] sm:$0xff] %v7264_v11  ;;  %3457 = vmatprep.subr.bf16.mxu1 %v3271_v28  ;;  %v1760_v42 = vmul.bf16 %v11045_v29, %v11133_v62  ;;  %v2432_v13 = vmul.bf16 %v6414_v19, %v11136_v38  ;;  %3405 = vmatpush1.bf16.msra.mxu0 %v3268_v43 }
  0xfd   :  { %3458 = vmatpush1.bf16.msra.mxu1 %v3270_v49  ;;  %v1853_v58 = vmul.bf16 %v6314_v31, %v7268_v30  ;;  %v1855_v10 = vmul.bf16 %v6326_v40, %v7268_v30  ;;  %v1852_v41 = vmul.bf16 %v6302_v23, %v7268_v30  ;;  %v1854_v16 = vmul.bf16 %v6335_v45, %v7268_v30  ;;  %v11143_v31 = vld [vmem:[#allocation50_spill] sm:$0xff]  ;;  %v7288_v3 = vpop.permute.xlu1 %2844 }
  0xfe   :  { %v2689_v52 = vadd.bf16 %v2433_v22, %v2017_v27  ;;  %v2691_v37 = vadd.bf16 %v2435_v55, %v2019_v18  ;;  %v1344_v44 = vadd.bf16 %v1088_v26, %v576_v32  ;;  %v578_v43 = vmul.bf16 %v11099_v2, %v11125_v36  ;;  %11144 = vst [vmem:[#allocation22_spill] sm:$0xff] %v7288_v3  ;;  %v11145_v23 = vld [vmem:[#allocation38_spill] sm:$0xff]  ;;  %v7301_v22 = vpop.permute.xlu0 %2849 }
  0xff   :  { %v2109_v47 = vadd.bf16 %v1853_v58, %v1437_v54  ;;  %v2111_v59 = vadd.bf16 %v1855_v10, %v1439_v34  ;;  %v2108_v28 = vadd.bf16 %v1852_v41, %v1436_v15  ;;  %v2110_v49 = vadd.bf16 %v1854_v16, %v1438_v21  ;;  %11149 = vst [vmem:[#allocation12_spill] sm:$0xff] %v7301_v22 }
 0x100   :  { %v2985_v0 = vadd.bf16 %v11143_v31, %v2689_v52  ;;  %v2987_v40 = vadd.bf16 %v11143_v31, %v2691_v37  ;;  %v2016_v11 = vadd.bf16 %v1760_v42, %v1344_v44  ;;  %v11146_v45 = vmul.bf16 %v6349_v56, %v11145_v23 }
 0x101   :  { %v11147_v55 = vmul.bf16 %v6352_v57, %v11145_v23  ;;  %v11148_v34 = vmul.bf16 %v6358_v60, %v11145_v23  ;;  %v1090_v21 = vmul.bf16 %v11040_v61, %v11132_v12  ;;  %v3045_v18 = vadd.bf16 %v7288_v3, %v7188_v7 }
 0x102   :  { %v2781_v27 = vadd.bf16 %v11146_v45, %v2109_v47  ;;  %v3047_v56 = vadd.bf16 %v7288_v3, %v7193_v20  ;;  %v3044_v32 = vadd.bf16 %v7288_v3, %v7198_v5  ;;  %v3046_v57 = vadd.bf16 %v7288_v3, %v7203_v48 }
 0x103   :  { %v2783_v54 = vadd.bf16 %v11147_v55, %v2111_v59  ;;  %v2780_v15 = vadd.bf16 %v11148_v34, %v2108_v28  ;;  %v11150_v58 = vmul.bf16 %v11050_v53, %v11145_v23  ;;  %v3301_v7 = vmax.bf16 %v11025_v46, %v3045_v18  ;;  %v11154_v34 = vld [vmem:[#allocation65_spill] sm:$0xff] }
 0x104   :  { %v3077_v60 = vadd.bf16 %v7301_v22, %v2781_v27  ;;  %v3303_v20 = vmax.bf16 %v11025_v46, %v3047_v56  ;;  %v3300_v41 = vmax.bf16 %v11025_v46, %v3044_v32  ;;  %v3302_v5 = vmax.bf16 %v11025_v46, %v3046_v57  ;;  %v11151_v27 = vld [vmem:[#allocation47_spill] sm:$0xff] }
 0x105   :  { %v3079_v26 = vadd.bf16 %v7301_v22, %v2783_v54  ;;  %v3076_v42 = vadd.bf16 %v7301_v22, %v2780_v15  ;;  %v2782_v10 = vadd.bf16 %v11150_v58, %v2110_v49  ;;  %3406 = vmatprep.subr.bf16.mxu0 %v3301_v7  ;;  %v7326_v53 = vmax.bf16 %v11025_v46, %v2985_v0  ;;  %v11153_v54 = vld [vmem:[#allocation17_spill] sm:$0xff]  ;;  %v11156_v58 = vld [vmem:[#allocation54_spill] sm:$0xff] }
 0x106   :  { %v3333_v48 = vmax.bf16 %v11025_v46, %v3077_v60  ;;  %3459 = vmatprep.subr.bf16.mxu1 %v3303_v20  ;;  %v7329_v44 = vmax.bf16 %v11025_v46, %v2987_v40  ;;  %v2688_v47 = vadd.bf16 %v2432_v13, %v2016_v11  ;;  %3407 = vmatpush1.bf16.msra.mxu0 %v3300_v41  ;;  %v11152_v11 = vld [vmem:[#allocation59_spill] sm:$0xff] }
 0x107   :  { %v3335_v16 = vmax.bf16 %v11025_v46, %v3079_v26  ;;  %v3332_v52 = vmax.bf16 %v11025_v46, %v3076_v42  ;;  %v3078_v37 = vadd.bf16 %v7301_v22, %v2782_v10  ;;  %3460 = vmatpush1.bf16.msra.mxu1 %v3302_v5  ;;  %v1346_v28 = vadd.bf16 %v1090_v21, %v578_v43  ;;  %v11155_v42 = vld [vmem:[#allocation11_spill] sm:$0xff] }
 0x108   :  { %v1762_v49 = vmul.bf16 %v11117_v33, %v11133_v62  ;;  %3408 = vmatprep.subr.bf16.mxu0 %v3333_v48  ;;  %v2984_v45 = vadd.bf16 %v11143_v31, %v2688_v47  ;;  %v2434_v0 = vmul.bf16 %v11038_v4, %v11136_v38  ;;  %v609_v40 = vmul.bf16 %v6341_v51, %v11151_v27 }
 0x109   :  { %v3334_v59 = vmax.bf16 %v11025_v46, %v3078_v37  ;;  %3461 = vmatprep.subr.bf16.mxu1 %v3335_v16  ;;  %v1121_v13 = vmul.bf16 %v6364_v63, %v11152_v11  ;;  %v1793_v43 = vmul.bf16 %v11134_v35, %v11153_v54  ;;  %v2465_v15 = vmul.bf16 %v6408_v17, %v11154_v34 }
 0x10a   :  { %v2018_v55 = vadd.bf16 %v1762_v49, %v1346_v28  ;;  %v7346_v21 = vmax.bf16 %v11025_v46, %v2984_v45  ;;  %v611_v18 = vmul.bf16 %v6370_v1, %v11151_v27  ;;  %v1123_v56 = vmul.bf16 %v11137_v24, %v11152_v11  ;;  %3409 = vmatpush1.bf16.msra.mxu0 %v3332_v52  ;;  %v11157_v52 = vld [vmem:[#allocation24_spill] sm:$0xff]  ;;  %v11158_v28 = vld [vmem:[#allocation55_spill] sm:$0xff] }
 0x10b   :  { %v1795_v32 = vmul.bf16 %v11138_v14, %v11153_v54  ;;  %3462 = vmatpush1.bf16.msra.mxu1 %v3334_v59  ;;  %v1377_v60 = vadd.bf16 %v1121_v13, %v609_v40  ;;  %v2467_v26 = vmul.bf16 %v11139_v25, %v11154_v34  ;;  %3500 = vmatprep.subr.bf16.mxu0 %v11155_v42  ;;  %v11159_v49 = vld [vmem:[#allocation39_spill] sm:$0xff]  ;;  %v11161_v13 = vld [vmem:[#allocation57_spill] sm:$0xff] }
 0x10c   :  { %v2690_v57 = vadd.bf16 %v2434_v0, %v2018_v55  ;;  %3553 = vmatprep.subr.bf16.mxu1 %v11156_v58  ;;  %v1379_v10 = vadd.bf16 %v1123_v56, %v611_v18  ;;  %v608_v7 = vmul.bf16 %v11141_v6, %v11151_v27  ;;  %v1120_v20 = vmul.bf16 %v11096_v9, %v11152_v11  ;;  %v11160_v55 = vld [vmem:[#allocation56_spill] sm:$0xff]  ;;  %v11162_v58 = vld [vmem:[#allocation49_spill] sm:$0xff] }
 0x10d   :  { %v2049_v5 = vadd.bf16 %v1793_v43, %v1377_v60  ;;  %v1792_v48 = vmul.bf16 %v11045_v29, %v11153_v54  ;;  %v2464_v16 = vmul.bf16 %v6414_v19, %v11154_v34  ;;  %3427 = vmatmul.mubr.bf16.vlgmr.msra.gmra.mrb[0].mxu0 %v11157_v52  ;;  %v610_v59 = vmul.bf16 %v11099_v2, %v11151_v27 }
 0x10e   :  { %v2986_v41 = vadd.bf16 %v11143_v31, %v2690_v57  ;;  %3480 = vmatmul.mubr.bf16.vlgmr.msra.gmra.mrb[0].mxu1 %v11157_v52  ;;  %v2051_v37 = vadd.bf16 %v1795_v32, %v1379_v10  ;;  %v1376_v47 = vadd.bf16 %v1120_v20, %v608_v7  ;;  %3501 = vmatpush1.bf16.msra.mxu0 %v11158_v28  ;;  %v11163_v10 = vld [vmem:[#allocation63_spill] sm:$0xff]  ;;  %v11164_v20 = vld [vmem:[#allocation42_spill] sm:$0xff] }
 0x10f   :  { %3554 = vmatpush1.bf16.msra.mxu1 %v11159_v49  ;;  %v2721_v0 = vadd.bf16 %v2465_v15, %v2049_v5  ;;  %v1122_v40 = vmul.bf16 %v11040_v61, %v11152_v11  ;;  %3502 = vmatprep.subr.bf16.mxu0 %v11160_v55  ;;  %v1794_v56 = vmul.bf16 %v11117_v33, %v11153_v54  ;;  %v11168_v28 = vld [vmem:[#allocation18_spill] sm:$0xff] }
 0x110   :  { %v7374_v45 = vmax.bf16 %v11025_v46, %v2986_v41  ;;  %3555 = vmatprep.subr.bf16.mxu1 %v11161_v13  ;;  %v2723_v43 = vadd.bf16 %v2467_v26, %v2051_v37  ;;  %v2048_v18 = vadd.bf16 %v1792_v48, %v1376_v47  ;;  %3436 = vmatprep.mubr.bf16.mxu0 %v11025_v46  ;;  %v11165_v41 = vld [vmem:[#allocation60_spill] sm:$0xff]  ;;  %v11166_v37 = vld [vmem:[#allocation67_spill] sm:$0xff] }
 0x111   :  { %3489 = vmatprep.mubr.bf16.mxu1 %v11025_v46  ;;  %v3017_v32 = vadd.bf16 %v7238_v39, %v2721_v0  ;;  %v1378_v57 = vadd.bf16 %v1122_v40, %v610_v59  ;;  %v2466_v15 = vmul.bf16 %v11038_v4, %v11154_v34  ;;  %v641_v26 = vmul.bf16 %v6341_v51, %v11162_v58  ;;  %v11167_v59 = vld [vmem:[#allocation62_spill] sm:$0xff] }
 0x112   :  { %v3019_v60 = vadd.bf16 %v7238_v39, %v2723_v43  ;;  %v2720_v42 = vadd.bf16 %v2464_v16, %v2048_v18  ;;  %v1153_v7 = vmul.bf16 %v6364_v63, %v11163_v10  ;;  %3503 = vmatpush1.bf16.msra.mxu0 %v11164_v20  ;;  %v1825_v47 = vmul.bf16 %v11134_v35, %v11166_v37  ;;  %v11169_v18 = vld [vmem:[#allocation31_spill] sm:$0xff]  ;;  %v11172_v20 = vld [vmem:[#allocation68_spill] sm:$0xff] }
 0x113   :  { %3556 = vmatpush1.bf16.msra.mxu1 %v11165_v41  ;;  %v3273_v5 = vmax.bf16 %v11025_v46, %v3017_v32  ;;  %v2050_v48 = vadd.bf16 %v1794_v56, %v1378_v57  ;;  %3504 = vmatprep.subr.bf16.mxu0 %v11167_v59  ;;  %v2497_v55 = vmul.bf16 %v6408_v17, %v11119_v50 }
 0x114   :  { %3557 = vmatprep.subr.bf16.mxu1 %v11168_v28  ;;  %v3275_v16 = vmax.bf16 %v11025_v46, %v3019_v60  ;;  %v3016_v49 = vadd.bf16 %v7238_v39, %v2720_v42  ;;  %v1409_v0 = vadd.bf16 %v1153_v7, %v641_v26  ;;  %v643_v13 = vmul.bf16 %v6370_v1, %v11162_v58  ;;  %v11171_v60 = vld [vmem:[#allocation66_spill] sm:$0xff] }
 0x115   :  { %v2722_v40 = vadd.bf16 %v2466_v15, %v2050_v48  ;;  %v1155_v43 = vmul.bf16 %v11137_v24, %v11163_v10  ;;  %3437 = vmatmul.mubr.bf16.gmra.mrb[4].mxu0 %v11169_v18  ;;  %v1827_v57 = vmul.bf16 %v11138_v14, %v11166_v37  ;;  %v11170_v15 = vld [vmem:[#allocation64_spill] sm:$0xff]  ;;  %v2499_v7 = vmul.bf16 %v11139_v25, %v11119_v50 }
 0x116   :  { %3490 = vmatmul.mubr.bf16.gmra.mrb[4].mxu1 %v11169_v18  ;;  %v3272_v56 = vmax.bf16 %v11025_v46, %v3016_v49  ;;  %v2081_v32 = vadd.bf16 %v1825_v47, %v1409_v0  ;;  %3505 = vmatpush1.bf16.msra.mxu0 %v11170_v15  ;;  %v640_v48 = vmul.bf16 %v11141_v6, %v11162_v58 }
 0x117   :  { %3558 = vmatpush1.bf16.msra.mxu1 %v11171_v60  ;;  %v3018_v42 = vadd.bf16 %v7238_v39, %v2722_v40  ;;  %v1411_v26 = vadd.bf16 %v1155_v43, %v643_v13  ;;  %3506 = vmatprep.subr.bf16.mxu0 %v7176_v8  ;;  %v1152_v47 = vmul.bf16 %v11096_v9, %v11163_v10  ;;  %v11173_v43 = vld [vmem:[#allocation69_spill] sm:$0xff] }
 0x118   :  { %3559 = vmatprep.subr.bf16.mxu1 %v11172_v20  ;;  %v2753_v41 = vadd.bf16 %v2497_v55, %v2081_v32  ;;  %v1824_v49 = vmul.bf16 %v11045_v29, %v11166_v37  ;;  %v2496_v0 = vmul.bf16 %v6414_v19, %v11119_v50  ;;  %3532 = vmatprep.mubr.bf16.mxu0 %v11025_v46  ;;  %v11174_v32 = vld [vmem:[#allocation16_spill] sm:$0xff] }
 0x119   :  { %v3274_v59 = vmax.bf16 %v11025_v46, %v3018_v42  ;;  %v2083_v28 = vadd.bf16 %v1827_v57, %v1411_v26  ;;  %v1408_v40 = vadd.bf16 %v1152_v47, %v640_v48  ;;  %v642_v55 = vmul.bf16 %v11099_v2, %v11162_v58  ;;  %3585 = vmatprep.mubr.bf16.mxu1 %v11025_v46  ;;  %v11175_v48 = vld [vmem:[#allocation25_spill] sm:$0xff] }
 0x11a   :  { %v3049_v8 = vadd.bf16 %v7288_v3, %v2753_v41  ;;  %v1154_v13 = vmul.bf16 %v11040_v61, %v11163_v10  ;;  %3507 = vmatpush1.bf16.msra.mxu0 %v11173_v43  ;;  %v1826_v15 = vmul.bf16 %v11117_v33, %v11166_v37  ;;  %v2498_v60 = vmul.bf16 %v11038_v4, %v11119_v50 }
 0x11b   :  { %3560 = vmatpush1.bf16.msra.mxu1 %v11174_v32  ;;  %v2755_v57 = vadd.bf16 %v2499_v7, %v2083_v28  ;;  %3508 = vmatprep.subr.bf16.mxu0 %v7326_v53  ;;  %v2080_v26 = vadd.bf16 %v1824_v49, %v1408_v40  ;;  %v673_v47 = vmul.bf16 %v6341_v51, %v11175_v48  ;;  %v11176_v7 = vld [vmem:[#allocation15_spill] sm:$0xff] }
 0x11c   :  { %3561 = vmatprep.subr.bf16.mxu1 %v7329_v44  ;;  %v3305_v42 = vmax.bf16 %v11025_v46, %v3049_v8  ;;  %v1410_v20 = vadd.bf16 %v1154_v13, %v642_v55  ;;  %v1185_v28 = vmul.bf16 %v6364_v63, %v11176_v7  ;;  %v1857_v43 = vmul.bf16 %v11134_v35, %v7268_v30  ;;  %v11177_v8 = vld [vmem:[#allocation9_spill] sm:$0xff] }
 0x11d   :  { %v3051_v41 = vadd.bf16 %v7288_v3, %v2755_v57  ;;  %v2752_v32 = vadd.bf16 %v2496_v0, %v2080_v26  ;;  %v2529_v53 = vmul.bf16 %v6408_v17, %v11145_v23  ;;  %v675_v44 = vmul.bf16 %v6370_v1, %v11175_v48  ;;  %v11179_v26 = vld [vmem:[#allocation27_spill] sm:$0xff] }
 0x11e   :  { %v2082_v50 = vadd.bf16 %v1826_v15, %v1410_v20  ;;  %3509 = vmatpush1.bf16.msra.mxu0 %v7346_v21  ;;  %v1441_v49 = vadd.bf16 %v1185_v28, %v673_v47  ;;  %v1187_v63 = vmul.bf16 %v11137_v24, %v11176_v7  ;;  %v1859_v17 = vmul.bf16 %v11138_v14, %v7268_v30 }
 0x11f   :  { %3562 = vmatpush1.bf16.msra.mxu1 %v7374_v45  ;;  %v3307_v51 = vmax.bf16 %v11025_v46, %v3051_v41  ;;  %3510 = vmatprep.subr.bf16.mxu0 %v3273_v5  ;;  %v3048_v35 = vadd.bf16 %v7288_v3, %v2752_v32  ;;  %v795_v1 = vshrl.u32 %v11177_v8, 16  ;;  %v2531_v45 = vmul.bf16 %v11139_v25, %v11145_v23 }
 0x120   :  { %3563 = vmatprep.subr.bf16.mxu1 %v3275_v16  ;;  %v2754_v0 = vadd.bf16 %v2498_v60, %v2082_v50  ;;  %v2113_v40 = vadd.bf16 %v1857_v43, %v1441_v49  ;;  %v1443_v21 = vadd.bf16 %v1187_v63, %v675_v44  ;;  %v672_v55 = vmul.bf16 %v11141_v6, %v11175_v48  ;;  %v11182_v44 = vld [vmem:[#allocation8_spill] sm:$0xff] }
 0x121   :  { %v3304_v24 = vmax.bf16 %v11025_v46, %v3048_v35  ;;  %v1184_v50 = vmul.bf16 %v11096_v9, %v11176_v7  ;;  %v1856_v14 = vmul.bf16 %v11045_v29, %v7268_v30  ;;  %v2528_v25 = vmul.bf16 %v6414_v19, %v11145_v23 }
 0x122   :  { %v3050_v5 = vadd.bf16 %v7288_v3, %v2754_v0  ;;  %3511 = vmatpush1.bf16.msra.mxu0 %v3272_v56  ;;  %v2785_v16 = vadd.bf16 %v2529_v53, %v2113_v40  ;;  %v2115_v13 = vadd.bf16 %v1859_v17, %v1443_v21  ;;  %v674_v15 = vmul.bf16 %v11099_v2, %v11175_v48  ;;  %v41_v2 = vld [vmem:[%s10717_s0 + $0x28] sm:$0xff]  ;;  %v11184_v40 = vld [vmem:[#allocation21_spill] sm:$0xff] }
 0x123   :  { %3564 = vmatpush1.bf16.msra.mxu1 %v3274_v59  ;;  %3512 = vmatprep.subr.bf16.mxu0 %v3305_v42  ;;  %v1440_v57 = vadd.bf16 %v1184_v50, %v672_v55  ;;  %v1186_v29 = vmul.bf16 %v11040_v61, %v11176_v7  ;;  %v1858_v56 = vmul.bf16 %v11117_v33, %v7268_v30  ;;  %v11178_v42 = vld [vmem:[#allocation40_spill] sm:$0xff]  ;;  %v11180_v33 = vld [vmem:[#allocation26_spill] sm:$0xff]  ;;  %v11181_v53 = vld [vmem:[#allocation7_spill] sm:$0xff] }
 0x124   :  { %3565 = vmatprep.subr.bf16.mxu1 %v3307_v51  ;;  %v3306_v6 = vmax.bf16 %v11025_v46, %v3050_v5  ;;  %v3081_v9 = vadd.bf16 %v7301_v22, %v2785_v16  ;;  %v2787_v60 = vadd.bf16 %v2531_v45, %v2115_v13  ;;  %v2530_v19 = vmul.bf16 %v11038_v4, %v11145_v23  ;;  %v11183_v51 = vld [vmem:[#allocation19_spill] sm:$0xff]  ;;  %v11185_v45 = vld [vmem:[#allocation20_spill] sm:$0xff] }
 0x125   :  { %v2112_v59 = vadd.bf16 %v1856_v14, %v1440_v57  ;;  %v453_v20 = vmul.bf16 %v11179_v26, %v11178_v42  ;;  %v796_v41 = vpack.i.b16 %v795_v1, %v795_v1  ;;  %v1442_v28 = vadd.bf16 %v1186_v29, %v674_v15 }
 0x126   :  { %3513 = vmatpush1.bf16.msra.mxu0 %v3304_v24  ;;  %v3337_v47 = vmax.bf16 %v11025_v46, %v3081_v9  ;;  %v3083_v61 = vadd.bf16 %v7301_v22, %v2787_v60  ;;  %v788_v43 = vshrl.u32 %v11180_v33, 16  ;;  %v7499_v49 = vrot.slane %v11183_v51, %v11182_v44  ;;  %v11186_v24 = vld [vmem:[#allocation33_spill] sm:$0xff] }
 0x127   :  { %3566 = vmatpush1.bf16.msra.mxu1 %v3306_v6  ;;  %v2784_v32 = vadd.bf16 %v2528_v25, %v2112_v59  ;;  %v7495_v4 = vrot.slane %v796_v41, %v11181_v53  ;;  %v7502_v63 = vrot.slane %v796_v41, %v11182_v44  ;;  %v2114_v0 = vadd.bf16 %v1858_v56, %v1442_v28 }
 0x128   :  { %3514 = vmatprep.subr.bf16.mxu0 %v3337_v47  ;;  %v3339_v35 = vmax.bf16 %v11025_v46, %v3083_v61  ;;  %v73_v17 = vcombine.high %v41_v2, %v41_v2  ;;  %v110_v8 = vpack.c.bf16 %v41_v2, %v41_v2  ;;  %v1637_v55 = vmul.bf16 %v7499_v49, %v11185_v45 }
 0x129   :  { %v3080_v1 = vadd.bf16 %v7301_v22, %v2784_v32  ;;  %v965_v21 = vmul.bf16 %v7495_v4, %v11184_v40  ;;  %v2309_v5 = vmul.bf16 %v7502_v63, %v11186_v24  ;;  %v2786_v50 = vadd.bf16 %v2530_v19, %v2114_v0 }
 0x12a   :  { %3567 = vmatprep.subr.bf16.mxu1 %v3339_v35  ;;  %v111_v14 = vpack.c.bf16 %v73_v17, %v73_v17  ;;  %v277_v16 = vpack.i.b16 %v11180_v33, %v11180_v33  ;;  %v789_v13 = vpack.i.b16 %v788_v43, %v788_v43  ;;  %v291_v57 = vpack.i.b16 %v110_v8, %v110_v8 }
 0x12b   :  { %v3336_v25 = vmax.bf16 %v11025_v46, %v3080_v1  ;;  %v1221_v6 = vadd.bf16 %v965_v21, %v453_v20  ;;  %v802_v15 = vshrl.u32 %v110_v8, 16  ;;  %v3082_v9 = vadd.bf16 %v7301_v22, %v2786_v50  ;;  %v11187_v1 = vld [vmem:[#allocation44_spill] sm:$0xff] }
 0x12c   :  { %v298_v60 = vpack.i.b16 %v111_v14, %v111_v14  ;;  %v809_v29 = vshrl.u32 %v111_v14, 16  ;;  %v7517_v56 = vrot.slane %v277_v16, %v11181_v53  ;;  %v7520_v19 = vrot.slane %v789_v13, %v11181_v53 }
 0x12d   :  { %3515 = vmatpush1.bf16.msra.mxu0 %v3336_v25  ;;  %v1893_v59 = vadd.bf16 %v1637_v55, %v1221_v6  ;;  %v7523_v41 = vrot.slane %v277_v16, %v11182_v44  ;;  %v7526_v2 = vrot.slane %v789_v13, %v11182_v44  ;;  %v3338_v20 = vmax.bf16 %v11025_v46, %v3082_v9 }
 0x12e   :  { %v7530_v47 = vrot.slane %v298_v60, %v11181_v53  ;;  %v810_v61 = vpack.i.b16 %v809_v29, %v809_v29  ;;  %v7533_v28 = vrot.slane %v298_v60, %v11182_v44  ;;  %v452_v43 = vmul.bf16 %v7517_v56, %v11178_v42  ;;  %v11188_v29 = vld [vmem:[#allocation29_spill] sm:$0xff] }
 0x12f   :  { %v2565_v33 = vadd.bf16 %v2309_v5, %v1893_v59  ;;  %v964_v32 = vmul.bf16 %v7520_v19, %v11184_v40  ;;  %v1636_v51 = vmul.bf16 %v7523_v41, %v11185_v45  ;;  %3568 = vmatpush1.bf16.msra.mxu1 %v3338_v20  ;;  %v2308_v5 = vmul.bf16 %v7526_v2, %v11186_v24 }
 0x130   :  { %v455_v35 = vmul.bf16 %v7530_v47, %v11178_v42  ;;  %v7544_v0 = vrot.slane %v810_v61, %v11181_v53  ;;  %v1639_v17 = vmul.bf16 %v7533_v28, %v11185_v45  ;;  %v7549_v8 = vrot.slane %v810_v61, %v11182_v44  ;;  %3533 = vmatmul.mubr.bf16.vlgmr.msra.gmra.mrb[8].mxu0 %v11157_v52 }
 0x131   :  { %v2861_v21 = vadd.bf16 %v11187_v1, %v2565_v33  ;;  %v1220_v55 = vadd.bf16 %v964_v32, %v452_v43  ;;  %v7556_v50 = vrot.slane %v291_v57, %v11181_v53  ;;  %v803_v13 = vpack.i.b16 %v802_v15, %v802_v15  ;;  %3542 = vmatprep.mubr.bf16.mxu0 %v11025_v46  ;;  %v11189_v43 = vld [vmem:[#allocation32_spill] sm:$0xff] }
 0x132   :  { %v967_v14 = vmul.bf16 %v7544_v0, %v11184_v40  ;;  %v2311_v16 = vmul.bf16 %v7549_v8, %v11186_v24  ;;  %v7563_v25 = vrot.slane %v291_v57, %v11182_v44  ;;  %3586 = vmatmul.mubr.bf16.vlgmr.msra.gmra.mrb[8].mxu1 %v11157_v52  ;;  %v485_v59 = vmul.bf16 %v11179_v26, %v11188_v29 }
 0x133   :  { %v3117_v6 = vmax.bf16 %v11025_v46, %v2861_v21  ;;  %v1892_v9 = vadd.bf16 %v1636_v51, %v1220_v55  ;;  %v454_v60 = vmul.bf16 %v7556_v50, %v11178_v42  ;;  %v7573_v61 = vrot.slane %v803_v13, %v11181_v53  ;;  %3595 = vmatprep.mubr.bf16.mxu1 %v11025_v46  ;;  %v11190_v51 = vld [vmem:[#allocation34_spill] sm:$0xff] }
 0x134   :  { %v1223_v20 = vadd.bf16 %v967_v14, %v455_v35  ;;  %v1638_v57 = vmul.bf16 %v7563_v25, %v11185_v45  ;;  %v7578_v15 = vrot.slane %v803_v13, %v11182_v44  ;;  %v997_v32 = vmul.bf16 %v7495_v4, %v11189_v43  ;;  %v11191_v35 = vld [vmem:[#allocation41_spill] sm:$0xff] }
 0x135   :  { %3606 = vmatprep.subr.bf16.mxu0 %v3117_v6  ;;  %v2564_v33 = vadd.bf16 %v2308_v5, %v1892_v9  ;;  %v1669_v21 = vmul.bf16 %v7499_v49, %v11190_v51  ;;  %v2341_v55 = vmul.bf16 %v7502_v63, %v11191_v35  ;;  %v966_v52 = vmul.bf16 %v7573_v61, %v11184_v40 }
 0x136   :  { %v1895_v14 = vadd.bf16 %v1639_v17, %v1223_v20  ;;  %v2310_v13 = vmul.bf16 %v7578_v15, %v11186_v24  ;;  %v487_v6 = vmul.bf16 %v7530_v47, %v11188_v29  ;;  %v1253_v9 = vadd.bf16 %v997_v32, %v485_v59 }
 0x137   :  { %v2860_v5 = vadd.bf16 %v11187_v1, %v2564_v33  ;;  %v999_v45 = vmul.bf16 %v7544_v0, %v11189_v43  ;;  %v1671_v42 = vmul.bf16 %v7533_v28, %v11190_v51  ;;  %v1222_v17 = vadd.bf16 %v966_v52, %v454_v60 }
 0x138   :  { %v2567_v44 = vadd.bf16 %v2311_v16, %v1895_v14  ;;  %v2343_v20 = vmul.bf16 %v7549_v8, %v11191_v35  ;;  %v484_v24 = vmul.bf16 %v7517_v56, %v11188_v29  ;;  %v1925_v53 = vadd.bf16 %v1669_v21, %v1253_v9  ;;  %3543 = vmatmul.mubr.bf16.gmra.mrb[12].mxu0 %v11169_v18  ;;  %v11192_v9 = vld [vmem:[#allocation51_spill] sm:$0xff] }
 0x139   :  { %v3116_v40 = vmax.bf16 %v11025_v46, %v2860_v5  ;;  %v1255_v22 = vadd.bf16 %v999_v45, %v487_v6  ;;  %v996_v59 = vmul.bf16 %v7520_v19, %v11189_v43  ;;  %v1894_v32 = vadd.bf16 %v1638_v57, %v1222_v17  ;;  %3638 = vmatprep.mubr.bf16.mxu0 %v11025_v46 }
 0x13a   :  { %v2863_v33 = vadd.bf16 %v11187_v1, %v2567_v44  ;;  %v1668_v52 = vmul.bf16 %v7523_v41, %v11190_v51  ;;  %v2340_v16 = vmul.bf16 %v7526_v2, %v11191_v35  ;;  %v2597_v60 = vadd.bf16 %v2341_v55, %v1925_v53  ;;  %3596 = vmatmul.mubr.bf16.gmra.mrb[12].mxu1 %v11169_v18  ;;  %v11193_v55 = vld [vmem:[#allocation36_spill] sm:$0xff] }
 0x13b   :  { %3607 = vmatpush1.bf16.msra.mxu0 %v3116_v40  ;;  %v1927_v21 = vadd.bf16 %v1671_v42, %v1255_v22  ;;  %v1252_v45 = vadd.bf16 %v996_v59, %v484_v24  ;;  %v486_v14 = vmul.bf16 %v7556_v50, %v11188_v29  ;;  %v2566_v5 = vadd.bf16 %v2310_v13, %v1894_v32  ;;  %v11194_v59 = vld [vmem:[#allocation28_spill] sm:$0xff] }
 0x13c   :  { %v3119_v6 = vmax.bf16 %v11025_v46, %v2863_v33  ;;  %v998_v44 = vmul.bf16 %v7573_v61, %v11189_v43  ;;  %v1670_v57 = vmul.bf16 %v7563_v25, %v11190_v51  ;;  %v2893_v17 = vadd.bf16 %v11192_v9, %v2597_v60  ;;  %3691 = vmatprep.mubr.bf16.mxu1 %v11025_v46  ;;  %v11195_v60 = vld [vmem:[#allocation30_spill] sm:$0xff] }
 0x13d   :  { %v2599_v40 = vadd.bf16 %v2343_v20, %v1927_v21  ;;  %v1924_v53 = vadd.bf16 %v1668_v52, %v1252_v45  ;;  %v2342_v22 = vmul.bf16 %v7578_v15, %v11191_v35  ;;  %v2862_v42 = vadd.bf16 %v11187_v1, %v2566_v5  ;;  %v11196_v5 = vld [vmem:[#allocation35_spill] sm:$0xff] }
 0x13e   :  { %3659 = vmatprep.subr.bf16.mxu1 %v3119_v6  ;;  %v1254_v24 = vadd.bf16 %v998_v44, %v486_v14  ;;  %v517_v13 = vmul.bf16 %v11179_v26, %v11193_v55  ;;  %v1029_v33 = vmul.bf16 %v7495_v4, %v11194_v59  ;;  %v3149_v32 = vmax.bf16 %v11025_v46, %v2893_v17 }
 0x13f   :  { %v2895_v20 = vadd.bf16 %v11192_v9, %v2599_v40  ;;  %v2596_v52 = vadd.bf16 %v2340_v16, %v1924_v53  ;;  %v1701_v21 = vmul.bf16 %v7499_v49, %v11195_v60  ;;  %v3118_v45 = vmax.bf16 %v11025_v46, %v2862_v42 }
 0x140   :  { %v1926_v6 = vadd.bf16 %v1670_v57, %v1254_v24  ;;  %v1285_v18 = vadd.bf16 %v1029_v33, %v517_v13  ;;  %v2373_v14 = vmul.bf16 %v7502_v63, %v11196_v5  ;;  %3608 = vmatprep.subr.bf16.mxu0 %v3149_v32  ;;  %v519_v17 = vmul.bf16 %v7530_v47, %v11193_v55 }
 0x141   :  { %v3151_v44 = vmax.bf16 %v11025_v46, %v2895_v20  ;;  %v2892_v35 = vadd.bf16 %v11192_v9, %v2596_v52  ;;  %v1031_v16 = vmul.bf16 %v7544_v0, %v11194_v59  ;;  %3660 = vmatpush1.bf16.msra.mxu1 %v3118_v45  ;;  %v1703_v57 = vmul.bf16 %v7533_v28, %v11195_v60 }
 0x142   :  { %v2598_v40 = vadd.bf16 %v2342_v22, %v1926_v6  ;;  %v1957_v53 = vadd.bf16 %v1701_v21, %v1285_v18  ;;  %v2375_v42 = vmul.bf16 %v7549_v8, %v11196_v5  ;;  %v516_v33 = vmul.bf16 %v7517_v56, %v11193_v55 }
 0x143   :  { %3661 = vmatprep.subr.bf16.mxu1 %v3151_v44  ;;  %v3148_v24 = vmax.bf16 %v11025_v46, %v2892_v35  ;;  %v1287_v13 = vadd.bf16 %v1031_v16, %v519_v17  ;;  %v1028_v32 = vmul.bf16 %v7520_v19, %v11194_v59  ;;  %v1700_v18 = vmul.bf16 %v7523_v41, %v11195_v60  ;;  %v11197_v17 = vld [vmem:[#allocation45_spill] sm:$0xff] }
 0x144   :  { %v2894_v20 = vadd.bf16 %v11192_v9, %v2598_v40  ;;  %v2629_v22 = vadd.bf16 %v2373_v14, %v1957_v53  ;;  %v2372_v52 = vmul.bf16 %v7526_v2, %v11196_v5  ;;  %v518_v35 = vmul.bf16 %v7556_v50, %v11193_v55  ;;  %v11200_v55 = vld [vmem:[#allocation23_spill] sm:$0xff]  ;;  %v11201_v9 = vld [vmem:[#allocation37_spill] sm:$0xff] }
 0x145   :  { %3609 = vmatpush1.bf16.msra.mxu0 %v3148_v24  ;;  %v1959_v21 = vadd.bf16 %v1703_v57, %v1287_v13  ;;  %v1284_v45 = vadd.bf16 %v1028_v32, %v516_v33  ;;  %v1030_v6 = vmul.bf16 %v7573_v61, %v11194_v59  ;;  %v1702_v14 = vmul.bf16 %v7563_v25, %v11195_v60  ;;  %v11198_v13 = vld [vmem:[#allocation46_spill] sm:$0xff]  ;;  %v11199_v59 = vld [vmem:[#allocation48_spill] sm:$0xff] }
 0x146   :  { %v3150_v44 = vmax.bf16 %v11025_v46, %v2894_v20  ;;  %v2925_v16 = vadd.bf16 %v11197_v17, %v2629_v22  ;;  %v2374_v40 = vmul.bf16 %v7578_v15, %v11196_v5  ;;  %v549_v33 = vmul.bf16 %v11179_v26, %v11198_v13 }
 0x147   :  { %v2631_v53 = vadd.bf16 %v2375_v42, %v1959_v21  ;;  %v1956_v24 = vadd.bf16 %v1700_v18, %v1284_v45  ;;  %v1286_v57 = vadd.bf16 %v1030_v6, %v518_v35  ;;  %v1061_v20 = vmul.bf16 %v7495_v4, %v11199_v59 }
 0x148   :  { %3662 = vmatpush1.bf16.msra.mxu1 %v3150_v44  ;;  %v3181_v32 = vmax.bf16 %v11025_v46, %v2925_v16  ;;  %v1733_v22 = vmul.bf16 %v7499_v49, %v11200_v55  ;;  %v2405_v60 = vmul.bf16 %v7502_v63, %v11201_v9  ;;  %v551_v21 = vmul.bf16 %v7530_v47, %v11198_v13 }
 0x149   :  { %v2927_v5 = vadd.bf16 %v11197_v17, %v2631_v53  ;;  %v2628_v42 = vadd.bf16 %v2372_v52, %v1956_v24  ;;  %v1958_v18 = vadd.bf16 %v1702_v14, %v1286_v57  ;;  %v1317_v45 = vadd.bf16 %v1061_v20, %v549_v33 }
 0x14a   :  { %3610 = vmatprep.subr.bf16.mxu0 %v3181_v32  ;;  %v1063_v35 = vmul.bf16 %v7544_v0, %v11199_v59  ;;  %v1735_v6 = vmul.bf16 %v7533_v28, %v11200_v55  ;;  %v2407_v44 = vmul.bf16 %v7549_v8, %v11201_v9  ;;  %v548_v14 = vmul.bf16 %v7517_v56, %v11198_v13 }
 0x14b   :  { %v3183_v16 = vmax.bf16 %v11025_v46, %v2927_v5  ;;  %v2924_v53 = vadd.bf16 %v11197_v17, %v2628_v42  ;;  %v2630_v52 = vadd.bf16 %v2374_v40, %v1958_v18  ;;  %v1989_v24 = vadd.bf16 %v1733_v22, %v1317_v45 }
 0x14c   :  { %v1319_v57 = vadd.bf16 %v1063_v35, %v551_v21  ;;  %v1060_v33 = vmul.bf16 %v7520_v19, %v11199_v59  ;;  %v1732_v32 = vmul.bf16 %v7523_v41, %v11200_v55  ;;  %v2404_v5 = vmul.bf16 %v7526_v2, %v11201_v9 }
 0x14d   :  { %3663 = vmatprep.subr.bf16.mxu1 %v3183_v16  ;;  %v3180_v20 = vmax.bf16 %v11025_v46, %v2924_v53  ;;  %v2926_v51 = vadd.bf16 %v11197_v17, %v2630_v52  ;;  %v550_v40 = vmul.bf16 %v7556_v50, %v11198_v13  ;;  %v2661_v42 = vadd.bf16 %v2405_v60, %v1989_v24  ;;  %v11202_v52 = vld [vmem:[#allocation61_spill] sm:$0xff] }
 0x14e   :  { %v1991_v22 = vadd.bf16 %v1735_v6, %v1319_v57  ;;  %v1316_v18 = vadd.bf16 %v1060_v33, %v548_v14  ;;  %v1062_v21 = vmul.bf16 %v7573_v61, %v11199_v59  ;;  %v1734_v35 = vmul.bf16 %v7563_v25, %v11200_v55 }
 0x14f   :  { %3611 = vmatpush1.bf16.msra.mxu0 %v3180_v20  ;;  %v3182_v45 = vmax.bf16 %v11025_v46, %v2926_v51  ;;  %v2406_v16 = vmul.bf16 %v7578_v15, %v11201_v9  ;;  %v581_v53 = vmul.bf16 %v11179_v26, %v11125_v36  ;;  %v2957_v13 = vadd.bf16 %v11202_v52, %v2661_v42 }
 0x150   :  { %v2663_v60 = vadd.bf16 %v2407_v44, %v1991_v22  ;;  %v1988_v6 = vadd.bf16 %v1732_v32, %v1316_v18  ;;  %v1318_v14 = vadd.bf16 %v1062_v21, %v550_v40  ;;  %v1093_v24 = vmul.bf16 %v7495_v4, %v11132_v12 }
 0x151   :  { %3664 = vmatpush1.bf16.msra.mxu1 %v3182_v45  ;;  %v1765_v51 = vmul.bf16 %v7499_v49, %v11133_v62  ;;  %v2437_v57 = vmul.bf16 %v7502_v63, %v11136_v38  ;;  %v583_v33 = vmul.bf16 %v7530_v47, %v11125_v36  ;;  %v3213_v20 = vmax.bf16 %v11025_v46, %v2957_v13 }
 0x152   :  { %v2959_v42 = vadd.bf16 %v11202_v52, %v2663_v60  ;;  %v2660_v44 = vadd.bf16 %v2404_v5, %v1988_v6  ;;  %v1990_v32 = vadd.bf16 %v1734_v35, %v1318_v14  ;;  %v1349_v40 = vadd.bf16 %v1093_v24, %v581_v53 }
 0x153   :  { %v1095_v22 = vmul.bf16 %v7544_v0, %v11132_v12  ;;  %v1767_v18 = vmul.bf16 %v7533_v28, %v11133_v62  ;;  %v2439_v21 = vmul.bf16 %v7549_v8, %v11136_v38  ;;  %3612 = vmatprep.subr.bf16.mxu0 %v3213_v20  ;;  %v580_v5 = vmul.bf16 %v7517_v56, %v11125_v36 }
 0x154   :  { %v3215_v45 = vmax.bf16 %v11025_v46, %v2959_v42  ;;  %v2956_v9 = vadd.bf16 %v11202_v52, %v2660_v44  ;;  %v2662_v13 = vadd.bf16 %v2406_v16, %v1990_v32  ;;  %v2021_v35 = vadd.bf16 %v1765_v51, %v1349_v40 }
 0x155   :  { %v1351_v53 = vadd.bf16 %v1095_v22, %v583_v33  ;;  %v1092_v60 = vmul.bf16 %v7520_v19, %v11132_v12  ;;  %v1764_v6 = vmul.bf16 %v7523_v41, %v11133_v62  ;;  %v2436_v20 = vmul.bf16 %v7526_v2, %v11136_v38 }
 0x156   :  { %3665 = vmatprep.subr.bf16.mxu1 %v3215_v45  ;;  %v3212_v14 = vmax.bf16 %v11025_v46, %v2956_v9  ;;  %v2958_v24 = vadd.bf16 %v11202_v52, %v2662_v13  ;;  %v582_v16 = vmul.bf16 %v7556_v50, %v11125_v36  ;;  %v2693_v42 = vadd.bf16 %v2437_v57, %v2021_v35 }
 0x157   :  { %v2023_v51 = vadd.bf16 %v1767_v18, %v1351_v53  ;;  %v1348_v33 = vadd.bf16 %v1092_v60, %v580_v5  ;;  %v1094_v44 = vmul.bf16 %v7573_v61, %v11132_v12  ;;  %v1766_v9 = vmul.bf16 %v7563_v25, %v11133_v62 }
 0x158   :  { %3613 = vmatpush1.bf16.msra.mxu0 %v3212_v14  ;;  %v3214_v32 = vmax.bf16 %v11025_v46, %v2958_v24  ;;  %v2438_v40 = vmul.bf16 %v7578_v15, %v11136_v38  ;;  %v613_v22 = vmul.bf16 %v11179_v26, %v11151_v27  ;;  %v2989_v45 = vadd.bf16 %v11143_v31, %v2693_v42 }
 0x159   :  { %v2695_v57 = vadd.bf16 %v2439_v21, %v2023_v51  ;;  %v2020_v18 = vadd.bf16 %v1764_v6, %v1348_v33  ;;  %v1350_v13 = vadd.bf16 %v1094_v44, %v582_v16  ;;  %v1125_v5 = vmul.bf16 %v7495_v4, %v11152_v11 }
 0x15a   :  { %3666 = vmatpush1.bf16.msra.mxu1 %v3214_v32  ;;  %v1797_v35 = vmul.bf16 %v7499_v49, %v11153_v54  ;;  %v2469_v53 = vmul.bf16 %v7502_v63, %v11154_v34  ;;  %v615_v60 = vmul.bf16 %v7530_v47, %v11151_v27  ;;  %v3245_v14 = vmax.bf16 %v11025_v46, %v2989_v45 }
 0x15b   :  { %v2991_v24 = vadd.bf16 %v11143_v31, %v2695_v57  ;;  %v2692_v21 = vadd.bf16 %v2436_v20, %v2020_v18  ;;  %v2022_v6 = vadd.bf16 %v1766_v9, %v1350_v13  ;;  %v1381_v16 = vadd.bf16 %v1125_v5, %v613_v22 }
 0x15c   :  { %v1127_v42 = vmul.bf16 %v7544_v0, %v11152_v11  ;;  %v1799_v51 = vmul.bf16 %v7533_v28, %v11153_v54  ;;  %v2471_v33 = vmul.bf16 %v7549_v8, %v11154_v34  ;;  %3614 = vmatprep.subr.bf16.mxu0 %v3245_v14  ;;  %v612_v20 = vmul.bf16 %v7517_v56, %v11151_v27 }
 0x15d   :  { %v3247_v44 = vmax.bf16 %v11025_v46, %v2991_v24  ;;  %v2988_v32 = vadd.bf16 %v11143_v31, %v2692_v21  ;;  %v2694_v45 = vadd.bf16 %v2438_v40, %v2022_v6  ;;  %v2053_v9 = vadd.bf16 %v1797_v35, %v1381_v16 }
 0x15e   :  { %v1383_v22 = vadd.bf16 %v1127_v42, %v615_v60  ;;  %v1124_v57 = vmul.bf16 %v7520_v19, %v11152_v11  ;;  %v1796_v18 = vmul.bf16 %v7523_v41, %v11153_v54  ;;  %v2468_v14 = vmul.bf16 %v7526_v2, %v11154_v34 }
 0x15f   :  { %3667 = vmatprep.subr.bf16.mxu1 %v3247_v44  ;;  %v3244_v13 = vmax.bf16 %v11025_v46, %v2988_v32  ;;  %v2990_v5 = vadd.bf16 %v11143_v31, %v2694_v45  ;;  %v614_v40 = vmul.bf16 %v7556_v50, %v11151_v27  ;;  %v2725_v24 = vadd.bf16 %v2469_v53, %v2053_v9 }
 0x160   :  { %v2055_v35 = vadd.bf16 %v1799_v51, %v1383_v22  ;;  %v1380_v60 = vadd.bf16 %v1124_v57, %v612_v20  ;;  %v1126_v21 = vmul.bf16 %v7573_v61, %v11152_v11  ;;  %v1798_v16 = vmul.bf16 %v7563_v25, %v11153_v54  ;;  %v11203_v22 = vld [vmem:[#allocation53_spill] sm:$0xff] }
 0x161   :  { %3615 = vmatpush1.bf16.msra.mxu0 %v3244_v13  ;;  %v3246_v6 = vmax.bf16 %v11025_v46, %v2990_v5  ;;  %v2470_v42 = vmul.bf16 %v7578_v15, %v11154_v34  ;;  %v645_v44 = vmul.bf16 %v11179_v26, %v11162_v58  ;;  %v3021_v32 = vadd.bf16 %v7238_v39, %v2725_v24 }
 0x162   :  { %v2727_v53 = vadd.bf16 %v2471_v33, %v2055_v35  ;;  %v2052_v51 = vadd.bf16 %v1796_v18, %v1380_v60  ;;  %v1382_v45 = vadd.bf16 %v1126_v21, %v614_v40  ;;  %v1157_v20 = vmul.bf16 %v7495_v4, %v11163_v10 }
 0x163   :  { %3668 = vmatpush1.bf16.msra.mxu1 %v3246_v6  ;;  %v1829_v9 = vmul.bf16 %v7499_v49, %v11166_v37  ;;  %v2501_v57 = vmul.bf16 %v7502_v63, %v11203_v22  ;;  %v647_v13 = vmul.bf16 %v7530_v47, %v11162_v58  ;;  %v3277_v5 = vmax.bf16 %v11025_v46, %v3021_v32 }
 0x164   :  { %v3023_v24 = vadd.bf16 %v7238_v39, %v2727_v53  ;;  %v2724_v33 = vadd.bf16 %v2468_v14, %v2052_v51  ;;  %v2054_v18 = vadd.bf16 %v1798_v16, %v1382_v45  ;;  %v1413_v40 = vadd.bf16 %v1157_v20, %v645_v44 }
 0x165   :  { %v1159_v35 = vmul.bf16 %v7544_v0, %v11163_v10  ;;  %v1831_v60 = vmul.bf16 %v7533_v28, %v11166_v37  ;;  %v2503_v21 = vmul.bf16 %v7549_v8, %v11203_v22  ;;  %3616 = vmatprep.subr.bf16.mxu0 %v3277_v5  ;;  %v644_v14 = vmul.bf16 %v7517_v56, %v11162_v58 }
 0x166   :  { %v3279_v6 = vmax.bf16 %v11025_v46, %v3023_v24  ;;  %v3020_v34 = vadd.bf16 %v7238_v39, %v2724_v33  ;;  %v2726_v32 = vadd.bf16 %v2470_v42, %v2054_v18  ;;  %v2085_v16 = vadd.bf16 %v1829_v9, %v1413_v40 }
 0x167   :  { %v1415_v44 = vadd.bf16 %v1159_v35, %v647_v13  ;;  %v1156_v53 = vmul.bf16 %v7520_v19, %v11163_v10  ;;  %v1828_v51 = vmul.bf16 %v7523_v41, %v11166_v37  ;;  %v2500_v5 = vmul.bf16 %v7526_v2, %v11203_v22 }
 0x168   :  { %3669 = vmatprep.subr.bf16.mxu1 %v3279_v6  ;;  %v3276_v45 = vmax.bf16 %v11025_v46, %v3020_v34  ;;  %v3022_v20 = vadd.bf16 %v7238_v39, %v2726_v32  ;;  %v646_v42 = vmul.bf16 %v7556_v50, %v11162_v58  ;;  %v2757_v24 = vadd.bf16 %v2501_v57, %v2085_v16 }
 0x169   :  { %v2087_v9 = vadd.bf16 %v1831_v60, %v1415_v44  ;;  %v1412_v13 = vadd.bf16 %v1156_v53, %v644_v14  ;;  %v1158_v33 = vmul.bf16 %v7573_v61, %v11163_v10  ;;  %v1830_v34 = vmul.bf16 %v7563_v25, %v11166_v37 }
 0x16a   :  { %3617 = vmatpush1.bf16.msra.mxu0 %v3276_v45  ;;  %v3278_v18 = vmax.bf16 %v11025_v46, %v3022_v20  ;;  %v2502_v40 = vmul.bf16 %v7578_v15, %v11203_v22  ;;  %v677_v35 = vmul.bf16 %v11179_v26, %v11175_v48  ;;  %v3053_v6 = vadd.bf16 %v7288_v3, %v2757_v24 }
 0x16b   :  { %v2759_v57 = vadd.bf16 %v2503_v21, %v2087_v9  ;;  %v2084_v60 = vadd.bf16 %v1828_v51, %v1412_v13  ;;  %v1414_v32 = vadd.bf16 %v1158_v33, %v646_v42  ;;  %v1189_v14 = vmul.bf16 %v7495_v4, %v11176_v7 }
 0x16c   :  { %3670 = vmatpush1.bf16.msra.mxu1 %v3278_v18  ;;  %v1861_v16 = vmul.bf16 %v7499_v49, %v7268_v30  ;;  %v2533_v44 = vmul.bf16 %v7502_v63, %v11145_v23  ;;  %v679_v53 = vmul.bf16 %v7530_v47, %v11175_v48  ;;  %v3309_v26 = vmax.bf16 %v11025_v46, %v3053_v6  ;;  %v43_v6 = vld [vmem:[%s10717_s0 + $0x38] sm:$0xff] }
 0x16d   :  { %v3055_v45 = vadd.bf16 %v7288_v3, %v2759_v57  ;;  %v2756_v21 = vadd.bf16 %v2500_v5, %v2084_v60  ;;  %v2086_v51 = vadd.bf16 %v1830_v34, %v1414_v32  ;;  %v1445_v20 = vadd.bf16 %v1189_v14, %v677_v35  ;;  %v11204_v32 = vld [vmem:[#allocation12_spill] sm:$0xff] }
 0x16e   :  { %v1191_v42 = vmul.bf16 %v7544_v0, %v11176_v7  ;;  %v1863_v4 = vmul.bf16 %v7533_v28, %v7268_v30  ;;  %v2535_v49 = vmul.bf16 %v7549_v8, %v11145_v23  ;;  %3618 = vmatprep.subr.bf16.mxu0 %v3309_v26  ;;  %v676_v5 = vmul.bf16 %v7517_v56, %v11175_v48  ;;  %v42_v8 = vld [vmem:[%s10717_s0 + $0x30] sm:$0xff] }
 0x16f   :  { %v3311_v63 = vmax.bf16 %v11025_v46, %v3055_v45  ;;  %v3052_v47 = vadd.bf16 %v7288_v3, %v2756_v21  ;;  %v2758_v24 = vadd.bf16 %v2502_v40, %v2086_v51  ;;  %v2117_v9 = vadd.bf16 %v1861_v16, %v1445_v20 }
 0x170   :  { %v1447_v13 = vadd.bf16 %v1191_v42, %v679_v53  ;;  %v1188_v0 = vmul.bf16 %v7520_v19, %v11176_v7  ;;  %v1860_v28 = vmul.bf16 %v7523_v41, %v7268_v30  ;;  %v2532_v56 = vmul.bf16 %v7526_v2, %v11145_v23 }
 0x171   :  { %3671 = vmatprep.subr.bf16.mxu1 %v3311_v63  ;;  %v3308_v33 = vmax.bf16 %v11025_v46, %v3052_v47  ;;  %v3054_v18 = vadd.bf16 %v7288_v3, %v2758_v24  ;;  %v678_v34 = vmul.bf16 %v7556_v50, %v11175_v48  ;;  %v2789_v40 = vadd.bf16 %v2533_v44, %v2117_v9 }
 0x172   :  { %v2119_v19 = vadd.bf16 %v1863_v4, %v1447_v13  ;;  %v1444_v35 = vadd.bf16 %v1188_v0, %v676_v5  ;;  %v1190_v41 = vmul.bf16 %v7573_v61, %v11176_v7  ;;  %v1862_v60 = vmul.bf16 %v7563_v25, %v7268_v30  ;;  %v11205_v13 = vld [vmem:[#allocation7_spill] sm:$0xff]  ;;  %v11213_v30 = vld [vmem:[#allocation41_spill] sm:$0xff] }
 0x173   :  { %3619 = vmatpush1.bf16.msra.mxu0 %v3308_v33  ;;  %v3310_v57 = vmax.bf16 %v11025_v46, %v3054_v18  ;;  %v2534_v2 = vmul.bf16 %v7578_v15, %v11145_v23  ;;  %v74_v50 = vcombine.high %v42_v8, %v42_v8  ;;  %v3085_v14 = vadd.bf16 %v11204_v32, %v2789_v40 }
 0x174   :  { %v2791_v16 = vadd.bf16 %v2535_v49, %v2119_v19  ;;  %v2116_v44 = vadd.bf16 %v1860_v28, %v1444_v35  ;;  %v1446_v53 = vadd.bf16 %v1190_v41, %v678_v34  ;;  %v112_v61 = vpack.c.bf16 %v42_v8, %v42_v8  ;;  %v11206_v8 = vld [vmem:[#allocation8_spill] sm:$0xff] }
 0x175   :  { %3672 = vmatpush1.bf16.msra.mxu1 %v3310_v57  ;;  %v113_v26 = vpack.c.bf16 %v74_v50, %v74_v50  ;;  %v75_v45 = vcombine.high %v43_v6, %v43_v6  ;;  %v114_v21 = vpack.c.bf16 %v43_v6, %v43_v6  ;;  %v3341_v51 = vmax.bf16 %v11025_v46, %v3085_v14  ;;  %v11207_v35 = vld [vmem:[#allocation40_spill] sm:$0xff] }
 0x176   :  { %v3087_v20 = vadd.bf16 %v11204_v32, %v2791_v16  ;;  %v2788_v42 = vadd.bf16 %v2532_v56, %v2116_v44  ;;  %v2118_v25 = vadd.bf16 %v1862_v60, %v1446_v53  ;;  %v305_v47 = vpack.i.b16 %v112_v61, %v112_v61  ;;  %v11208_v57 = vld [vmem:[#allocation20_spill] sm:$0xff]  ;;  %v11209_v53 = vld [vmem:[#allocation21_spill] sm:$0xff] }
 0x177   :  { %v312_v4 = vpack.i.b16 %v113_v26, %v113_v26  ;;  %v823_v63 = vshrl.u32 %v113_v26, 16  ;;  %v115_v15 = vpack.c.bf16 %v75_v45, %v75_v45  ;;  %3620 = vmatprep.subr.bf16.mxu0 %v3341_v51  ;;  %v816_v9 = vshrl.u32 %v112_v61, 16  ;;  %v11210_v26 = vld [vmem:[#allocation33_spill] sm:$0xff] }
 0x178   :  { %v3343_v49 = vmax.bf16 %v11025_v46, %v3087_v20  ;;  %v3084_v24 = vadd.bf16 %v11204_v32, %v2788_v42  ;;  %v2790_v5 = vadd.bf16 %v2534_v2, %v2118_v25  ;;  %v7885_v19 = vrot.slane %v305_v47, %v11205_v13 }
 0x179   :  { %v7877_v0 = vrot.slane %v312_v4, %v11205_v13  ;;  %v824_v28 = vpack.i.b16 %v823_v63, %v823_v63  ;;  %v7880_v33 = vrot.slane %v312_v4, %v11206_v8  ;;  %v326_v18 = vpack.i.b16 %v115_v15, %v115_v15 }
 0x17a   :  { %3673 = vmatprep.subr.bf16.mxu1 %v3343_v49  ;;  %v3340_v56 = vmax.bf16 %v11025_v46, %v3084_v24  ;;  %v3086_v34 = vadd.bf16 %v11204_v32, %v2790_v5  ;;  %v837_v40 = vshrl.u32 %v115_v15, 16  ;;  %v456_v51 = vmul.bf16 %v7885_v19, %v11207_v35  ;;  %v11211_v49 = vld [vmem:[#allocation24_spill] sm:$0xff] }
 0x17b   :  { %v457_v41 = vmul.bf16 %v7877_v0, %v11207_v35  ;;  %v7890_v6 = vrot.slane %v824_v28, %v11205_v13  ;;  %v1641_v60 = vmul.bf16 %v7880_v33, %v11208_v57  ;;  %v7895_v2 = vrot.slane %v824_v28, %v11206_v8 }
 0x17c   :  { %3621 = vmatpush1.bf16.msra.mxu0 %v3340_v56  ;;  %v3342_v50 = vmax.bf16 %v11025_v46, %v3086_v34  ;;  %v7899_v14 = vrot.slane %v326_v18, %v11205_v13  ;;  %v838_v16 = vpack.i.b16 %v837_v40, %v837_v40  ;;  %v7902_v44 = vrot.slane %v326_v18, %v11206_v8 }
 0x17d   :  { %v969_v61 = vmul.bf16 %v7890_v6, %v11209_v53  ;;  %v2313_v45 = vmul.bf16 %v7895_v2, %v11210_v26  ;;  %v817_v20 = vpack.i.b16 %v816_v9, %v816_v9  ;;  %v7925_v5 = vrot.slane %v305_v47, %v11206_v8 }
 0x17e   :  { %3674 = vmatpush1.bf16.msra.mxu1 %v3342_v50  ;;  %v459_v42 = vmul.bf16 %v7899_v14, %v11207_v35  ;;  %v7913_v25 = vrot.slane %v838_v16, %v11205_v13  ;;  %v1643_v4 = vmul.bf16 %v7902_v44, %v11208_v57  ;;  %v7918_v63 = vrot.slane %v838_v16, %v11206_v8 }
 0x17f   :  { %v1225_v15 = vadd.bf16 %v969_v61, %v457_v41  ;;  %3639 = vmatmul.mubr.bf16.vlgmr.msra.gmra.mrb[16].mxu0 %v11211_v49  ;;  %v7922_v24 = vrot.slane %v817_v20, %v11205_v13  ;;  %v7928_v9 = vrot.slane %v817_v20, %v11206_v8  ;;  %v319_v56 = vpack.i.b16 %v114_v21, %v114_v21 }
 0x180   :  { %v971_v28 = vmul.bf16 %v7913_v25, %v11209_v53  ;;  %v2315_v18 = vmul.bf16 %v7918_v63, %v11210_v26  ;;  %v830_v34 = vshrl.u32 %v114_v21, 16  ;;  %3648 = vmatprep.mubr.bf16.mxu0 %v11025_v46  ;;  %v1640_v41 = vmul.bf16 %v7925_v5, %v11208_v57 }
 0x181   :  { %v1897_v40 = vadd.bf16 %v1641_v60, %v1225_v15  ;;  %3692 = vmatmul.mubr.bf16.vlgmr.msra.gmra.mrb[16].mxu1 %v11211_v49  ;;  %v968_v47 = vmul.bf16 %v7922_v24, %v11209_v53  ;;  %v2312_v50 = vmul.bf16 %v7928_v9, %v11210_v26  ;;  %v7943_v61 = vrot.slane %v319_v56, %v11205_v13 }
 0x182   :  { %v1227_v16 = vadd.bf16 %v971_v28, %v459_v42  ;;  %v831_v20 = vpack.i.b16 %v830_v34, %v830_v34  ;;  %v7946_v21 = vrot.slane %v319_v56, %v11206_v8  ;;  %3701 = vmatprep.mubr.bf16.mxu1 %v11025_v46  ;;  %v489_v49 = vmul.bf16 %v7877_v0, %v11188_v29 }
 0x183   :  { %v2569_v60 = vadd.bf16 %v2313_v45, %v1897_v40  ;;  %v1224_v15 = vadd.bf16 %v968_v47, %v456_v51  ;;  %v1001_v32 = vmul.bf16 %v7890_v6, %v11189_v43  ;;  %v458_v42 = vmul.bf16 %v7943_v61, %v11207_v35 }
 0x184   :  { %v1899_v23 = vadd.bf16 %v1643_v4, %v1227_v16  ;;  %v7956_v28 = vrot.slane %v831_v20, %v11205_v13  ;;  %v1642_v56 = vmul.bf16 %v7946_v21, %v11208_v57  ;;  %v7962_v51 = vrot.slane %v831_v20, %v11206_v8  ;;  %v11212_v16 = vld [vmem:[#allocation34_spill] sm:$0xff] }
 0x185   :  { %v2865_v34 = vadd.bf16 %v11187_v1, %v2569_v60  ;;  %v1896_v45 = vadd.bf16 %v1640_v41, %v1224_v15  ;;  %v1257_v40 = vadd.bf16 %v1001_v32, %v489_v49  ;;  %v1673_v35 = vmul.bf16 %v7880_v33, %v11212_v16  ;;  %v11214_v32 = vld [vmem:[#allocation31_spill] sm:$0xff] }
 0x186   :  { %v2571_v47 = vadd.bf16 %v2315_v18, %v1899_v23  ;;  %v970_v4 = vmul.bf16 %v7956_v28, %v11209_v53  ;;  %v2345_v13 = vmul.bf16 %v7895_v2, %v11213_v30  ;;  %v2314_v41 = vmul.bf16 %v7962_v51, %v11210_v26  ;;  %v11220_v53 = vld [vmem:[#allocation46_spill] sm:$0xff] }
 0x187   :  { %v3121_v7 = vmax.bf16 %v11025_v46, %v2865_v34  ;;  %v2568_v57 = vadd.bf16 %v2312_v50, %v1896_v45  ;;  %v491_v20 = vmul.bf16 %v7899_v14, %v11188_v29  ;;  %3649 = vmatmul.mubr.bf16.gmra.mrb[20].mxu0 %v11214_v32  ;;  %v1929_v18 = vadd.bf16 %v1673_v35, %v1257_v40 }
 0x188   :  { %v2867_v23 = vadd.bf16 %v11187_v1, %v2571_v47  ;;  %v1226_v49 = vadd.bf16 %v970_v4, %v458_v42  ;;  %v1003_v60 = vmul.bf16 %v7913_v25, %v11189_v43  ;;  %3744 = vmatprep.mubr.bf16.mxu0 %v11025_v46  ;;  %v1675_v15 = vmul.bf16 %v7902_v44, %v11212_v16 }
 0x189   :  { %3712 = vmatprep.subr.bf16.mxu0 %v3121_v7  ;;  %v2864_v50 = vadd.bf16 %v11187_v1, %v2568_v57  ;;  %v2347_v34 = vmul.bf16 %v7918_v63, %v11213_v30  ;;  %v488_v45 = vmul.bf16 %v7885_v19, %v11188_v29  ;;  %v2601_v40 = vadd.bf16 %v2345_v13, %v1929_v18 }
 0x18a   :  { %v3123_v42 = vmax.bf16 %v11025_v46, %v2867_v23  ;;  %v1898_v35 = vadd.bf16 %v1642_v56, %v1226_v49  ;;  %v1259_v47 = vadd.bf16 %v1003_v60, %v491_v20  ;;  %3702 = vmatmul.mubr.bf16.gmra.mrb[20].mxu1 %v11214_v32  ;;  %v1000_v57 = vmul.bf16 %v7922_v24, %v11189_v43  ;;  %v11215_v56 = vld [vmem:[#allocation51_spill] sm:$0xff] }
 0x18b   :  { %v3120_v7 = vmax.bf16 %v11025_v46, %v2864_v50  ;;  %v1672_v4 = vmul.bf16 %v7925_v5, %v11212_v16  ;;  %v2344_v26 = vmul.bf16 %v7928_v9, %v11213_v30  ;;  %3797 = vmatprep.mubr.bf16.mxu1 %v11025_v46  ;;  %v2897_v13 = vadd.bf16 %v11215_v56, %v2601_v40 }
 0x18c   :  { %3765 = vmatprep.subr.bf16.mxu1 %v3123_v42  ;;  %v2570_v23 = vadd.bf16 %v2314_v41, %v1898_v35  ;;  %v1931_v20 = vadd.bf16 %v1675_v15, %v1259_v47  ;;  %v490_v49 = vmul.bf16 %v7943_v61, %v11188_v29  ;;  %v1256_v18 = vadd.bf16 %v1000_v57, %v488_v45  ;;  %v11216_v15 = vld [vmem:[#allocation36_spill] sm:$0xff] }
 0x18d   :  { %3713 = vmatpush1.bf16.msra.mxu0 %v3120_v7  ;;  %v1002_v60 = vmul.bf16 %v7956_v28, %v11189_v43  ;;  %v1674_v50 = vmul.bf16 %v7946_v21, %v11212_v16  ;;  %v2346_v32 = vmul.bf16 %v7962_v51, %v11213_v30  ;;  %v3153_v41 = vmax.bf16 %v11025_v46, %v2897_v13  ;;  %v11217_v45 = vld [vmem:[#allocation28_spill] sm:$0xff]  ;;  %v11218_v43 = vld [vmem:[#allocation30_spill] sm:$0xff] }
 0x18e   :  { %v2866_v42 = vadd.bf16 %v11187_v1, %v2570_v23  ;;  %v2603_v35 = vadd.bf16 %v2347_v34, %v1931_v20  ;;  %v521_v40 = vmul.bf16 %v7877_v0, %v11216_v15  ;;  %v1928_v47 = vadd.bf16 %v1672_v4, %v1256_v18  ;;  %v11219_v23 = vld [vmem:[#allocation35_spill] sm:$0xff] }
 0x18f   :  { %v1258_v7 = vadd.bf16 %v1002_v60, %v490_v49  ;;  %v1033_v57 = vmul.bf16 %v7890_v6, %v11217_v45  ;;  %v1705_v29 = vmul.bf16 %v7880_v33, %v11218_v43  ;;  %3714 = vmatprep.subr.bf16.mxu0 %v3153_v41  ;;  %v2377_v13 = vmul.bf16 %v7895_v2, %v11219_v23 }
 0x190   :  { %v3122_v16 = vmax.bf16 %v11025_v46, %v2866_v42  ;;  %v2899_v30 = vadd.bf16 %v11215_v56, %v2603_v35  ;;  %v523_v34 = vmul.bf16 %v7899_v14, %v11216_v15  ;;  %v2600_v20 = vadd.bf16 %v2344_v26, %v1928_v47 }
 0x191   :  { %v1930_v4 = vadd.bf16 %v1674_v50, %v1258_v7  ;;  %v1289_v49 = vadd.bf16 %v1033_v57, %v521_v40  ;;  %v1035_v18 = vmul.bf16 %v7913_v25, %v11217_v45  ;;  %v1707_v42 = vmul.bf16 %v7902_v44, %v11218_v43 }
 0x192   :  { %3766 = vmatpush1.bf16.msra.mxu1 %v3122_v16  ;;  %v3155_v60 = vmax.bf16 %v11025_v46, %v2899_v30  ;;  %v2379_v41 = vmul.bf16 %v7918_v63, %v11219_v23  ;;  %v520_v35 = vmul.bf16 %v7885_v19, %v11216_v15  ;;  %v2896_v1 = vadd.bf16 %v11215_v56, %v2600_v20 }
 0x193   :  { %v2602_v26 = vadd.bf16 %v2346_v32, %v1930_v4  ;;  %v1961_v50 = vadd.bf16 %v1705_v29, %v1289_v49  ;;  %v1291_v40 = vadd.bf16 %v1035_v18, %v523_v34  ;;  %v1032_v16 = vmul.bf16 %v7922_v24, %v11217_v45 }
 0x194   :  { %3767 = vmatprep.subr.bf16.mxu1 %v3155_v60  ;;  %v1704_v30 = vmul.bf16 %v7925_v5, %v11218_v43  ;;  %v2376_v47 = vmul.bf16 %v7928_v9, %v11219_v23  ;;  %v522_v7 = vmul.bf16 %v7943_v61, %v11216_v15  ;;  %v3152_v57 = vmax.bf16 %v11025_v46, %v2896_v1 }
 0x195   :  { %v2898_v20 = vadd.bf16 %v11215_v56, %v2602_v26  ;;  %v2633_v32 = vadd.bf16 %v2377_v13, %v1961_v50  ;;  %v1963_v29 = vadd.bf16 %v1707_v42, %v1291_v40  ;;  %v1288_v34 = vadd.bf16 %v1032_v16, %v520_v35 }
 0x196   :  { %v1034_v4 = vmul.bf16 %v7956_v28, %v11217_v45  ;;  %v1706_v49 = vmul.bf16 %v7946_v21, %v11218_v43  ;;  %v2378_v18 = vmul.bf16 %v7962_v51, %v11219_v23  ;;  %3715 = vmatpush1.bf16.msra.mxu0 %v3152_v57  ;;  %v553_v13 = vmul.bf16 %v7877_v0, %v11220_v53  ;;  %v11221_v57 = vld [vmem:[#allocation37_spill] sm:$0xff] }
 0x197   :  { %v3154_v60 = vmax.bf16 %v11025_v46, %v2898_v20  ;;  %v2929_v15 = vadd.bf16 %v11197_v17, %v2633_v32  ;;  %v2635_v1 = vadd.bf16 %v2379_v41, %v1963_v29  ;;  %v1960_v42 = vadd.bf16 %v1704_v30, %v1288_v34 }
 0x198   :  { %v1290_v35 = vadd.bf16 %v1034_v4, %v522_v7  ;;  %v1065_v26 = vmul.bf16 %v7890_v6, %v11199_v59  ;;  %v1737_v50 = vmul.bf16 %v7880_v33, %v11200_v55  ;;  %v2409_v20 = vmul.bf16 %v7895_v2, %v11221_v57 }
 0x199   :  { %3768 = vmatpush1.bf16.msra.mxu1 %v3154_v60  ;;  %v3185_v40 = vmax.bf16 %v11025_v46, %v2929_v15  ;;  %v2931_v16 = vadd.bf16 %v11197_v17, %v2635_v1  ;;  %v555_v41 = vmul.bf16 %v7899_v14, %v11220_v53  ;;  %v2632_v32 = vadd.bf16 %v2376_v47, %v1960_v42 }
 0x19a   :  { %v1962_v30 = vadd.bf16 %v1706_v49, %v1290_v35  ;;  %v1321_v7 = vadd.bf16 %v1065_v26, %v553_v13  ;;  %v1067_v29 = vmul.bf16 %v7913_v25, %v11199_v59  ;;  %v1739_v15 = vmul.bf16 %v7902_v44, %v11200_v55 }
 0x19b   :  { %3716 = vmatprep.subr.bf16.mxu0 %v3185_v40  ;;  %v3187_v34 = vmax.bf16 %v11025_v46, %v2931_v16  ;;  %v2411_v4 = vmul.bf16 %v7918_v63, %v11221_v57  ;;  %v552_v60 = vmul.bf16 %v7885_v19, %v11220_v53  ;;  %v2928_v1 = vadd.bf16 %v11197_v17, %v2632_v32 }
 0x19c   :  { %v2634_v47 = vadd.bf16 %v2378_v18, %v1962_v30  ;;  %v1993_v49 = vadd.bf16 %v1737_v50, %v1321_v7  ;;  %v1323_v13 = vadd.bf16 %v1067_v29, %v555_v41  ;;  %v1064_v42 = vmul.bf16 %v7922_v24, %v11199_v59 }
 0x19d   :  { %3769 = vmatprep.subr.bf16.mxu1 %v3187_v34  ;;  %v1736_v35 = vmul.bf16 %v7925_v5, %v11200_v55  ;;  %v2408_v26 = vmul.bf16 %v7928_v9, %v11221_v57  ;;  %v554_v40 = vmul.bf16 %v7943_v61, %v11220_v53  ;;  %v3184_v16 = vmax.bf16 %v11025_v46, %v2928_v1 }
 0x19e   :  { %v2930_v32 = vadd.bf16 %v11197_v17, %v2634_v47  ;;  %v2665_v18 = vadd.bf16 %v2409_v20, %v1993_v49  ;;  %v1995_v50 = vadd.bf16 %v1739_v15, %v1323_v13  ;;  %v1320_v41 = vadd.bf16 %v1064_v42, %v552_v60 }
 0x19f   :  { %v1066_v30 = vmul.bf16 %v7956_v28, %v11199_v59  ;;  %v1738_v7 = vmul.bf16 %v7946_v21, %v11200_v55  ;;  %v2410_v29 = vmul.bf16 %v7962_v51, %v11221_v57  ;;  %3717 = vmatpush1.bf16.msra.mxu0 %v3184_v16  ;;  %v585_v20 = vmul.bf16 %v7877_v0, %v11125_v36 }
 0x1a0   :  { %v3186_v34 = vmax.bf16 %v11025_v46, %v2930_v32  ;;  %v2961_v53 = vadd.bf16 %v11202_v52, %v2665_v18  ;;  %v2667_v1 = vadd.bf16 %v2411_v4, %v1995_v50  ;;  %v1992_v15 = vadd.bf16 %v1736_v35, %v1320_v41 }
 0x1a1   :  { %v1322_v60 = vadd.bf16 %v1066_v30, %v554_v40  ;;  %v1097_v47 = vmul.bf16 %v7890_v6, %v11132_v12  ;;  %v1769_v49 = vmul.bf16 %v7880_v33, %v11133_v62  ;;  %v2441_v16 = vmul.bf16 %v7895_v2, %v11136_v38 }
 0x1a2   :  { %3770 = vmatpush1.bf16.msra.mxu1 %v3186_v34  ;;  %v3217_v13 = vmax.bf16 %v11025_v46, %v2961_v53  ;;  %v2963_v42 = vadd.bf16 %v11202_v52, %v2667_v1  ;;  %v587_v4 = vmul.bf16 %v7899_v14, %v11125_v36  ;;  %v2664_v32 = vadd.bf16 %v2408_v26, %v1992_v15 }
 0x1a3   :  { %v1994_v35 = vadd.bf16 %v1738_v7, %v1322_v60  ;;  %v1353_v40 = vadd.bf16 %v1097_v47, %v585_v20  ;;  %v1099_v18 = vmul.bf16 %v7913_v25, %v11132_v12  ;;  %v1771_v53 = vmul.bf16 %v7902_v44, %v11133_v62 }
 0x1a4   :  { %3718 = vmatprep.subr.bf16.mxu0 %v3217_v13  ;;  %v3219_v50 = vmax.bf16 %v11025_v46, %v2963_v42  ;;  %v2443_v41 = vmul.bf16 %v7918_v63, %v11136_v38  ;;  %v584_v30 = vmul.bf16 %v7885_v19, %v11125_v36  ;;  %v2960_v34 = vadd.bf16 %v11202_v52, %v2664_v32 }
 0x1a5   :  { %v2666_v26 = vadd.bf16 %v2410_v29, %v1994_v35  ;;  %v2025_v7 = vadd.bf16 %v1769_v49, %v1353_v40  ;;  %v1355_v1 = vadd.bf16 %v1099_v18, %v587_v4  ;;  %v1096_v20 = vmul.bf16 %v7922_v24, %v11132_v12 }
 0x1a6   :  { %3771 = vmatprep.subr.bf16.mxu1 %v3219_v50  ;;  %v1768_v15 = vmul.bf16 %v7925_v5, %v11133_v62  ;;  %v2440_v60 = vmul.bf16 %v7928_v9, %v11136_v38  ;;  %v586_v47 = vmul.bf16 %v7943_v61, %v11125_v36  ;;  %v3216_v13 = vmax.bf16 %v11025_v46, %v2960_v34 }
 0x1a7   :  { %v2962_v42 = vadd.bf16 %v11202_v52, %v2666_v26  ;;  %v2697_v29 = vadd.bf16 %v2441_v16, %v2025_v7  ;;  %v2027_v49 = vadd.bf16 %v1771_v53, %v1355_v1  ;;  %v1352_v4 = vadd.bf16 %v1096_v20, %v584_v30 }
 0x1a8   :  { %v1098_v32 = vmul.bf16 %v7956_v28, %v11132_v12  ;;  %v1770_v35 = vmul.bf16 %v7946_v21, %v11133_v62  ;;  %v2442_v40 = vmul.bf16 %v7962_v51, %v11136_v38  ;;  %3719 = vmatpush1.bf16.msra.mxu0 %v3216_v13  ;;  %v617_v16 = vmul.bf16 %v7877_v0, %v11151_v27  ;;  %v11222_v13 = vld [vmem:[#allocation65_spill] sm:$0xff] }
 0x1a9   :  { %v3218_v18 = vmax.bf16 %v11025_v46, %v2962_v42  ;;  %v2993_v50 = vadd.bf16 %v11143_v31, %v2697_v29  ;;  %v2699_v34 = vadd.bf16 %v2443_v41, %v2027_v49  ;;  %v2024_v53 = vadd.bf16 %v1768_v15, %v1352_v4 }
 0x1aa   :  { %v1354_v30 = vadd.bf16 %v1098_v32, %v586_v47  ;;  %v1129_v26 = vmul.bf16 %v7890_v6, %v11152_v11  ;;  %v1801_v7 = vmul.bf16 %v7880_v33, %v11153_v54  ;;  %v2473_v42 = vmul.bf16 %v7895_v2, %v11222_v13 }
 0x1ab   :  { %3772 = vmatpush1.bf16.msra.mxu1 %v3218_v18  ;;  %v3249_v1 = vmax.bf16 %v11025_v46, %v2993_v50  ;;  %v2995_v20 = vadd.bf16 %v11143_v31, %v2699_v34  ;;  %v619_v41 = vmul.bf16 %v7899_v14, %v11151_v27  ;;  %v2696_v29 = vadd.bf16 %v2440_v60, %v2024_v53 }
 0x1ac   :  { %v2026_v15 = vadd.bf16 %v1770_v35, %v1354_v30  ;;  %v1385_v47 = vadd.bf16 %v1129_v26, %v617_v16  ;;  %v1131_v49 = vmul.bf16 %v7913_v25, %v11152_v11  ;;  %v1803_v32 = vmul.bf16 %v7902_v44, %v11153_v54 }
 0x1ad   :  { %3720 = vmatprep.subr.bf16.mxu0 %v3249_v1  ;;  %v3251_v4 = vmax.bf16 %v11025_v46, %v2995_v20  ;;  %v2475_v18 = vmul.bf16 %v7918_v63, %v11222_v13  ;;  %v616_v50 = vmul.bf16 %v7885_v19, %v11151_v27  ;;  %v2992_v34 = vadd.bf16 %v11143_v31, %v2696_v29 }
 0x1ae   :  { %v2698_v60 = vadd.bf16 %v2442_v40, %v2026_v15  ;;  %v2057_v35 = vadd.bf16 %v1801_v7, %v1385_v47  ;;  %v1387_v16 = vadd.bf16 %v1131_v49, %v619_v41  ;;  %v1128_v53 = vmul.bf16 %v7922_v24, %v11152_v11 }
 0x1af   :  { %3773 = vmatprep.subr.bf16.mxu1 %v3251_v4  ;;  %v1800_v30 = vmul.bf16 %v7925_v5, %v11153_v54  ;;  %v2472_v26 = vmul.bf16 %v7928_v9, %v11222_v13  ;;  %v618_v1 = vmul.bf16 %v7943_v61, %v11151_v27  ;;  %v3248_v20 = vmax.bf16 %v11025_v46, %v2992_v34 }
 0x1b0   :  { %v2994_v29 = vadd.bf16 %v11143_v31, %v2698_v60  ;;  %v2729_v40 = vadd.bf16 %v2473_v42, %v2057_v35  ;;  %v2059_v7 = vadd.bf16 %v1803_v32, %v1387_v16  ;;  %v1384_v41 = vadd.bf16 %v1128_v53, %v616_v50 }
 0x1b1   :  { %v1130_v15 = vmul.bf16 %v7956_v28, %v11152_v11  ;;  %v1802_v47 = vmul.bf16 %v7946_v21, %v11153_v54  ;;  %v2474_v49 = vmul.bf16 %v7962_v51, %v11222_v13  ;;  %3721 = vmatpush1.bf16.msra.mxu0 %v3248_v20  ;;  %v649_v42 = vmul.bf16 %v7877_v0, %v11162_v58 }
 0x1b2   :  { %v3250_v4 = vmax.bf16 %v11025_v46, %v2994_v29  ;;  %v3025_v27 = vadd.bf16 %v7238_v39, %v2729_v40  ;;  %v2731_v34 = vadd.bf16 %v2475_v18, %v2059_v7  ;;  %v2056_v32 = vadd.bf16 %v1800_v30, %v1384_v41 }
 0x1b3   :  { %v1386_v50 = vadd.bf16 %v1130_v15, %v618_v1  ;;  %v1161_v60 = vmul.bf16 %v7890_v6, %v11163_v10  ;;  %v1833_v35 = vmul.bf16 %v7880_v33, %v11166_v37  ;;  %v2505_v20 = vmul.bf16 %v7895_v2, %v11203_v22 }
 0x1b4   :  { %3774 = vmatpush1.bf16.msra.mxu1 %v3250_v4  ;;  %v3281_v16 = vmax.bf16 %v11025_v46, %v3025_v27  ;;  %v3027_v53 = vadd.bf16 %v7238_v39, %v2731_v34  ;;  %v651_v18 = vmul.bf16 %v7899_v14, %v11162_v58  ;;  %v2728_v29 = vadd.bf16 %v2472_v26, %v2056_v32 }
 0x1b5   :  { %v2058_v30 = vadd.bf16 %v1802_v47, %v1386_v50  ;;  %v1417_v1 = vadd.bf16 %v1161_v60, %v649_v42  ;;  %v1163_v40 = vmul.bf16 %v7913_v25, %v11163_v10  ;;  %v1835_v27 = vmul.bf16 %v7902_v44, %v11166_v37 }
 0x1b6   :  { %3722 = vmatprep.subr.bf16.mxu0 %v3281_v16  ;;  %v3283_v7 = vmax.bf16 %v11025_v46, %v3027_v53  ;;  %v2507_v41 = vmul.bf16 %v7918_v63, %v11203_v22  ;;  %v648_v15 = vmul.bf16 %v7885_v19, %v11162_v58  ;;  %v3024_v4 = vadd.bf16 %v7238_v39, %v2728_v29 }
 0x1b7   :  { %v2730_v26 = vadd.bf16 %v2474_v49, %v2058_v30  ;;  %v2089_v47 = vadd.bf16 %v1833_v35, %v1417_v1  ;;  %v1419_v34 = vadd.bf16 %v1163_v40, %v651_v18  ;;  %v1160_v42 = vmul.bf16 %v7922_v24, %v11163_v10 }
 0x1b8   :  { %3775 = vmatprep.subr.bf16.mxu1 %v3283_v7  ;;  %v1832_v32 = vmul.bf16 %v7925_v5, %v11166_v37  ;;  %v2504_v50 = vmul.bf16 %v7928_v9, %v11203_v22  ;;  %v650_v60 = vmul.bf16 %v7943_v61, %v11162_v58  ;;  %v3280_v16 = vmax.bf16 %v11025_v46, %v3024_v4 }
 0x1b9   :  { %v3026_v53 = vadd.bf16 %v7238_v39, %v2730_v26  ;;  %v2761_v49 = vadd.bf16 %v2505_v20, %v2089_v47  ;;  %v2091_v35 = vadd.bf16 %v1835_v27, %v1419_v34  ;;  %v1416_v18 = vadd.bf16 %v1160_v42, %v648_v15  ;;  %v11223_v26 = vld [vmem:[#allocation15_spill] sm:$0xff]  ;;  %v11224_v34 = vld [vmem:[#allocation13_spill] sm:$0xff] }
 0x1ba   :  { %v1162_v29 = vmul.bf16 %v7956_v28, %v11163_v10  ;;  %v1834_v30 = vmul.bf16 %v7946_v21, %v11166_v37  ;;  %v2506_v1 = vmul.bf16 %v7962_v51, %v11203_v22  ;;  %3723 = vmatpush1.bf16.msra.mxu0 %v3280_v16  ;;  %v681_v20 = vmul.bf16 %v7877_v0, %v11175_v48 }
 0x1bb   :  { %v3282_v40 = vmax.bf16 %v11025_v46, %v3026_v53  ;;  %v3057_v7 = vadd.bf16 %v7288_v3, %v2761_v49  ;;  %v2763_v4 = vadd.bf16 %v2507_v41, %v2091_v35  ;;  %v2088_v27 = vadd.bf16 %v1832_v32, %v1416_v18  ;;  %v11225_v53 = vld [vmem:[#allocation38_spill] sm:$0xff] }
 0x1bc   :  { %v1418_v15 = vadd.bf16 %v1162_v29, %v650_v60  ;;  %v1193_v47 = vmul.bf16 %v7890_v6, %v11223_v26  ;;  %v1865_v42 = vmul.bf16 %v7880_v33, %v11224_v34  ;;  %v2537_v49 = vmul.bf16 %v7895_v2, %v11225_v53 }
 0x1bd   :  { %3776 = vmatpush1.bf16.msra.mxu1 %v3282_v40  ;;  %v3313_v22 = vmax.bf16 %v11025_v46, %v3057_v7  ;;  %v3059_v16 = vadd.bf16 %v7288_v3, %v2763_v4  ;;  %v683_v41 = vmul.bf16 %v7899_v14, %v11175_v48  ;;  %v2760_v0 = vadd.bf16 %v2504_v50, %v2088_v27 }
 0x1be   :  { %v2090_v32 = vadd.bf16 %v1834_v30, %v1418_v15  ;;  %v1449_v60 = vadd.bf16 %v1193_v47, %v681_v20  ;;  %v1195_v6 = vmul.bf16 %v7913_v25, %v11223_v26  ;;  %v1867_v35 = vmul.bf16 %v7902_v44, %v11224_v34  ;;  %v11226_v15 = vld [vmem:[#allocation12_spill] sm:$0xff] }
 0x1bf   :  { %3724 = vmatprep.subr.bf16.mxu0 %v3313_v22  ;;  %v3315_v33 = vmax.bf16 %v11025_v46, %v3059_v16  ;;  %v2539_v18 = vmul.bf16 %v7918_v63, %v11225_v53  ;;  %v680_v2 = vmul.bf16 %v7885_v19, %v11175_v48  ;;  %v3056_v14 = vadd.bf16 %v7288_v3, %v2760_v0  ;;  %v44_v19 = vld [vmem:[%s10717_s0 + $0x40] sm:$0xff] }
 0x1c0   :  { %v2762_v50 = vadd.bf16 %v2506_v1, %v2090_v32  ;;  %v2121_v29 = vadd.bf16 %v1865_v42, %v1449_v60  ;;  %v1451_v30 = vadd.bf16 %v1195_v6, %v683_v41  ;;  %v1192_v22 = vmul.bf16 %v7922_v24, %v11223_v26  ;;  %v45_v24 = vld [vmem:[%s10717_s0 + $0x48] sm:$0xff] }
 0x1c1   :  { %3777 = vmatprep.subr.bf16.mxu1 %v3315_v33  ;;  %v1864_v25 = vmul.bf16 %v7925_v5, %v11224_v34  ;;  %v2536_v44 = vmul.bf16 %v7928_v9, %v11225_v53  ;;  %v682_v63 = vmul.bf16 %v7943_v61, %v11175_v48  ;;  %v3312_v1 = vmax.bf16 %v11025_v46, %v3056_v14 }
 0x1c2   :  { %v3058_v40 = vadd.bf16 %v7288_v3, %v2762_v50  ;;  %v2793_v7 = vadd.bf16 %v2537_v49, %v2121_v29  ;;  %v2123_v4 = vadd.bf16 %v1867_v35, %v1451_v30  ;;  %v1448_v5 = vadd.bf16 %v1192_v22, %v680_v2  ;;  %v11235_v3 = vld [vmem:[#allocation44_spill] sm:$0xff] }
 0x1c3   :  { %v1194_v9 = vmul.bf16 %v7956_v28, %v11223_v26  ;;  %v1866_v61 = vmul.bf16 %v7946_v21, %v11224_v34  ;;  %v2538_v20 = vmul.bf16 %v7962_v51, %v11225_v53  ;;  %3725 = vmatpush1.bf16.msra.mxu0 %v3312_v1  ;;  %v76_v16 = vcombine.high %v44_v19, %v44_v19  ;;  %v11234_v34 = vld [vmem:[#allocation32_spill] sm:$0xff] }
 0x1c4   :  { %v3314_v27 = vmax.bf16 %v11025_v46, %v3058_v40  ;;  %v3089_v47 = vadd.bf16 %v11226_v15, %v2793_v7  ;;  %v2795_v42 = vadd.bf16 %v2539_v18, %v2123_v4  ;;  %v2120_v49 = vadd.bf16 %v1864_v25, %v1448_v5 }
 0x1c5   :  { %v1450_v41 = vadd.bf16 %v1194_v9, %v682_v63  ;;  %v116_v0 = vpack.c.bf16 %v44_v19, %v44_v19  ;;  %v77_v32 = vcombine.high %v45_v24, %v45_v24  ;;  %v117_v21 = vpack.c.bf16 %v76_v16, %v76_v16  ;;  %v11227_v19 = vld [vmem:[#allocation7_spill] sm:$0xff] }
 0x1c6   :  { %3778 = vmatpush1.bf16.msra.mxu1 %v3314_v27  ;;  %v3345_v28 = vmax.bf16 %v11025_v46, %v3089_v47  ;;  %v3091_v60 = vadd.bf16 %v11226_v15, %v2795_v42  ;;  %v118_v6 = vpack.c.bf16 %v45_v24, %v45_v24  ;;  %v2792_v33 = vadd.bf16 %v2536_v44, %v2120_v49  ;;  %v11229_v47 = vld [vmem:[#allocation20_spill] sm:$0xff] }
 0x1c7   :  { %v2122_v51 = vadd.bf16 %v1866_v61, %v1450_v41  ;;  %v119_v35 = vpack.c.bf16 %v77_v32, %v77_v32  ;;  %v333_v2 = vpack.i.b16 %v116_v0, %v116_v0  ;;  %v340_v18 = vpack.i.b16 %v117_v21, %v117_v21  ;;  %v11228_v61 = vld [vmem:[#allocation40_spill] sm:$0xff] }
 0x1c8   :  { %3726 = vmatprep.subr.bf16.mxu0 %v3345_v28  ;;  %v3347_v14 = vmax.bf16 %v11025_v46, %v3091_v60  ;;  %v851_v50 = vshrl.u32 %v117_v21, 16  ;;  %v844_v29 = vshrl.u32 %v116_v0, 16  ;;  %v3088_v30 = vadd.bf16 %v11226_v15, %v2792_v33  ;;  %v11230_v28 = vld [vmem:[#allocation21_spill] sm:$0xff] }
 0x1c9   :  { %v2794_v22 = vadd.bf16 %v2538_v20, %v2122_v51  ;;  %v354_v25 = vpack.i.b16 %v119_v35, %v119_v35  ;;  %v865_v63 = vshrl.u32 %v119_v35, 16  ;;  %v8259_v1 = vrot.slane %v340_v18, %v11227_v19  ;;  %v11231_v21 = vld [vmem:[#allocation33_spill] sm:$0xff] }
 0x1ca   :  { %3779 = vmatprep.subr.bf16.mxu1 %v3347_v14  ;;  %v852_v40 = vpack.i.b16 %v851_v50, %v851_v50  ;;  %v8262_v44 = vrot.slane %v340_v18, %v11206_v8  ;;  %v8265_v7 = vrot.slane %v333_v2, %v11227_v19  ;;  %v3344_v4 = vmax.bf16 %v11025_v46, %v3088_v30 }
 0x1cb   :  { %v3090_v24 = vadd.bf16 %v11226_v15, %v2794_v22  ;;  %v8270_v5 = vrot.slane %v354_v25, %v11227_v19  ;;  %v866_v9 = vpack.i.b16 %v865_v63, %v865_v63  ;;  %v461_v20 = vmul.bf16 %v8259_v1, %v11228_v61  ;;  %v11232_v63 = vld [vmem:[#allocation24_spill] sm:$0xff]  ;;  %v11233_v15 = vld [vmem:[#allocation29_spill] sm:$0xff] }
 0x1cc   :  { %v8275_v27 = vrot.slane %v852_v40, %v11227_v19  ;;  %v1645_v42 = vmul.bf16 %v8262_v44, %v11229_v47  ;;  %v8280_v16 = vrot.slane %v852_v40, %v11206_v8  ;;  %3727 = vmatpush1.bf16.msra.mxu0 %v3344_v4  ;;  %v8289_v32 = vrot.slane %v354_v25, %v11206_v8 }
 0x1cd   :  { %v3346_v49 = vmax.bf16 %v11025_v46, %v3090_v24  ;;  %v463_v41 = vmul.bf16 %v8270_v5, %v11228_v61  ;;  %v8286_v0 = vrot.slane %v866_v9, %v11227_v19  ;;  %v8296_v51 = vrot.slane %v866_v9, %v11206_v8 }
 0x1ce   :  { %v973_v60 = vmul.bf16 %v8275_v27, %v11230_v28  ;;  %v2317_v33 = vmul.bf16 %v8280_v16, %v11231_v21  ;;  %v460_v35 = vmul.bf16 %v8265_v7, %v11228_v61  ;;  %v1647_v18 = vmul.bf16 %v8289_v32, %v11229_v47 }
 0x1cf   :  { %3780 = vmatpush1.bf16.msra.mxu1 %v3346_v49  ;;  %v975_v14 = vmul.bf16 %v8286_v0, %v11230_v28  ;;  %v845_v50 = vpack.i.b16 %v844_v29, %v844_v29  ;;  %v8305_v30 = vrot.slane %v333_v2, %v11206_v8  ;;  %v2319_v25 = vmul.bf16 %v8296_v51, %v11231_v21 }
 0x1d0   :  { %v1229_v22 = vadd.bf16 %v973_v60, %v461_v20  ;;  %3745 = vmatmul.mubr.bf16.vlgmr.msra.gmra.mrb[24].mxu0 %v11232_v63  ;;  %v347_v40 = vpack.i.b16 %v118_v6, %v118_v6  ;;  %v858_v4 = vshrl.u32 %v118_v6, 16  ;;  %v493_v53 = vmul.bf16 %v8259_v1, %v11233_v15 }
 0x1d1   :  { %v1231_v24 = vadd.bf16 %v975_v14, %v463_v41  ;;  %v8311_v9 = vrot.slane %v845_v50, %v11227_v19  ;;  %v1644_v49 = vmul.bf16 %v8305_v30, %v11229_v47  ;;  %v8316_v29 = vrot.slane %v845_v50, %v11206_v8  ;;  %3754 = vmatprep.mubr.bf16.mxu0 %v11025_v46 }
 0x1d2   :  { %v1901_v2 = vadd.bf16 %v1645_v42, %v1229_v22  ;;  %3798 = vmatmul.mubr.bf16.vlgmr.msra.gmra.mrb[24].mxu1 %v11232_v63  ;;  %v8321_v20 = vrot.slane %v347_v40, %v11227_v19  ;;  %v859_v60 = vpack.i.b16 %v858_v4, %v858_v4  ;;  %v8324_v6 = vrot.slane %v347_v40, %v11206_v8 }
 0x1d3   :  { %v1903_v41 = vadd.bf16 %v1647_v18, %v1231_v24  ;;  %v972_v14 = vmul.bf16 %v8311_v9, %v11230_v28  ;;  %v2316_v50 = vmul.bf16 %v8316_v29, %v11231_v21  ;;  %3807 = vmatprep.mubr.bf16.mxu1 %v11025_v46  ;;  %v1005_v26 = vmul.bf16 %v8275_v27, %v11234_v34 }
 0x1d4   :  { %v2573_v42 = vadd.bf16 %v2317_v33, %v1901_v2  ;;  %v462_v22 = vmul.bf16 %v8321_v20, %v11228_v61  ;;  %v8336_v4 = vrot.slane %v859_v60, %v11227_v19  ;;  %v1646_v18 = vmul.bf16 %v8324_v6, %v11229_v47  ;;  %v11236_v2 = vld [vmem:[#allocation34_spill] sm:$0xff]  ;;  %v11237_v19 = vld [vmem:[#allocation41_spill] sm:$0xff] }
 0x1d5   :  { %v2575_v40 = vadd.bf16 %v2319_v25, %v1903_v41  ;;  %v1228_v24 = vadd.bf16 %v972_v14, %v460_v35  ;;  %v8341_v63 = vrot.slane %v859_v60, %v11206_v8  ;;  %v1677_v61 = vmul.bf16 %v8262_v44, %v11236_v2  ;;  %v11238_v8 = vld [vmem:[#allocation31_spill] sm:$0xff] }
 0x1d6   :  { %v2869_v48 = vadd.bf16 %v11235_v3, %v2573_v42  ;;  %v974_v33 = vmul.bf16 %v8336_v4, %v11230_v28  ;;  %v2349_v37 = vmul.bf16 %v8280_v16, %v11237_v19  ;;  %v1261_v41 = vadd.bf16 %v1005_v26, %v493_v53 }
 0x1d7   :  { %v2871_v25 = vadd.bf16 %v11235_v3, %v2575_v40  ;;  %v1900_v35 = vadd.bf16 %v1644_v49, %v1228_v24  ;;  %v2318_v60 = vmul.bf16 %v8341_v63, %v11231_v21  ;;  %v495_v42 = vmul.bf16 %v8270_v5, %v11233_v15 }
 0x1d8   :  { %v3125_v14 = vmax.bf16 %v11025_v46, %v2869_v48  ;;  %v1230_v47 = vadd.bf16 %v974_v33, %v462_v22  ;;  %v1007_v28 = vmul.bf16 %v8286_v0, %v11234_v34  ;;  %3755 = vmatmul.mubr.bf16.gmra.mrb[28].mxu0 %v11238_v8  ;;  %v1933_v40 = vadd.bf16 %v1677_v61, %v1261_v41 }
 0x1d9   :  { %v3127_v10 = vmax.bf16 %v11025_v46, %v2871_v25  ;;  %v2572_v39 = vadd.bf16 %v2316_v50, %v1900_v35  ;;  %v1679_v49 = vmul.bf16 %v8289_v32, %v11236_v2  ;;  %3850 = vmatprep.mubr.bf16.mxu0 %v11025_v46  ;;  %v2351_v53 = vmul.bf16 %v8296_v51, %v11237_v19 }
 0x1da   :  { %3818 = vmatprep.subr.bf16.mxu0 %v3125_v14  ;;  %v1902_v48 = vadd.bf16 %v1646_v18, %v1230_v47  ;;  %v1263_v26 = vadd.bf16 %v1007_v28, %v495_v42  ;;  %v492_v22 = vmul.bf16 %v8265_v7, %v11233_v15  ;;  %v2605_v33 = vadd.bf16 %v2349_v37, %v1933_v40 }
 0x1db   :  { %3871 = vmatprep.subr.bf16.mxu1 %v3127_v10  ;;  %v2868_v24 = vadd.bf16 %v11235_v3, %v2572_v39  ;;  %v1004_v61 = vmul.bf16 %v8311_v9, %v11234_v34  ;;  %v1676_v50 = vmul.bf16 %v8305_v30, %v11236_v2  ;;  %v2348_v47 = vmul.bf16 %v8316_v29, %v11237_v19 }
 0x1dc   :  { %v2574_v25 = vadd.bf16 %v2318_v60, %v1902_v48  ;;  %v1935_v35 = vadd.bf16 %v1679_v49, %v1263_v26  ;;  %v494_v28 = vmul.bf16 %v8321_v20, %v11233_v15  ;;  %3808 = vmatmul.mubr.bf16.gmra.mrb[28].mxu1 %v11238_v8  ;;  %v2901_v39 = vadd.bf16 %v11215_v56, %v2605_v33  ;;  %v11239_v26 = vld [vmem:[#allocation36_spill] sm:$0xff] }
 0x1dd   :  { %v3124_v10 = vmax.bf16 %v11025_v46, %v2868_v24  ;;  %v1260_v37 = vadd.bf16 %v1004_v61, %v492_v22  ;;  %v1006_v18 = vmul.bf16 %v8336_v4, %v11234_v34  ;;  %3903 = vmatprep.mubr.bf16.mxu1 %v11025_v46  ;;  %v1678_v14 = vmul.bf16 %v8324_v6, %v11236_v2 }
 0x1de   :  { %v2870_v60 = vadd.bf16 %v11235_v3, %v2574_v25  ;;  %v2607_v41 = vadd.bf16 %v2351_v53, %v1935_v35  ;;  %v2350_v42 = vmul.bf16 %v8341_v63, %v11237_v19  ;;  %v3157_v40 = vmax.bf16 %v11025_v46, %v2901_v39 }
 0x1df   :  { %3819 = vmatpush1.bf16.msra.mxu0 %v3124_v10  ;;  %v1932_v49 = vadd.bf16 %v1676_v50, %v1260_v37  ;;  %v1262_v48 = vadd.bf16 %v1006_v18, %v494_v28  ;;  %v525_v22 = vmul.bf16 %v8259_v1, %v11239_v26  ;;  %v1037_v53 = vmul.bf16 %v8275_v27, %v11217_v45 }
 0x1e0   :  { %v3126_v24 = vmax.bf16 %v11025_v46, %v2870_v60  ;;  %v2903_v33 = vadd.bf16 %v11215_v56, %v2607_v41  ;;  %v1709_v61 = vmul.bf16 %v8262_v44, %v11218_v43  ;;  %3820 = vmatprep.subr.bf16.mxu0 %v3157_v40  ;;  %v2381_v50 = vmul.bf16 %v8280_v16, %v11219_v23 }
 0x1e1   :  { %v2604_v25 = vadd.bf16 %v2348_v47, %v1932_v49  ;;  %v1934_v35 = vadd.bf16 %v1678_v14, %v1262_v48  ;;  %v527_v28 = vmul.bf16 %v8270_v5, %v11239_v26  ;;  %v1293_v39 = vadd.bf16 %v1037_v53, %v525_v22 }
 0x1e2   :  { %3872 = vmatpush1.bf16.msra.mxu1 %v3126_v24  ;;  %v3159_v10 = vmax.bf16 %v11025_v46, %v2903_v33  ;;  %v1039_v37 = vmul.bf16 %v8286_v0, %v11217_v45  ;;  %v1711_v18 = vmul.bf16 %v8289_v32, %v11218_v43  ;;  %v2383_v41 = vmul.bf16 %v8296_v51, %v11219_v23 }
 0x1e3   :  { %v2900_v60 = vadd.bf16 %v11215_v56, %v2604_v25  ;;  %v2606_v47 = vadd.bf16 %v2350_v42, %v1934_v35  ;;  %v524_v14 = vmul.bf16 %v8265_v7, %v11239_v26  ;;  %v1965_v40 = vadd.bf16 %v1709_v61, %v1293_v39 }
 0x1e4   :  { %3873 = vmatprep.subr.bf16.mxu1 %v3159_v10  ;;  %v1295_v49 = vadd.bf16 %v1039_v37, %v527_v28  ;;  %v1036_v48 = vmul.bf16 %v8311_v9, %v11217_v45  ;;  %v1708_v22 = vmul.bf16 %v8305_v30, %v11218_v43  ;;  %v2380_v42 = vmul.bf16 %v8316_v29, %v11219_v23 }
 0x1e5   :  { %v3156_v24 = vmax.bf16 %v11025_v46, %v2900_v60  ;;  %v2902_v33 = vadd.bf16 %v11215_v56, %v2606_v47  ;;  %v526_v53 = vmul.bf16 %v8321_v20, %v11239_v26  ;;  %v2637_v25 = vadd.bf16 %v2381_v50, %v1965_v40  ;;  %v11240_v60 = vld [vmem:[#allocation46_spill] sm:$0xff] }
 0x1e6   :  { %v1967_v35 = vadd.bf16 %v1711_v18, %v1295_v49  ;;  %v1292_v61 = vadd.bf16 %v1036_v48, %v524_v14  ;;  %v1038_v28 = vmul.bf16 %v8336_v4, %v11217_v45  ;;  %v1710_v39 = vmul.bf16 %v8324_v6, %v11218_v43 }
 0x1e7   :  { %3821 = vmatpush1.bf16.msra.mxu0 %v3156_v24  ;;  %v3158_v10 = vmax.bf16 %v11025_v46, %v2902_v33  ;;  %v2382_v37 = vmul.bf16 %v8341_v63, %v11219_v23  ;;  %v557_v47 = vmul.bf16 %v8259_v1, %v11240_v60  ;;  %v2933_v26 = vadd.bf16 %v11197_v17, %v2637_v25 }
 0x1e8   :  { %v2639_v50 = vadd.bf16 %v2383_v41, %v1967_v35  ;;  %v1964_v18 = vadd.bf16 %v1708_v22, %v1292_v61  ;;  %v1294_v14 = vadd.bf16 %v1038_v28, %v526_v53  ;;  %v1069_v40 = vmul.bf16 %v8275_v27, %v11199_v59 }
 0x1e9   :  { %3874 = vmatpush1.bf16.msra.mxu1 %v3158_v10  ;;  %v1741_v49 = vmul.bf16 %v8262_v44, %v11200_v55  ;;  %v2413_v48 = vmul.bf16 %v8280_v16, %v11221_v57  ;;  %v559_v24 = vmul.bf16 %v8270_v5, %v11240_v60  ;;  %v3189_v33 = vmax.bf16 %v11025_v46, %v2933_v26 }
 0x1ea   :  { %v2935_v25 = vadd.bf16 %v11197_v17, %v2639_v50  ;;  %v2636_v41 = vadd.bf16 %v2380_v42, %v1964_v18  ;;  %v1966_v22 = vadd.bf16 %v1710_v39, %v1294_v14  ;;  %v1325_v53 = vadd.bf16 %v1069_v40, %v557_v47 }
 0x1eb   :  { %v1071_v35 = vmul.bf16 %v8286_v0, %v11199_v59  ;;  %v1743_v61 = vmul.bf16 %v8289_v32, %v11200_v55  ;;  %v2415_v28 = vmul.bf16 %v8296_v51, %v11221_v57  ;;  %3822 = vmatprep.subr.bf16.mxu0 %v3189_v33  ;;  %v556_v42 = vmul.bf16 %v8265_v7, %v11240_v60 }
 0x1ec   :  { %v3191_v10 = vmax.bf16 %v11025_v46, %v2935_v25  ;;  %v2932_v23 = vadd.bf16 %v11197_v17, %v2636_v41  ;;  %v2638_v26 = vadd.bf16 %v2382_v37, %v1966_v22  ;;  %v1997_v39 = vadd.bf16 %v1741_v49, %v1325_v53 }
 0x1ed   :  { %v1327_v47 = vadd.bf16 %v1071_v35, %v559_v24  ;;  %v1068_v50 = vmul.bf16 %v8311_v9, %v11199_v59  ;;  %v1740_v18 = vmul.bf16 %v8305_v30, %v11200_v55  ;;  %v2412_v33 = vmul.bf16 %v8316_v29, %v11221_v57 }
 0x1ee   :  { %3875 = vmatprep.subr.bf16.mxu1 %v3191_v10  ;;  %v3188_v14 = vmax.bf16 %v11025_v46, %v2932_v23  ;;  %v2934_v40 = vadd.bf16 %v11197_v17, %v2638_v26  ;;  %v558_v37 = vmul.bf16 %v8321_v20, %v11240_v60  ;;  %v2669_v25 = vadd.bf16 %v2413_v48, %v1997_v39 }
 0x1ef   :  { %v1999_v49 = vadd.bf16 %v1743_v61, %v1327_v47  ;;  %v1324_v24 = vadd.bf16 %v1068_v50, %v556_v42  ;;  %v1070_v41 = vmul.bf16 %v8336_v4, %v11199_v59  ;;  %v1742_v23 = vmul.bf16 %v8324_v6, %v11200_v55 }
 0x1f0   :  { %3823 = vmatpush1.bf16.msra.mxu0 %v3188_v14  ;;  %v3190_v22 = vmax.bf16 %v11025_v46, %v2934_v40  ;;  %v2414_v53 = vmul.bf16 %v8341_v63, %v11221_v57  ;;  %v589_v35 = vmul.bf16 %v8259_v1, %v11125_v36  ;;  %v2965_v10 = vadd.bf16 %v11202_v52, %v2669_v25 }
 0x1f1   :  { %v2671_v48 = vadd.bf16 %v2415_v28, %v1999_v49  ;;  %v1996_v61 = vadd.bf16 %v1740_v18, %v1324_v24  ;;  %v1326_v26 = vadd.bf16 %v1070_v41, %v558_v37  ;;  %v1101_v42 = vmul.bf16 %v8275_v27, %v11132_v12 }
 0x1f2   :  { %3876 = vmatpush1.bf16.msra.mxu1 %v3190_v22  ;;  %v1773_v39 = vmul.bf16 %v8262_v44, %v11133_v62  ;;  %v2445_v47 = vmul.bf16 %v8280_v16, %v11136_v38  ;;  %v591_v50 = vmul.bf16 %v8270_v5, %v11125_v36  ;;  %v3221_v14 = vmax.bf16 %v11025_v46, %v2965_v10 }
 0x1f3   :  { %v2967_v40 = vadd.bf16 %v11202_v52, %v2671_v48  ;;  %v2668_v28 = vadd.bf16 %v2412_v33, %v1996_v61  ;;  %v1998_v18 = vadd.bf16 %v1742_v23, %v1326_v26  ;;  %v1357_v37 = vadd.bf16 %v1101_v42, %v589_v35 }
 0x1f4   :  { %v1103_v25 = vmul.bf16 %v8286_v0, %v11132_v12  ;;  %v1775_v49 = vmul.bf16 %v8289_v32, %v11133_v62  ;;  %v2447_v24 = vmul.bf16 %v8296_v51, %v11136_v38  ;;  %3824 = vmatprep.subr.bf16.mxu0 %v3221_v14  ;;  %v588_v33 = vmul.bf16 %v8265_v7, %v11125_v36 }
 0x1f5   :  { %v3223_v41 = vmax.bf16 %v11025_v46, %v2967_v40  ;;  %v2964_v22 = vadd.bf16 %v11202_v52, %v2668_v28  ;;  %v2670_v10 = vadd.bf16 %v2414_v53, %v1998_v18  ;;  %v2029_v23 = vadd.bf16 %v1773_v39, %v1357_v37 }
 0x1f6   :  { %v1359_v35 = vadd.bf16 %v1103_v25, %v591_v50  ;;  %v1100_v48 = vmul.bf16 %v8311_v9, %v11132_v12  ;;  %v1772_v61 = vmul.bf16 %v8305_v30, %v11133_v62  ;;  %v2444_v14 = vmul.bf16 %v8316_v29, %v11136_v38 }
 0x1f7   :  { %3877 = vmatprep.subr.bf16.mxu1 %v3223_v41  ;;  %v3220_v26 = vmax.bf16 %v11025_v46, %v2964_v22  ;;  %v2966_v42 = vadd.bf16 %v11202_v52, %v2670_v10  ;;  %v590_v53 = vmul.bf16 %v8321_v20, %v11125_v36  ;;  %v2701_v40 = vadd.bf16 %v2445_v47, %v2029_v23  ;;  %v11241_v41 = vld [vmem:[#allocation47_spill] sm:$0xff] }
 0x1f8   :  { %v2031_v39 = vadd.bf16 %v1775_v49, %v1359_v35  ;;  %v1356_v50 = vadd.bf16 %v1100_v48, %v588_v33  ;;  %v1102_v28 = vmul.bf16 %v8336_v4, %v11132_v12  ;;  %v1774_v37 = vmul.bf16 %v8324_v6, %v11133_v62 }
 0x1f9   :  { %3825 = vmatpush1.bf16.msra.mxu0 %v3220_v26  ;;  %v3222_v18 = vmax.bf16 %v11025_v46, %v2966_v42  ;;  %v2446_v25 = vmul.bf16 %v8341_v63, %v11136_v38  ;;  %v621_v22 = vmul.bf16 %v8259_v1, %v11241_v41  ;;  %v2997_v10 = vadd.bf16 %v11143_v31, %v2701_v40 }
 0x1fa   :  { %v2703_v47 = vadd.bf16 %v2447_v24, %v2031_v39  ;;  %v2028_v49 = vadd.bf16 %v1772_v61, %v1356_v50  ;;  %v1358_v33 = vadd.bf16 %v1102_v28, %v590_v53  ;;  %v1133_v23 = vmul.bf16 %v8275_v27, %v11152_v11 }
 0x1fb   :  { %3878 = vmatpush1.bf16.msra.mxu1 %v3222_v18  ;;  %v1805_v35 = vmul.bf16 %v8262_v44, %v11153_v54  ;;  %v2477_v48 = vmul.bf16 %v8280_v16, %v11222_v13  ;;  %v623_v26 = vmul.bf16 %v8270_v5, %v11241_v41  ;;  %v3253_v42 = vmax.bf16 %v11025_v46, %v2997_v10 }
 0x1fc   :  { %v2999_v40 = vadd.bf16 %v11143_v31, %v2703_v47  ;;  %v2700_v24 = vadd.bf16 %v2444_v14, %v2028_v49  ;;  %v2030_v61 = vadd.bf16 %v1774_v37, %v1358_v33  ;;  %v1389_v53 = vadd.bf16 %v1133_v23, %v621_v22 }
 0x1fd   :  { %v1135_v39 = vmul.bf16 %v8286_v0, %v11152_v11  ;;  %v1807_v50 = vmul.bf16 %v8289_v32, %v11153_v54  ;;  %v2479_v28 = vmul.bf16 %v8296_v51, %v11222_v13  ;;  %3826 = vmatprep.subr.bf16.mxu0 %v3253_v42  ;;  %v620_v14 = vmul.bf16 %v8265_v7, %v11241_v41 }
 0x1fe   :  { %v3255_v18 = vmax.bf16 %v11025_v46, %v2999_v40  ;;  %v2996_v38 = vadd.bf16 %v11143_v31, %v2700_v24  ;;  %v2702_v10 = vadd.bf16 %v2446_v25, %v2030_v61  ;;  %v2061_v37 = vadd.bf16 %v1805_v35, %v1389_v53 }
 0x1ff   :  { %v1391_v22 = vadd.bf16 %v1135_v39, %v623_v26  ;;  %v1132_v47 = vmul.bf16 %v8311_v9, %v11152_v11  ;;  %v1804_v49 = vmul.bf16 %v8305_v30, %v11153_v54  ;;  %v2476_v42 = vmul.bf16 %v8316_v29, %v11222_v13 }
 0x200   :  { %3879 = vmatprep.subr.bf16.mxu1 %v3255_v18  ;;  %v3252_v33 = vmax.bf16 %v11025_v46, %v2996_v38  ;;  %v2998_v23 = vadd.bf16 %v11143_v31, %v2702_v10  ;;  %v622_v25 = vmul.bf16 %v8321_v20, %v11241_v41  ;;  %v2733_v40 = vadd.bf16 %v2477_v48, %v2061_v37  ;;  %v11242_v18 = vld [vmem:[#allocation10_spill] sm:$0xff]  ;;  %v11243_v37 = vld [vmem:[#allocation63_spill] sm:$0xff] }
 0x201   :  { %v2063_v35 = vadd.bf16 %v1807_v50, %v1391_v22  ;;  %v1388_v26 = vadd.bf16 %v1132_v47, %v620_v14  ;;  %v1134_v24 = vmul.bf16 %v8336_v4, %v11152_v11  ;;  %v1806_v38 = vmul.bf16 %v8324_v6, %v11153_v54  ;;  %v11244_v47 = vld [vmem:[#allocation67_spill] sm:$0xff] }
 0x202   :  { %3827 = vmatpush1.bf16.msra.mxu0 %v3252_v33  ;;  %v3254_v61 = vmax.bf16 %v11025_v46, %v2998_v23  ;;  %v2478_v53 = vmul.bf16 %v8341_v63, %v11222_v13  ;;  %v653_v39 = vmul.bf16 %v8259_v1, %v11162_v58  ;;  %v3029_v10 = vadd.bf16 %v11242_v18, %v2733_v40  ;;  %v11245_v23 = vld [vmem:[#allocation53_spill] sm:$0xff] }
 0x203   :  { %v2735_v48 = vadd.bf16 %v2479_v28, %v2063_v35  ;;  %v2060_v50 = vadd.bf16 %v1804_v49, %v1388_v26  ;;  %v1390_v14 = vadd.bf16 %v1134_v24, %v622_v25  ;;  %v1165_v22 = vmul.bf16 %v8275_v27, %v11243_v37 }
 0x204   :  { %3880 = vmatpush1.bf16.msra.mxu1 %v3254_v61  ;;  %v1837_v33 = vmul.bf16 %v8262_v44, %v11244_v47  ;;  %v2509_v54 = vmul.bf16 %v8280_v16, %v11245_v23  ;;  %v655_v13 = vmul.bf16 %v8270_v5, %v11162_v58  ;;  %v3285_v11 = vmax.bf16 %v11025_v46, %v3029_v10 }
 0x205   :  { %v3031_v40 = vadd.bf16 %v11242_v18, %v2735_v48  ;;  %v2732_v28 = vadd.bf16 %v2476_v42, %v2060_v50  ;;  %v2062_v49 = vadd.bf16 %v1806_v38, %v1390_v14  ;;  %v1421_v25 = vadd.bf16 %v1165_v22, %v653_v39 }
 0x206   :  { %v1167_v35 = vmul.bf16 %v8286_v0, %v11243_v37  ;;  %v1839_v26 = vmul.bf16 %v8289_v32, %v11244_v47  ;;  %v2511_v24 = vmul.bf16 %v8296_v51, %v11245_v23  ;;  %3828 = vmatprep.subr.bf16.mxu0 %v3285_v11  ;;  %v652_v42 = vmul.bf16 %v8265_v7, %v11162_v58 }
 0x207   :  { %v3287_v61 = vmax.bf16 %v11025_v46, %v3031_v40  ;;  %v3028_v41 = vadd.bf16 %v11242_v18, %v2732_v28  ;;  %v2734_v10 = vadd.bf16 %v2478_v53, %v2062_v49  ;;  %v2093_v38 = vadd.bf16 %v1837_v33, %v1421_v25 }
 0x208   :  { %v1423_v39 = vadd.bf16 %v1167_v35, %v655_v13  ;;  %v1164_v48 = vmul.bf16 %v8311_v9, %v11243_v37  ;;  %v1836_v50 = vmul.bf16 %v8305_v30, %v11244_v47  ;;  %v2508_v22 = vmul.bf16 %v8316_v29, %v11245_v23  ;;  %v11246_v35 = vld [vmem:[#allocation25_spill] sm:$0xff] }
 0x209   :  { %3881 = vmatprep.subr.bf16.mxu1 %v3287_v61  ;;  %v3284_v14 = vmax.bf16 %v11025_v46, %v3028_v41  ;;  %v3030_v11 = vadd.bf16 %v11242_v18, %v2734_v10  ;;  %v654_v53 = vmul.bf16 %v8321_v20, %v11162_v58  ;;  %v2765_v40 = vadd.bf16 %v2509_v54, %v2093_v38  ;;  %v11247_v10 = vld [vmem:[#allocation22_spill] sm:$0xff]  ;;  %v11248_v38 = vld [vmem:[#allocation15_spill] sm:$0xff] }
 0x20a   :  { %v2095_v33 = vadd.bf16 %v1839_v26, %v1423_v39  ;;  %v1420_v13 = vadd.bf16 %v1164_v48, %v652_v42  ;;  %v1166_v28 = vmul.bf16 %v8336_v4, %v11243_v37  ;;  %v1838_v41 = vmul.bf16 %v8324_v6, %v11244_v47  ;;  %v11249_v48 = vld [vmem:[#allocation13_spill] sm:$0xff] }
 0x20b   :  { %3829 = vmatpush1.bf16.msra.mxu0 %v3284_v14  ;;  %v3286_v49 = vmax.bf16 %v11025_v46, %v3030_v11  ;;  %v2510_v25 = vmul.bf16 %v8341_v63, %v11245_v23  ;;  %v685_v61 = vmul.bf16 %v8259_v1, %v11246_v35  ;;  %v3061_v58 = vadd.bf16 %v11247_v10, %v2765_v40  ;;  %v11250_v11 = vld [vmem:[#allocation38_spill] sm:$0xff] }
 0x20c   :  { %v2767_v54 = vadd.bf16 %v2511_v24, %v2095_v33  ;;  %v2092_v26 = vadd.bf16 %v1836_v50, %v1420_v13  ;;  %v1422_v42 = vadd.bf16 %v1166_v28, %v654_v53  ;;  %v1197_v39 = vmul.bf16 %v8275_v27, %v11248_v38 }
 0x20d   :  { %3882 = vmatpush1.bf16.msra.mxu1 %v3286_v49  ;;  %v1869_v14 = vmul.bf16 %v8262_v44, %v11249_v48  ;;  %v2541_v47 = vmul.bf16 %v8280_v16, %v11250_v11  ;;  %v687_v23 = vmul.bf16 %v8270_v5, %v11246_v35  ;;  %v3317_v1 = vmax.bf16 %v11025_v46, %v3061_v58 }
 0x20e   :  { %v3063_v40 = vadd.bf16 %v11247_v10, %v2767_v54  ;;  %v2764_v24 = vadd.bf16 %v2508_v22, %v2092_v26  ;;  %v2094_v50 = vadd.bf16 %v1838_v41, %v1422_v42  ;;  %v1453_v53 = vadd.bf16 %v1197_v39, %v685_v61  ;;  %v47_v54 = vld [vmem:[%s10717_s0 + $0x58] sm:$0xff] }
 0x20f   :  { %v1199_v33 = vmul.bf16 %v8286_v0, %v11248_v38  ;;  %v1871_v27 = vmul.bf16 %v8289_v32, %v11249_v48  ;;  %v2543_v44 = vmul.bf16 %v8296_v51, %v11250_v11  ;;  %3830 = vmatprep.subr.bf16.mxu0 %v3317_v1  ;;  %v684_v22 = vmul.bf16 %v8265_v7, %v11246_v35  ;;  %v46_v51 = vld [vmem:[%s10717_s0 + $0x50] sm:$0xff] }
 0x210   :  { %v3319_v16 = vmax.bf16 %v11025_v46, %v3063_v40  ;;  %v3060_v5 = vadd.bf16 %v11247_v10, %v2764_v24  ;;  %v2766_v58 = vadd.bf16 %v2510_v25, %v2094_v50  ;;  %v2125_v13 = vadd.bf16 %v1869_v14, %v1453_v53 }
 0x211   :  { %v1455_v28 = vadd.bf16 %v1199_v33, %v687_v23  ;;  %v1196_v0 = vmul.bf16 %v8311_v9, %v11248_v38  ;;  %v1868_v32 = vmul.bf16 %v8305_v30, %v11249_v48  ;;  %v2540_v7 = vmul.bf16 %v8316_v29, %v11250_v11 }
 0x212   :  { %3883 = vmatprep.subr.bf16.mxu1 %v3319_v16  ;;  %v3316_v49 = vmax.bf16 %v11025_v46, %v3060_v5  ;;  %v3062_v41 = vadd.bf16 %v11247_v10, %v2766_v58  ;;  %v686_v23 = vmul.bf16 %v8321_v20, %v11246_v35  ;;  %v2797_v25 = vadd.bf16 %v2541_v47, %v2125_v13  ;;  %v11251_v47 = vld [vmem:[#allocation12_spill] sm:$0xff] }
 0x213   :  { %v2127_v9 = vadd.bf16 %v1871_v27, %v1455_v28  ;;  %v1452_v61 = vadd.bf16 %v1196_v0, %v684_v22  ;;  %v1198_v30 = vmul.bf16 %v8336_v4, %v11248_v38  ;;  %v1870_v42 = vmul.bf16 %v8324_v6, %v11249_v48 }
 0x214   :  { %3831 = vmatpush1.bf16.msra.mxu0 %v3316_v49  ;;  %v3318_v26 = vmax.bf16 %v11025_v46, %v3062_v41  ;;  %v2542_v29 = vmul.bf16 %v8341_v63, %v11250_v11  ;;  %v78_v20 = vcombine.high %v46_v51, %v46_v51  ;;  %v3093_v39 = vadd.bf16 %v11251_v47, %v2797_v25  ;;  %v11253_v41 = vld [vmem:[#allocation8_spill] sm:$0xff] }
 0x215   :  { %v2799_v14 = vadd.bf16 %v2543_v44, %v2127_v9  ;;  %v2124_v1 = vadd.bf16 %v1868_v32, %v1452_v61  ;;  %v1454_v40 = vadd.bf16 %v1198_v30, %v686_v23  ;;  %v120_v4 = vpack.c.bf16 %v46_v51, %v46_v51  ;;  %v11252_v32 = vld [vmem:[#allocation7_spill] sm:$0xff] }
 0x216   :  { %3884 = vmatpush1.bf16.msra.mxu1 %v3318_v26  ;;  %v121_v24 = vpack.c.bf16 %v78_v20, %v78_v20  ;;  %v79_v50 = vcombine.high %v47_v54, %v47_v54  ;;  %v122_v53 = vpack.c.bf16 %v47_v54, %v47_v54  ;;  %v3349_v33 = vmax.bf16 %v11025_v46, %v3093_v39  ;;  %v11254_v54 = vld [vmem:[#allocation40_spill] sm:$0xff] }
 0x217   :  { %v3095_v27 = vadd.bf16 %v11251_v47, %v2799_v14  ;;  %v2796_v16 = vadd.bf16 %v2540_v7, %v2124_v1  ;;  %v2126_v6 = vadd.bf16 %v1870_v42, %v1454_v40  ;;  %v361_v22 = vpack.i.b16 %v120_v4, %v120_v4 }
 0x218   :  { %v368_v5 = vpack.i.b16 %v121_v24, %v121_v24  ;;  %v879_v58 = vshrl.u32 %v121_v24, 16  ;;  %v123_v63 = vpack.c.bf16 %v79_v50, %v79_v50  ;;  %3832 = vmatprep.subr.bf16.mxu0 %v3349_v33  ;;  %v872_v0 = vshrl.u32 %v120_v4, 16  ;;  %v11256_v24 = vld [vmem:[#allocation21_spill] sm:$0xff] }
 0x219   :  { %v3351_v44 = vmax.bf16 %v11025_v46, %v3095_v27  ;;  %v3092_v13 = vadd.bf16 %v11251_v47, %v2796_v16  ;;  %v2798_v28 = vadd.bf16 %v2542_v29, %v2126_v6  ;;  %v8649_v30 = vrot.slane %v361_v22, %v11252_v32  ;;  %v11255_v29 = vld [vmem:[#allocation20_spill] sm:$0xff] }
 0x21a   :  { %v8641_v51 = vrot.slane %v368_v5, %v11252_v32  ;;  %v880_v49 = vpack.i.b16 %v879_v58, %v879_v58  ;;  %v8644_v23 = vrot.slane %v368_v5, %v11253_v41  ;;  %v382_v7 = vpack.i.b16 %v123_v63, %v123_v63 }
 0x21b   :  { %3885 = vmatprep.subr.bf16.mxu1 %v3351_v44  ;;  %v3348_v25 = vmax.bf16 %v11025_v46, %v3092_v13  ;;  %v3094_v9 = vadd.bf16 %v11251_v47, %v2798_v28  ;;  %v893_v61 = vshrl.u32 %v123_v63, 16  ;;  %v464_v27 = vmul.bf16 %v8649_v30, %v11254_v54  ;;  %v11257_v13 = vld [vmem:[#allocation24_spill] sm:$0xff] }
 0x21c   :  { %v465_v26 = vmul.bf16 %v8641_v51, %v11254_v54  ;;  %v8654_v42 = vrot.slane %v880_v49, %v11252_v32  ;;  %v1649_v20 = vmul.bf16 %v8644_v23, %v11255_v29  ;;  %v8659_v39 = vrot.slane %v880_v49, %v11253_v41 }
 0x21d   :  { %3833 = vmatpush1.bf16.msra.mxu0 %v3348_v25  ;;  %v3350_v14 = vmax.bf16 %v11025_v46, %v3094_v9  ;;  %v8663_v1 = vrot.slane %v382_v7, %v11252_v32  ;;  %v894_v40 = vpack.i.b16 %v893_v61, %v893_v61  ;;  %v8666_v4 = vrot.slane %v382_v7, %v11253_v41 }
 0x21e   :  { %v977_v50 = vmul.bf16 %v8654_v42, %v11256_v24  ;;  %v2321_v33 = vmul.bf16 %v8659_v39, %v11231_v21  ;;  %v873_v16 = vpack.i.b16 %v872_v0, %v872_v0  ;;  %v8689_v0 = vrot.slane %v361_v22, %v11253_v41 }
 0x21f   :  { %3886 = vmatpush1.bf16.msra.mxu1 %v3350_v14  ;;  %v467_v6 = vmul.bf16 %v8663_v1, %v11254_v54  ;;  %v8677_v5 = vrot.slane %v894_v40, %v11252_v32  ;;  %v1651_v58 = vmul.bf16 %v8666_v4, %v11255_v29  ;;  %v8682_v63 = vrot.slane %v894_v40, %v11253_v41 }
 0x220   :  { %v1233_v44 = vadd.bf16 %v977_v50, %v465_v26  ;;  %3851 = vmatmul.mubr.bf16.vlgmr.msra.gmra.mrb[32].mxu0 %v11257_v13  ;;  %v8686_v28 = vrot.slane %v873_v16, %v11252_v32  ;;  %v8692_v49 = vrot.slane %v873_v16, %v11253_v41  ;;  %v375_v9 = vpack.i.b16 %v122_v53, %v122_v53 }
 0x221   :  { %v979_v7 = vmul.bf16 %v8677_v5, %v11256_v24  ;;  %v2323_v25 = vmul.bf16 %v8682_v63, %v11231_v21  ;;  %v886_v61 = vshrl.u32 %v122_v53, 16  ;;  %3860 = vmatprep.mubr.bf16.mxu0 %v11025_v46  ;;  %v1648_v14 = vmul.bf16 %v8689_v0, %v11255_v29 }
 0x222   :  { %v1905_v26 = vadd.bf16 %v1649_v20, %v1233_v44  ;;  %3904 = vmatmul.mubr.bf16.vlgmr.msra.gmra.mrb[32].mxu1 %v11257_v13  ;;  %v976_v22 = vmul.bf16 %v8686_v28, %v11256_v24  ;;  %v2320_v40 = vmul.bf16 %v8692_v49, %v11231_v21  ;;  %v8707_v16 = vrot.slane %v375_v9, %v11252_v32 }
 0x223   :  { %v1235_v50 = vadd.bf16 %v979_v7, %v467_v6  ;;  %v887_v47 = vpack.i.b16 %v886_v61, %v886_v61  ;;  %v8710_v53 = vrot.slane %v375_v9, %v11253_v41  ;;  %3913 = vmatprep.mubr.bf16.mxu1 %v11025_v46  ;;  %v497_v13 = vmul.bf16 %v8641_v51, %v11233_v15 }
 0x224   :  { %v2577_v20 = vadd.bf16 %v2321_v33, %v1905_v26  ;;  %v1232_v44 = vadd.bf16 %v976_v22, %v464_v27  ;;  %v1009_v11 = vmul.bf16 %v8654_v42, %v11234_v34  ;;  %v466_v6 = vmul.bf16 %v8707_v16, %v11254_v54 }
 0x225   :  { %v1907_v48 = vadd.bf16 %v1651_v58, %v1235_v50  ;;  %v8720_v7 = vrot.slane %v887_v47, %v11252_v32  ;;  %v1650_v9 = vmul.bf16 %v8710_v53, %v11255_v29  ;;  %v8726_v27 = vrot.slane %v887_v47, %v11253_v41 }
 0x226   :  { %v2873_v61 = vadd.bf16 %v11235_v3, %v2577_v20  ;;  %v1904_v33 = vadd.bf16 %v1648_v14, %v1232_v44  ;;  %v1265_v26 = vadd.bf16 %v1009_v11, %v497_v13  ;;  %v1681_v50 = vmul.bf16 %v8644_v23, %v11236_v2 }
 0x227   :  { %v2579_v22 = vadd.bf16 %v2323_v25, %v1907_v48  ;;  %v978_v58 = vmul.bf16 %v8720_v7, %v11256_v24  ;;  %v2353_v54 = vmul.bf16 %v8659_v39, %v11237_v19  ;;  %v2322_v14 = vmul.bf16 %v8726_v27, %v11231_v21 }
 0x228   :  { %v3129_v32 = vmax.bf16 %v11025_v46, %v2873_v61  ;;  %v2576_v29 = vadd.bf16 %v2320_v40, %v1904_v33  ;;  %v499_v47 = vmul.bf16 %v8663_v1, %v11233_v15  ;;  %3861 = vmatmul.mubr.bf16.gmra.mrb[36].mxu0 %v11238_v8  ;;  %v1937_v13 = vadd.bf16 %v1681_v50, %v1265_v26 }
 0x229   :  { %v2875_v48 = vadd.bf16 %v11235_v3, %v2579_v22  ;;  %v1234_v11 = vadd.bf16 %v978_v58, %v466_v6  ;;  %v1011_v25 = vmul.bf16 %v8677_v5, %v11234_v34  ;;  %3956 = vmatprep.mubr.bf16.mxu0 %v11025_v46  ;;  %v1683_v20 = vmul.bf16 %v8666_v4, %v11236_v2 }
 0x22a   :  { %3924 = vmatprep.subr.bf16.mxu0 %v3129_v32  ;;  %v2872_v40 = vadd.bf16 %v11235_v3, %v2576_v29  ;;  %v2355_v44 = vmul.bf16 %v8682_v63, %v11237_v19  ;;  %v496_v61 = vmul.bf16 %v8649_v30, %v11233_v15  ;;  %v2609_v26 = vadd.bf16 %v2353_v54, %v1937_v13 }
 0x22b   :  { %v3131_v6 = vmax.bf16 %v11025_v46, %v2875_v48  ;;  %v1906_v33 = vadd.bf16 %v1650_v9, %v1234_v11  ;;  %v1267_v22 = vadd.bf16 %v1011_v25, %v499_v47  ;;  %3914 = vmatmul.mubr.bf16.gmra.mrb[36].mxu1 %v11238_v8  ;;  %v1008_v29 = vmul.bf16 %v8686_v28, %v11234_v34 }
 0x22c   :  { %v3128_v32 = vmax.bf16 %v11025_v46, %v2872_v40  ;;  %v1680_v58 = vmul.bf16 %v8689_v0, %v11236_v2  ;;  %v2352_v50 = vmul.bf16 %v8692_v49, %v11237_v19  ;;  %4009 = vmatprep.mubr.bf16.mxu1 %v11025_v46  ;;  %v2905_v54 = vadd.bf16 %v11215_v56, %v2609_v26 }
 0x22d   :  { %3977 = vmatprep.subr.bf16.mxu1 %v3131_v6  ;;  %v2578_v48 = vadd.bf16 %v2322_v14, %v1906_v33  ;;  %v1939_v9 = vadd.bf16 %v1683_v20, %v1267_v22  ;;  %v498_v47 = vmul.bf16 %v8707_v16, %v11233_v15  ;;  %v1264_v11 = vadd.bf16 %v1008_v29, %v496_v61  ;;  %v11258_v20 = vld [vmem:[#allocation36_spill] sm:$0xff] }
 0x22e   :  { %3925 = vmatpush1.bf16.msra.mxu0 %v3128_v32  ;;  %v1010_v13 = vmul.bf16 %v8720_v7, %v11234_v34  ;;  %v1682_v25 = vmul.bf16 %v8710_v53, %v11236_v2  ;;  %v2354_v40 = vmul.bf16 %v8726_v27, %v11237_v19  ;;  %v3161_v14 = vmax.bf16 %v11025_v46, %v2905_v54 }
 0x22f   :  { %v2874_v6 = vadd.bf16 %v11235_v3, %v2578_v48  ;;  %v2611_v33 = vadd.bf16 %v2355_v44, %v1939_v9  ;;  %v529_v26 = vmul.bf16 %v8641_v51, %v11258_v20  ;;  %v1936_v22 = vadd.bf16 %v1680_v58, %v1264_v11  ;;  %v11259_v48 = vld [vmem:[#allocation35_spill] sm:$0xff] }
 0x230   :  { %v1266_v32 = vadd.bf16 %v1010_v13, %v498_v47  ;;  %v1041_v61 = vmul.bf16 %v8654_v42, %v11217_v45  ;;  %v1713_v29 = vmul.bf16 %v8644_v23, %v11218_v43  ;;  %3926 = vmatprep.subr.bf16.mxu0 %v3161_v14  ;;  %v2385_v54 = vmul.bf16 %v8659_v39, %v11259_v48 }
 0x231   :  { %v3130_v8 = vmax.bf16 %v11025_v46, %v2874_v6  ;;  %v2907_v19 = vadd.bf16 %v11215_v56, %v2611_v33  ;;  %v531_v44 = vmul.bf16 %v8663_v1, %v11258_v20  ;;  %v2608_v9 = vadd.bf16 %v2352_v50, %v1936_v22 }
 0x232   :  { %v1938_v58 = vadd.bf16 %v1682_v25, %v1266_v32  ;;  %v1297_v47 = vadd.bf16 %v1041_v61, %v529_v26  ;;  %v1043_v11 = vmul.bf16 %v8677_v5, %v11217_v45  ;;  %v1715_v6 = vmul.bf16 %v8666_v4, %v11218_v43 }
 0x233   :  { %3978 = vmatpush1.bf16.msra.mxu1 %v3130_v8  ;;  %v3163_v13 = vmax.bf16 %v11025_v46, %v2907_v19  ;;  %v2387_v14 = vmul.bf16 %v8682_v63, %v11259_v48  ;;  %v528_v33 = vmul.bf16 %v8649_v30, %v11258_v20  ;;  %v2904_v2 = vadd.bf16 %v11215_v56, %v2608_v9 }
 0x234   :  { %v2610_v50 = vadd.bf16 %v2354_v40, %v1938_v58  ;;  %v1969_v25 = vadd.bf16 %v1713_v29, %v1297_v47  ;;  %v1299_v26 = vadd.bf16 %v1043_v11, %v531_v44  ;;  %v1040_v8 = vmul.bf16 %v8686_v28, %v11217_v45 }
 0x235   :  { %3979 = vmatprep.subr.bf16.mxu1 %v3163_v13  ;;  %v1712_v19 = vmul.bf16 %v8689_v0, %v11218_v43  ;;  %v2384_v22 = vmul.bf16 %v8692_v49, %v11259_v48  ;;  %v530_v32 = vmul.bf16 %v8707_v16, %v11258_v20  ;;  %v3160_v61 = vmax.bf16 %v11025_v46, %v2904_v2 }
 0x236   :  { %v2906_v9 = vadd.bf16 %v11215_v56, %v2610_v50  ;;  %v2641_v40 = vadd.bf16 %v2385_v54, %v1969_v25  ;;  %v1971_v29 = vadd.bf16 %v1715_v6, %v1299_v26  ;;  %v1296_v44 = vadd.bf16 %v1040_v8, %v528_v33 }
 0x237   :  { %v1042_v58 = vmul.bf16 %v8720_v7, %v11217_v45  ;;  %v1714_v47 = vmul.bf16 %v8710_v53, %v11218_v43  ;;  %v2386_v11 = vmul.bf16 %v8726_v27, %v11259_v48  ;;  %3927 = vmatpush1.bf16.msra.mxu0 %v3160_v61  ;;  %v561_v54 = vmul.bf16 %v8641_v51, %v11240_v60 }
 0x238   :  { %v3162_v13 = vmax.bf16 %v11025_v46, %v2906_v9  ;;  %v2937_v20 = vadd.bf16 %v11197_v17, %v2641_v40  ;;  %v2643_v2 = vadd.bf16 %v2387_v14, %v1971_v29  ;;  %v1968_v6 = vadd.bf16 %v1712_v19, %v1296_v44 }
 0x239   :  { %v1298_v33 = vadd.bf16 %v1042_v58, %v530_v32  ;;  %v1073_v50 = vmul.bf16 %v8654_v42, %v11199_v59  ;;  %v1745_v25 = vmul.bf16 %v8644_v23, %v11200_v55  ;;  %v2417_v61 = vmul.bf16 %v8659_v39, %v11221_v57 }
 0x23a   :  { %3980 = vmatpush1.bf16.msra.mxu1 %v3162_v13  ;;  %v3193_v26 = vmax.bf16 %v11025_v46, %v2937_v20  ;;  %v2939_v8 = vadd.bf16 %v11197_v17, %v2643_v2  ;;  %v563_v14 = vmul.bf16 %v8663_v1, %v11240_v60  ;;  %v2640_v9 = vadd.bf16 %v2384_v22, %v1968_v6 }
 0x23b   :  { %v1970_v19 = vadd.bf16 %v1714_v47, %v1298_v33  ;;  %v1329_v32 = vadd.bf16 %v1073_v50, %v561_v54  ;;  %v1075_v40 = vmul.bf16 %v8677_v5, %v11199_v59  ;;  %v1747_v20 = vmul.bf16 %v8666_v4, %v11200_v55 }
 0x23c   :  { %3928 = vmatprep.subr.bf16.mxu0 %v3193_v26  ;;  %v3195_v29 = vmax.bf16 %v11025_v46, %v2939_v8  ;;  %v2419_v44 = vmul.bf16 %v8682_v63, %v11221_v57  ;;  %v560_v58 = vmul.bf16 %v8649_v30, %v11240_v60  ;;  %v2936_v13 = vadd.bf16 %v11197_v17, %v2640_v9 }
 0x23d   :  { %v2642_v22 = vadd.bf16 %v2386_v11, %v1970_v19  ;;  %v2001_v47 = vadd.bf16 %v1745_v25, %v1329_v32  ;;  %v1331_v2 = vadd.bf16 %v1075_v40, %v563_v14  ;;  %v1072_v54 = vmul.bf16 %v8686_v28, %v11199_v59 }
 0x23e   :  { %3981 = vmatprep.subr.bf16.mxu1 %v3195_v29  ;;  %v1744_v6 = vmul.bf16 %v8689_v0, %v11200_v55  ;;  %v2416_v33 = vmul.bf16 %v8692_v49, %v11221_v57  ;;  %v562_v50 = vmul.bf16 %v8707_v16, %v11240_v60  ;;  %v3192_v26 = vmax.bf16 %v11025_v46, %v2936_v13 }
 0x23f   :  { %v2938_v8 = vadd.bf16 %v11197_v17, %v2642_v22  ;;  %v2673_v11 = vadd.bf16 %v2417_v61, %v2001_v47  ;;  %v2003_v25 = vadd.bf16 %v1747_v20, %v1331_v2  ;;  %v1328_v14 = vadd.bf16 %v1072_v54, %v560_v58 }
 0x240   :  { %v1074_v9 = vmul.bf16 %v8720_v7, %v11199_v59  ;;  %v1746_v19 = vmul.bf16 %v8710_v53, %v11200_v55  ;;  %v2418_v32 = vmul.bf16 %v8726_v27, %v11221_v57  ;;  %3929 = vmatpush1.bf16.msra.mxu0 %v3192_v26  ;;  %v593_v61 = vmul.bf16 %v8641_v51, %v11125_v36  ;;  %v11260_v26 = vld [vmem:[#allocation14_spill] sm:$0xff]  ;;  %v11261_v57 = vld [vmem:[#allocation47_spill] sm:$0xff] }
 0x241   :  { %v3194_v40 = vmax.bf16 %v11025_v46, %v2938_v8  ;;  %v2969_v29 = vadd.bf16 %v11202_v52, %v2673_v11  ;;  %v2675_v13 = vadd.bf16 %v2419_v44, %v2003_v25  ;;  %v2000_v20 = vadd.bf16 %v1744_v6, %v1328_v14 }
 0x242   :  { %v1330_v58 = vadd.bf16 %v1074_v9, %v562_v50  ;;  %v1105_v22 = vmul.bf16 %v8654_v42, %v11132_v12  ;;  %v1777_v47 = vmul.bf16 %v8644_v23, %v11133_v62  ;;  %v2449_v8 = vmul.bf16 %v8659_v39, %v11260_v26 }
 0x243   :  { %3982 = vmatpush1.bf16.msra.mxu1 %v3194_v40  ;;  %v3225_v2 = vmax.bf16 %v11025_v46, %v2969_v29  ;;  %v2971_v54 = vadd.bf16 %v11202_v52, %v2675_v13  ;;  %v595_v44 = vmul.bf16 %v8663_v1, %v11125_v36  ;;  %v2672_v11 = vadd.bf16 %v2416_v33, %v2000_v20 }
 0x244   :  { %v2002_v6 = vadd.bf16 %v1746_v19, %v1330_v58  ;;  %v1361_v50 = vadd.bf16 %v1105_v22, %v593_v61  ;;  %v1107_v25 = vmul.bf16 %v8677_v5, %v11132_v12  ;;  %v1779_v9 = vmul.bf16 %v8666_v4, %v11133_v62 }
 0x245   :  { %3930 = vmatprep.subr.bf16.mxu0 %v3225_v2  ;;  %v3227_v14 = vmax.bf16 %v11025_v46, %v2971_v54  ;;  %v2451_v40 = vmul.bf16 %v8682_v63, %v11260_v26  ;;  %v592_v29 = vmul.bf16 %v8649_v30, %v11125_v36  ;;  %v2968_v13 = vadd.bf16 %v11202_v52, %v2672_v11 }
 0x246   :  { %v2674_v33 = vadd.bf16 %v2418_v32, %v2002_v6  ;;  %v2033_v19 = vadd.bf16 %v1777_v47, %v1361_v50  ;;  %v1363_v61 = vadd.bf16 %v1107_v25, %v595_v44  ;;  %v1104_v20 = vmul.bf16 %v8686_v28, %v11132_v12 }
 0x247   :  { %3983 = vmatprep.subr.bf16.mxu1 %v3227_v14  ;;  %v1776_v58 = vmul.bf16 %v8689_v0, %v11133_v62  ;;  %v2448_v22 = vmul.bf16 %v8692_v49, %v11260_v26  ;;  %v594_v2 = vmul.bf16 %v8707_v16, %v11125_v36  ;;  %v3224_v54 = vmax.bf16 %v11025_v46, %v2968_v13 }
 0x248   :  { %v2970_v11 = vadd.bf16 %v11202_v52, %v2674_v33  ;;  %v2705_v32 = vadd.bf16 %v2449_v8, %v2033_v19  ;;  %v2035_v47 = vadd.bf16 %v1779_v9, %v1363_v61  ;;  %v1360_v44 = vadd.bf16 %v1104_v20, %v592_v29  ;;  %v11262_v33 = vld [vmem:[#allocation59_spill] sm:$0xff]  ;;  %v11263_v61 = vld [vmem:[#allocation17_spill] sm:$0xff] }
 0x249   :  { %v1106_v6 = vmul.bf16 %v8720_v7, %v11132_v12  ;;  %v1778_v50 = vmul.bf16 %v8710_v53, %v11133_v62  ;;  %v2450_v25 = vmul.bf16 %v8726_v27, %v11260_v26  ;;  %3931 = vmatpush1.bf16.msra.mxu0 %v3224_v54  ;;  %v625_v8 = vmul.bf16 %v8641_v51, %v11261_v57  ;;  %v11265_v12 = vld [vmem:[#allocation49_spill] sm:$0xff] }
 0x24a   :  { %v3226_v14 = vmax.bf16 %v11025_v46, %v2970_v11  ;;  %v3001_v36 = vadd.bf16 %v11143_v31, %v2705_v32  ;;  %v2707_v13 = vadd.bf16 %v2451_v40, %v2035_v47  ;;  %v2032_v9 = vadd.bf16 %v1776_v58, %v1360_v44  ;;  %v11264_v11 = vld [vmem:[#allocation65_spill] sm:$0xff] }
 0x24b   :  { %v1362_v29 = vadd.bf16 %v1106_v6, %v594_v2  ;;  %v1137_v19 = vmul.bf16 %v8654_v42, %v11262_v33  ;;  %v1809_v20 = vmul.bf16 %v8644_v23, %v11263_v61  ;;  %v2481_v32 = vmul.bf16 %v8659_v39, %v11264_v11 }
 0x24c   :  { %3984 = vmatpush1.bf16.msra.mxu1 %v3226_v14  ;;  %v3257_v26 = vmax.bf16 %v11025_v46, %v3001_v36  ;;  %v3003_v54 = vadd.bf16 %v11143_v31, %v2707_v13  ;;  %v627_v40 = vmul.bf16 %v8663_v1, %v11261_v57  ;;  %v2704_v47 = vadd.bf16 %v2448_v22, %v2032_v9 }
 0x24d   :  { %v2034_v58 = vadd.bf16 %v1778_v50, %v1362_v29  ;;  %v1393_v2 = vadd.bf16 %v1137_v19, %v625_v8  ;;  %v1139_v44 = vmul.bf16 %v8677_v5, %v11262_v33  ;;  %v1811_v36 = vmul.bf16 %v8666_v4, %v11263_v61 }
 0x24e   :  { %3932 = vmatprep.subr.bf16.mxu0 %v3257_v26  ;;  %v3259_v6 = vmax.bf16 %v11025_v46, %v3003_v54  ;;  %v2483_v14 = vmul.bf16 %v8682_v63, %v11264_v11  ;;  %v624_v13 = vmul.bf16 %v8649_v30, %v11261_v57  ;;  %v3000_v62 = vadd.bf16 %v11143_v31, %v2704_v47 }
 0x24f   :  { %v2706_v22 = vadd.bf16 %v2450_v25, %v2034_v58  ;;  %v2065_v50 = vadd.bf16 %v1809_v20, %v1393_v2  ;;  %v1395_v8 = vadd.bf16 %v1139_v44, %v627_v40  ;;  %v1136_v26 = vmul.bf16 %v8686_v28, %v11262_v33 }
 0x250   :  { %3985 = vmatprep.subr.bf16.mxu1 %v3259_v6  ;;  %v1808_v9 = vmul.bf16 %v8689_v0, %v11263_v61  ;;  %v2480_v29 = vmul.bf16 %v8692_v49, %v11264_v11  ;;  %v626_v19 = vmul.bf16 %v8707_v16, %v11261_v57  ;;  %v3256_v54 = vmax.bf16 %v11025_v46, %v3000_v62 }
 0x251   :  { %v3002_v47 = vadd.bf16 %v11143_v31, %v2706_v22  ;;  %v2737_v25 = vadd.bf16 %v2481_v32, %v2065_v50  ;;  %v2067_v20 = vadd.bf16 %v1811_v36, %v1395_v8  ;;  %v1392_v40 = vadd.bf16 %v1136_v26, %v624_v13  ;;  %v11266_v50 = vld [vmem:[#allocation67_spill] sm:$0xff] }
 0x252   :  { %v1138_v58 = vmul.bf16 %v8720_v7, %v11262_v33  ;;  %v1810_v2 = vmul.bf16 %v8710_v53, %v11263_v61  ;;  %v2482_v44 = vmul.bf16 %v8726_v27, %v11264_v11  ;;  %3933 = vmatpush1.bf16.msra.mxu0 %v3256_v54  ;;  %v657_v32 = vmul.bf16 %v8641_v51, %v11265_v12 }
 0x253   :  { %v3258_v6 = vmax.bf16 %v11025_v46, %v3002_v47  ;;  %v3033_v57 = vadd.bf16 %v11242_v18, %v2737_v25  ;;  %v2739_v62 = vadd.bf16 %v2483_v14, %v2067_v20  ;;  %v2064_v36 = vadd.bf16 %v1808_v9, %v1392_v40  ;;  %v11267_v47 = vld [vmem:[#allocation53_spill] sm:$0xff] }
 0x254   :  { %v1394_v13 = vadd.bf16 %v1138_v58, %v626_v19  ;;  %v1169_v22 = vmul.bf16 %v8654_v42, %v11243_v37  ;;  %v1841_v8 = vmul.bf16 %v8644_v23, %v11266_v50  ;;  %v2513_v25 = vmul.bf16 %v8659_v39, %v11267_v47 }
 0x255   :  { %3986 = vmatpush1.bf16.msra.mxu1 %v3258_v6  ;;  %v3289_v26 = vmax.bf16 %v11025_v46, %v3033_v57  ;;  %v3035_v54 = vadd.bf16 %v11242_v18, %v2739_v62  ;;  %v659_v14 = vmul.bf16 %v8663_v1, %v11265_v12  ;;  %v2736_v20 = vadd.bf16 %v2480_v29, %v2064_v36 }
 0x256   :  { %v2066_v9 = vadd.bf16 %v1810_v2, %v1394_v13  ;;  %v1425_v19 = vadd.bf16 %v1169_v22, %v657_v32  ;;  %v1171_v40 = vmul.bf16 %v8677_v5, %v11243_v37  ;;  %v1843_v57 = vmul.bf16 %v8666_v4, %v11266_v50 }
 0x257   :  { %3934 = vmatprep.subr.bf16.mxu0 %v3289_v26  ;;  %v3291_v58 = vmax.bf16 %v11025_v46, %v3035_v54  ;;  %v2515_v6 = vmul.bf16 %v8682_v63, %v11267_v47  ;;  %v656_v62 = vmul.bf16 %v8649_v30, %v11265_v12  ;;  %v3032_v11 = vadd.bf16 %v11242_v18, %v2736_v20 }
 0x258   :  { %v2738_v29 = vadd.bf16 %v2482_v44, %v2066_v9  ;;  %v2097_v2 = vadd.bf16 %v1841_v8, %v1425_v19  ;;  %v1427_v32 = vadd.bf16 %v1171_v40, %v659_v14  ;;  %v1168_v36 = vmul.bf16 %v8686_v28, %v11243_v37 }
 0x259   :  { %3987 = vmatprep.subr.bf16.mxu1 %v3291_v58  ;;  %v1840_v13 = vmul.bf16 %v8689_v0, %v11266_v50  ;;  %v2512_v22 = vmul.bf16 %v8692_v49, %v11267_v47  ;;  %v658_v26 = vmul.bf16 %v8707_v16, %v11265_v12  ;;  %v3288_v54 = vmax.bf16 %v11025_v46, %v3032_v11 }
 0x25a   :  { %v3034_v20 = vadd.bf16 %v11242_v18, %v2738_v29  ;;  %v2769_v44 = vadd.bf16 %v2513_v25, %v2097_v2  ;;  %v2099_v8 = vadd.bf16 %v1843_v57, %v1427_v32  ;;  %v1424_v14 = vadd.bf16 %v1168_v36, %v656_v62  ;;  %v11268_v2 = vld [vmem:[#allocation13_spill] sm:$0xff] }
 0x25b   :  { %v1170_v9 = vmul.bf16 %v8720_v7, %v11243_v37  ;;  %v1842_v19 = vmul.bf16 %v8710_v53, %v11266_v50  ;;  %v2514_v40 = vmul.bf16 %v8726_v27, %v11267_v47  ;;  %3935 = vmatpush1.bf16.msra.mxu0 %v3288_v54  ;;  %v689_v25 = vmul.bf16 %v8641_v51, %v11246_v35 }
 0x25c   :  { %v3290_v58 = vmax.bf16 %v11025_v46, %v3034_v20  ;;  %v3065_v12 = vadd.bf16 %v11247_v10, %v2769_v44  ;;  %v2771_v11 = vadd.bf16 %v2515_v6, %v2099_v8  ;;  %v2096_v57 = vadd.bf16 %v1840_v13, %v1424_v14  ;;  %v11269_v20 = vld [vmem:[#allocation38_spill] sm:$0xff] }
 0x25d   :  { %v1426_v62 = vadd.bf16 %v1170_v9, %v658_v26  ;;  %v1201_v29 = vmul.bf16 %v8654_v42, %v11248_v38  ;;  %v1873_v32 = vmul.bf16 %v8644_v23, %v11268_v2  ;;  %v2545_v44 = vmul.bf16 %v8659_v39, %v11269_v20 }
 0x25e   :  { %3988 = vmatpush1.bf16.msra.mxu1 %v3290_v58  ;;  %v3321_v36 = vmax.bf16 %v11025_v46, %v3065_v12  ;;  %v3067_v54 = vadd.bf16 %v11247_v10, %v2771_v11  ;;  %v691_v6 = vmul.bf16 %v8663_v1, %v11246_v35  ;;  %v2768_v51 = vadd.bf16 %v2512_v22, %v2096_v57 }
 0x25f   :  { %v2098_v13 = vadd.bf16 %v1842_v19, %v1426_v62  ;;  %v1457_v26 = vadd.bf16 %v1201_v29, %v689_v25  ;;  %v1203_v42 = vmul.bf16 %v8677_v5, %v11248_v38  ;;  %v1875_v12 = vmul.bf16 %v8666_v4, %v11268_v2  ;;  %v11270_v29 = vld [vmem:[#allocation12_spill] sm:$0xff] }
 0x260   :  { %3936 = vmatprep.subr.bf16.mxu0 %v3321_v36  ;;  %v3323_v23 = vmax.bf16 %v11025_v46, %v3067_v54  ;;  %v2547_v8 = vmul.bf16 %v8682_v63, %v11269_v20  ;;  %v688_v39 = vmul.bf16 %v8649_v30, %v11246_v35  ;;  %v3064_v1 = vadd.bf16 %v11247_v10, %v2768_v51  ;;  %v48_v30 = vld [vmem:[%s10717_s0 + $0x60] sm:$0xff] }
 0x261   :  { %v2770_v22 = vadd.bf16 %v2514_v40, %v2098_v13  ;;  %v2129_v14 = vadd.bf16 %v1873_v32, %v1457_v26  ;;  %v1459_v9 = vadd.bf16 %v1203_v42, %v691_v6  ;;  %v1200_v5 = vmul.bf16 %v8686_v28, %v11248_v38  ;;  %v49_v28 = vld [vmem:[%s10717_s0 + $0x68] sm:$0xff] }
 0x262   :  { %3989 = vmatprep.subr.bf16.mxu1 %v3323_v23  ;;  %v1872_v19 = vmul.bf16 %v8689_v0, %v11268_v2  ;;  %v2544_v4 = vmul.bf16 %v8692_v49, %v11269_v20  ;;  %v690_v63 = vmul.bf16 %v8707_v16, %v11246_v35  ;;  %v3320_v40 = vmax.bf16 %v11025_v46, %v3064_v1 }
 0x263   :  { %v3066_v58 = vadd.bf16 %v11247_v10, %v2770_v22  ;;  %v2801_v11 = vadd.bf16 %v2545_v44, %v2129_v14  ;;  %v2131_v25 = vadd.bf16 %v1875_v12, %v1459_v9  ;;  %v1456_v0 = vadd.bf16 %v1200_v5, %v688_v39 }
 0x264   :  { %v1202_v49 = vmul.bf16 %v8720_v7, %v11248_v38  ;;  %v1874_v16 = vmul.bf16 %v8710_v53, %v11268_v2  ;;  %v2546_v57 = vmul.bf16 %v8726_v27, %v11269_v20  ;;  %3937 = vmatpush1.bf16.msra.mxu0 %v3320_v40  ;;  %v80_v54 = vcombine.high %v48_v30, %v48_v30 }
 0x265   :  { %v3322_v62 = vmax.bf16 %v11025_v46, %v3066_v58  ;;  %v3097_v32 = vadd.bf16 %v11270_v29, %v2801_v11  ;;  %v2803_v36 = vadd.bf16 %v2547_v8, %v2131_v25  ;;  %v2128_v44 = vadd.bf16 %v1872_v19, %v1456_v0 }
 0x266   :  { %v1458_v6 = vadd.bf16 %v1202_v49, %v690_v63  ;;  %v124_v51 = vpack.c.bf16 %v48_v30, %v48_v30  ;;  %v81_v13 = vcombine.high %v49_v28, %v49_v28  ;;  %v125_v53 = vpack.c.bf16 %v80_v54, %v80_v54  ;;  %v11271_v30 = vld [vmem:[#allocation7_spill] sm:$0xff] }
 0x267   :  { %3990 = vmatpush1.bf16.msra.mxu1 %v3322_v62  ;;  %v3353_v7 = vmax.bf16 %v11025_v46, %v3097_v32  ;;  %v3099_v26 = vadd.bf16 %v11270_v29, %v2803_v36  ;;  %v126_v42 = vpack.c.bf16 %v49_v28, %v49_v28  ;;  %v2800_v23 = vadd.bf16 %v2544_v4, %v2128_v44  ;;  %v11273_v32 = vld [vmem:[#allocation20_spill] sm:$0xff] }
 0x268   :  { %v2130_v27 = vadd.bf16 %v1874_v16, %v1458_v6  ;;  %v127_v12 = vpack.c.bf16 %v81_v13, %v81_v13  ;;  %v389_v39 = vpack.i.b16 %v124_v51, %v124_v51  ;;  %v396_v8 = vpack.i.b16 %v125_v53, %v125_v53  ;;  %v11272_v16 = vld [vmem:[#allocation40_spill] sm:$0xff] }
 0x269   :  { %3938 = vmatprep.subr.bf16.mxu0 %v3353_v7  ;;  %v3355_v1 = vmax.bf16 %v11025_v46, %v3099_v26  ;;  %v907_v22 = vshrl.u32 %v125_v53, 16  ;;  %v900_v14 = vshrl.u32 %v124_v51, 16  ;;  %v3096_v9 = vadd.bf16 %v11270_v29, %v2800_v23 }
 0x26a   :  { %v2802_v5 = vadd.bf16 %v2546_v57, %v2130_v27  ;;  %v410_v19 = vpack.i.b16 %v127_v12, %v127_v12  ;;  %v921_v63 = vshrl.u32 %v127_v12, 16  ;;  %v9023_v40 = vrot.slane %v396_v8, %v11271_v30 }
 0x26b   :  { %3991 = vmatprep.subr.bf16.mxu1 %v3355_v1  ;;  %v908_v58 = vpack.i.b16 %v907_v22, %v907_v22  ;;  %v9026_v4 = vrot.slane %v396_v8, %v11253_v41  ;;  %v9029_v11 = vrot.slane %v389_v39, %v11271_v30  ;;  %v3352_v25 = vmax.bf16 %v11025_v46, %v3096_v9 }
 0x26c   :  { %v3098_v28 = vadd.bf16 %v11270_v29, %v2802_v5  ;;  %v9034_v0 = vrot.slane %v410_v19, %v11271_v30  ;;  %v922_v49 = vpack.i.b16 %v921_v63, %v921_v63  ;;  %v469_v57 = vmul.bf16 %v9023_v40, %v11272_v16  ;;  %v11274_v5 = vld [vmem:[#allocation24_spill] sm:$0xff] }
 0x26d   :  { %v9039_v62 = vrot.slane %v908_v58, %v11271_v30  ;;  %v1653_v36 = vmul.bf16 %v9026_v4, %v11273_v32  ;;  %v9044_v54 = vrot.slane %v908_v58, %v11253_v41  ;;  %3939 = vmatpush1.bf16.msra.mxu0 %v3352_v25  ;;  %v9053_v13 = vrot.slane %v410_v19, %v11253_v41 }
 0x26e   :  { %v3354_v44 = vmax.bf16 %v11025_v46, %v3098_v28  ;;  %v471_v6 = vmul.bf16 %v9034_v0, %v11272_v16  ;;  %v9050_v51 = vrot.slane %v922_v49, %v11271_v30  ;;  %v9060_v53 = vrot.slane %v922_v49, %v11253_v41 }
 0x26f   :  { %v981_v7 = vmul.bf16 %v9039_v62, %v11256_v24  ;;  %v2325_v26 = vmul.bf16 %v9044_v54, %v11231_v21  ;;  %v468_v23 = vmul.bf16 %v9029_v11, %v11272_v16  ;;  %v1655_v12 = vmul.bf16 %v9053_v13, %v11273_v32 }
 0x270   :  { %3992 = vmatpush1.bf16.msra.mxu1 %v3354_v44  ;;  %v983_v27 = vmul.bf16 %v9050_v51, %v11256_v24  ;;  %v901_v1 = vpack.i.b16 %v900_v14, %v900_v14  ;;  %v9069_v8 = vrot.slane %v389_v39, %v11253_v41  ;;  %v2327_v9 = vmul.bf16 %v9060_v53, %v11231_v21 }
 0x271   :  { %v1237_v22 = vadd.bf16 %v981_v7, %v469_v57  ;;  %3957 = vmatmul.mubr.bf16.vlgmr.msra.gmra.mrb[40].mxu0 %v11274_v5  ;;  %v403_v19 = vpack.i.b16 %v126_v42, %v126_v42  ;;  %v914_v63 = vshrl.u32 %v126_v42, 16 }
 0x272   :  { %v1239_v58 = vadd.bf16 %v983_v27, %v471_v6  ;;  %v9075_v25 = vrot.slane %v901_v1, %v11271_v30  ;;  %v1652_v28 = vmul.bf16 %v9069_v8, %v11273_v32  ;;  %v9080_v14 = vrot.slane %v901_v1, %v11253_v41  ;;  %3966 = vmatprep.mubr.bf16.mxu0 %v11025_v46 }
 0x273   :  { %v1909_v39 = vadd.bf16 %v1653_v36, %v1237_v22  ;;  %4010 = vmatmul.mubr.bf16.vlgmr.msra.gmra.mrb[40].mxu1 %v11274_v5  ;;  %v9085_v49 = vrot.slane %v403_v19, %v11271_v30  ;;  %v915_v57 = vpack.i.b16 %v914_v63, %v914_v63  ;;  %v9088_v42 = vrot.slane %v403_v19, %v11253_v41 }
 0x274   :  { %v1911_v44 = vadd.bf16 %v1655_v12, %v1239_v58  ;;  %v980_v6 = vmul.bf16 %v9075_v25, %v11256_v24  ;;  %v2324_v7 = vmul.bf16 %v9080_v14, %v11231_v21  ;;  %v501_v27 = vmul.bf16 %v9023_v40, %v11233_v15  ;;  %4019 = vmatprep.mubr.bf16.mxu1 %v11025_v46 }
 0x275   :  { %v2581_v36 = vadd.bf16 %v2325_v26, %v1909_v39  ;;  %v470_v1 = vmul.bf16 %v9085_v49, %v11272_v16  ;;  %v9100_v22 = vrot.slane %v915_v57, %v11271_v30  ;;  %v1654_v12 = vmul.bf16 %v9088_v42, %v11273_v32  ;;  %v11275_v39 = vld [vmem:[#allocation34_spill] sm:$0xff]  ;;  %v11276_v30 = vld [vmem:[#allocation41_spill] sm:$0xff] }
 0x276   :  { %v2583_v19 = vadd.bf16 %v2327_v9, %v1911_v44  ;;  %v1236_v63 = vadd.bf16 %v980_v6, %v468_v23  ;;  %v9105_v58 = vrot.slane %v915_v57, %v11253_v41  ;;  %v1013_v5 = vmul.bf16 %v9039_v62, %v11234_v34  ;;  %v11277_v41 = vld [vmem:[#allocation31_spill] sm:$0xff] }
 0x277   :  { %v2877_v29 = vadd.bf16 %v11235_v3, %v2581_v36  ;;  %v982_v26 = vmul.bf16 %v9100_v22, %v11256_v24  ;;  %v1685_v16 = vmul.bf16 %v9026_v4, %v11275_v39  ;;  %v2357_v20 = vmul.bf16 %v9044_v54, %v11276_v30 }
 0x278   :  { %v2879_v9 = vadd.bf16 %v11235_v3, %v2583_v19  ;;  %v1908_v23 = vadd.bf16 %v1652_v28, %v1236_v63  ;;  %v2326_v57 = vmul.bf16 %v9105_v58, %v11231_v21  ;;  %v1269_v44 = vadd.bf16 %v1013_v5, %v501_v27  ;;  %v9129_v5 = vpop.f32.mrb[0].mxu0 }
 0x279   :  { %v3133_v6 = vmax.bf16 %v11025_v46, %v2877_v29  ;;  %v1238_v32 = vadd.bf16 %v982_v26, %v470_v1  ;;  %v503_v36 = vmul.bf16 %v9034_v0, %v11233_v15  ;;  %v1015_v24 = vmul.bf16 %v9050_v51, %v11234_v34  ;;  %3967 = vmatmul.mubr.bf16.gmra.mrb[44].mxu0 %v11277_v41  ;;  %v9131_v29 = vpop.f32.mrb[0].mxu1 }
 0x27a   :  { %v3135_v2 = vmax.bf16 %v11025_v46, %v2879_v9  ;;  %v2580_v38 = vadd.bf16 %v2324_v7, %v1908_v23  ;;  %v1941_v19 = vadd.bf16 %v1685_v16, %v1269_v44  ;;  %v1687_v28 = vmul.bf16 %v9053_v13, %v11275_v39  ;;  %4062 = vmatprep.mubr.bf16.mxu0 %v11025_v46  ;;  %v9137_v7 = vpop.f32.mrb[1].mxu0  ;;  %v9139_v16 = vpop.f32.mrb[1].mxu1 }
 0x27b   :  { %11278 = vst [vmem:[#allocation50_spill] sm:$0xff] %v9129_v5  ;;  %11279 = vst [vmem:[#allocation11_spill] sm:$0xff] %v9131_v29  ;;  %4030 = vmatprep.subr.bf16.mxu0 %v3133_v6  ;;  %v1910_v27 = vadd.bf16 %v1654_v12, %v1238_v32  ;;  %v1271_v1 = vadd.bf16 %v1015_v24, %v503_v36  ;;  %v2359_v63 = vmul.bf16 %v9060_v53, %v11276_v30  ;;  %v9146_v32 = vpop.f32.mrb[2].mxu0  ;;  %v9148_v12 = vpop.f32.mrb[2].mxu1 }
 0x27c   :  { %v500_v26 = vmul.bf16 %v9029_v11, %v11233_v15  ;;  %11280 = vst [vmem:[#allocation54_spill] sm:$0xff] %v9137_v7  ;;  %11281 = vst [vmem:[#allocation55_spill] sm:$0xff] %v9139_v16  ;;  %4083 = vmatprep.subr.bf16.mxu1 %v3135_v2  ;;  %v2876_v9 = vadd.bf16 %v11235_v3, %v2580_v38  ;;  %v2613_v23 = vadd.bf16 %v2357_v20, %v1941_v19 }
 0x27d   :  { %v1012_v44 = vmul.bf16 %v9075_v25, %v11234_v34  ;;  %v1684_v24 = vmul.bf16 %v9069_v8, %v11275_v39  ;;  %11282 = vst [vmem:[#allocation39_spill] sm:$0xff] %v9146_v32  ;;  %11283 = vst [vmem:[#allocation56_spill] sm:$0xff] %v9148_v12  ;;  %v2582_v6 = vadd.bf16 %v2326_v57, %v1910_v27  ;;  %4020 = vmatmul.mubr.bf16.gmra.mrb[44].mxu1 %v11277_v41 }
 0x27e   :  { %v1943_v36 = vadd.bf16 %v1687_v28, %v1271_v1  ;;  %v2356_v7 = vmul.bf16 %v9080_v14, %v11276_v30  ;;  %v502_v2 = vmul.bf16 %v9085_v49, %v11233_v15  ;;  %v3132_v38 = vmax.bf16 %v11025_v46, %v2876_v9  ;;  %4115 = vmatprep.mubr.bf16.mxu1 %v11025_v46 }
 0x27f   :  { %v2909_v20 = vadd.bf16 %v11215_v56, %v2613_v23  ;;  %v1268_v19 = vadd.bf16 %v1012_v44, %v500_v26  ;;  %v1014_v32 = vmul.bf16 %v9100_v22, %v11234_v34  ;;  %v2878_v57 = vadd.bf16 %v11235_v3, %v2582_v6  ;;  %v11284_v26 = vld [vmem:[#allocation36_spill] sm:$0xff] }
 0x280   :  { %v2615_v28 = vadd.bf16 %v2359_v63, %v1943_v36  ;;  %v1686_v27 = vmul.bf16 %v9088_v42, %v11275_v39  ;;  %v2358_v1 = vmul.bf16 %v9105_v58, %v11276_v30  ;;  %4031 = vmatpush1.bf16.msra.mxu0 %v3132_v38  ;;  %v533_v44 = vmul.bf16 %v9023_v40, %v11284_v26 }
 0x281   :  { %v3165_v9 = vmax.bf16 %v11025_v46, %v2909_v20  ;;  %v1940_v12 = vadd.bf16 %v1684_v24, %v1268_v19  ;;  %v1270_v23 = vadd.bf16 %v1014_v32, %v502_v2  ;;  %v3134_v16 = vmax.bf16 %v11025_v46, %v2878_v57 }
 0x282   :  { %v2911_v29 = vadd.bf16 %v11215_v56, %v2615_v28  ;;  %v1045_v63 = vmul.bf16 %v9039_v62, %v11217_v45  ;;  %v1717_v6 = vmul.bf16 %v9026_v4, %v11218_v43  ;;  %v2389_v24 = vmul.bf16 %v9044_v54, %v11259_v48  ;;  %v9183_v28 = vpop.f32.mrb[3].mxu0 }
 0x283   :  { %4032 = vmatprep.subr.bf16.mxu0 %v3165_v9  ;;  %v2612_v36 = vadd.bf16 %v2356_v7, %v1940_v12  ;;  %v1942_v38 = vadd.bf16 %v1686_v27, %v1270_v23  ;;  %v535_v32 = vmul.bf16 %v9034_v0, %v11284_v26  ;;  %4084 = vmatpush1.bf16.msra.mxu1 %v3134_v16  ;;  %v9185_v7 = vpop.f32.mrb[3].mxu1 }
 0x284   :  { %v3167_v2 = vmax.bf16 %v11025_v46, %v2911_v29  ;;  %v1301_v20 = vadd.bf16 %v1045_v63, %v533_v44  ;;  %v1047_v19 = vmul.bf16 %v9050_v51, %v11217_v45  ;;  %v1719_v57 = vmul.bf16 %v9053_v13, %v11218_v43  ;;  %11285 = vst [vmem:[#allocation57_spill] sm:$0xff] %v9183_v28 }
 0x285   :  { %11286 = vst [vmem:[#allocation42_spill] sm:$0xff] %v9185_v7  ;;  %v2908_v12 = vadd.bf16 %v11215_v56, %v2612_v36  ;;  %v2614_v27 = vadd.bf16 %v2358_v1, %v1942_v38  ;;  %v2391_v9 = vmul.bf16 %v9060_v53, %v11259_v48  ;;  %v532_v29 = vmul.bf16 %v9029_v11, %v11284_v26 }
 0x286   :  { %4085 = vmatprep.subr.bf16.mxu1 %v3167_v2  ;;  %v1973_v16 = vadd.bf16 %v1717_v6, %v1301_v20  ;;  %v1303_v23 = vadd.bf16 %v1047_v19, %v535_v32  ;;  %v1044_v44 = vmul.bf16 %v9075_v25, %v11217_v45  ;;  %v1716_v63 = vmul.bf16 %v9069_v8, %v11218_v43 }
 0x287   :  { %v3164_v7 = vmax.bf16 %v11025_v46, %v2908_v12  ;;  %v2910_v36 = vadd.bf16 %v11215_v56, %v2614_v27  ;;  %v2388_v1 = vmul.bf16 %v9080_v14, %v11259_v48  ;;  %v534_v38 = vmul.bf16 %v9085_v49, %v11284_v26 }
 0x288   :  { %v2645_v28 = vadd.bf16 %v2389_v24, %v1973_v16  ;;  %v1975_v2 = vadd.bf16 %v1719_v57, %v1303_v23  ;;  %v1300_v6 = vadd.bf16 %v1044_v44, %v532_v29  ;;  %v1046_v32 = vmul.bf16 %v9100_v22, %v11217_v45  ;;  %v11287_v23 = vld [vmem:[#allocation37_spill] sm:$0xff] }
 0x289   :  { %4033 = vmatpush1.bf16.msra.mxu0 %v3164_v7  ;;  %v3166_v20 = vmax.bf16 %v11025_v46, %v2910_v36  ;;  %v1718_v19 = vmul.bf16 %v9088_v42, %v11218_v43  ;;  %v2390_v12 = vmul.bf16 %v9105_v58, %v11259_v48  ;;  %v565_v27 = vmul.bf16 %v9023_v40, %v11240_v60 }
 0x28a   :  { %v2941_v5 = vadd.bf16 %v11197_v17, %v2645_v28  ;;  %v2647_v24 = vadd.bf16 %v2391_v9, %v1975_v2  ;;  %v1972_v57 = vadd.bf16 %v1716_v63, %v1300_v6  ;;  %v1302_v29 = vadd.bf16 %v1046_v32, %v534_v38 }
 0x28b   :  { %4086 = vmatpush1.bf16.msra.mxu1 %v3166_v20  ;;  %v1077_v7 = vmul.bf16 %v9039_v62, %v11199_v59  ;;  %v1749_v16 = vmul.bf16 %v9026_v4, %v11200_v55  ;;  %v2421_v44 = vmul.bf16 %v9044_v54, %v11287_v23  ;;  %v567_v36 = vmul.bf16 %v9034_v0, %v11240_v60 }
 0x28c   :  { %v3197_v48 = vmax.bf16 %v11025_v46, %v2941_v5  ;;  %v2943_v28 = vadd.bf16 %v11197_v17, %v2647_v24  ;;  %v2644_v9 = vadd.bf16 %v2388_v1, %v1972_v57  ;;  %v1974_v63 = vadd.bf16 %v1718_v19, %v1302_v29 }
 0x28d   :  { %v1333_v38 = vadd.bf16 %v1077_v7, %v565_v27  ;;  %v1079_v2 = vmul.bf16 %v9050_v51, %v11199_v59  ;;  %v1751_v6 = vmul.bf16 %v9053_v13, %v11200_v55  ;;  %v2423_v32 = vmul.bf16 %v9060_v53, %v11287_v23 }
 0x28e   :  { %4034 = vmatprep.subr.bf16.mxu0 %v3197_v48  ;;  %v3199_v20 = vmax.bf16 %v11025_v46, %v2943_v28  ;;  %v2940_v43 = vadd.bf16 %v11197_v17, %v2644_v9  ;;  %v2646_v5 = vadd.bf16 %v2390_v12, %v1974_v63  ;;  %v564_v1 = vmul.bf16 %v9029_v11, %v11240_v60 }
 0x28f   :  { %v2005_v19 = vadd.bf16 %v1749_v16, %v1333_v38  ;;  %v1335_v27 = vadd.bf16 %v1079_v2, %v567_v36  ;;  %v1076_v24 = vmul.bf16 %v9075_v25, %v11199_v59  ;;  %v1748_v57 = vmul.bf16 %v9069_v8, %v11200_v55  ;;  %v11288_v2 = vld [vmem:[#allocation43_spill] sm:$0xff] }
 0x290   :  { %4087 = vmatprep.subr.bf16.mxu1 %v3199_v20  ;;  %v3196_v29 = vmax.bf16 %v11025_v46, %v2940_v43  ;;  %v2942_v48 = vadd.bf16 %v11197_v17, %v2646_v5  ;;  %v2420_v7 = vmul.bf16 %v9080_v14, %v11287_v23  ;;  %v566_v12 = vmul.bf16 %v9085_v49, %v11240_v60  ;;  %v9251_v5 = vpop.f32.mrb[4].mxu0  ;;  %v11295_v60 = vld [vmem:[#allocation14_spill] sm:$0xff] }
 0x291   :  { %v2677_v28 = vadd.bf16 %v2421_v44, %v2005_v19  ;;  %v2007_v16 = vadd.bf16 %v1751_v6, %v1335_v27  ;;  %v1332_v36 = vadd.bf16 %v1076_v24, %v564_v1  ;;  %v1078_v9 = vmul.bf16 %v9100_v22, %v11199_v59  ;;  %11289 = vst [vmem:[#allocation60_spill] sm:$0xff] %v9251_v5  ;;  %v9253_v44 = vpop.f32.mrb[4].mxu1  ;;  %v9256_v24 = vpop.f32.mrb[5].mxu0 }
 0x292   :  { %4035 = vmatpush1.bf16.msra.mxu0 %v3196_v29  ;;  %v3198_v63 = vmax.bf16 %v11025_v46, %v2942_v48  ;;  %v1750_v43 = vmul.bf16 %v9088_v42, %v11200_v55  ;;  %v2422_v38 = vmul.bf16 %v9105_v58, %v11287_v23  ;;  %v597_v20 = vmul.bf16 %v9023_v40, %v11288_v2  ;;  %v9258_v29 = vpop.f32.mrb[5].mxu1  ;;  %v11293_v48 = vld [vmem:[#allocation52_spill] sm:$0xff]  ;;  %v11294_v55 = vld [vmem:[#allocation58_spill] sm:$0xff] }
 0x293   :  { %11290 = vst [vmem:[#allocation62_spill] sm:$0xff] %v9253_v44  ;;  %v2973_v6 = vadd.bf16 %v11202_v52, %v2677_v28  ;;  %v2679_v1 = vadd.bf16 %v2423_v32, %v2007_v16  ;;  %v2004_v19 = vadd.bf16 %v1748_v57, %v1332_v36  ;;  %v1334_v27 = vadd.bf16 %v1078_v9, %v566_v12  ;;  %v9268_v32 = vpop.f32.mrb[6].mxu0  ;;  %v9270_v57 = vpop.f32.mrb[6].mxu1 }
 0x294   :  { %11291 = vst [vmem:[#allocation18_spill] sm:$0xff] %v9256_v24  ;;  %11292 = vst [vmem:[#allocation64_spill] sm:$0xff] %v9258_v29  ;;  %4088 = vmatpush1.bf16.msra.mxu1 %v3198_v63  ;;  %v1109_v23 = vmul.bf16 %v9039_v62, %v11293_v48  ;;  %v1781_v59 = vmul.bf16 %v9026_v4, %v11294_v55  ;;  %v2453_v5 = vmul.bf16 %v9044_v54, %v11295_v60 }
 0x295   :  { %v599_v28 = vmul.bf16 %v9034_v0, %v11288_v2  ;;  %11296 = vst [vmem:[#allocation66_spill] sm:$0xff] %v9268_v32  ;;  %11297 = vst [vmem:[#allocation68_spill] sm:$0xff] %v9270_v57  ;;  %v3229_v12 = vmax.bf16 %v11025_v46, %v2973_v6  ;;  %v2975_v16 = vadd.bf16 %v11202_v52, %v2679_v1 }
 0x296   :  { %v2676_v36 = vadd.bf16 %v2420_v7, %v2004_v19  ;;  %v2006_v9 = vadd.bf16 %v1750_v43, %v1334_v27  ;;  %v1365_v63 = vadd.bf16 %v1109_v23, %v597_v20  ;;  %v1111_v29 = vmul.bf16 %v9050_v51, %v11293_v48 }
 0x297   :  { %v1783_v24 = vmul.bf16 %v9053_v13, %v11294_v55  ;;  %v2455_v44 = vmul.bf16 %v9060_v53, %v11295_v60  ;;  %4036 = vmatprep.subr.bf16.mxu0 %v3229_v12  ;;  %v3231_v32 = vmax.bf16 %v11025_v46, %v2975_v16  ;;  %v596_v7 = vmul.bf16 %v9029_v11, %v11288_v2 }
 0x298   :  { %v2972_v57 = vadd.bf16 %v11202_v52, %v2676_v36  ;;  %v2678_v6 = vadd.bf16 %v2422_v38, %v2006_v9  ;;  %v2037_v43 = vadd.bf16 %v1781_v59, %v1365_v63  ;;  %v1367_v23 = vadd.bf16 %v1111_v29, %v599_v28  ;;  %v11298_v9 = vld [vmem:[#allocation47_spill] sm:$0xff] }
 0x299   :  { %v1108_v20 = vmul.bf16 %v9075_v25, %v11293_v48  ;;  %v1780_v1 = vmul.bf16 %v9069_v8, %v11294_v55  ;;  %4089 = vmatprep.subr.bf16.mxu1 %v3231_v32  ;;  %v2452_v12 = vmul.bf16 %v9080_v14, %v11295_v60  ;;  %v598_v38 = vmul.bf16 %v9085_v49, %v11288_v2 }
 0x29a   :  { %v3228_v19 = vmax.bf16 %v11025_v46, %v2972_v57  ;;  %v2974_v27 = vadd.bf16 %v11202_v52, %v2678_v6  ;;  %v2709_v16 = vadd.bf16 %v2453_v5, %v2037_v43  ;;  %v2039_v59 = vadd.bf16 %v1783_v24, %v1367_v23  ;;  %v9303_v6 = vpop.f32.mrb[7].mxu0  ;;  %v9305_v5 = vpop.f32.mrb[7].mxu1 }
 0x29b   :  { %v1364_v29 = vadd.bf16 %v1108_v20, %v596_v7  ;;  %v1110_v28 = vmul.bf16 %v9100_v22, %v11293_v48  ;;  %v1782_v32 = vmul.bf16 %v9088_v42, %v11294_v55  ;;  %v2454_v57 = vmul.bf16 %v9105_v58, %v11295_v60  ;;  %11299 = vst [vmem:[#allocation69_spill] sm:$0xff] %v9303_v6 }
 0x29c   :  { %4037 = vmatpush1.bf16.msra.mxu0 %v3228_v19  ;;  %v3230_v36 = vmax.bf16 %v11025_v46, %v2974_v27  ;;  %v629_v63 = vmul.bf16 %v9023_v40, %v11298_v9  ;;  %11300 = vst [vmem:[#allocation16_spill] sm:$0xff] %v9305_v5  ;;  %v3005_v24 = vadd.bf16 %v11143_v31, %v2709_v16  ;;  %v11301_v27 = vld [vmem:[#allocation65_spill] sm:$0xff] }
 0x29d   :  { %v2711_v7 = vadd.bf16 %v2455_v44, %v2039_v59  ;;  %v2036_v43 = vadd.bf16 %v1780_v1, %v1364_v29  ;;  %v1366_v23 = vadd.bf16 %v1110_v28, %v598_v38  ;;  %v1141_v20 = vmul.bf16 %v9039_v62, %v11262_v33 }
 0x29e   :  { %4090 = vmatpush1.bf16.msra.mxu1 %v3230_v36  ;;  %v1813_v19 = vmul.bf16 %v9026_v4, %v11263_v61  ;;  %v2485_v60 = vmul.bf16 %v9044_v54, %v11301_v27  ;;  %v631_v6 = vmul.bf16 %v9034_v0, %v11298_v9  ;;  %v3261_v5 = vmax.bf16 %v11025_v46, %v3005_v24 }
 0x29f   :  { %v3007_v16 = vadd.bf16 %v11143_v31, %v2711_v7  ;;  %v2708_v44 = vadd.bf16 %v2452_v12, %v2036_v43  ;;  %v2038_v1 = vadd.bf16 %v1782_v32, %v1366_v23  ;;  %v1397_v38 = vadd.bf16 %v1141_v20, %v629_v63 }
 0x2a0   :  { %v1143_v59 = vmul.bf16 %v9050_v51, %v11262_v33  ;;  %v1815_v29 = vmul.bf16 %v9053_v13, %v11263_v61  ;;  %v2487_v28 = vmul.bf16 %v9060_v53, %v11301_v27  ;;  %4038 = vmatprep.subr.bf16.mxu0 %v3261_v5  ;;  %v628_v12 = vmul.bf16 %v9029_v11, %v11298_v9 }
 0x2a1   :  { %v3263_v36 = vmax.bf16 %v11025_v46, %v3007_v16  ;;  %v3004_v55 = vadd.bf16 %v11143_v31, %v2708_v44  ;;  %v2710_v24 = vadd.bf16 %v2454_v57, %v2038_v1  ;;  %v2069_v32 = vadd.bf16 %v1813_v19, %v1397_v38 }
 0x2a2   :  { %v1399_v63 = vadd.bf16 %v1143_v59, %v631_v6  ;;  %v1140_v7 = vmul.bf16 %v9075_v25, %v11262_v33  ;;  %v1812_v43 = vmul.bf16 %v9069_v8, %v11263_v61  ;;  %v2484_v20 = vmul.bf16 %v9080_v14, %v11301_v27  ;;  %v11302_v59 = vld [vmem:[#allocation49_spill] sm:$0xff] }
 0x2a3   :  { %4091 = vmatprep.subr.bf16.mxu1 %v3263_v36  ;;  %v3260_v23 = vmax.bf16 %v11025_v46, %v3004_v55  ;;  %v3006_v5 = vadd.bf16 %v11143_v31, %v2710_v24  ;;  %v630_v57 = vmul.bf16 %v9085_v49, %v11298_v9  ;;  %v2741_v16 = vadd.bf16 %v2485_v60, %v2069_v32 }
 0x2a4   :  { %v2071_v19 = vadd.bf16 %v1815_v29, %v1399_v63  ;;  %v1396_v6 = vadd.bf16 %v1140_v7, %v628_v12  ;;  %v1142_v44 = vmul.bf16 %v9100_v22, %v11262_v33  ;;  %v1814_v55 = vmul.bf16 %v9088_v42, %v11263_v61 }
 0x2a5   :  { %4039 = vmatpush1.bf16.msra.mxu0 %v3260_v23  ;;  %v3262_v1 = vmax.bf16 %v11025_v46, %v3006_v5  ;;  %v2486_v38 = vmul.bf16 %v9105_v58, %v11301_v27  ;;  %v661_v36 = vmul.bf16 %v9023_v40, %v11302_v59  ;;  %v3037_v24 = vadd.bf16 %v11242_v18, %v2741_v16 }
 0x2a6   :  { %v2743_v60 = vadd.bf16 %v2487_v28, %v2071_v19  ;;  %v2068_v29 = vadd.bf16 %v1812_v43, %v1396_v6  ;;  %v1398_v12 = vadd.bf16 %v1142_v44, %v630_v57  ;;  %v1173_v32 = vmul.bf16 %v9039_v62, %v11243_v37 }
 0x2a7   :  { %4092 = vmatpush1.bf16.msra.mxu1 %v3262_v1  ;;  %v1845_v63 = vmul.bf16 %v9026_v4, %v11266_v50  ;;  %v2517_v7 = vmul.bf16 %v9044_v54, %v11267_v47  ;;  %v663_v23 = vmul.bf16 %v9034_v0, %v11302_v59  ;;  %v3293_v5 = vmax.bf16 %v11025_v46, %v3037_v24 }
 0x2a8   :  { %v3039_v16 = vadd.bf16 %v11242_v18, %v2743_v60  ;;  %v2740_v28 = vadd.bf16 %v2484_v20, %v2068_v29  ;;  %v2070_v43 = vadd.bf16 %v1814_v55, %v1398_v12  ;;  %v1429_v57 = vadd.bf16 %v1173_v32, %v661_v36 }
 0x2a9   :  { %v1175_v19 = vmul.bf16 %v9050_v51, %v11243_v37  ;;  %v1847_v6 = vmul.bf16 %v9053_v13, %v11266_v50  ;;  %v2519_v44 = vmul.bf16 %v9060_v53, %v11267_v47  ;;  %4040 = vmatprep.subr.bf16.mxu0 %v3293_v5  ;;  %v660_v20 = vmul.bf16 %v9029_v11, %v11302_v59 }
 0x2aa   :  { %v3295_v1 = vmax.bf16 %v11025_v46, %v3039_v16  ;;  %v3036_v27 = vadd.bf16 %v11242_v18, %v2740_v28  ;;  %v2742_v24 = vadd.bf16 %v2486_v38, %v2070_v43  ;;  %v2101_v55 = vadd.bf16 %v1845_v63, %v1429_v57 }
 0x2ab   :  { %v1431_v36 = vadd.bf16 %v1175_v19, %v663_v23  ;;  %v1172_v60 = vmul.bf16 %v9075_v25, %v11243_v37  ;;  %v1844_v29 = vmul.bf16 %v9069_v8, %v11266_v50  ;;  %v2516_v5 = vmul.bf16 %v9080_v14, %v11267_v47 }
 0x2ac   :  { %4093 = vmatprep.subr.bf16.mxu1 %v3295_v1  ;;  %v3292_v12 = vmax.bf16 %v11025_v46, %v3036_v27  ;;  %v3038_v32 = vadd.bf16 %v11242_v18, %v2742_v24  ;;  %v662_v38 = vmul.bf16 %v9085_v49, %v11302_v59  ;;  %v2773_v16 = vadd.bf16 %v2517_v7, %v2101_v55  ;;  %v9390_v55 = vpop.f32.mrb[8].mxu1 }
 0x2ad   :  { %v2103_v63 = vadd.bf16 %v1847_v6, %v1431_v36  ;;  %v1428_v23 = vadd.bf16 %v1172_v60, %v660_v20  ;;  %v1174_v28 = vmul.bf16 %v9100_v22, %v11243_v37  ;;  %v1846_v27 = vmul.bf16 %v9088_v42, %v11266_v50  ;;  %v9388_v20 = vpop.f32.mrb[8].mxu0  ;;  %11304 = vst [vmem:[#allocation27_spill] sm:$0xff] %v9390_v55  ;;  %v11305_v36 = vld [vmem:[#allocation15_spill] sm:$0xff] }
 0x2ae   :  { %4041 = vmatpush1.bf16.msra.mxu0 %v3292_v12  ;;  %v3294_v43 = vmax.bf16 %v11025_v46, %v3038_v32  ;;  %v2518_v57 = vmul.bf16 %v9105_v58, %v11267_v47  ;;  %v693_v19 = vmul.bf16 %v9023_v40, %v11246_v35  ;;  %v3069_v1 = vadd.bf16 %v11247_v10, %v2773_v16  ;;  %v11306_v12 = vld [vmem:[#allocation13_spill] sm:$0xff]  ;;  %v11307_v47 = vld [vmem:[#allocation38_spill] sm:$0xff] }
 0x2af   :  { %v2775_v7 = vadd.bf16 %v2519_v44, %v2103_v63  ;;  %v2100_v6 = vadd.bf16 %v1844_v29, %v1428_v23  ;;  %v1430_v24 = vadd.bf16 %v1174_v28, %v662_v38  ;;  %11303 = vst [vmem:[#allocation9_spill] sm:$0xff] %v9388_v20  ;;  %v1205_v60 = vmul.bf16 %v9039_v62, %v11305_v36  ;;  %v9400_v44 = vpop.f32.mrb[9].mxu0  ;;  %v9402_v29 = vpop.f32.mrb[9].mxu1 }
 0x2b0   :  { %4094 = vmatpush1.bf16.msra.mxu1 %v3294_v43  ;;  %v1877_v32 = vmul.bf16 %v9026_v4, %v11306_v12  ;;  %v2549_v50 = vmul.bf16 %v9044_v54, %v11307_v47  ;;  %v695_v40 = vmul.bf16 %v9034_v0, %v11246_v35  ;;  %11308 = vst [vmem:[#allocation26_spill] sm:$0xff] %v9400_v44  ;;  %11309 = vst [vmem:[#allocation19_spill] sm:$0xff] %v9402_v29  ;;  %v9406_v62 = vpop.f32.mrb[10].mxu0  ;;  %v9408_v28 = vpop.f32.mrb[10].mxu1 }
 0x2b1   :  { %v3325_v38 = vmax.bf16 %v11025_v46, %v3069_v1  ;;  %v3071_v16 = vadd.bf16 %v11247_v10, %v2775_v7  ;;  %v2772_v63 = vadd.bf16 %v2516_v5, %v2100_v6  ;;  %v2102_v23 = vadd.bf16 %v1846_v27, %v1430_v24  ;;  %11310 = vst [vmem:[#allocation45_spill] sm:$0xff] %v9406_v62  ;;  %v9416_v29 = vpop.f32.mrb[11].mxu0  ;;  %v9418_v1 = vpop.f32.mrb[11].mxu1 }
 0x2b2   :  { %11311 = vst [vmem:[#allocation61_spill] sm:$0xff] %v9408_v28  ;;  %v1461_v4 = vadd.bf16 %v1205_v60, %v693_v19  ;;  %v1207_v54 = vmul.bf16 %v9050_v51, %v11305_v36  ;;  %v1879_v0 = vmul.bf16 %v9053_v13, %v11306_v12  ;;  %v2551_v43 = vmul.bf16 %v9060_v53, %v11307_v47  ;;  %v9424_v51 = vpop.f32.mrb[12].mxu0  ;;  %v9426_v6 = vpop.f32.mrb[12].mxu1 }
 0x2b3   :  { %11312 = vst [vmem:[#allocation51_spill] sm:$0xff] %v9416_v29  ;;  %11313 = vst [vmem:[#allocation28_spill] sm:$0xff] %v9418_v1  ;;  %4042 = vmatprep.subr.bf16.mxu0 %v3325_v38  ;;  %v3327_v5 = vmax.bf16 %v11025_v46, %v3071_v16  ;;  %v3068_v27 = vadd.bf16 %v11247_v10, %v2772_v63  ;;  %v2774_v7 = vadd.bf16 %v2518_v57, %v2102_v23  ;;  %v50_v38 = vld [vmem:[%s10717_s0 + $0x70] sm:$0xff]  ;;  %v9435_v57 = vpop.f32.mrb[13].mxu0  ;;  %v9437_v16 = vpop.f32.mrb[13].mxu1 }
 0x2b4   :  { %v692_v19 = vmul.bf16 %v9029_v11, %v11246_v35  ;;  %11314 = vst [vmem:[#allocation33_spill] sm:$0xff] %v9424_v51  ;;  %11315 = vst [vmem:[#allocation29_spill] sm:$0xff] %v9426_v6  ;;  %v2133_v13 = vadd.bf16 %v1877_v32, %v1461_v4  ;;  %v1463_v24 = vadd.bf16 %v1207_v54, %v695_v40  ;;  %v9447_v63 = vpop.f32.mrb[14].mxu1  ;;  %v11352_v29 = vld [vmem:[#allocation24_spill] sm:$0xff] }
 0x2b5   :  { %v1204_v53 = vmul.bf16 %v9075_v25, %v11305_v36  ;;  %v1876_v60 = vmul.bf16 %v9069_v8, %v11306_v12  ;;  %11316 = vst [vmem:[#allocation32_spill] sm:$0xff] %v9435_v57  ;;  %11317 = vst [vmem:[#allocation44_spill] sm:$0xff] %v9437_v16  ;;  %4095 = vmatprep.subr.bf16.mxu1 %v3327_v5  ;;  %v3324_v11 = vmax.bf16 %v11025_v46, %v3068_v27  ;;  %v9445_v8 = vpop.f32.mrb[14].mxu0  ;;  %v51_v27 = vld [vmem:[%s10717_s0 + $0x78] sm:$0xff] }
 0x2b6   :  { %v3070_v32 = vadd.bf16 %v11247_v10, %v2774_v7  ;;  %v2548_v40 = vmul.bf16 %v9080_v14, %v11307_v47  ;;  %v694_v25 = vmul.bf16 %v9085_v49, %v11246_v35  ;;  %11318 = vst [vmem:[#allocation10_spill] sm:$0xff] %v9445_v8  ;;  %11319 = vst [vmem:[#allocation63_spill] sm:$0xff] %v9447_v63  ;;  %v9454_v7 = vpop.f32.mrb[15].mxu0  ;;  %v9456_v14 = vpop.f32.mrb[15].mxu1 }
 0x2b7   :  { %v2805_v23 = vadd.bf16 %v2549_v50, %v2133_v13  ;;  %v2135_v4 = vadd.bf16 %v1879_v0, %v1463_v24  ;;  %v1460_v54 = vadd.bf16 %v1204_v53, %v692_v19  ;;  %v1206_v5 = vmul.bf16 %v9100_v22, %v11305_v36  ;;  %11320 = vst [vmem:[#allocation25_spill] sm:$0xff] %v9454_v7  ;;  %v9463_v19 = vpop.f32.mrb[16].mxu0  ;;  %v9465_v22 = vpop.f32.mrb[16].mxu1  ;;  %v11324_v13 = vld [vmem:[#allocation12_spill] sm:$0xff] }
 0x2b8   :  { %11321 = vst [vmem:[#allocation22_spill] sm:$0xff] %v9456_v14  ;;  %4043 = vmatpush1.bf16.msra.mxu0 %v3324_v11  ;;  %v3326_v49 = vmax.bf16 %v11025_v46, %v3070_v32  ;;  %v1878_v63 = vmul.bf16 %v9088_v42, %v11306_v12  ;;  %v2550_v50 = vmul.bf16 %v9105_v58, %v11307_v47  ;;  %11322 = vst [vmem:[#allocation59_spill] sm:$0xff] %v9463_v19  ;;  %v9468_v14 = vpop.f32.mrb[17].mxu0  ;;  %v9470_v11 = vpop.f32.mrb[17].mxu1 }
 0x2b9   :  { %v82_v0 = vcombine.high %v50_v38, %v50_v38  ;;  %11323 = vst [vmem:[#allocation17_spill] sm:$0xff] %v9465_v22  ;;  %v3101_v24 = vadd.bf16 %v11324_v13, %v2805_v23  ;;  %v2807_v53 = vadd.bf16 %v2551_v43, %v2135_v4  ;;  %v2132_v7 = vadd.bf16 %v1876_v60, %v1460_v54  ;;  %v9474_v58 = vpop.f32.mrb[18].mxu0  ;;  %v9476_v19 = vpop.f32.mrb[18].mxu1 }
 0x2ba   :  { %v1462_v8 = vadd.bf16 %v1206_v5, %v694_v25  ;;  %11325 = vst [vmem:[#allocation34_spill] sm:$0xff] %v9468_v14  ;;  %11326 = vst [vmem:[#allocation41_spill] sm:$0xff] %v9470_v11  ;;  %4096 = vmatpush1.bf16.msra.mxu1 %v3326_v49  ;;  %v128_v32 = vpack.c.bf16 %v50_v38, %v50_v38  ;;  %v83_v16 = vcombine.high %v51_v27, %v51_v27  ;;  %v9480_v23 = vpop.f32.mrb[19].mxu0  ;;  %v9482_v4 = vpop.f32.mrb[19].mxu1 }
 0x2bb   :  { %v129_v42 = vpack.c.bf16 %v82_v0, %v82_v0  ;;  %v9472_v57 = vpack.c.bf16 %v51_v27, %v51_v27  ;;  %11327 = vst [vmem:[#allocation31_spill] sm:$0xff] %v9474_v58  ;;  %11328 = vst [vmem:[#allocation36_spill] sm:$0xff] %v9476_v19  ;;  %v3357_v22 = vmax.bf16 %v11025_v46, %v3101_v24  ;;  %v9484_v27 = vpop.f32.mrb[20].mxu0  ;;  %v9486_v0 = vpop.f32.mrb[20].mxu1 }
 0x2bc   :  { %v3103_v43 = vadd.bf16 %v11324_v13, %v2807_v53  ;;  %v2804_v60 = vadd.bf16 %v2548_v40, %v2132_v7  ;;  %v2134_v25 = vadd.bf16 %v1878_v63, %v1462_v8  ;;  %11329 = vst [vmem:[#allocation43_spill] sm:$0xff] %v9480_v23  ;;  %11330 = vst [vmem:[#allocation52_spill] sm:$0xff] %v9482_v4  ;;  %v928_v40 = vshrl.u32 %v128_v32, 16  ;;  %v9490_v8 = vpop.f32.mrb[21].mxu0  ;;  %v9492_v63 = vpop.f32.mrb[21].mxu1  ;;  %v11335_v7 = vld [vmem:[#allocation7_spill] sm:$0xff] }
 0x2bd   :  { %v424_v54 = vpack.i.b16 %v129_v42, %v129_v42  ;;  %v935_v38 = vshrl.u32 %v129_v42, 16  ;;  %v131_v5 = vpack.c.bf16 %v83_v16, %v83_v16  ;;  %v417_v49 = vpack.i.b16 %v128_v32, %v128_v32  ;;  %11331 = vst [vmem:[#allocation47_spill] sm:$0xff] %v9484_v27  ;;  %11332 = vst [vmem:[#allocation49_spill] sm:$0xff] %v9486_v0  ;;  %v11336_v42 = vld [vmem:[#allocation8_spill] sm:$0xff]  ;;  %v9500_v0 = vpop.f32.mrb[22].mxu0 }
 0x2be   :  { %4044 = vmatprep.subr.bf16.mxu0 %v3357_v22  ;;  %v3359_v19 = vmax.bf16 %v11025_v46, %v3103_v43  ;;  %v3100_v24 = vadd.bf16 %v11324_v13, %v2804_v60  ;;  %v2806_v53 = vadd.bf16 %v2550_v50, %v2134_v25  ;;  %11333 = vst [vmem:[#allocation15_spill] sm:$0xff] %v9490_v8  ;;  %11334 = vst [vmem:[#allocation70_spill] sm:$0xff] %v9492_v63  ;;  %v9502_v22 = vpop.f32.mrb[22].mxu1  ;;  %v9509_v25 = vpop.f32.mrb[23].mxu0 }
 0x2bf   :  { %v9495_v4 = vrot.slane %v424_v54, %v11335_v7  ;;  %v936_v16 = vpack.i.b16 %v935_v38, %v935_v38  ;;  %v9498_v23 = vrot.slane %v424_v54, %v11336_v42  ;;  %v438_v27 = vpack.i.b16 %v131_v5, %v131_v5  ;;  %11337 = vst [vmem:[#allocation8_spill] sm:$0xff] %v9500_v0  ;;  %v9511_v38 = vpop.f32.mrb[23].mxu1  ;;  %v11341_v54 = vld [vmem:[#allocation40_spill] sm:$0xff] }
 0x2c0   :  { %11338 = vst [vmem:[#allocation71_spill] sm:$0xff] %v9502_v22  ;;  %4097 = vmatprep.subr.bf16.mxu1 %v3359_v19  ;;  %v3356_v50 = vmax.bf16 %v11025_v46, %v3100_v24  ;;  %v3102_v32 = vadd.bf16 %v11324_v13, %v2806_v53  ;;  %v949_v43 = vshrl.u32 %v131_v5, 16  ;;  %v9507_v60 = vrot.slane %v417_v49, %v11335_v7  ;;  %v11342_v22 = vld [vmem:[#allocation20_spill] sm:$0xff]  ;;  %v9523_v5 = vpop.f32.mrb[24].mxu0  ;;  %v9525_v53 = vpop.f32.mrb[24].mxu1 }
 0x2c1   :  { %11339 = vst [vmem:[#allocation72_spill] sm:$0xff] %v9509_v25  ;;  %11340 = vst [vmem:[#allocation73_spill] sm:$0xff] %v9511_v38  ;;  %v473_v63 = vmul.bf16 %v9495_v4, %v11341_v54  ;;  %v9516_v0 = vrot.slane %v936_v16, %v11335_v7  ;;  %v1657_v19 = vmul.bf16 %v9498_v23, %v11342_v22  ;;  %v9534_v11 = vpop.f32.mrb[25].mxu0  ;;  %v9536_v14 = vpop.f32.mrb[25].mxu1 }
 0x2c2   :  { %v9521_v24 = vrot.slane %v936_v16, %v11336_v42  ;;  %11343 = vst [vmem:[#allocation40_spill] sm:$0xff] %v9523_v5  ;;  %11344 = vst [vmem:[#allocation20_spill] sm:$0xff] %v9525_v53  ;;  %4045 = vmatpush1.bf16.msra.mxu0 %v3356_v50  ;;  %v3358_v25 = vmax.bf16 %v11025_v46, %v3102_v32  ;;  %v9529_v38 = vrot.slane %v438_v27, %v11335_v7  ;;  %v11347_v16 = vld [vmem:[#allocation21_spill] sm:$0xff]  ;;  %v9544_v5 = vpop.f32.mrb[26].mxu0 }
 0x2c3   :  { %v950_v8 = vpack.i.b16 %v949_v43, %v949_v43  ;;  %v9532_v58 = vrot.slane %v438_v27, %v11336_v42  ;;  %11345 = vst [vmem:[#allocation74_spill] sm:$0xff] %v9534_v11  ;;  %11346 = vst [vmem:[#allocation75_spill] sm:$0xff] %v9536_v14  ;;  %v985_v6 = vmul.bf16 %v9516_v0, %v11347_v16  ;;  %v9546_v43 = vpop.f32.mrb[26].mxu1  ;;  %v9558_v1 = vpop.f32.mrb[27].mxu0 }
 0x2c4   :  { %v2329_v53 = vmul.bf16 %v9521_v24, %v11231_v21  ;;  %v472_v50 = vmul.bf16 %v9507_v60, %v11341_v54  ;;  %v929_v32 = vpack.i.b16 %v928_v40, %v928_v40  ;;  %11348 = vst [vmem:[#allocation21_spill] sm:$0xff] %v9544_v5  ;;  %11349 = vst [vmem:[#allocation76_spill] sm:$0xff] %v9546_v43  ;;  %4098 = vmatpush1.bf16.msra.mxu1 %v3358_v25  ;;  %v9560_v40 = vpop.f32.mrb[27].mxu1  ;;  %v9572_v62 = vpop.f32.mrb[28].mxu0 }
 0x2c5   :  { %v475_v27 = vmul.bf16 %v9529_v38, %v11341_v54  ;;  %v9551_v14 = vrot.slane %v950_v8, %v11335_v7  ;;  %v1659_v11 = vmul.bf16 %v9532_v58, %v11342_v22  ;;  %v9556_v51 = vrot.slane %v950_v8, %v11336_v42  ;;  %11350 = vst [vmem:[#allocation77_spill] sm:$0xff] %v9558_v1  ;;  %v9574_v8 = vpop.f32.mrb[28].mxu1 }
 0x2c6   :  { %11351 = vst [vmem:[#allocation78_spill] sm:$0xff] %v9560_v40  ;;  %v1241_v5 = vadd.bf16 %v985_v6, %v473_v63  ;;  %4063 = vmatmul.mubr.bf16.vlgmr.msra.gmra.mrb[48].mxu0 %v11352_v29  ;;  %v9564_v25 = vrot.slane %v929_v32, %v11335_v7  ;;  %v9567_v43 = vrot.slane %v417_v49, %v11336_v42  ;;  %11353 = vst [vmem:[#allocation79_spill] sm:$0xff] %v9572_v62  ;;  %v9584_v49 = vpop.f32.mrb[29].mxu0 }
 0x2c7   :  { %v9570_v28 = vrot.slane %v929_v32, %v11336_v42  ;;  %11354 = vst [vmem:[#allocation80_spill] sm:$0xff] %v9574_v8  ;;  %v987_v1 = vmul.bf16 %v9551_v14, %v11347_v16  ;;  %v2331_v6 = vmul.bf16 %v9556_v51, %v11231_v21  ;;  %v431_v63 = vpack.i.b16 %v9472_v57, %v9472_v57  ;;  %v9586_v32 = vpop.f32.mrb[29].mxu1  ;;  %v9595_v20 = vpop.f32.mrb[30].mxu0 }
 0x2c8   :  { %v942_v40 = vshrl.u32 %v9472_v57, 16  ;;  %4072 = vmatprep.mubr.bf16.mxu0 %v11025_v46  ;;  %11355 = vst [vmem:[#allocation81_spill] sm:$0xff] %v9584_v49  ;;  %11356 = vst [vmem:[#allocation82_spill] sm:$0xff] %v9586_v32  ;;  %v1913_v62 = vadd.bf16 %v1657_v19, %v1241_v5  ;;  %4116 = vmatmul.mubr.bf16.vlgmr.msra.gmra.mrb[48].mxu1 %v11352_v29  ;;  %v984_v8 = vmul.bf16 %v9564_v25, %v11347_v16  ;;  %v9597_v57 = vpop.f32.mrb[30].mxu1  ;;  %v9606_v32 = vpop.f32.mrb[31].mxu0 }
 0x2c9   :  { %v1656_v44 = vmul.bf16 %v9567_v43, %v11342_v22  ;;  %v2328_v55 = vmul.bf16 %v9570_v28, %v11231_v21  ;;  %11357 = vst [vmem:[#allocation83_spill] sm:$0xff] %v9595_v20  ;;  %v1243_v13 = vadd.bf16 %v987_v1, %v475_v27  ;;  %v9600_v49 = vrot.slane %v431_v63, %v11335_v7  ;;  %v9608_v29 = vpop.f32.mrb[31].mxu1 }
 0x2ca   :  { %v943_v19 = vpack.i.b16 %v942_v40, %v942_v40  ;;  %v9603_v5 = vrot.slane %v431_v63, %v11336_v42  ;;  %4125 = vmatprep.mubr.bf16.mxu1 %v11025_v46  ;;  %11358 = vst [vmem:[#allocation84_spill] sm:$0xff] %v9606_v32  ;;  %11359 = vst [vmem:[#allocation85_spill] sm:$0xff] %v9608_v29  ;;  %v2585_v47 = vadd.bf16 %v2329_v53, %v1913_v62 }
 0x2cb   :  { %v1240_v12 = vadd.bf16 %v984_v8, %v472_v50  ;;  %v505_v20 = vmul.bf16 %v9495_v4, %v11233_v15  ;;  %v1017_v1 = vmul.bf16 %v9516_v0, %v11234_v34  ;;  %v1915_v27 = vadd.bf16 %v1659_v11, %v1243_v13 }
 0x2cc   :  { %v474_v40 = vmul.bf16 %v9600_v49, %v11341_v54  ;;  %v9617_v63 = vrot.slane %v943_v19, %v11335_v7  ;;  %v1658_v32 = vmul.bf16 %v9603_v5, %v11342_v22  ;;  %v2881_v29 = vadd.bf16 %v11235_v3, %v2585_v47 }
 0x2cd   :  { %v1912_v62 = vadd.bf16 %v1656_v44, %v1240_v12  ;;  %v9623_v53 = vrot.slane %v943_v19, %v11336_v42  ;;  %v1273_v50 = vadd.bf16 %v1017_v1, %v505_v20  ;;  %v2587_v8 = vadd.bf16 %v2331_v6, %v1915_v27 }
 0x2ce   :  { %v986_v13 = vmul.bf16 %v9617_v63, %v11347_v16  ;;  %v1689_v11 = vmul.bf16 %v9498_v23, %v11275_v39  ;;  %v2361_v54 = vmul.bf16 %v9521_v24, %v11276_v30  ;;  %v3137_v7 = vmax.bf16 %v11025_v46, %v2881_v29  ;;  %4073 = vmatmul.mubr.bf16.gmra.mrb[52].mxu0 %v11277_v41 }
 0x2cf   :  { %v2584_v22 = vadd.bf16 %v2328_v55, %v1912_v62  ;;  %v2330_v47 = vmul.bf16 %v9623_v53, %v11231_v21  ;;  %v507_v12 = vmul.bf16 %v9529_v38, %v11233_v15  ;;  %v2883_v20 = vadd.bf16 %v11235_v3, %v2587_v8  ;;  %4168 = vmatprep.mubr.bf16.mxu0 %v11025_v46 }
 0x2d0   :  { %v1242_v44 = vadd.bf16 %v986_v13, %v474_v40  ;;  %v1945_v42 = vadd.bf16 %v1689_v11, %v1273_v50  ;;  %v1019_v16 = vmul.bf16 %v9551_v14, %v11234_v34  ;;  %4136 = vmatprep.subr.bf16.mxu0 %v3137_v7  ;;  %v1691_v21 = vmul.bf16 %v9532_v58, %v11275_v39 }
 0x2d1   :  { %v2880_v55 = vadd.bf16 %v11235_v3, %v2584_v22  ;;  %v2363_v29 = vmul.bf16 %v9556_v51, %v11276_v30  ;;  %v504_v6 = vmul.bf16 %v9507_v60, %v11233_v15  ;;  %v3139_v19 = vmax.bf16 %v11025_v46, %v2883_v20  ;;  %4126 = vmatmul.mubr.bf16.gmra.mrb[52].mxu1 %v11277_v41 }
 0x2d2   :  { %v1914_v1 = vadd.bf16 %v1658_v32, %v1242_v44  ;;  %v2617_v27 = vadd.bf16 %v2361_v54, %v1945_v42  ;;  %v1275_v40 = vadd.bf16 %v1019_v16, %v507_v12  ;;  %v1016_v62 = vmul.bf16 %v9564_v25, %v11234_v34  ;;  %4221 = vmatprep.mubr.bf16.mxu1 %v11025_v46 }
 0x2d3   :  { %v3136_v7 = vmax.bf16 %v11025_v46, %v2880_v55  ;;  %v1688_v50 = vmul.bf16 %v9567_v43, %v11275_v39  ;;  %v2360_v8 = vmul.bf16 %v9570_v28, %v11276_v30  ;;  %4189 = vmatprep.subr.bf16.mxu1 %v3139_v19  ;;  %v506_v54 = vmul.bf16 %v9600_v49, %v11233_v15 }
 0x2d4   :  { %v2586_v13 = vadd.bf16 %v2330_v47, %v1914_v1  ;;  %v2913_v32 = vadd.bf16 %v11215_v56, %v2617_v27  ;;  %v1947_v11 = vadd.bf16 %v1691_v21, %v1275_v40  ;;  %v1272_v22 = vadd.bf16 %v1016_v62, %v504_v6 }
 0x2d5   :  { %4137 = vmatpush1.bf16.msra.mxu0 %v3136_v7  ;;  %v1018_v12 = vmul.bf16 %v9617_v63, %v11234_v34  ;;  %v1690_v20 = vmul.bf16 %v9603_v5, %v11275_v39  ;;  %v2362_v44 = vmul.bf16 %v9623_v53, %v11276_v30  ;;  %v537_v55 = vmul.bf16 %v9495_v4, %v11284_v26  ;;  %v11360_v34 = vld [vmem:[#allocation30_spill] sm:$0xff] }
 0x2d6   :  { %v2882_v42 = vadd.bf16 %v11235_v3, %v2586_v13  ;;  %v3169_v47 = vmax.bf16 %v11025_v46, %v2913_v32  ;;  %v2619_v16 = vadd.bf16 %v2363_v29, %v1947_v11  ;;  %v1944_v15 = vadd.bf16 %v1688_v50, %v1272_v22  ;;  %v11361_v3 = vld [vmem:[#allocation35_spill] sm:$0xff] }
 0x2d7   :  { %v1274_v21 = vadd.bf16 %v1018_v12, %v506_v54  ;;  %v1049_v6 = vmul.bf16 %v9516_v0, %v11217_v45  ;;  %v1721_v19 = vmul.bf16 %v9498_v23, %v11360_v34  ;;  %v2393_v1 = vmul.bf16 %v9521_v24, %v11361_v3 }
 0x2d8   :  { %v3138_v39 = vmax.bf16 %v11025_v46, %v2882_v42  ;;  %4138 = vmatprep.subr.bf16.mxu0 %v3169_v47  ;;  %v2915_v30 = vadd.bf16 %v11215_v56, %v2619_v16  ;;  %v539_v29 = vmul.bf16 %v9529_v38, %v11284_v26  ;;  %v2616_v27 = vadd.bf16 %v2360_v8, %v1944_v15 }
 0x2d9   :  { %v1946_v40 = vadd.bf16 %v1690_v20, %v1274_v21  ;;  %v1305_v7 = vadd.bf16 %v1049_v6, %v537_v55  ;;  %v1051_v62 = vmul.bf16 %v9551_v14, %v11217_v45  ;;  %v1723_v13 = vmul.bf16 %v9532_v58, %v11360_v34 }
 0x2da   :  { %4190 = vmatpush1.bf16.msra.mxu1 %v3138_v39  ;;  %v3171_v50 = vmax.bf16 %v11025_v46, %v2915_v30  ;;  %v2395_v32 = vmul.bf16 %v9556_v51, %v11361_v3  ;;  %v536_v11 = vmul.bf16 %v9507_v60, %v11284_v26  ;;  %v2912_v54 = vadd.bf16 %v11215_v56, %v2616_v27 }
 0x2db   :  { %v2618_v8 = vadd.bf16 %v2362_v44, %v1946_v40  ;;  %v1977_v22 = vadd.bf16 %v1721_v19, %v1305_v7  ;;  %v1307_v12 = vadd.bf16 %v1051_v62, %v539_v29  ;;  %v1048_v20 = vmul.bf16 %v9564_v25, %v11217_v45  ;;  %v11362_v40 = vld [vmem:[#allocation46_spill] sm:$0xff]  ;;  %v11363_v62 = vld [vmem:[#allocation48_spill] sm:$0xff] }
 0x2dc   :  { %4191 = vmatprep.subr.bf16.mxu1 %v3171_v50  ;;  %v1720_v42 = vmul.bf16 %v9567_v43, %v11360_v34  ;;  %v2392_v47 = vmul.bf16 %v9570_v28, %v11361_v3  ;;  %v538_v16 = vmul.bf16 %v9600_v49, %v11284_v26  ;;  %v3168_v55 = vmax.bf16 %v11025_v46, %v2912_v54  ;;  %v11364_v50 = vld [vmem:[#allocation23_spill] sm:$0xff] }
 0x2dd   :  { %v2914_v15 = vadd.bf16 %v11215_v56, %v2618_v8  ;;  %v2649_v44 = vadd.bf16 %v2393_v1, %v1977_v22  ;;  %v1979_v21 = vadd.bf16 %v1723_v13, %v1307_v12  ;;  %v1304_v6 = vadd.bf16 %v1048_v20, %v536_v11  ;;  %v11365_v11 = vld [vmem:[#allocation37_spill] sm:$0xff] }
 0x2de   :  { %v1050_v19 = vmul.bf16 %v9617_v63, %v11217_v45  ;;  %v1722_v39 = vmul.bf16 %v9603_v5, %v11360_v34  ;;  %v2394_v30 = vmul.bf16 %v9623_v53, %v11361_v3  ;;  %4139 = vmatpush1.bf16.msra.mxu0 %v3168_v55  ;;  %v569_v56 = vmul.bf16 %v9495_v4, %v11362_v40 }
 0x2df   :  { %v3170_v29 = vmax.bf16 %v11025_v46, %v2914_v15  ;;  %v2945_v26 = vadd.bf16 %v11197_v17, %v2649_v44  ;;  %v2651_v27 = vadd.bf16 %v2395_v32, %v1979_v21  ;;  %v1976_v1 = vadd.bf16 %v1720_v42, %v1304_v6 }
 0x2e0   :  { %v1306_v7 = vadd.bf16 %v1050_v19, %v538_v16  ;;  %v1081_v45 = vmul.bf16 %v9516_v0, %v11363_v62  ;;  %v1753_v34 = vmul.bf16 %v9498_v23, %v11364_v50  ;;  %v2425_v54 = vmul.bf16 %v9521_v24, %v11365_v11 }
 0x2e1   :  { %4192 = vmatpush1.bf16.msra.mxu1 %v3170_v29  ;;  %v3201_v3 = vmax.bf16 %v11025_v46, %v2945_v26  ;;  %v2947_v13 = vadd.bf16 %v11197_v17, %v2651_v27  ;;  %v571_v32 = vmul.bf16 %v9529_v38, %v11362_v40  ;;  %v2648_v8 = vadd.bf16 %v2392_v47, %v1976_v1 }
 0x2e2   :  { %v1978_v22 = vadd.bf16 %v1722_v39, %v1306_v7  ;;  %v1337_v12 = vadd.bf16 %v1081_v45, %v569_v56  ;;  %v1083_v20 = vmul.bf16 %v9551_v14, %v11363_v62  ;;  %v1755_v16 = vmul.bf16 %v9532_v58, %v11364_v50 }
 0x2e3   :  { %4140 = vmatprep.subr.bf16.mxu0 %v3201_v3  ;;  %v3203_v42 = vmax.bf16 %v11025_v46, %v2947_v13  ;;  %v2427_v55 = vmul.bf16 %v9556_v51, %v11365_v11  ;;  %v568_v15 = vmul.bf16 %v9507_v60, %v11362_v40  ;;  %v2944_v44 = vadd.bf16 %v11197_v17, %v2648_v8 }
 0x2e4   :  { %v2650_v47 = vadd.bf16 %v2394_v30, %v1978_v22  ;;  %v2009_v21 = vadd.bf16 %v1753_v34, %v1337_v12  ;;  %v1339_v6 = vadd.bf16 %v1083_v20, %v571_v32  ;;  %v1080_v19 = vmul.bf16 %v9564_v25, %v11363_v62  ;;  %v11366_v22 = vld [vmem:[#allocation58_spill] sm:$0xff] }
 0x2e5   :  { %4193 = vmatprep.subr.bf16.mxu1 %v3203_v42  ;;  %v1752_v39 = vmul.bf16 %v9567_v43, %v11364_v50  ;;  %v2424_v29 = vmul.bf16 %v9570_v28, %v11365_v11  ;;  %v570_v26 = vmul.bf16 %v9600_v49, %v11362_v40  ;;  %v3200_v27 = vmax.bf16 %v11025_v46, %v2944_v44  ;;  %v11367_v20 = vld [vmem:[#allocation14_spill] sm:$0xff] }
 0x2e6   :  { %v2946_v56 = vadd.bf16 %v11197_v17, %v2650_v47  ;;  %v2681_v30 = vadd.bf16 %v2425_v54, %v2009_v21  ;;  %v2011_v1 = vadd.bf16 %v1755_v16, %v1339_v6  ;;  %v1336_v7 = vadd.bf16 %v1080_v19, %v568_v15 }
 0x2e7   :  { %v1082_v45 = vmul.bf16 %v9617_v63, %v11363_v62  ;;  %v1754_v34 = vmul.bf16 %v9603_v5, %v11364_v50  ;;  %v2426_v3 = vmul.bf16 %v9623_v53, %v11365_v11  ;;  %4141 = vmatpush1.bf16.msra.mxu0 %v3200_v27  ;;  %v601_v17 = vmul.bf16 %v9495_v4, %v11288_v2 }
 0x2e8   :  { %v3202_v13 = vmax.bf16 %v11025_v46, %v2946_v56  ;;  %v2977_v40 = vadd.bf16 %v11202_v52, %v2681_v30  ;;  %v2683_v32 = vadd.bf16 %v2427_v55, %v2011_v1  ;;  %v2008_v54 = vadd.bf16 %v1752_v39, %v1336_v7 }
 0x2e9   :  { %v1338_v8 = vadd.bf16 %v1082_v45, %v570_v26  ;;  %v1113_v62 = vmul.bf16 %v9516_v0, %v11293_v48  ;;  %v1785_v50 = vmul.bf16 %v9498_v23, %v11366_v22  ;;  %v2457_v42 = vmul.bf16 %v9521_v24, %v11367_v20 }
 0x2ea   :  { %4194 = vmatpush1.bf16.msra.mxu1 %v3202_v13  ;;  %v3233_v11 = vmax.bf16 %v11025_v46, %v2977_v40  ;;  %v2979_v12 = vadd.bf16 %v11202_v52, %v2683_v32  ;;  %v603_v16 = vmul.bf16 %v9529_v38, %v11288_v2  ;;  %v2680_v55 = vadd.bf16 %v2424_v29, %v2008_v54 }
 0x2eb   :  { %v2010_v15 = vadd.bf16 %v1754_v34, %v1338_v8  ;;  %v1369_v44 = vadd.bf16 %v1113_v62, %v601_v17  ;;  %v1115_v47 = vmul.bf16 %v9551_v14, %v11293_v48  ;;  %v1787_v6 = vmul.bf16 %v9532_v58, %v11366_v22 }
 0x2ec   :  { %4142 = vmatprep.subr.bf16.mxu0 %v3233_v11  ;;  %v3235_v21 = vmax.bf16 %v11025_v46, %v2979_v12  ;;  %v2459_v19 = vmul.bf16 %v9556_v51, %v11367_v20  ;;  %v600_v39 = vmul.bf16 %v9507_v60, %v11288_v2  ;;  %v2976_v26 = vadd.bf16 %v11202_v52, %v2680_v55  ;;  %v9791_v11 = vpop.permute.xlu1 %3376  ;;  %v11368_v55 = vld [vmem:[#allocation65_spill] sm:$0xff] }
 0x2ed   :  { %v2682_v29 = vadd.bf16 %v2426_v3, %v2010_v15  ;;  %v2041_v27 = vadd.bf16 %v1785_v50, %v1369_v44  ;;  %v1371_v56 = vadd.bf16 %v1115_v47, %v603_v16  ;;  %v1112_v30 = vmul.bf16 %v9564_v25, %v11293_v48 }
 0x2ee   :  { %4195 = vmatprep.subr.bf16.mxu1 %v3235_v21  ;;  %v1784_v1 = vmul.bf16 %v9567_v43, %v11366_v22  ;;  %v2456_v7 = vmul.bf16 %v9570_v28, %v11367_v20  ;;  %v602_v45 = vmul.bf16 %v9600_v49, %v11288_v2  ;;  %v3232_v34 = vmax.bf16 %v11025_v46, %v2976_v26 }
 0x2ef   :  { %v2978_v13 = vadd.bf16 %v11202_v52, %v2682_v29  ;;  %v2713_v3 = vadd.bf16 %v2457_v42, %v2041_v27  ;;  %v2043_v40 = vadd.bf16 %v1787_v6, %v1371_v56  ;;  %v1368_v32 = vadd.bf16 %v1112_v30, %v600_v39  ;;  %v11369_v27 = vld [vmem:[#allocation50_spill] sm:$0xff] }
 0x2f0   :  { %v1114_v17 = vmul.bf16 %v9617_v63, %v11293_v48  ;;  %v1786_v54 = vmul.bf16 %v9603_v5, %v11366_v22  ;;  %v2458_v8 = vmul.bf16 %v9623_v53, %v11367_v20  ;;  %4143 = vmatpush1.bf16.msra.mxu0 %v3232_v34  ;;  %v633_v52 = vmul.bf16 %v9495_v4, %v11298_v9 }
 0x2f1   :  { %v3234_v62 = vmax.bf16 %v11025_v46, %v2978_v13  ;;  %v3009_v2 = vadd.bf16 %v11143_v31, %v2713_v3  ;;  %v2715_v50 = vadd.bf16 %v2459_v19, %v2043_v40  ;;  %v2040_v12 = vadd.bf16 %v1784_v1, %v1368_v32  ;;  %v11370_v13 = vld [vmem:[#allocation11_spill] sm:$0xff]  ;;  %v11371_v40 = vld [vmem:[#allocation54_spill] sm:$0xff] }
 0x2f2   :  { %v1370_v42 = vadd.bf16 %v1114_v17, %v602_v45  ;;  %v1145_v48 = vmul.bf16 %v9516_v0, %v11262_v33  ;;  %v1817_v22 = vmul.bf16 %v9498_v23, %v11263_v61  ;;  %v2489_v15 = vmul.bf16 %v9521_v24, %v11368_v55  ;;  %v11372_v17 = vld [vmem:[#allocation55_spill] sm:$0xff] }
 0x2f3   :  { %4196 = vmatpush1.bf16.msra.mxu1 %v3234_v62  ;;  %v3265_v20 = vmax.bf16 %v11025_v46, %v3009_v2  ;;  %v3011_v16 = vadd.bf16 %v11143_v31, %v2715_v50  ;;  %v635_v44 = vmul.bf16 %v9529_v38, %v11298_v9  ;;  %v2712_v47 = vadd.bf16 %v2456_v7, %v2040_v12  ;;  %v9823_v62 = vpop.permute.xlu1 %3381 }
 0x2f4   :  { %v2042_v21 = vadd.bf16 %v1786_v54, %v1370_v42  ;;  %v1401_v6 = vadd.bf16 %v1145_v48, %v633_v52  ;;  %v1147_v19 = vmul.bf16 %v9551_v14, %v11262_v33  ;;  %v1819_v26 = vmul.bf16 %v9532_v58, %v11263_v61 }
 0x2f5   :  { %4144 = vmatprep.subr.bf16.mxu0 %v3265_v20  ;;  %v3267_v39 = vmax.bf16 %v11025_v46, %v3011_v16  ;;  %v2491_v29 = vmul.bf16 %v9556_v51, %v11368_v55  ;;  %v3429_v56 = vadd.f32 %v11369_v27, %v9791_v11  ;;  %v3008_v30 = vadd.bf16 %v11143_v31, %v2712_v47  ;;  %v9831_v16 = vpop.f32.mrb[32].mxu0 }
 0x2f6   :  { %v2714_v1 = vadd.bf16 %v2458_v8, %v2042_v21  ;;  %v2073_v7 = vadd.bf16 %v1817_v22, %v1401_v6  ;;  %v1403_v45 = vadd.bf16 %v1147_v19, %v635_v44  ;;  %v3482_v3 = vadd.f32 %v11370_v13, %v9791_v11  ;;  %v11373_v22 = vld [vmem:[#allocation39_spill] sm:$0xff]  ;;  %v9837_v6 = vpop.f32.mrb[33].mxu0 }
 0x2f7   :  { %4197 = vmatprep.subr.bf16.mxu1 %v3267_v39  ;;  %v4242_v34 = vmax.f32 %v3429_v56, 0.0  ;;  %v9817_v32 = vadd.f32 %v11371_v40, %v9791_v11  ;;  %v9821_v54 = vadd.f32 %v11372_v17, %v9791_v11  ;;  %v3264_v2 = vmax.bf16 %v11025_v46, %v3008_v30  ;;  %v9845_v56 = vpop.f32.mrb[32].mxu1  ;;  %v9847_v30 = vpop.f32.mrb[34].mxu0 }
 0x2f8   :  { %v3010_v8 = vadd.bf16 %v11143_v31, %v2714_v1  ;;  %v2745_v50 = vadd.bf16 %v2489_v15, %v2073_v7  ;;  %v2075_v52 = vadd.bf16 %v1819_v26, %v1403_v45  ;;  %v4244_v12 = vmax.f32 %v3482_v3, 0.0  ;;  %v11374_v31 = vld [vmem:[#allocation56_spill] sm:$0xff]  ;;  %v9853_v13 = vpop.f32.mrb[33].mxu1  ;;  %v9855_v3 = vpop.f32.mrb[35].mxu0 }
 0x2f9   :  { %v4243_v42 = vmax.f32 %v9817_v32, 0.0  ;;  %v4245_v48 = vmax.f32 %v9821_v54, 0.0  ;;  %v3433_v20 = vadd.f32 %v11373_v22, %v9823_v62  ;;  %4145 = vmatpush1.bf16.msra.mxu0 %v3264_v2  ;;  %v3486_v15 = vadd.f32 %v11374_v31, %v9823_v62  ;;  %v9863_v2 = vpop.f32.mrb[34].mxu1  ;;  %v11377_v31 = vld [vmem:[#allocation67_spill] sm:$0xff] }
 0x2fa   :  { %v3266_v44 = vmax.bf16 %v11025_v46, %v3010_v8  ;;  %v3041_v47 = vadd.bf16 %v11242_v18, %v2745_v50  ;;  %v2747_v21 = vadd.bf16 %v2491_v29, %v2075_v52  ;;  %v632_v39 = vmul.bf16 %v9507_v60, %v11298_v9  ;;  %v9872_v22 = vpop.f32.mrb[35].mxu1 }
 0x2fb   :  { %v4274_v19 = vmax.f32 %v3433_v20, 0.0  ;;  %v1144_v26 = vmul.bf16 %v9564_v25, %v11262_v33  ;;  %v1816_v27 = vmul.bf16 %v9567_v43, %v11263_v61  ;;  %v4276_v7 = vmax.f32 %v3486_v15, 0.0  ;;  %v11378_v15 = vld [vmem:[#allocation53_spill] sm:$0xff] }
 0x2fc   :  { %4198 = vmatpush1.bf16.msra.mxu1 %v3266_v44  ;;  %v3297_v29 = vmax.bf16 %v11025_v46, %v3041_v47  ;;  %v3043_v1 = vadd.bf16 %v11242_v18, %v2747_v21  ;;  %v2488_v45 = vmul.bf16 %v9570_v28, %v11368_v55  ;;  %v634_v17 = vmul.bf16 %v9600_v49, %v11298_v9  ;;  %v11375_v44 = vld [vmem:[#allocation57_spill] sm:$0xff]  ;;  %v11376_v47 = vld [vmem:[#allocation42_spill] sm:$0xff] }
 0x2fd   :  { %v9857_v40 = vpack.c.bf16 %v4274_v19, %v4242_v34  ;;  %v1400_v32 = vadd.bf16 %v1144_v26, %v632_v39  ;;  %v1146_v54 = vmul.bf16 %v9617_v63, %v11262_v33  ;;  %v9866_v50 = vpack.c.bf16 %v4276_v7, %v4244_v12 }
 0x2fe   :  { %4146 = vmatprep.subr.bf16.mxu0 %v3297_v29  ;;  %v3299_v8 = vmax.bf16 %v11025_v46, %v3043_v1  ;;  %v1818_v52 = vmul.bf16 %v9603_v5, %v11263_v61  ;;  %v2490_v34 = vmul.bf16 %v9623_v53, %v11368_v55  ;;  %v3435_v33 = vadd.f32 %v11375_v44, %v9823_v62  ;;  %v9886_v1 = vpop.f32.mrb[36].mxu0 }
 0x2ff   :  { %v2072_v20 = vadd.bf16 %v1816_v27, %v1400_v32  ;;  %v1402_v9 = vadd.bf16 %v1146_v54, %v634_v17  ;;  %v3488_v21 = vadd.f32 %v11376_v47, %v9823_v62  ;;  %v665_v12 = vmul.bf16 %v9495_v4, %v11302_v59 }
 0x300   :  { %4199 = vmatprep.subr.bf16.mxu1 %v3299_v8  ;;  %v1177_v61 = vmul.bf16 %v9516_v0, %v11243_v37  ;;  %v1849_v55 = vmul.bf16 %v9498_v23, %v11377_v31  ;;  %v2521_v19 = vmul.bf16 %v9521_v24, %v11378_v15  ;;  %v4275_v27 = vmax.f32 %v3435_v33, 0.0  ;;  %v9894_v8 = vpop.f32.mrb[37].mxu0 }
 0x301   :  { %v2744_v39 = vadd.bf16 %v2488_v45, %v2072_v20  ;;  %v2074_v26 = vadd.bf16 %v1818_v52, %v1402_v9  ;;  %v4277_v29 = vmax.f32 %v3488_v21, 0.0  ;;  %v667_v32 = vmul.bf16 %v9529_v38, %v11302_v59  ;;  %11379 = vst [vmem:[#allocation30_spill] sm:$0xff] %v9894_v8  ;;  %v9901_v9 = vpop.f32.mrb[38].mxu0 }
 0x302   :  { %v1433_v7 = vadd.bf16 %v1177_v61, %v665_v12  ;;  %v1179_v17 = vmul.bf16 %v9551_v14, %v11243_v37  ;;  %v1851_v54 = vmul.bf16 %v9532_v58, %v11377_v31  ;;  %v9897_v52 = vpack.c.bf16 %v4275_v27, %v4243_v42  ;;  %v9907_v61 = vpop.f32.mrb[36].mxu1  ;;  %v9909_v8 = vpop.f32.mrb[39].mxu0 }
 0x303   :  { %v3040_v44 = vadd.bf16 %v11242_v18, %v2744_v39  ;;  %v2746_v45 = vadd.bf16 %v2490_v34, %v2074_v26  ;;  %v9899_v20 = vpack.c.bf16 %v4277_v29, %v4245_v48  ;;  %v2523_v21 = vmul.bf16 %v9556_v51, %v11378_v15  ;;  %v9917_v39 = vpop.f32.mrb[37].mxu1 }
 0x304   :  { %v2105_v33 = vadd.bf16 %v1849_v55, %v1433_v7  ;;  %v1435_v47 = vadd.bf16 %v1179_v17, %v667_v32  ;;  %v664_v12 = vmul.bf16 %v9507_v60, %v11302_v59  ;;  %v1176_v48 = vmul.bf16 %v9564_v25, %v11243_v37  ;;  %v9923_v32 = vpop.f32.mrb[38].mxu1 }
 0x305   :  { %v3296_v34 = vmax.bf16 %v11025_v46, %v3040_v44  ;;  %v3042_v42 = vadd.bf16 %v11242_v18, %v2746_v45  ;;  %v1848_v55 = vmul.bf16 %v9567_v43, %v11377_v31  ;;  %v2520_v29 = vmul.bf16 %v9570_v28, %v11378_v15 }
 0x306   :  { %v2777_v26 = vadd.bf16 %v2521_v19, %v2105_v33  ;;  %v2107_v27 = vadd.bf16 %v1851_v54, %v1435_v47  ;;  %v666_v7 = vmul.bf16 %v9600_v49, %v11302_v59  ;;  %v1432_v17 = vadd.bf16 %v1176_v48, %v664_v12  ;;  %v9930_v19 = vpop.f32.mrb[39].mxu1 }
 0x307   :  { %4147 = vmatpush1.bf16.msra.mxu0 %v3296_v34  ;;  %v3298_v18 = vmax.bf16 %v11025_v46, %v3042_v42  ;;  %v1178_v44 = vmul.bf16 %v9617_v63, %v11243_v37  ;;  %v1850_v45 = vmul.bf16 %v9603_v5, %v11377_v31  ;;  %v2522_v59 = vmul.bf16 %v9623_v53, %v11378_v15  ;;  %v11380_v42 = vld [vmem:[#allocation13_spill] sm:$0xff]  ;;  %v9945_v15 = vpop.permute.xlu0 %3386 }
 0x308   :  { %v3073_v54 = vadd.bf16 %v11247_v10, %v2777_v26  ;;  %v2779_v33 = vadd.bf16 %v2523_v21, %v2107_v27  ;;  %v697_v47 = vmul.bf16 %v9495_v4, %v11246_v35  ;;  %v2104_v34 = vadd.bf16 %v1848_v55, %v1432_v17 }
 0x309   :  { %4200 = vmatpush1.bf16.msra.mxu1 %v3298_v18  ;;  %v1434_v12 = vadd.bf16 %v1178_v44, %v666_v7  ;;  %v1209_v37 = vmul.bf16 %v9516_v0, %v11305_v36  ;;  %v1881_v31 = vmul.bf16 %v9498_v23, %v11380_v42  ;;  %v699_v21 = vmul.bf16 %v9529_v38, %v11246_v35  ;;  %v11381_v7 = vld [vmem:[#allocation38_spill] sm:$0xff]  ;;  %v11382_v44 = vld [vmem:[#allocation60_spill] sm:$0xff] }
 0x30a   :  { %v3329_v48 = vmax.bf16 %v11025_v46, %v3073_v54  ;;  %v3075_v26 = vadd.bf16 %v11247_v10, %v2779_v33  ;;  %v2776_v27 = vadd.bf16 %v2520_v29, %v2104_v34  ;;  %v1211_v55 = vmul.bf16 %v9551_v14, %v11305_v36 }
 0x30b   :  { %v2106_v4 = vadd.bf16 %v1850_v45, %v1434_v12  ;;  %v1465_v18 = vadd.bf16 %v1209_v37, %v697_v47  ;;  %v2553_v23 = vmul.bf16 %v9521_v24, %v11381_v7  ;;  %v1883_v17 = vmul.bf16 %v9532_v58, %v11380_v42  ;;  %v11383_v47 = vld [vmem:[#allocation62_spill] sm:$0xff]  ;;  %v9963_v37 = vpop.permute.xlu1 %3391 }
 0x30c   :  { %4148 = vmatprep.subr.bf16.mxu0 %v3329_v48  ;;  %v3331_v0 = vmax.bf16 %v11025_v46, %v3075_v26  ;;  %v3439_v38 = vadd.f32 %v11382_v44, %v9945_v15  ;;  %v3072_v54 = vadd.bf16 %v11247_v10, %v2776_v27  ;;  %v1467_v33 = vadd.bf16 %v1211_v55, %v699_v21  ;;  %v11384_v24 = vld [vmem:[#allocation18_spill] sm:$0xff]  ;;  %v11385_v27 = vld [vmem:[#allocation64_spill] sm:$0xff] }
 0x30d   :  { %v2778_v29 = vadd.bf16 %v2522_v59, %v2106_v4  ;;  %v2137_v45 = vadd.bf16 %v1881_v31, %v1465_v18  ;;  %v2555_v14 = vmul.bf16 %v9556_v51, %v11381_v7  ;;  %v3492_v34 = vadd.f32 %v11383_v47, %v9945_v15  ;;  %v11386_v51 = vld [vmem:[#allocation66_spill] sm:$0xff] }
 0x30e   :  { %4201 = vmatprep.subr.bf16.mxu1 %v3331_v0  ;;  %v3441_v12 = vadd.f32 %v11384_v24, %v9945_v15  ;;  %v3328_v58 = vmax.bf16 %v11025_v46, %v3072_v54  ;;  %v2139_v59 = vadd.bf16 %v1883_v17, %v1467_v33  ;;  %v4306_v31 = vmax.f32 %v3439_v38, 0.0  ;;  %v11387_v0 = vld [vmem:[#allocation12_spill] sm:$0xff] }
 0x30f   :  { %v3074_v48 = vadd.bf16 %v11247_v10, %v2778_v29  ;;  %v2809_v26 = vadd.bf16 %v2553_v23, %v2137_v45  ;;  %v4308_v21 = vmax.f32 %v3492_v34, 0.0  ;;  %v3494_v4 = vadd.f32 %v11385_v27, %v9945_v15  ;;  %v11388_v54 = vld [vmem:[#allocation68_spill] sm:$0xff]  ;;  %v11389_v27 = vld [vmem:[#allocation69_spill] sm:$0xff] }
 0x310   :  { %v3443_v18 = vadd.f32 %v11386_v51, %v9963_v37  ;;  %4149 = vmatpush1.bf16.msra.mxu0 %v3328_v58  ;;  %v2811_v47 = vadd.bf16 %v2555_v14, %v2139_v59  ;;  %v3496_v24 = vadd.f32 %v11388_v54, %v9963_v37  ;;  %v696_v23 = vmul.bf16 %v9507_v60, %v11246_v35 }
 0x311   :  { %v3330_v55 = vmax.bf16 %v11025_v46, %v3074_v48  ;;  %v3105_v44 = vadd.bf16 %v11387_v0, %v2809_v26  ;;  %v1208_v17 = vmul.bf16 %v9564_v25, %v11305_v36  ;;  %v1880_v38 = vmul.bf16 %v9567_v43, %v11380_v42 }
 0x312   :  { %v4338_v10 = vmax.f32 %v3443_v18, 0.0  ;;  %v3107_v45 = vadd.bf16 %v11387_v0, %v2811_v47  ;;  %v4307_v33 = vmax.f32 %v3441_v12, 0.0  ;;  %v4340_v14 = vmax.f32 %v3496_v24, 0.0  ;;  %v11393_v24 = vld [vmem:[#allocation26_spill] sm:$0xff] }
 0x313   :  { %4202 = vmatpush1.bf16.msra.mxu1 %v3330_v55  ;;  %v3361_v29 = vmax.bf16 %v11025_v46, %v3105_v44  ;;  %v1464_v58 = vadd.bf16 %v1208_v17, %v696_v23  ;;  %v698_v48 = vmul.bf16 %v9600_v49, %v11246_v35  ;;  %v1210_v60 = vmul.bf16 %v9617_v63, %v11305_v36  ;;  %v11390_v35 = vld [vmem:[#allocation16_spill] sm:$0xff]  ;;  %v11394_v23 = vld [vmem:[#allocation19_spill] sm:$0xff] }
 0x314   :  { %v9983_v34 = vpack.c.bf16 %v4338_v10, %v4306_v31  ;;  %v3363_v25 = vmax.bf16 %v11025_v46, %v3107_v45  ;;  %v9990_v43 = vpack.c.bf16 %v4340_v14, %v4308_v21  ;;  %v2552_v26 = vmul.bf16 %v9570_v28, %v11381_v7  ;;  %v11391_v21 = vld [vmem:[#allocation9_spill] sm:$0xff]  ;;  %v11392_v28 = vld [vmem:[#allocation27_spill] sm:$0xff] }
 0x315   :  { %4150 = vmatprep.subr.bf16.mxu0 %v3361_v29  ;;  %v1882_v12 = vmul.bf16 %v9603_v5, %v11380_v42  ;;  %v2136_v59 = vadd.bf16 %v1880_v38, %v1464_v58  ;;  %v1466_v31 = vadd.bf16 %v1210_v60, %v698_v48  ;;  %v3445_v51 = vadd.f32 %v11389_v27, %v9963_v37  ;;  %v11395_v14 = vld [vmem:[#allocation45_spill] sm:$0xff] }
 0x316   :  { %v3498_v49 = vadd.f32 %v11390_v35, %v9963_v37  ;;  %4203 = vmatprep.subr.bf16.mxu1 %v3363_v25  ;;  %v4309_v36 = vmax.f32 %v3494_v4, 0.0  ;;  %v2554_v63 = vmul.bf16 %v9623_v53, %v11381_v7  ;;  %v3535_v18 = vadd.f32 %v11391_v21, %v9791_v11  ;;  %v11396_v48 = vld [vmem:[#allocation61_spill] sm:$0xff] }
 0x317   :  { %v3588_v55 = vadd.f32 %v11392_v28, %v9791_v11  ;;  %v2808_v5 = vadd.bf16 %v2552_v26, %v2136_v59  ;;  %v2138_v42 = vadd.bf16 %v1882_v12, %v1466_v31  ;;  %v4339_v44 = vmax.f32 %v3445_v51, 0.0  ;;  %v11397_v12 = vld [vmem:[#allocation51_spill] sm:$0xff]  ;;  %v11398_v31 = vld [vmem:[#allocation28_spill] sm:$0xff] }
 0x318   :  { %v4341_v47 = vmax.f32 %v3498_v49, 0.0  ;;  %v4246_v54 = vmax.f32 %v3535_v18, 0.0  ;;  %v3537_v10 = vadd.f32 %v11393_v24, %v9791_v11  ;;  %v3590_v4 = vadd.f32 %v11394_v23, %v9791_v11  ;;  %v4435_v51 = vld [vmem:[%s10722_s5 + $0x8] sm:$0xff] }
 0x319   :  { %v3104_v17 = vadd.bf16 %v11387_v0, %v2808_v5  ;;  %v2810_v53 = vadd.bf16 %v2554_v63, %v2138_v42  ;;  %v4403_v7 = vpack.c.bf16 %v4339_v44, %v4307_v33  ;;  %v4248_v29 = vmax.f32 %v3588_v55, 0.0  ;;  %v4434_v33 = vld [vmem:[%s10722_s5] sm:$0xff]  ;;  %s6085_s5 = smov [#allocation3]  }
 0x31a   :  { %v4405_v38 = vpack.c.bf16 %v4341_v47, %v4309_v36  ;;  %v4247_v45 = vmax.f32 %v3537_v10, 0.0  ;;  %v3539_v58 = vadd.f32 %v11395_v14, %v9823_v62  ;;  %v3592_v60 = vadd.f32 %v11396_v48, %v9823_v62  ;;  %v11399_v63 = vld [vmem:[#allocation33_spill] sm:$0xff]  ;;  %v11401_v47 = vld [vmem:[#allocation32_spill] sm:$0xff]  ;;  %s5917_s12 = sshll.u32 %s6085_s5, 4  ;;  %s5918_s12 = int_to_ptr.vmem [resolvable:$true] %s5917_s12 }
 0x31b   :  { %v3360_v25 = vmax.bf16 %v11025_v46, %v3104_v17  ;;  %v3106_v26 = vadd.bf16 %v11387_v0, %v2810_v53  ;;  %v3541_v59 = vadd.f32 %v11397_v12, %v9823_v62  ;;  %v3594_v27 = vadd.f32 %v11398_v31, %v9823_v62  ;;  %v11400_v55 = vld [vmem:[#allocation29_spill] sm:$0xff]  ;;  %v11402_v17 = vld [vmem:[#allocation44_spill] sm:$0xff]  ;;  %v11408_v12 = vld [vmem:[#allocation59_spill] sm:$0xff]  ;;  %s6056_s13 = scalar_lea.vmem %s5918_s12, 512  ;;  %p6061_p1 = scmp.lt.s32.totalorder %s5918_s12, %s5918_s12 }
 0x31c   :  { %v4249_v35 = vmax.f32 %v3590_v4, 0.0  ;;  %v4278_v49 = vmax.f32 %v3539_v58, 0.0  ;;  %v4280_v36 = vmax.f32 %v3592_v60, 0.0  ;;  %v3545_v0 = vadd.f32 %v11399_v63, %v9945_v15  ;;  %v11403_v14 = vld [vmem:[#allocation24_spill] sm:$0xff]  ;;  %v11405_v58 = vld [vmem:[#allocation63_spill] sm:$0xff]  ;;  %v11406_v60 = vld [vmem:[#allocation25_spill] sm:$0xff]  ;;  %p6057_p0 = scmp.ne.s32.totalorder %s5918_s12, %s6056_s13  ;;  %p6062_p2 = scmp.lt.s32.totalorder %s6056_s13, %s6056_s13 }
 0x31d   :  { %4151 = vmatpush1.bf16.msra.mxu0 %v3360_v25  ;;  %v3362_v21 = vmax.bf16 %v11025_v46, %v3106_v26  ;;  %v4279_v18 = vmax.f32 %v3541_v59, 0.0  ;;  %v4281_v28 = vmax.f32 %v3594_v27, 0.0  ;;  %v3598_v5 = vadd.f32 %v11400_v55, %v9945_v15  ;;  %v11407_v26 = vld [vmem:[#allocation22_spill] sm:$0xff]  ;;  %v11409_v31 = vld [vmem:[#allocation17_spill] sm:$0xff] }
 0x31e   :  { %4453 = vmatprep.subr.bf16.mxu0 %v9897_v52  ;;  %v10033_v42 = vpack.c.bf16 %v4278_v49, %v4246_v54  ;;  %v10035_v44 = vpack.c.bf16 %v4280_v36, %v4248_v29  ;;  %v3547_v24 = vadd.f32 %v11401_v47, %v9945_v15  ;;  %v10039_v10 = vpack.c.bf16 %v4435_v51, %v4434_v33  ;;  %v11404_v54 = vld [vmem:[#allocation10_spill] sm:$0xff]  ;;  %p6063_p3 = por %p6062_p2, %p6061_p1 }
 0x31f   :  { %4204 = vmatpush1.bf16.msra.mxu1 %v3362_v21  ;;  %v4375_v23 = vpack.c.bf16 %v4279_v18, %v4247_v45  ;;  %v4377_v4 = vpack.c.bf16 %v4281_v28, %v4249_v35  ;;  %v3600_v53 = vadd.f32 %v11402_v17, %v9945_v15  ;;  %v4310_v52 = vmax.f32 %v3545_v0, 0.0  ;;  %v11410_v63 = vld [vmem:[#allocation34_spill] sm:$0xff]  ;;  %v11411_v21 = vld [vmem:[#allocation41_spill] sm:$0xff] }
 0x320   :  { %4496 = vmatprep.subr.bf16.mxu1 %v9899_v20  ;;  %4169 = vmatmul.mubr.bf16.vlgmr.msra.gmra.mrb[56].mxu0 %v11403_v14  ;;  %v3549_v29 = vadd.f32 %v11404_v54, %v9963_v37  ;;  %v3602_v48 = vadd.f32 %v11405_v58, %v9963_v37  ;;  %v3551_v25 = vadd.f32 %v11406_v60, %v9963_v37  ;;  %v4312_v45 = vmax.f32 %v3598_v5, 0.0  ;;  %v11415_v54 = vld [vmem:[#allocation52_spill] sm:$0xff]  ;;  %v11416_v58 = vld [vmem:[#allocation47_spill] sm:$0xff]  ;;  %p6064_p4 = pnand %p6063_p3, %p6057_p0 }
 0x321   :  { %4454 = vmatpush1.bf16.msra.mxu0 %v9857_v40  ;;  %4178 = vmatprep.mubr.bf16.mxu0 %v11025_v46  ;;  %v3604_v20 = vadd.f32 %v11407_v26, %v9963_v37  ;;  %v3641_v59 = vadd.f32 %v11408_v12, %v9791_v11  ;;  %v3694_v27 = vadd.f32 %v11409_v31, %v9791_v11  ;;  %v4311_v33 = vmax.f32 %v3547_v24, 0.0  ;;  %v11412_v24 = vld [vmem:[#allocation31_spill] sm:$0xff] }
 0x322   :  { %4222 = vmatmul.mubr.bf16.vlgmr.msra.gmra.mrb[56].mxu1 %v11403_v14  ;;  %4455 = vmatprep.subr.bf16.mxu0 %v4403_v7  ;;  %v4342_v51 = vmax.f32 %v3549_v29, 0.0  ;;  %v4344_v35 = vmax.f32 %v3602_v48, 0.0  ;;  %v4343_v49 = vmax.f32 %v3551_v25, 0.0  ;;  %v4313_v40 = vmax.f32 %v3600_v53, 0.0  ;;  %v11413_v53 = vld [vmem:[#allocation36_spill] sm:$0xff]  ;;  %v11417_v48 = vld [vmem:[#allocation49_spill] sm:$0xff] }
 0x323   :  { %4497 = vmatpush1.bf16.msra.mxu1 %v9866_v50  ;;  %4231 = vmatprep.mubr.bf16.mxu1 %v11025_v46  ;;  %v4345_v36 = vmax.f32 %v3604_v20, 0.0  ;;  %v3643_v0 = vadd.f32 %v11410_v63, %v9791_v11  ;;  %v3696_v18 = vadd.f32 %v11411_v21, %v9791_v11  ;;  %v4250_v5 = vmax.f32 %v3641_v59, 0.0  ;;  %v11418_v59 = vld [vmem:[#allocation15_spill] sm:$0xff] }
 0x324   :  { %4498 = vmatprep.subr.bf16.mxu1 %v4405_v38  ;;  %v10066_v28 = vpack.c.bf16 %v4342_v51, %v4310_v52  ;;  %v10068_v7 = vpack.c.bf16 %v4344_v35, %v4312_v45  ;;  %v10070_v55 = vpack.c.bf16 %v4343_v49, %v4311_v33  ;;  %v4252_v47 = vmax.f32 %v3694_v27, 0.0  ;;  %v11414_v38 = vld [vmem:[#allocation43_spill] sm:$0xff]  ;;  %v11419_v27 = vld [vmem:[#allocation70_spill] sm:$0xff] }
 0x325   :  { %4456 = vmatpush1.bf16.msra.mxu0 %v9983_v34  ;;  %v10073_v50 = vpack.c.bf16 %v4345_v36, %v4313_v40  ;;  %v3645_v17 = vadd.f32 %v11412_v24, %v9823_v62  ;;  %v3698_v14 = vadd.f32 %v11413_v53, %v9823_v62  ;;  %v3647_v52 = vadd.f32 %v11414_v38, %v9823_v62  ;;  %v11420_v36 = vld [vmem:[#allocation8_spill] sm:$0xff] }
 0x326   :  { %4539 = vmatprep.subr.bf16.mxu0 %v4375_v23  ;;  %v3700_v29 = vadd.f32 %v11415_v54, %v9823_v62  ;;  %v3651_v34 = vadd.f32 %v11416_v58, %v9945_v15  ;;  %v3704_v60 = vadd.f32 %v11417_v48, %v9945_v15  ;;  %v4251_v25 = vmax.f32 %v3643_v0, 0.0  ;;  %v11421_v0 = vld [vmem:[#allocation71_spill] sm:$0xff]  ;;  %v11425_v53 = vld [vmem:[#allocation20_spill] sm:$0xff]  ;;  %v11426_v48 = vld [vmem:[#allocation74_spill] sm:$0xff] }
 0x327   :  { %4499 = vmatpush1.bf16.msra.mxu1 %v9990_v43  ;;  %v4253_v45 = vmax.f32 %v3696_v18, 0.0  ;;  %v4282_v26 = vmax.f32 %v3645_v17, 0.0  ;;  %v4284_v20 = vmax.f32 %v3698_v14, 0.0  ;;  %v4283_v23 = vmax.f32 %v3647_v52, 0.0  ;;  %v11422_v18 = vld [vmem:[#allocation72_spill] sm:$0xff] }
 0x328   :  { %4179 = vmatmul.mubr.bf16.gmra.mrb[60].mxu0 %v11277_v41  ;;  %4582 = vmatprep.subr.bf16.mxu1 %v4377_v4  ;;  %v4285_v12 = vmax.f32 %v3700_v29, 0.0  ;;  %v3653_v31 = vadd.f32 %v11418_v59, %v9945_v15  ;;  %v3706_v33 = vadd.f32 %v11419_v27, %v9945_v15  ;;  %v4314_v35 = vmax.f32 %v3651_v34, 0.0  ;;  %v11424_v17 = vld [vmem:[#allocation40_spill] sm:$0xff] }
 0x329   :  { %4485 = vmatprep.mubr.bf16.mxu0 %v11025_v46  ;;  %v10094_v51 = vpack.c.bf16 %v4282_v26, %v4250_v5  ;;  %v10096_v43 = vpack.c.bf16 %v4284_v20, %v4252_v47  ;;  %v4316_v49 = vmax.f32 %v3704_v60, 0.0  ;;  %v4379_v40 = vpack.c.bf16 %v4283_v23, %v4251_v25  ;;  %v11423_v47 = vld [vmem:[#allocation73_spill] sm:$0xff]  ;;  %v11427_v25 = vld [vmem:[#allocation75_spill] sm:$0xff] }
 0x32a   :  { %4232 = vmatmul.mubr.bf16.gmra.mrb[60].mxu1 %v11277_v41  ;;  %v10099_v4 = vpack.c.bf16 %v4285_v12, %v4253_v45  ;;  %v3655_v63 = vadd.f32 %v11420_v36, %v9963_v37  ;;  %v3708_v21 = vadd.f32 %v11421_v0, %v9963_v37  ;;  %v3657_v5 = vadd.f32 %v11422_v18, %v9963_v37  ;;  %v11429_v36 = vld [vmem:[#allocation76_spill] sm:$0xff]  ;;  %v11430_v0 = vld [vmem:[#allocation77_spill] sm:$0xff]  ;;  %v11432_v18 = vld [vmem:[#allocation79_spill] sm:$0xff] }
 0x32b   :  { %4528 = vmatprep.mubr.bf16.mxu1 %v11025_v46  ;;  %v3710_v24 = vadd.f32 %v11423_v47, %v9963_v37  ;;  %v3747_v41 = vadd.f32 %v11424_v17, %v9791_v11  ;;  %v3800_v14 = vadd.f32 %v11425_v53, %v9791_v11  ;;  %v4315_v38 = vmax.f32 %v3653_v31, 0.0  ;;  %v11428_v31 = vld [vmem:[#allocation21_spill] sm:$0xff]  ;;  %v11433_v47 = vld [vmem:[#allocation80_spill] sm:$0xff] }
 0x32c   :  { %v4317_v52 = vmax.f32 %v3706_v33, 0.0  ;;  %v4346_v54 = vmax.f32 %v3655_v63, 0.0  ;;  %v4348_v29 = vmax.f32 %v3708_v21, 0.0  ;;  %v4347_v58 = vmax.f32 %v3657_v5, 0.0 }
 0x32d   :  { %v4349_v34 = vmax.f32 %v3710_v24, 0.0  ;;  %v3749_v60 = vadd.f32 %v11426_v48, %v9791_v11  ;;  %v3802_v45 = vadd.f32 %v11427_v25, %v9791_v11  ;;  %v4254_v23 = vmax.f32 %v3747_v41, 0.0 }
 0x32e   :  { %v10118_v26 = vpack.c.bf16 %v4346_v54, %v4314_v35  ;;  %v10120_v20 = vpack.c.bf16 %v4348_v29, %v4316_v49  ;;  %v4256_v12 = vmax.f32 %v3800_v14, 0.0  ;;  %v4411_v59 = vpack.c.bf16 %v4347_v58, %v4315_v38  ;;  %v11431_v49 = vld [vmem:[#allocation78_spill] sm:$0xff]  ;;  %v11434_v54 = vld [vmem:[#allocation81_spill] sm:$0xff] }
 0x32f   :  { %v10122_v27 = vpack.c.bf16 %v4349_v34, %v4317_v52  ;;  %v3751_v33 = vadd.f32 %v11428_v31, %v9823_v62  ;;  %v3804_v63 = vadd.f32 %v11429_v36, %v9823_v62  ;;  %v3753_v35 = vadd.f32 %v11430_v0, %v9823_v62  ;;  %v11435_v58 = vld [vmem:[#allocation82_spill] sm:$0xff]  ;;  %v11436_v31 = vld [vmem:[#allocation83_spill] sm:$0xff] }
 0x330   :  { %5925 = vmatmul.mubr.msk.bf16.vlgmr.msra.gmra.mrb[64].mxu0 %vm4449_vm0, %v10039_v10  ;;  %v3806_v21 = vadd.f32 %v11431_v49, %v9823_v62  ;;  %v3757_v5 = vadd.f32 %v11432_v18, %v9945_v15  ;;  %v3810_v24 = vadd.f32 %v11433_v47, %v9945_v15  ;;  %v4255_v17 = vmax.f32 %v3749_v60, 0.0 }
 0x331   :  { %4540 = vmatpush1.bf16.msra.mxu0 %v10033_v42  ;;  %4571 = vmatprep.mubr.bf16.mxu0 %v11025_v46  ;;  %v4257_v41 = vmax.f32 %v3802_v45, 0.0  ;;  %v4286_v53 = vmax.f32 %v3751_v33, 0.0  ;;  %v4288_v14 = vmax.f32 %v3804_v63, 0.0  ;;  %v4287_v38 = vmax.f32 %v3753_v35, 0.0 }
 0x332   :  { %5926 = vmatmul.mubr.msk.bf16.vlgmr.msra.gmra.mrb[64].mxu1 %vm4449_vm0, %v10039_v10  ;;  %4541 = vmatprep.subr.bf16.mxu0 %v10070_v55  ;;  %v4289_v52 = vmax.f32 %v3806_v21, 0.0  ;;  %v3759_v29 = vadd.f32 %v11434_v54, %v9945_v15  ;;  %v3812_v34 = vadd.f32 %v11435_v58, %v9945_v15  ;;  %v4318_v60 = vmax.f32 %v3757_v5, 0.0 }
 0x333   :  { %4583 = vmatpush1.bf16.msra.mxu1 %v10035_v44  ;;  %4614 = vmatprep.mubr.bf16.mxu1 %v11025_v46  ;;  %v10149_v42 = vpack.c.bf16 %v4286_v53, %v4254_v23  ;;  %v10151_v48 = vpack.c.bf16 %v4288_v14, %v4256_v12  ;;  %v4320_v25 = vmax.f32 %v3810_v24, 0.0  ;;  %v4383_v55 = vpack.c.bf16 %v4287_v38, %v4255_v17  ;;  %v11437_v44 = vld [vmem:[#allocation84_spill] sm:$0xff]  ;;  %v11438_v12 = vld [vmem:[#allocation85_spill] sm:$0xff] }
 0x334   :  { %4584 = vmatprep.subr.bf16.mxu1 %v10073_v50  ;;  %v4385_v45 = vpack.c.bf16 %v4289_v52, %v4257_v41  ;;  %v3761_v33 = vadd.f32 %v11436_v31, %v9963_v37  ;;  %v3814_v36 = vadd.f32 %v9597_v57, %v9963_v37  ;;  %v3763_v23 = vadd.f32 %v11437_v44, %v9963_v37  ;;  %v11439_v52 = vld [vmem:[#allocation30_spill] sm:$0xff] }
 0x335   :  { %4542 = vmatpush1.bf16.msra.mxu0 %v10066_v28  ;;  %v3816_v63 = vadd.f32 %v11438_v12, %v9963_v37  ;;  %v3853_v0 = vadd.f32 %v9831_v16, %v9791_v11  ;;  %v3906_v50 = vadd.f32 %v9845_v56, %v9791_v11  ;;  %v4319_v35 = vmax.f32 %v3759_v29, 0.0 }
 0x336   :  { %4625 = vmatprep.subr.bf16.mxu0 %v4379_v40  ;;  %v4350_v49 = vmax.f32 %v3761_v33, 0.0  ;;  %v4352_v21 = vmax.f32 %v3814_v36, 0.0  ;;  %v3855_v57 = vadd.f32 %v9837_v6, %v9791_v11  ;;  %v4321_v28 = vmax.f32 %v3812_v34, 0.0 }
 0x337   :  { %4585 = vmatpush1.bf16.msra.mxu1 %v10068_v7  ;;  %v4351_v18 = vmax.f32 %v3763_v23, 0.0  ;;  %v4353_v5 = vmax.f32 %v3816_v63, 0.0  ;;  %v3908_v47 = vadd.f32 %v9853_v13, %v9791_v11  ;;  %v4258_v40 = vmax.f32 %v3853_v0, 0.0 }
 0x338   :  { %5927 = vmatmul.mubr.msk.bf16.vlgmr.msra.gmra.mrb[68].mxu0 %vm4449_vm0, %v10039_v10  ;;  %4668 = vmatprep.subr.bf16.mxu1 %v10099_v4  ;;  %v4414_v16 = vpack.c.bf16 %v4350_v49, %v4318_v60  ;;  %v4416_v56 = vpack.c.bf16 %v4352_v21, %v4320_v25  ;;  %v4260_v24 = vmax.f32 %v3906_v50, 0.0  ;;  %v3857_v17 = vadd.f32 %v9847_v30, %v9823_v62 }
 0x339   :  { %4626 = vmatpush1.bf16.msra.mxu0 %v10094_v51  ;;  %4657 = vmatprep.mubr.bf16.mxu0 %v11025_v46  ;;  %v4415_v6 = vpack.c.bf16 %v4351_v18, %v4319_v35  ;;  %v4417_v7 = vpack.c.bf16 %v4353_v5, %v4321_v28  ;;  %v4259_v13 = vmax.f32 %v3855_v57, 0.0  ;;  %v3910_v4 = vadd.f32 %v9863_v2, %v9823_v62 }
 0x33a   :  { %5928 = vmatmul.mubr.msk.bf16.vlgmr.msra.gmra.mrb[68].mxu1 %vm4449_vm0, %v10039_v10  ;;  %4627 = vmatprep.subr.bf16.mxu0 %v4411_v59  ;;  %v3859_v41 = vadd.f32 %v9855_v3, %v9823_v62  ;;  %v3912_v51 = vadd.f32 %v9872_v22, %v9823_v62  ;;  %v4261_v53 = vmax.f32 %v3908_v47, 0.0  ;;  %v4290_v30 = vmax.f32 %v3857_v17, 0.0 }
 0x33b   :  { %4669 = vmatpush1.bf16.msra.mxu1 %v10096_v43  ;;  %4700 = vmatprep.mubr.bf16.mxu1 %v11025_v46  ;;  %v3863_v14 = vadd.f32 %v9886_v1, %v9945_v15  ;;  %v3916_v59 = vadd.f32 %v9907_v61, %v9945_v15  ;;  %v4292_v2 = vmax.f32 %v3910_v4, 0.0  ;;  %v3865_v22 = vadd.f32 %v11439_v52, %v9945_v15 }
 0x33c   :  { %4670 = vmatprep.subr.bf16.mxu1 %v10122_v27  ;;  %v4291_v38 = vmax.f32 %v3859_v41, 0.0  ;;  %v4293_v3 = vmax.f32 %v3912_v51, 0.0  ;;  %v4386_v43 = vpack.c.bf16 %v4290_v30, %v4258_v40  ;;  %v3918_v1 = vadd.f32 %v9917_v39, %v9945_v15 }
 0x33d   :  { %4628 = vmatpush1.bf16.msra.mxu0 %v10118_v26  ;;  %v4388_v54 = vpack.c.bf16 %v4292_v2, %v4260_v24  ;;  %v3867_v61 = vadd.f32 %v9901_v9, %v9963_v37  ;;  %v3920_v27 = vadd.f32 %v9923_v32, %v9963_v37  ;;  %v3869_v34 = vadd.f32 %v9909_v8, %v9963_v37 }
 0x33e   :  { %4711 = vmatprep.subr.bf16.mxu0 %v4383_v55  ;;  %v4387_v29 = vpack.c.bf16 %v4291_v38, %v4259_v13  ;;  %v4389_v58 = vpack.c.bf16 %v4293_v3, %v4261_v53  ;;  %v3922_v26 = vadd.f32 %v9930_v19, %v9963_v37  ;;  %v4322_v60 = vmax.f32 %v3863_v14, 0.0 }
 0x33f   :  { %4671 = vmatpush1.bf16.msra.mxu1 %v10120_v20  ;;  %v4324_v39 = vmax.f32 %v3916_v59, 0.0  ;;  %v4323_v25 = vmax.f32 %v3865_v22, 0.0  ;;  %v4354_v9 = vmax.f32 %v3867_v61, 0.0  ;;  %v4356_v20 = vmax.f32 %v3920_v27, 0.0 }
 0x340   :  { %5929 = vmatmul.mubr.msk.bf16.vlgmr.msra.gmra.mrb[72].mxu0 %vm4449_vm0, %v10039_v10  ;;  %4754 = vmatprep.subr.bf16.mxu1 %v4385_v45  ;;  %v4355_v32 = vmax.f32 %v3869_v34, 0.0  ;;  %v4357_v55 = vmax.f32 %v3922_v26, 0.0  ;;  %v4325_v8 = vmax.f32 %v3918_v1, 0.0 }
 0x341   :  { %4712 = vmatpush1.bf16.msra.mxu0 %v10149_v42  ;;  %4743 = vmatprep.mubr.bf16.mxu0 %v11025_v46  ;;  %v4418_v19 = vpack.c.bf16 %v4354_v9, %v4322_v60  ;;  %v4420_v45 = vpack.c.bf16 %v4356_v20, %v4324_v39 }
 0x342   :  { %5930 = vmatmul.mubr.msk.bf16.vlgmr.msra.gmra.mrb[72].mxu1 %vm4449_vm0, %v10039_v10  ;;  %4713 = vmatprep.subr.bf16.mxu0 %v4415_v6  ;;  %v4419_v31 = vpack.c.bf16 %v4355_v32, %v4323_v25  ;;  %v4421_v42 = vpack.c.bf16 %v4357_v55, %v4325_v8 }
 0x343   :  { %4755 = vmatpush1.bf16.msra.mxu1 %v10151_v48  ;;  %4786 = vmatprep.mubr.bf16.mxu1 %v11025_v46 }
 0x344   :  { %4756 = vmatprep.subr.bf16.mxu1 %v4417_v7  ;;  %v3958_v33 = vpop.f32.mrb[40].mxu0 }
 0x345   :  { %4714 = vmatpush1.bf16.msra.mxu0 %v4414_v16  ;;  %v3959_v48 = vadd.f32 %v3958_v33, %v9791_v11  ;;  %v3960_v36 = vpop.f32.mrb[41].mxu0 }
 0x346   :  { %4797 = vmatprep.subr.bf16.mxu0 %v4387_v29  ;;  %v4011_v44 = vpop.f32.mrb[40].mxu1  ;;  %v3961_v23 = vadd.f32 %v3960_v36, %v9791_v11  ;;  %v3962_v12 = vpop.f32.mrb[42].mxu0 }
 0x347   :  { %4757 = vmatpush1.bf16.msra.mxu1 %v4416_v56  ;;  %v4012_v63 = vadd.f32 %v4011_v44, %v9791_v11  ;;  %v4013_v0 = vpop.f32.mrb[41].mxu1  ;;  %v3963_v50 = vadd.f32 %v3962_v12, %v9823_v62  ;;  %v3964_v35 = vpop.f32.mrb[43].mxu0  ;;  %v4262_v28 = vmax.f32 %v3959_v48, 0.0 }
 0x348   :  { %5931 = vmatmul.mubr.msk.bf16.vlgmr.msra.gmra.mrb[76].mxu0 %vm4449_vm0, %v10039_v10  ;;  %4840 = vmatprep.subr.bf16.mxu1 %v4389_v58  ;;  %v4014_v49 = vadd.f32 %v4013_v0, %v9791_v11  ;;  %v4015_v21 = vpop.f32.mrb[42].mxu1  ;;  %v3965_v57 = vadd.f32 %v3964_v35, %v9823_v62  ;;  %v4263_v16 = vmax.f32 %v3961_v23, 0.0 }
 0x349   :  { %4798 = vmatpush1.bf16.msra.mxu0 %v4386_v43  ;;  %4829 = vmatprep.mubr.bf16.mxu0 %v11025_v46  ;;  %v4294_v18 = vmax.f32 %v3963_v50, 0.0  ;;  %v4016_v5 = vadd.f32 %v4015_v21, %v9823_v62  ;;  %v4017_v47 = vpop.f32.mrb[43].mxu1  ;;  %v4264_v6 = vmax.f32 %v4012_v63, 0.0 }
 0x34a   :  { %5932 = vmatmul.mubr.msk.bf16.vlgmr.msra.gmra.mrb[76].mxu1 %vm4449_vm0, %v10039_v10  ;;  %4799 = vmatprep.subr.bf16.mxu0 %v4419_v31  ;;  %v4295_v56 = vmax.f32 %v3965_v57, 0.0  ;;  %v4018_v40 = vadd.f32 %v4017_v47, %v9823_v62  ;;  %v4265_v17 = vmax.f32 %v4014_v49, 0.0 }
 0x34b   :  { %4841 = vmatpush1.bf16.msra.mxu1 %v4388_v54  ;;  %4872 = vmatprep.mubr.bf16.mxu1 %v11025_v46  ;;  %v4390_v7 = vpack.c.bf16 %v4294_v18, %v4262_v28  ;;  %v4296_v24 = vmax.f32 %v4016_v5, 0.0 }
 0x34c   :  { %4842 = vmatprep.subr.bf16.mxu1 %v4421_v42  ;;  %v4391_v13 = vpack.c.bf16 %v4295_v56, %v4263_v16  ;;  %v4297_v4 = vmax.f32 %v4018_v40, 0.0  ;;  %v3968_v41 = vpop.f32.mrb[44].mxu0 }
 0x34d   :  { %4800 = vmatpush1.bf16.msra.mxu0 %v4418_v19  ;;  %v4392_v51 = vpack.c.bf16 %v4296_v24, %v4264_v6  ;;  %v3969_v53 = vadd.f32 %v3968_v41, %v9945_v15  ;;  %v3970_v30 = vpop.f32.mrb[45].mxu0 }
 0x34e   :  { %v4393_v14 = vpack.c.bf16 %v4297_v4, %v4265_v17  ;;  %v3971_v59 = vadd.f32 %v3970_v30, %v9945_v15  ;;  %v3972_v2 = vpop.f32.mrb[46].mxu0  ;;  %4883 = vmatprep.subr.bf16.mxu0 %v4391_v13 }
 0x34f   :  { %4843 = vmatpush1.bf16.msra.mxu1 %v4420_v45  ;;  %v3973_v38 = vadd.f32 %v3972_v2, %v9963_v37  ;;  %v3974_v3 = vpop.f32.mrb[47].mxu0  ;;  %v4326_v43 = vmax.f32 %v3969_v53, 0.0 }
 0x350   :  { %5933 = vmatmul.mubr.msk.bf16.vlgmr.msra.gmra.mrb[80].mxu0 %vm4449_vm0, %v10039_v10  ;;  %v4021_v52 = vpop.f32.mrb[44].mxu1  ;;  %4926 = vmatprep.subr.bf16.mxu1 %v4393_v14  ;;  %v3975_v22 = vadd.f32 %v3974_v3, %v9963_v37  ;;  %v4327_v1 = vmax.f32 %v3971_v59, 0.0 }
 0x351   :  { %4915 = vmatprep.mubr.bf16.mxu0 %v11025_v46  ;;  %4884 = vmatpush1.bf16.msra.mxu0 %v4390_v7  ;;  %v4022_v54 = vadd.f32 %v4021_v52, %v9945_v15  ;;  %v4023_v29 = vpop.f32.mrb[45].mxu1  ;;  %v4358_v58 = vmax.f32 %v3973_v38, 0.0 }
 0x352   :  { %5934 = vmatmul.mubr.msk.bf16.vlgmr.msra.gmra.mrb[80].mxu1 %vm4449_vm0, %v10039_v10  ;;  %v4024_v61 = vadd.f32 %v4023_v29, %v9945_v15  ;;  %v4025_v27 = vpop.f32.mrb[46].mxu1  ;;  %v4359_v34 = vmax.f32 %v3975_v22, 0.0 }
 0x353   :  { %4958 = vmatprep.mubr.bf16.mxu1 %v11025_v46  ;;  %4927 = vmatpush1.bf16.msra.mxu1 %v4392_v51  ;;  %v4422_v26 = vpack.c.bf16 %v4358_v58, %v4326_v43  ;;  %v4026_v60 = vadd.f32 %v4025_v27, %v9963_v37  ;;  %v4027_v39 = vpop.f32.mrb[47].mxu1  ;;  %v4328_v20 = vmax.f32 %v4022_v54, 0.0 }
 0x354   :  { %v4423_v25 = vpack.c.bf16 %v4359_v34, %v4327_v1  ;;  %v4028_v9 = vadd.f32 %v4027_v39, %v9963_v37  ;;  %v4329_v55 = vmax.f32 %v4024_v61, 0.0 }
 0x355   :  { %v4360_v32 = vmax.f32 %v4026_v60, 0.0 }
 0x356   :  { %v4361_v8 = vmax.f32 %v4028_v9, 0.0  ;;  %4885 = vmatprep.subr.bf16.mxu0 %v4423_v25 }
 0x357   :  { %v4424_v19 = vpack.c.bf16 %v4360_v32, %v4328_v20  ;;  %4886 = vmatpush1.bf16.msra.mxu0 %v4422_v26 }
 0x358   :  { %v4425_v45 = vpack.c.bf16 %v4361_v8, %v4329_v55 }
 0x35a   :  { %4928 = vmatprep.subr.bf16.mxu1 %v4425_v45  ;;  %5935 = vmatmul.mubr.msk.bf16.vlgmr.msra.gmra.mrb[84].mxu0 %vm4449_vm0, %v10039_v10 }
 0x35b   :  { %4929 = vmatpush1.bf16.msra.mxu1 %v4424_v19  ;;  %5001 = vmatprep.mubr.bf16.mxu0 %v11025_v46 }
 0x35e   :  { %5936 = vmatmul.mubr.msk.bf16.vlgmr.msra.gmra.mrb[84].mxu1 %vm4449_vm0, %v10039_v10 }
 0x35f   :  { %5044 = vmatprep.mubr.bf16.mxu1 %v11025_v46 }
 0x399   :  { %v4064_v31 = vpop.f32.mrb[48].mxu0 }
 0x39a   :  { %v4065_v42 = vadd.f32 %v4064_v31, %v9791_v11  ;;  %v4066_v33 = vpop.f32.mrb[49].mxu0 }
 0x39b   :  { %v4117_v48 = vpop.f32.mrb[48].mxu1  ;;  %v4067_v36 = vadd.f32 %v4066_v33, %v9791_v11  ;;  %v4068_v44 = vpop.f32.mrb[50].mxu0 }
 0x39c   :  { %v4118_v23 = vadd.f32 %v4117_v48, %v9791_v11  ;;  %v4119_v12 = vpop.f32.mrb[49].mxu1  ;;  %v4069_v63 = vadd.f32 %v4068_v44, %v9823_v62  ;;  %v4070_v0 = vpop.f32.mrb[51].mxu0  ;;  %v4266_v21 = vmax.f32 %v4065_v42, 0.0 }
 0x39d   :  { %v4120_v50 = vadd.f32 %v4119_v12, %v9791_v11  ;;  %v4121_v35 = vpop.f32.mrb[50].mxu1  ;;  %v4071_v49 = vadd.f32 %v4070_v0, %v9823_v62  ;;  %v4267_v5 = vmax.f32 %v4067_v36, 0.0 }
 0x39e   :  { %v4298_v57 = vmax.f32 %v4069_v63, 0.0  ;;  %v4122_v28 = vadd.f32 %v4121_v35, %v9823_v62  ;;  %v4123_v18 = vpop.f32.mrb[51].mxu1  ;;  %v4268_v56 = vmax.f32 %v4118_v23, 0.0 }
 0x39f   :  { %v4299_v47 = vmax.f32 %v4071_v49, 0.0  ;;  %v4124_v16 = vadd.f32 %v4123_v18, %v9823_v62  ;;  %v4269_v7 = vmax.f32 %v4120_v50, 0.0 }
 0x3a0   :  { %v4394_v40 = vpack.c.bf16 %v4298_v57, %v4266_v21  ;;  %v4300_v6 = vmax.f32 %v4122_v28, 0.0 }
 0x3a1   :  { %v4395_v24 = vpack.c.bf16 %v4299_v47, %v4267_v5  ;;  %v4301_v17 = vmax.f32 %v4124_v16, 0.0  ;;  %v4074_v13 = vpop.f32.mrb[52].mxu0 }
 0x3a2   :  { %v4396_v4 = vpack.c.bf16 %v4300_v6, %v4268_v56  ;;  %v4075_v41 = vadd.f32 %v4074_v13, %v9945_v15  ;;  %v4076_v51 = vpop.f32.mrb[53].mxu0 }
 0x3a3   :  { %v4397_v53 = vpack.c.bf16 %v4301_v17, %v4269_v7  ;;  %v4077_v30 = vadd.f32 %v4076_v51, %v9945_v15  ;;  %v4078_v14 = vpop.f32.mrb[54].mxu0  ;;  %4969 = vmatprep.subr.bf16.mxu0 %v4395_v24 }
 0x3a4   :  { %v4127_v59 = vpop.f32.mrb[52].mxu1  ;;  %v4079_v2 = vadd.f32 %v4078_v14, %v9963_v37  ;;  %v4080_v38 = vpop.f32.mrb[55].mxu0  ;;  %4970 = vmatpush1.bf16.msra.mxu0 %v4394_v40  ;;  %v4330_v43 = vmax.f32 %v4075_v41, 0.0 }
 0x3a5   :  { %v4128_v3 = vadd.f32 %v4127_v59, %v9945_v15  ;;  %v4129_v52 = vpop.f32.mrb[53].mxu1  ;;  %5012 = vmatprep.subr.bf16.mxu1 %v4397_v53  ;;  %v4081_v22 = vadd.f32 %v4080_v38, %v9963_v37  ;;  %v4331_v1 = vmax.f32 %v4077_v30, 0.0 }
 0x3a6   :  { %v4130_v54 = vadd.f32 %v4129_v52, %v9945_v15  ;;  %v4362_v29 = vmax.f32 %v4079_v2, 0.0  ;;  %v4131_v58 = vpop.f32.mrb[54].mxu1  ;;  %5013 = vmatpush1.bf16.msra.mxu1 %v4396_v4 }
 0x3a7   :  { %v4132_v61 = vadd.f32 %v4131_v58, %v9963_v37  ;;  %v4363_v27 = vmax.f32 %v4081_v22, 0.0  ;;  %v4133_v34 = vpop.f32.mrb[55].mxu1  ;;  %v4332_v39 = vmax.f32 %v4128_v3, 0.0 }
 0x3a8   :  { %v4426_v26 = vpack.c.bf16 %v4362_v29, %v4330_v43  ;;  %v4134_v60 = vadd.f32 %v4133_v34, %v9963_v37  ;;  %v4333_v20 = vmax.f32 %v4130_v54, 0.0 }
 0x3a9   :  { %v4364_v25 = vmax.f32 %v4132_v61, 0.0  ;;  %v4427_v9 = vpack.c.bf16 %v4363_v27, %v4331_v1  ;;  %v10288_v1 = vpop.permute.xlu0 %4441 }
 0x3aa   :  { %v4365_v32 = vmax.f32 %v4134_v60, 0.0 }
 0x3ab   :  { %v4428_v55 = vpack.c.bf16 %v4364_v25, %v4332_v39  ;;  %4971 = vmatprep.subr.bf16.mxu0 %v4427_v9 }
 0x3ac   :  { %v4429_v8 = vpack.c.bf16 %v4365_v32, %v4333_v20  ;;  %4972 = vmatpush1.bf16.msra.mxu0 %v4426_v26 }
 0x3ae   :  { %5014 = vmatprep.subr.bf16.mxu1 %v4429_v8 }
 0x3af   :  { %5015 = vmatpush1.bf16.msra.mxu1 %v4428_v55  ;;  %5937 = vmatmul.mubr.msk.bf16.vlgmr.msra.gmra.mrb[88].mxu0 %vm4449_vm0, %v10039_v10 }
 0x3b0   :  { %5087 = vmatprep.mubr.bf16.mxu0 %v11025_v46 }
 0x3b2   :  { %5938 = vmatmul.mubr.msk.bf16.vlgmr.msra.gmra.mrb[88].mxu1 %vm4449_vm0, %v10039_v10 }
 0x3b3   :  { %5130 = vmatprep.mubr.bf16.mxu1 %v11025_v46 }
 0x3f3   :  { %v4170_v19 = vpop.f32.mrb[56].mxu0 }
 0x3f4   :  { %v4171_v45 = vadd.f32 %v4170_v19, %v9791_v11  ;;  %v4172_v31 = vpop.f32.mrb[57].mxu0 }
 0x3f5   :  { %v4223_v42 = vpop.f32.mrb[56].mxu1  ;;  %v4173_v33 = vadd.f32 %v4172_v31, %v9791_v11  ;;  %v4174_v48 = vpop.f32.mrb[58].mxu0 }
 0x3f6   :  { %v4224_v36 = vadd.f32 %v4223_v42, %v9791_v11  ;;  %v4225_v44 = vpop.f32.mrb[57].mxu1  ;;  %v4175_v23 = vadd.f32 %v4174_v48, %v9823_v62  ;;  %v4176_v12 = vpop.f32.mrb[59].mxu0  ;;  %v4270_v46 = vmax.f32 %v4171_v45, 0.0 }
 0x3f7   :  { %v4226_v63 = vadd.f32 %v4225_v44, %v9791_v11  ;;  %v4227_v0 = vpop.f32.mrb[58].mxu1  ;;  %v4177_v50 = vadd.f32 %v4176_v12, %v9823_v62  ;;  %v4271_v57 = vmax.f32 %v4173_v33, 0.0 }
 0x3f8   :  { %v4302_v35 = vmax.f32 %v4175_v23, 0.0  ;;  %v4228_v49 = vadd.f32 %v4227_v0, %v9823_v62  ;;  %v4229_v21 = vpop.f32.mrb[59].mxu1  ;;  %v4272_v5 = vmax.f32 %v4224_v36, 0.0 }
 0x3f9   :  { %v4303_v28 = vmax.f32 %v4177_v50, 0.0  ;;  %v4230_v18 = vadd.f32 %v4229_v21, %v9823_v62  ;;  %v4273_v56 = vmax.f32 %v4226_v63, 0.0 }
 0x3fa   :  { %v4398_v47 = vpack.c.bf16 %v4302_v35, %v4270_v46  ;;  %v4304_v16 = vmax.f32 %v4228_v49, 0.0  ;;  %v10299_v35 = vpop.permute.xlu0 %5209 }
 0x3fb   :  { %v4399_v40 = vpack.c.bf16 %v4303_v28, %v4271_v57  ;;  %v4305_v6 = vmax.f32 %v4230_v18, 0.0  ;;  %v4180_v7 = vpop.f32.mrb[60].mxu0 }
 0x3fc   :  { %v4400_v11 = vpack.c.bf16 %v4304_v16, %v4272_v5  ;;  %v4181_v24 = vadd.f32 %v4180_v7, %v9945_v15  ;;  %v4182_v17 = vpop.f32.mrb[61].mxu0 }
 0x3fd   :  { %v4401_v13 = vpack.c.bf16 %v4305_v6, %v4273_v56  ;;  %v4233_v4 = vpop.f32.mrb[60].mxu1  ;;  %v4183_v41 = vadd.f32 %v4182_v17, %v9945_v15  ;;  %v4184_v51 = vpop.f32.mrb[62].mxu0  ;;  %5055 = vmatprep.subr.bf16.mxu0 %v4399_v40 }
 0x3fe   :  { %v4234_v53 = vadd.f32 %v4233_v4, %v9945_v15  ;;  %v4235_v62 = vpop.f32.mrb[61].mxu1  ;;  %v4185_v30 = vadd.f32 %v4184_v51, %v9963_v37  ;;  %v4186_v14 = vpop.f32.mrb[63].mxu0  ;;  %5056 = vmatpush1.bf16.msra.mxu0 %v4398_v47  ;;  %v4334_v3 = vmax.f32 %v4181_v24, 0.0 }
 0x3ff   :  { %v4236_v59 = vadd.f32 %v4235_v62, %v9945_v15  ;;  %v4237_v2 = vpop.f32.mrb[62].mxu1  ;;  %5098 = vmatprep.subr.bf16.mxu1 %v4401_v13  ;;  %v4187_v38 = vadd.f32 %v4186_v14, %v9963_v37  ;;  %v4335_v54 = vmax.f32 %v4183_v41, 0.0  ;;  %v10290_v15 = vpop.permute.xlu1 %4446 }
 0x400   :  { %v4366_v52 = vmax.f32 %v4185_v30, 0.0  ;;  %v4238_v22 = vadd.f32 %v4237_v2, %v9963_v37  ;;  %v4239_v43 = vpop.f32.mrb[63].mxu1  ;;  %5099 = vmatpush1.bf16.msra.mxu1 %v4400_v11  ;;  %v4336_v61 = vmax.f32 %v4234_v53, 0.0 }
 0x401   :  { %v4367_v29 = vmax.f32 %v4187_v38, 0.0  ;;  %v4240_v58 = vadd.f32 %v4239_v43, %v9963_v37  ;;  %v4337_v26 = vmax.f32 %v4236_v59, 0.0 }
 0x402   :  { %v4430_v27 = vpack.c.bf16 %v4366_v52, %v4334_v3  ;;  %v4368_v34 = vmax.f32 %v4238_v22, 0.0 }
 0x403   :  { %v4431_v60 = vpack.c.bf16 %v4367_v29, %v4335_v54  ;;  %v4369_v39 = vmax.f32 %v4240_v58, 0.0  ;;  %v4487_v25 = vpop.f32.mrb[64].mxu0  ;;  %v10301_v49 = vpop.permute.xlu1 %5214 }
 0x404   :  { %v4432_v9 = vpack.c.bf16 %v4368_v34, %v4336_v61  ;;  %v4488_v20 = vadd.f32 %v4487_v25, %v10288_v1  ;;  %v4489_v32 = vpop.f32.mrb[65].mxu0 }
 0x405   :  { %v4433_v55 = vpack.c.bf16 %v4369_v39, %v4337_v26  ;;  %v4530_v8 = vpop.f32.mrb[64].mxu1  ;;  %v4490_v19 = vadd.f32 %v4489_v32, %v10288_v1  ;;  %v4491_v37 = vpop.f32.mrb[66].mxu0  ;;  %5057 = vmatprep.subr.bf16.mxu0 %v4431_v60 }
 0x406   :  { %v5141_v45 = vmax.f32 %v4488_v20, 0.0  ;;  %v4531_v31 = vadd.f32 %v4530_v8, %v10288_v1  ;;  %v4532_v42 = vpop.f32.mrb[65].mxu1  ;;  %v4492_v33 = vadd.f32 %v4491_v37, %v10290_v15  ;;  %v4493_v48 = vpop.f32.mrb[67].mxu0  ;;  %5058 = vmatpush1.bf16.msra.mxu0 %v4430_v27 }
 0x407   :  { %v5142_v36 = vmax.f32 %v4490_v19, 0.0  ;;  %v4533_v44 = vadd.f32 %v4532_v42, %v10288_v1  ;;  %v4534_v23 = vpop.f32.mrb[66].mxu1  ;;  %5100 = vmatprep.subr.bf16.mxu1 %v4433_v55  ;;  %v4494_v12 = vadd.f32 %v4493_v48, %v10290_v15 }
 0x408   :  { %v5143_v63 = vmax.f32 %v4531_v31, 0.0  ;;  %v5173_v0 = vmax.f32 %v4492_v33, 0.0  ;;  %v4535_v50 = vadd.f32 %v4534_v23, %v10290_v15  ;;  %v4536_v46 = vpop.f32.mrb[67].mxu1  ;;  %5101 = vmatpush1.bf16.msra.mxu1 %v4432_v9  ;;  %v5217_v18 = vmul.f32 %v10299_v35, %v5141_v45 }
 0x409   :  { %v5144_v21 = vmax.f32 %v4533_v44, 0.0  ;;  %v5174_v57 = vmax.f32 %v4494_v12, 0.0  ;;  %v4537_v28 = vadd.f32 %v4536_v46, %v10290_v15  ;;  %5939 = vmatmul.mubr.msk.bf16.vlgmr.msra.gmra.mrb[92].mxu0 %vm4449_vm0, %v10039_v10  ;;  %v5218_v16 = vmul.f32 %v10299_v35, %v5142_v36 }
 0x40a   :  { %v5249_v5 = vmul.f32 %v10301_v49, %v5173_v0  ;;  %v5175_v47 = vmax.f32 %v4535_v50, 0.0  ;;  %v5219_v7 = vmul.f32 %v10299_v35, %v5143_v63 }
 0x40b   :  { %v5250_v56 = vmul.f32 %v10301_v49, %v5174_v57  ;;  %v5176_v40 = vmax.f32 %v4537_v28, 0.0  ;;  %5940 = vmatmul.mubr.msk.bf16.vlgmr.msra.gmra.mrb[92].mxu1 %vm4449_vm0, %v10039_v10  ;;  %v4573_v6 = vpop.f32.mrb[68].mxu0  ;;  %v5220_v13 = vmul.f32 %v10299_v35, %v5144_v21 }
 0x40c   :  { %v5281_v11 = vadd.f32 %v5249_v5, %v5217_v18  ;;  %v5251_v24 = vmul.f32 %v10301_v49, %v5175_v47  ;;  %v4575_v17 = vpop.f32.mrb[69].mxu0  ;;  %v4574_v30 = vadd.f32 %v4573_v6, %v10288_v1 }
 0x40d   :  { %v5288_v4 = vadd.f32 %v5250_v56, %v5218_v16  ;;  %v5252_v41 = vmul.f32 %v10301_v49, %v5176_v40  ;;  %v4616_v51 = vpop.f32.mrb[68].mxu1  ;;  %v4577_v53 = vpop.f32.mrb[70].mxu0  ;;  %v4576_v3 = vadd.f32 %v4575_v17, %v10288_v1 }
 0x40e   :  { %v5295_v62 = vadd.f32 %v5251_v24, %v5219_v7  ;;  %v4618_v14 = vpop.f32.mrb[69].mxu1  ;;  %v4579_v59 = vpop.f32.mrb[71].mxu0  ;;  %v4617_v2 = vadd.f32 %v4616_v51, %v10288_v1  ;;  %v5282_v43 = vrot.slane %v5281_v11, 4  ;;  %v5145_v54 = vmax.f32 %v4574_v30, 0.0 }
 0x40f   :  { %v5302_v10 = vadd.f32 %v5252_v41, %v5220_v13  ;;  %v4620_v38 = vpop.f32.mrb[70].mxu1  ;;  %v4619_v22 = vadd.f32 %v4618_v14, %v10288_v1  ;;  %v4578_v29 = vadd.f32 %v4577_v53, %v10290_v15  ;;  %v5289_v34 = vrot.slane %v5288_v4, 4 }
 0x410   :  { %v4622_v52 = vpop.f32.mrb[71].mxu1  ;;  %v5147_v58 = vmax.f32 %v4617_v2, 0.0  ;;  %v4621_v61 = vadd.f32 %v4620_v38, %v10290_v15  ;;  %v5146_v26 = vmax.f32 %v4576_v3, 0.0  ;;  %v4580_v39 = vadd.f32 %v4579_v59, %v10290_v15  ;;  %v5509_v59 = vpop.permute.xlu0 %5508 }
 0x411   :  { %v5177_v60 = vmax.f32 %v4578_v29, 0.0  ;;  %v5148_v9 = vmax.f32 %v4619_v22, 0.0  ;;  %v4623_v32 = vadd.f32 %v4622_v52, %v10290_v15  ;;  %v5283_v19 = vadd.f32 %v5282_v43, %v5281_v11 }
 0x412   :  { %v5179_v20 = vmax.f32 %v4621_v61, 0.0  ;;  %v5221_v37 = vmul.f32 %v10299_v35, %v5145_v54  ;;  %v5178_v31 = vmax.f32 %v4580_v39, 0.0  ;;  %v5296_v48 = vrot.slane %v5295_v62, 4 }
 0x413   :  { %v4659_v27 = vpop.f32.mrb[72].mxu0  ;;  %v5253_v45 = vmul.f32 %v10301_v49, %v5177_v60  ;;  %v5223_v36 = vmul.f32 %v10299_v35, %v5147_v58  ;;  %v5180_v23 = vmax.f32 %v4623_v32, 0.0  ;;  %v5290_v63 = vadd.f32 %v5289_v34, %v5288_v4  ;;  %v11440_v58 = vld [vmem:[#allocation7_spill] sm:$0xff] }
 0x414   :  { %v10323_v25 = vpop.f32.mrb[73].mxu0  ;;  %v5255_v44 = vmul.f32 %v10301_v49, %v5179_v20  ;;  %v5222_v0 = vmul.f32 %v10299_v35, %v5146_v26  ;;  %v5254_v46 = vmul.f32 %v10301_v49, %v5178_v31  ;;  %v5224_v57 = vmul.f32 %v10299_v35, %v5148_v9 }
 0x415   :  { %v4702_v55 = vpop.f32.mrb[72].mxu1  ;;  %v4663_v8 = vpop.f32.mrb[74].mxu0  ;;  %v5309_v50 = vadd.f32 %v5253_v45, %v5221_v37  ;;  %v5256_v18 = vmul.f32 %v10301_v49, %v5180_v23  ;;  %v5303_v5 = vrot.slane %v5302_v10, 4  ;;  %v5284_v16 = vrot.slane %v5283_v19, 2 }
 0x416   :  { %v10328_v42 = vpop.f32.mrb[73].mxu1  ;;  %v10330_v33 = vpop.f32.mrb[75].mxu0  ;;  %v5323_v28 = vadd.f32 %v5255_v44, %v5223_v36  ;;  %v5316_v47 = vadd.f32 %v5254_v46, %v5222_v0  ;;  %v5297_v56 = vadd.f32 %v5296_v48, %v5295_v62  ;;  %v5291_v7 = vrot.slane %v5290_v63, 2 }
 0x417   :  { %v4706_v12 = vpop.f32.mrb[74].mxu1  ;;  %v5330_v40 = vadd.f32 %v5256_v18, %v5224_v57  ;;  %v5304_v13 = vadd.f32 %v5303_v5, %v5302_v10  ;;  %v5285_v51 = vadd.f32 %v5284_v16, %v5283_v19  ;;  %v5310_v38 = vrot.slane %v5309_v50, 4 }
 0x418   :  { %v10336_v21 = vpop.f32.mrb[75].mxu1  ;;  %v5298_v53 = vrot.slane %v5297_v56, 2  ;;  %v5292_v62 = vadd.f32 %v5291_v7, %v5290_v63  ;;  %v4660_v3 = vadd.f32 %v4659_v27, %v10288_v1  ;;  %v5324_v54 = vrot.slane %v5323_v28, 4 }
 0x419   :  { %v5305_v2 = vrot.slane %v5304_v13, 2  ;;  %v5286_v52 = vrot.slane %v5285_v51, 1  ;;  %v10362_v61 = vrot.slane %v5509_v59, %v11440_v58  ;;  %v5317_v34 = vrot.slane %v5316_v47, 4 }
 0x41a   :  { %v5299_v22 = vadd.f32 %v5298_v53, %v5297_v56  ;;  %v5293_v10 = vrot.slane %v5292_v62, 1  ;;  %v4703_v26 = vadd.f32 %v4702_v55, %v10288_v1  ;;  %v5311_v27 = vadd.f32 %v5310_v38, %v5309_v50 }
 0x41b   :  { %v10340_v6 = vpop.f32.mrb[76].mxu0  ;;  %v5306_v9 = vadd.f32 %v5305_v2, %v5304_v13  ;;  %v5149_v20 = vmax.f32 %v4660_v3, 0.0  ;;  %v4664_v32 = vadd.f32 %v4663_v8, %v10290_v15  ;;  %v5287_v45 = vadd.f32 %v5286_v52, %v5285_v51 }
 0x41c   :  { %v10342_v11 = vpop.f32.mrb[77].mxu0  ;;  %v5300_v31 = vrot.slane %v5299_v22, 1  ;;  %v4662_v48 = vadd.f32 %v10323_v25, %v10288_v1  ;;  %v4707_v55 = vadd.f32 %v4706_v12, %v10290_v15  ;;  %v5294_v44 = vadd.f32 %v5293_v10, %v5292_v62 }
 0x41d   :  { %v10344_v24 = vpop.f32.mrb[76].mxu1  ;;  %v10346_v17 = vpop.f32.mrb[78].mxu0  ;;  %v5325_v23 = vadd.f32 %v5324_v54, %v5323_v28  ;;  %v5331_v63 = vrot.slane %v5330_v40, 4  ;;  %v5181_v0 = vmax.f32 %v4664_v32, 0.0  ;;  %v5318_v8 = vadd.f32 %v5317_v34, %v5316_v47 }
 0x41e   :  { %v10348_v4 = vpop.f32.mrb[77].mxu1  ;;  %v10350_v41 = vpop.f32.mrb[79].mxu0  ;;  %v5151_v46 = vmax.f32 %v4703_v26, 0.0  ;;  %v5183_v57 = vmax.f32 %v4707_v55, 0.0  ;;  %v4666_v18 = vadd.f32 %v10330_v33, %v10290_v15  ;;  %v5312_v5 = vrot.slane %v5311_v27, 2 }
 0x41f   :  { %v10352_v30 = vpop.f32.mrb[78].mxu1  ;;  %v5225_v16 = vmul.f32 %v10299_v35, %v5149_v20  ;;  %v4705_v25 = vadd.f32 %v10328_v42, %v10288_v1  ;;  %v5257_v12 = vmul.f32 %v10301_v49, %v5181_v0  ;;  %v5515_v28 = vadd.f32 %v10362_v61, %v5287_v45 }
 0x420   :  { %v10354_v14 = vpop.f32.mrb[79].mxu1  ;;  %v5307_v56 = vrot.slane %v5306_v9, 1  ;;  %v5150_v7 = vmax.f32 %v4662_v48, 0.0  ;;  %v5301_v13 = vadd.f32 %v5300_v31, %v5299_v22  ;;  %v5326_v51 = vrot.slane %v5325_v23, 2 }
 0x421   :  { %v5332_v47 = vadd.f32 %v5331_v63, %v5330_v40  ;;  %v5337_v53 = vadd.f32 %v5257_v12, %v5225_v16  ;;  %v5319_v62 = vrot.slane %v5318_v8, 2  ;;  %v5227_v59 = vmul.f32 %v10299_v35, %v5151_v46 }
 0x422   :  { %v5259_v33 = vmul.f32 %v10301_v49, %v5183_v57  ;;  %v5182_v2 = vmax.f32 %v4666_v18, 0.0  ;;  %v5516_v38 = vadd.f32 %v10362_v61, %v5294_v44  ;;  %v5313_v3 = vadd.f32 %v5312_v5, %v5311_v27 }
 0x423   :  { %v10357_v43 = vpop.f32.mrb[80].mxu0  ;;  %v5152_v42 = vmax.f32 %v4705_v25, 0.0  ;;  %v4709_v52 = vadd.f32 %v10336_v21, %v10290_v15  ;;  %v5226_v10 = vmul.f32 %v10299_v35, %v5150_v7  ;;  %v5338_v54 = vrot.slane %v5337_v53, 4 }
 0x424   :  { %v10359_v29 = vpop.f32.mrb[81].mxu0  ;;  %v5351_v22 = vadd.f32 %v5259_v33, %v5227_v59  ;;  %v5258_v40 = vmul.f32 %v10301_v49, %v5182_v2  ;;  %v5308_v58 = vadd.f32 %v5307_v56, %v5306_v9  ;;  %v5327_v34 = vadd.f32 %v5326_v51, %v5325_v23 }
 0x425   :  { %v10365_v60 = vpop.f32.mrb[80].mxu1  ;;  %v10367_v39 = vpop.f32.mrb[82].mxu0  ;;  %v5184_v26 = vmax.f32 %v4709_v52, 0.0  ;;  %v5320_v20 = vadd.f32 %v5319_v62, %v5318_v8  ;;  %v5333_v32 = vrot.slane %v5332_v47, 2  ;;  %v4746_v31 = vadd.f32 %v10340_v6, %v10288_v1 }
 0x426   :  { %v10370_v19 = vpop.f32.mrb[81].mxu1  ;;  %v10372_v37 = vpop.f32.mrb[83].mxu0  ;;  %v5344_v45 = vadd.f32 %v5258_v40, %v5226_v10  ;;  %v10397_v27 = vmul.f32 0.5, %v5515_v28  ;;  %v5228_v48 = vmul.f32 %v10299_v35, %v5152_v42  ;;  %v5352_v21 = vrot.slane %v5351_v22, 4 }
 0x427   :  { %v10377_v36 = vpop.f32.mrb[82].mxu1  ;;  %v5260_v55 = vmul.f32 %v10301_v49, %v5184_v26  ;;  %v5517_v63 = vadd.f32 %v10362_v61, %v5301_v13  ;;  %v10404_v9 = vmul.f32 0.5, %v5516_v38  ;;  %v5314_v23 = vrot.slane %v5313_v3, 1 }
 0x428   :  { %v10379_v50 = vpop.f32.mrb[83].mxu1  ;;  %v5339_v0 = vadd.f32 %v5338_v54, %v5337_v53  ;;  %v5328_v46 = vrot.slane %v5327_v34, 1  ;;  %v4789_v6 = vadd.f32 %v10344_v24, %v10288_v1  ;;  %v4750_v18 = vadd.f32 %v10346_v17, %v10290_v15 }
 0x429   :  { %v5358_v57 = vadd.f32 %v5260_v55, %v5228_v48  ;;  %v5321_v16 = vrot.slane %v5320_v20, 1  ;;  %v5334_v25 = vadd.f32 %v5333_v32, %v5332_v47  ;;  %v5153_v12 = vmax.f32 %v4746_v31, 0.0 }
 0x42a   :  { %v4748_v28 = vadd.f32 %v10342_v11, %v10288_v1  ;;  %v5353_v7 = vadd.f32 %v5352_v21, %v5351_v22  ;;  %v5345_v13 = vrot.slane %v5344_v45, 4  ;;  %v5185_v51 = vmax.f32 %v4750_v18, 0.0 }
 0x42b   :  { %v4793_v53 = vadd.f32 %v10352_v30, %v10290_v15  ;;  %v5549_v62 = vmul.f32 0.5, %v5517_v63  ;;  %v5518_v17 = vadd.f32 %v10362_v61, %v5308_v58  ;;  %v5340_v59 = vrot.slane %v5339_v0, 2 }
 0x42c   :  { %v5359_v33 = vrot.slane %v5358_v57, 4  ;;  %v5315_v2 = vadd.f32 %v5314_v23, %v5313_v3  ;;  %v5329_v38 = vadd.f32 %v5328_v46, %v5327_v34  ;;  %v5155_v11 = vmax.f32 %v4789_v6, 0.0 }
 0x42d   :  { %v10401_v44 = vpop.f32.mrb[84].mxu0  ;;  %v4791_v42 = vadd.f32 %v10348_v4, %v10288_v1  ;;  %v5322_v10 = vadd.f32 %v5321_v16, %v5320_v20  ;;  %v5335_v54 = vrot.slane %v5334_v25, 1  ;;  %v5229_v30 = vmul.f32 %v10299_v35, %v5153_v12 }
 0x42e   :  { %v10406_v8 = vpop.f32.mrb[85].mxu0  ;;  %v5261_v22 = vmul.f32 %v10301_v49, %v5185_v51  ;;  %v5354_v58 = vrot.slane %v5353_v7, 2  ;;  %v5346_v26 = vadd.f32 %v5345_v13, %v5344_v45  ;;  %v5154_v32 = vmax.f32 %v4748_v28, 0.0 }
 0x42f   :  { %v10412_v5 = vpop.f32.mrb[86].mxu0  ;;  %v5187_v31 = vmax.f32 %v4793_v53, 0.0  ;;  %v5341_v3 = vadd.f32 %v5340_v59, %v5339_v0  ;;  %v5360_v34 = vadd.f32 %v5359_v33, %v5358_v57  ;;  %v4752_v4 = vadd.f32 %v10350_v41, %v10290_v15 }
 0x430   :  { %v10416_v56 = vpop.f32.mrb[87].mxu0  ;;  %v5365_v48 = vadd.f32 %v5261_v22, %v5229_v30  ;;  %v5231_v21 = vmul.f32 %v10299_v35, %v5155_v11  ;;  %v5156_v20 = vmax.f32 %v4791_v42, 0.0  ;;  %v4795_v63 = vadd.f32 %v10354_v14, %v10290_v15 }
 0x431   :  { %v10420_v24 = vpop.f32.mrb[84].mxu1  ;;  %v5263_v55 = vmul.f32 %v10301_v49, %v5187_v31  ;;  %v5519_v23 = vadd.f32 %v10362_v61, %v5315_v2  ;;  %v5521_v45 = vadd.f32 %v10362_v61, %v5329_v38  ;;  %v5336_v46 = vadd.f32 %v5335_v54, %v5334_v25 }
 0x432   :  { %v10423_v47 = vpop.f32.mrb[85].mxu1  ;;  %v5186_v6 = vmax.f32 %v4752_v4, 0.0  ;;  %v5355_v0 = vadd.f32 %v5354_v58, %v5353_v7  ;;  %v5347_v57 = vrot.slane %v5346_v26, 2  ;;  %v5188_v16 = vmax.f32 %v4795_v63, 0.0 }
 0x433   :  { %v10427_v52 = vpop.f32.mrb[86].mxu1  ;;  %v5379_v18 = vadd.f32 %v5263_v55, %v5231_v21  ;;  %v5342_v12 = vrot.slane %v5341_v3, 1  ;;  %v5361_v41 = vrot.slane %v5360_v34, 2  ;;  %v5230_v28 = vmul.f32 %v10299_v35, %v5154_v32 }
 0x434   :  { %v10431_v40 = vpop.f32.mrb[87].mxu1  ;;  %v5262_v13 = vmul.f32 %v10301_v49, %v5186_v6  ;;  %v5520_v51 = vadd.f32 %v10362_v61, %v5322_v10  ;;  %v5232_v14 = vmul.f32 %v10299_v35, %v5156_v20  ;;  %v5366_v53 = vrot.slane %v5365_v48, 4 }
 0x435   :  { %v5264_v59 = vmul.f32 %v10301_v49, %v5188_v16  ;;  %5992 = vtanh.f32 %v10397_v27  ;;  %v5550_v25 = vmul.f32 0.5, %v5518_v17  ;;  %v5522_v7 = vadd.f32 %v10362_v61, %v5336_v46 }
 0x436   :  { %v10448_v33 = vadd.f32 %v5262_v13, %v5230_v28  ;;  %v5551_v2 = vmul.f32 0.5, %v5519_v23  ;;  %v5356_v38 = vrot.slane %v5355_v0, 1  ;;  %v5348_v11 = vadd.f32 %v5347_v57, %v5346_v26 }
 0x437   :  { %v10450_v42 = vadd.f32 %v5264_v59, %v5232_v14  ;;  %5994 = vtanh.f32 %v10404_v9  ;;  %v5553_v10 = vmul.f32 0.5, %v5521_v45  ;;  %v5343_v54 = vadd.f32 %v5342_v12, %v5341_v3 }
 0x438   :  { %v5362_v30 = vadd.f32 %v5361_v41, %v5360_v34  ;;  %5996 = vtanh.f32 %v5549_v62  ;;  %v5552_v22 = vmul.f32 0.5, %v5520_v51  ;;  %v5367_v58 = vadd.f32 %v5366_v53, %v5365_v48 }
 0x439   :  { %5998 = vtanh.f32 %v5550_v25  ;;  %v5554_v27 = vmul.f32 0.5, %v5522_v7  ;;  %v5380_v17 = vrot.slane %v5379_v18, 4  ;;  %v4832_v32 = vadd.f32 %v10357_v43, %v10288_v1 }
 0x43a   :  { %6000 = vtanh.f32 %v5551_v2  ;;  %v5357_v31 = vadd.f32 %v5356_v38, %v5355_v0  ;;  %v5349_v4 = vrot.slane %v5348_v11, 1  ;;  %v5523_v26 = vadd.f32 %v10362_v61, %v5343_v54 }
 0x43b   :  { %6002 = vtanh.f32 %v5553_v10  ;;  %v5363_v21 = vrot.slane %v5362_v30, 1  ;;  %v4875_v9 = vadd.f32 %v10365_v60, %v10288_v1  ;;  %v5368_v62 = vrot.slane %v5367_v58, 2 }
 0x43c   :  { %6004 = vtanh.f32 %v5552_v22  ;;  %v4836_v3 = vadd.f32 %v10367_v39, %v10290_v15  ;;  %v5381_v34 = vadd.f32 %v5380_v17, %v5379_v18  ;;  %v5157_v48 = vmax.f32 %v4832_v32, 0.0 }
 0x43d   :  { %6006 = vtanh.f32 %v5554_v27  ;;  %v5525_v43 = vadd.f32 %v10362_v61, %v5357_v31  ;;  %v5350_v20 = vadd.f32 %v5349_v4, %v5348_v11  ;;  %v4834_v55 = vadd.f32 %v10359_v29, %v10288_v1 }
 0x43e   :  { %v5189_v63 = vmax.f32 %v4836_v3, 0.0  ;;  %v5555_v45 = vmul.f32 0.5, %v5523_v26  ;;  %v5364_v46 = vadd.f32 %v5363_v21, %v5362_v30  ;;  %v5159_v60 = vmax.f32 %v4875_v9, 0.0 }
 0x43f   :  { %v10463_v23 = vpop.eup %5992  ;;  %v4879_v6 = vadd.f32 %v10377_v36, %v10290_v15  ;;  %v5369_v0 = vadd.f32 %v5368_v62, %v5367_v58  ;;  %v5373_v39 = vrot.slane %v10448_v33, 4  ;;  %v4877_v57 = vadd.f32 %v10370_v19, %v10288_v1 }
 0x440   :  { %v5265_v18 = vmul.f32 %v10301_v49, %v5189_v63  ;;  %v5382_v29 = vrot.slane %v5381_v34, 2  ;;  %v5233_v12 = vmul.f32 %v10299_v35, %v5157_v48  ;;  %v4838_v28 = vadd.f32 %v10372_v37, %v10290_v15 }
 0x441   :  { %v10471_v16 = vpop.eup %5994  ;;  %v5191_v41 = vmax.f32 %v4879_v6, 0.0  ;;  %v5557_v36 = vmul.f32 0.5, %v5525_v43  ;;  %v5524_v51 = vadd.f32 %v10362_v61, %v5350_v20  ;;  %v5387_v14 = vrot.slane %v10450_v42, 4 }
 0x442   :  { %v10476_v13 = vpop.eup %5996  ;;  %v5158_v53 = vmax.f32 %v4834_v55, 0.0  ;;  %v5235_v59 = vmul.f32 %v10299_v35, %v5159_v60  ;;  %v5393_v25 = vadd.f32 %v5265_v18, %v5233_v12  ;;  %v5190_v2 = vmax.f32 %v4838_v28, 0.0 }
 0x443   :  { %v10480_v19 = vpop.eup %5998  ;;  %v5267_v7 = vmul.f32 %v10301_v49, %v5191_v41  ;;  %v5526_v37 = vadd.f32 %v10362_v61, %v5364_v46  ;;  %v5370_v11 = vrot.slane %v5369_v0, 1  ;;  %v5160_v10 = vmax.f32 %v4877_v57, 0.0 }
 0x444   :  { %v10484_v38 = vpop.eup %6000  ;;  %v4881_v54 = vadd.f32 %v10379_v50, %v10290_v15  ;;  %v5383_v22 = vadd.f32 %v5382_v29, %v5381_v34  ;;  %v5374_v58 = vadd.f32 %v5373_v39, %v10448_v33  ;;  %v5394_v27 = vrot.slane %v5393_v25, 4 }
 0x445   :  { %v10489_v30 = vpop.eup %6002  ;;  %v5407_v17 = vadd.f32 %v5267_v7, %v5235_v59  ;;  %v5388_v31 = vadd.f32 %v5387_v14, %v10450_v42  ;;  %v5234_v4 = vmul.f32 %v10299_v35, %v5158_v53  ;;  %v5266_v26 = vmul.f32 %v10301_v49, %v5190_v2 }
 0x446   :  { %v10492_v32 = vpop.eup %6004  ;;  %v5192_v21 = vmax.f32 %v4881_v54, 0.0  ;;  %6008 = vtanh.f32 %v5555_v45  ;;  %v5556_v50 = vmul.f32 0.5, %v5524_v51  ;;  %v5395_v62 = vadd.f32 %v5394_v27, %v5393_v25 }
 0x447   :  { %v10497_v9 = vpop.eup %6006  ;;  %v5408_v3 = vrot.slane %v5407_v17, 4  ;;  %6010 = vtanh.f32 %v5557_v36  ;;  %v5236_v33 = vmul.f32 %v10299_v35, %v5160_v10  ;;  %v5400_v34 = vadd.f32 %v5266_v26, %v5234_v4 }
 0x448   :  { %v5268_v48 = vmul.f32 %v10301_v49, %v5192_v21  ;;  %v5558_v43 = vmul.f32 0.5, %v5526_v37  ;;  %v5371_v20 = vadd.f32 %v5370_v11, %v5369_v0  ;;  %v5375_v42 = vrot.slane %v5374_v58, 2 }
 0x449   :  { %v5409_v55 = vadd.f32 %v5408_v3, %v5407_v17  ;;  %v5384_v63 = vrot.slane %v5383_v22, 1  ;;  %v5389_v46 = vrot.slane %v5388_v31, 2  ;;  %v5401_v60 = vrot.slane %v5400_v34, 4 }
 0x44a   :  { %v5414_v6 = vadd.f32 %v5268_v48, %v5236_v33  ;;  %6012 = vtanh.f32 %v5556_v50  ;;  %v5396_v39 = vrot.slane %v5395_v62, 2  ;;  %v4918_v45 = vadd.f32 %v10401_v44, %v10288_v1 }
 0x44b   :  { %v5410_v57 = vrot.slane %v5409_v55, 2  ;;  %v5402_v18 = vadd.f32 %v5401_v60, %v5400_v34  ;;  %v4961_v12 = vadd.f32 %v10420_v24, %v10288_v1  ;;  %6014 = vtanh.f32 %v5558_v43 }
 0x44c   :  { %v5415_v29 = vrot.slane %v5414_v6, 4  ;;  %v5527_v0 = vadd.f32 %v10362_v61, %v5371_v20  ;;  %v5376_v41 = vadd.f32 %v5375_v42, %v5374_v58  ;;  %v5385_v28 = vadd.f32 %v5384_v63, %v5383_v22 }
 0x44d   :  { %v5390_v36 = vadd.f32 %v5389_v46, %v5388_v31  ;;  %v5403_v51 = vrot.slane %v5402_v18, 2  ;;  %v5397_v53 = vadd.f32 %v5396_v39, %v5395_v62  ;;  %v5161_v59 = vmax.f32 %v4918_v45, 0.0 }
 0x44e   :  { %v5416_v14 = vadd.f32 %v5415_v29, %v5414_v6  ;;  %v4920_v25 = vadd.f32 %v10406_v8, %v10288_v1  ;;  %v4922_v44 = vadd.f32 %v10412_v5, %v10290_v15  ;;  %v5411_v7 = vadd.f32 %v5410_v57, %v5409_v55 }
 0x44f   :  { %v5163_v37 = vmax.f32 %v4961_v12, 0.0  ;;  %v4965_v24 = vadd.f32 %v10427_v52, %v10290_v15  ;;  %v5559_v10 = vmul.f32 0.5, %v5527_v0  ;;  %v5377_v54 = vrot.slane %v5376_v41, 1 }
 0x450   :  { %v5417_v2 = vrot.slane %v5416_v14, 2  ;;  %v10512_v11 = vpop.eup %6008  ;;  %v5404_v22 = vadd.f32 %v5403_v51, %v5402_v18  ;;  %v5193_v58 = vmax.f32 %v4922_v44, 0.0  ;;  %v5391_v17 = vrot.slane %v5390_v36, 1 }
 0x451   :  { %v10514_v27 = vpop.eup %6010  ;;  %v5195_v8 = vmax.f32 %v4965_v24, 0.0  ;;  %v4924_v5 = vadd.f32 %v10416_v56, %v10290_v15  ;;  %v5398_v4 = vrot.slane %v5397_v53, 1  ;;  %v5237_v26 = vmul.f32 %v10299_v35, %v5161_v59 }
 0x452   :  { %v5418_v31 = vadd.f32 %v5417_v2, %v5416_v14  ;;  %v4963_v52 = vadd.f32 %v10423_v47, %v10288_v1  ;;  %v5269_v21 = vmul.f32 %v10301_v49, %v5193_v58  ;;  %v5412_v50 = vrot.slane %v5411_v7, 1 }
 0x453   :  { %v5239_v62 = vmul.f32 %v10299_v35, %v5163_v37  ;;  %v5162_v3 = vmax.f32 %v4920_v25, 0.0  ;;  %v5271_v33 = vmul.f32 %v10301_v49, %v5195_v8  ;;  %v5529_v48 = vadd.f32 %v10362_v61, %v5385_v28 }
 0x454   :  { %v10524_v34 = vpop.eup %6012  ;;  %v5378_v43 = vadd.f32 %v5377_v54, %v5376_v41  ;;  %v5405_v56 = vrot.slane %v5404_v22, 1  ;;  %v5421_v20 = vadd.f32 %v5269_v21, %v5237_v26  ;;  %v5392_v42 = vadd.f32 %v5391_v17, %v5390_v36 }
 0x455   :  { %v5419_v55 = vrot.slane %v5418_v31, 1  ;;  %v5435_v63 = vadd.f32 %v5271_v33, %v5239_v62  ;;  %v5194_v46 = vmax.f32 %v4924_v5, 0.0  ;;  %v10527_v47 = vpop.eup %6014  ;;  %v5399_v60 = vadd.f32 %v5398_v4, %v5397_v53 }
 0x456   :  { %v5164_v6 = vmax.f32 %v4963_v52, 0.0  ;;  %v5422_v39 = vrot.slane %v5421_v20, 4  ;;  %v4967_v45 = vadd.f32 %v10431_v40, %v10290_v15  ;;  %v5413_v57 = vadd.f32 %v5412_v50, %v5411_v7 }
 0x457   :  { %v5238_v18 = vmul.f32 %v10299_v35, %v5162_v3  ;;  %v5436_v29 = vrot.slane %v5435_v63, 4  ;;  %v5270_v12 = vmul.f32 %v10301_v49, %v5194_v46  ;;  %v5528_v0 = vadd.f32 %v10362_v61, %v5378_v43 }
 0x458   :  { %v5406_v41 = vadd.f32 %v5405_v56, %v5404_v22  ;;  %v5423_v28 = vadd.f32 %v5422_v39, %v5421_v20  ;;  %v5196_v36 = vmax.f32 %v4967_v45, 0.0  ;;  %v5530_v51 = vadd.f32 %v10362_v61, %v5392_v42 }
 0x459   :  { %v5420_v14 = vadd.f32 %v5419_v55, %v5418_v31  ;;  %v5437_v53 = vadd.f32 %v5436_v29, %v5435_v63  ;;  %v5428_v59 = vadd.f32 %v5270_v12, %v5238_v18  ;;  %v5531_v25 = vadd.f32 %v10362_v61, %v5399_v60 }
 0x45a   :  { %v5240_v40 = vmul.f32 %v10299_v35, %v5164_v6  ;;  %v5424_v44 = vrot.slane %v5423_v28, 2  ;;  %v5272_v7 = vmul.f32 %v10301_v49, %v5196_v36  ;;  %v5561_v2 = vmul.f32 0.5, %v5529_v48 }
 0x45b   :  { %v5533_v37 = vadd.f32 %v10362_v61, %v5413_v57  ;;  %v5438_v24 = vrot.slane %v5437_v53, 2  ;;  %v5429_v54 = vrot.slane %v5428_v59, 4  ;;  %v5560_v22 = vmul.f32 0.5, %v5528_v0 }
 0x45c   :  { %v5532_v58 = vadd.f32 %v10362_v61, %v5406_v41  ;;  %v5425_v17 = vadd.f32 %v5424_v44, %v5423_v28  ;;  %v5442_v8 = vadd.f32 %v5272_v7, %v5240_v40  ;;  %v5562_v31 = vmul.f32 0.5, %v5530_v51 }
 0x45d   :  { %v5534_v5 = vadd.f32 %v10362_v61, %v5420_v14  ;;  %v5439_v4 = vadd.f32 %v5438_v24, %v5437_v53  ;;  %v5430_v26 = vadd.f32 %v5429_v54, %v5428_v59  ;;  %6016 = vtanh.f32 %v5559_v10 }
 0x45e   :  { %v5563_v52 = vmul.f32 0.5, %v5531_v25  ;;  %v5426_v21 = vrot.slane %v5425_v17, 1  ;;  %v5443_v50 = vrot.slane %v5442_v8, 4  ;;  %6018 = vtanh.f32 %v5561_v2 }
 0x45f   :  { %v5565_v62 = vmul.f32 0.5, %v5533_v37  ;;  %v5440_v3 = vrot.slane %v5439_v4, 1  ;;  %v5431_v33 = vrot.slane %v5430_v26, 2  ;;  %6020 = vtanh.f32 %v5560_v22 }
 0x460   :  { %v5564_v48 = vmul.f32 0.5, %v5532_v58  ;;  %v5427_v43 = vadd.f32 %v5426_v21, %v5425_v17  ;;  %v5444_v56 = vadd.f32 %v5443_v50, %v5442_v8  ;;  %6022 = vtanh.f32 %v5562_v31 }
 0x461   :  { %v5566_v20 = vmul.f32 0.5, %v5534_v5  ;;  %v5441_v42 = vadd.f32 %v5440_v3, %v5439_v4  ;;  %v5432_v55 = vadd.f32 %v5431_v33, %v5430_v26  ;;  %6024 = vtanh.f32 %v5563_v52 }
 0x462   :  { %v5535_v63 = vadd.f32 %v10362_v61, %v5427_v43  ;;  %v5445_v46 = vrot.slane %v5444_v56, 2  ;;  %6026 = vtanh.f32 %v5565_v62  ;;  %v5611_v28 = vadd.f32 1.0, %v10463_v23 }
 0x463   :  { %v5537_v10 = vadd.f32 %v10362_v61, %v5441_v42  ;;  %v5433_v60 = vrot.slane %v5432_v55, 1  ;;  %6028 = vtanh.f32 %v5564_v48  ;;  %v5612_v14 = vadd.f32 1.0, %v10471_v16 }
 0x464   :  { %v5567_v6 = vmul.f32 0.5, %v5535_v63  ;;  %v5446_v39 = vadd.f32 %v5445_v46, %v5444_v56  ;;  %6030 = vtanh.f32 %v5566_v20  ;;  %v5613_v25 = vadd.f32 1.0, %v10476_v13 }
 0x465   :  { %v5569_v45 = vmul.f32 0.5, %v5537_v10  ;;  %v5434_v57 = vadd.f32 %v5433_v60, %v5432_v55  ;;  %v5614_v40 = vadd.f32 1.0, %v10480_v19  ;;  %v5615_v44 = vadd.f32 1.0, %v10484_v38 }
 0x466   :  { %6032 = vtanh.f32 %v5567_v6  ;;  %v5447_v18 = vrot.slane %v5446_v39, 1  ;;  %v5617_v2 = vadd.f32 1.0, %v10489_v30  ;;  %v10551_v23 = vmul.f32 0.5, %v5611_v28 }
 0x467   :  { %6034 = vtanh.f32 %v5569_v45  ;;  %v5536_v29 = vadd.f32 %v10362_v61, %v5434_v57  ;;  %v6017_v12 = vpop.eup %6016  ;;  %v10553_v22 = vmul.f32 0.5, %v5612_v14  ;;  %v5616_v16 = vadd.f32 1.0, %v10492_v32 }
 0x468   :  { %v5448_v0 = vadd.f32 %v5447_v18, %v5446_v39  ;;  %v6019_v41 = vpop.eup %6018  ;;  %v5618_v58 = vadd.f32 1.0, %v10497_v9  ;;  %v10557_v19 = vmul.f32 0.5, %v5613_v25  ;;  %v10559_v38 = vmul.f32 0.5, %v5614_v40 }
 0x469   :  { %v5568_v36 = vmul.f32 0.5, %v5536_v29  ;;  %v6021_v51 = vpop.eup %6020  ;;  %v10561_v17 = vmul.f32 0.5, %v5615_v44  ;;  %v5619_v30 = vadd.f32 1.0, %v10512_v11  ;;  %v10564_v31 = vmul.f32 0.5, %v5617_v2 }
 0x46a   :  { %v5538_v53 = vadd.f32 %v10362_v61, %v5448_v0  ;;  %v6023_v59 = vpop.eup %6022  ;;  %v5621_v5 = vadd.f32 1.0, %v10514_v27  ;;  %v5620_v4 = vadd.f32 1.0, %v10524_v34  ;;  %v5622_v32 = vadd.f32 1.0, %v10527_v47 }
 0x46b   :  { %6036 = vtanh.f32 %v5568_v36  ;;  %v6025_v7 = vpop.eup %6024  ;;  %v5623_v26 = vadd.f32 1.0, %v6017_v12  ;;  %v5625_v52 = vadd.f32 1.0, %v6019_v41  ;;  %v5624_v21 = vadd.f32 1.0, %v6021_v51 }
 0x46c   :  { %v5570_v37 = vmul.f32 0.5, %v5538_v53  ;;  %v6027_v24 = vpop.eup %6026  ;;  %v5626_v50 = vadd.f32 1.0, %v6023_v59  ;;  %v10569_v62 = vmul.f32 0.5, %v5616_v16  ;;  %v10571_v3 = vmul.f32 0.5, %v5618_v58 }
 0x46d   :  { %v6029_v54 = vpop.eup %6028  ;;  %v5627_v33 = vadd.f32 1.0, %v6025_v7  ;;  %v5629_v11 = vadd.f32 1.0, %v6027_v24  ;;  %v10573_v48 = vmul.f32 0.5, %v5619_v30  ;;  %v10575_v20 = vmul.f32 0.5, %v5621_v5 }
 0x46e   :  { %6038 = vtanh.f32 %v5570_v37  ;;  %v6031_v13 = vpop.eup %6030  ;;  %v5628_v43 = vadd.f32 1.0, %v6029_v54  ;;  %v10577_v34 = vmul.f32 0.5, %v5620_v4  ;;  %v10579_v47 = vmul.f32 0.5, %v5622_v32 }
 0x46f   :  { %v5630_v56 = vadd.f32 1.0, %v6031_v13  ;;  %v10581_v63 = vmul.f32 0.5, %v5623_v26  ;;  %v10583_v46 = vmul.f32 0.5, %v5625_v52  ;;  %v10585_v10 = vmul.f32 0.5, %v5624_v21 }
 0x470   :  { %v6033_v8 = vpop.eup %6032  ;;  %v10587_v60 = vmul.f32 0.5, %v5626_v50  ;;  %v10589_v39 = vmul.f32 0.5, %v5627_v33  ;;  %v10591_v45 = vmul.f32 0.5, %v5629_v11  ;;  %v10594_v12 = vmul.f32 0.5, %v5628_v43 }
 0x471   :  { %v6035_v9 = vpop.eup %6034  ;;  %v5631_v27 = vadd.f32 1.0, %v6033_v8  ;;  %v10596_v0 = vmul.f32 0.5, %v5630_v56  ;;  %v5707_v8 = vcombine.low %v10551_v23, %v10553_v22  ;;  %v5708_v23 = vcombine.low %v10557_v19, %v10559_v38 }
 0x472   :  { %v5633_v42 = vadd.f32 1.0, %v6035_v9  ;;  %v5709_v22 = vcombine.low %v10561_v17, %v10569_v62  ;;  %v6084_v38 = vmov 1966171168  }
 0x473   :  { %v10598_v41 = vmul.f32 0.5, %v5631_v27  ;;  %v5712_v17 = vunpack.c.l.s4 %v6084_v38 }
 0x474   :  { %v10601_v14 = vmul.f32 0.5, %v5633_v42 }
 0x475   :  { %v6037_v55 = vpop.eup %6036 }
 0x476   :  { %v5632_v57 = vadd.f32 1.0, %v6037_v55 }
 0x478   :  { %v6039_v51 = vpop.eup %6038  ;;  %v10603_v53 = vmul.f32 0.5, %v5632_v57  ;;  %v5710_v57 = vcombine.low %v10564_v31, %v10571_v3 }
 0x479   :  { %v5634_v7 = vadd.f32 1.0, %v6039_v51  ;;  %v5758_v51 = vcombine.low %v10581_v63, %v10585_v10  ;;  %v11441_v10 = vld [vmem:[#allocation6_spill] sm:$0xff] }
 0x47b   :  { %v10612_v5 = vmul.f32 0.5, %v5634_v7 }
 0x482   :  { %v5003_v6 = vpop.f32.mrb[88].mxu0 }
 0x483   :  { %v5004_v18 = vadd.f32 %v5003_v6, %v10288_v1  ;;  %v5005_v29 = vpop.f32.mrb[89].mxu0 }
 0x484   :  { %v5006_v28 = vadd.f32 %v5005_v29, %v10288_v1  ;;  %v5007_v36 = vpop.f32.mrb[90].mxu0 }
 0x485   :  { %v5165_v59 = vmax.f32 %v5004_v18, 0.0  ;;  %v5046_v25 = vpop.f32.mrb[88].mxu1  ;;  %v5008_v40 = vadd.f32 %v5007_v36, %v10290_v15  ;;  %v5009_v44 = vpop.f32.mrb[91].mxu0  ;;  %v5756_v18 = vcombine.low %v10573_v48, %v10577_v34  ;;  %v5757_v36 = vcombine.low %v10575_v20, %v10579_v47 }
 0x486   :  { %v5047_v2 = vadd.f32 %v5046_v25, %v10288_v1  ;;  %v5166_v37 = vmax.f32 %v5006_v28, 0.0  ;;  %v5048_v24 = vpop.f32.mrb[89].mxu1  ;;  %v5010_v54 = vadd.f32 %v5009_v44, %v10290_v15  ;;  %v5713_v48 = vunpack.c.0.s8 %v5712_v17 }
 0x487   :  { %v5241_v16 = vmul.f32 %v10299_v35, %v5165_v59  ;;  %v5049_v58 = vadd.f32 %v5048_v24, %v10288_v1  ;;  %v5197_v13 = vmax.f32 %v5008_v40, 0.0  ;;  %v5050_v30 = vpop.f32.mrb[90].mxu1  ;;  %v5759_v59 = vcombine.low %v10583_v46, %v10587_v60 }
 0x488   :  { %v5167_v4 = vmax.f32 %v5047_v2, 0.0  ;;  %v5242_v32 = vmul.f32 %v10299_v35, %v5166_v37  ;;  %v5051_v9 = vadd.f32 %v5050_v30, %v10290_v15  ;;  %v5052_v26 = vpop.f32.mrb[91].mxu1  ;;  %v5198_v50 = vmax.f32 %v5010_v54, 0.0 }
 0x489   :  { %v5168_v52 = vmax.f32 %v5049_v58, 0.0  ;;  %v5273_v21 = vmul.f32 %v10301_v49, %v5197_v13  ;;  %v5053_v33 = vadd.f32 %v5052_v26, %v10290_v15  ;;  %v5805_v40 = vcombine.low %v10589_v39, %v10594_v12 }
 0x48a   :  { %v5243_v11 = vmul.f32 %v10299_v35, %v5167_v4  ;;  %v5199_v43 = vmax.f32 %v5051_v9, 0.0  ;;  %v5274_v42 = vmul.f32 %v10301_v49, %v5198_v50  ;;  %v5806_v44 = vcombine.low %v10591_v45, %v10596_v0 }
 0x48b   :  { %v5244_v56 = vmul.f32 %v10299_v35, %v5168_v52  ;;  %v5449_v27 = vadd.f32 %v5273_v21, %v5241_v16  ;;  %v5200_v55 = vmax.f32 %v5053_v33, 0.0  ;;  %v5807_v20 = vcombine.low %v10598_v41, %v10603_v53 }
 0x48c   :  { %v5275_v6 = vmul.f32 %v10301_v49, %v5199_v43  ;;  %v5456_v28 = vadd.f32 %v5274_v42, %v5242_v32  ;;  %v10644_v2 = vsub.s32 %v5713_v48, %v11441_v10  ;;  %v5808_v60 = vcombine.low %v10601_v14, %v10612_v5 }
 0x48d   :  { %v5450_v29 = vrot.slane %v5449_v27, 4  ;;  %v5276_v19 = vmul.f32 %v10301_v49, %v5200_v55 }
 0x48e   :  { %v5463_v62 = vadd.f32 %v5275_v6, %v5243_v11  ;;  %v5457_v3 = vrot.slane %v5456_v28, 4  ;;  %v5717_v39 = vrot.slane %v5707_v8, %v10644_v2  ;;  %v5724_v45 = vrot.slane %v5708_v23, %v10644_v2 }
 0x48f   :  { %v5451_v31 = vadd.f32 %v5450_v29, %v5449_v27  ;;  %v5470_v25 = vadd.f32 %v5276_v19, %v5244_v56  ;;  %v5731_v0 = vrot.slane %v5709_v22, %v10644_v2  ;;  %v5738_v41 = vrot.slane %v5710_v57, %v10644_v2 }
 0x490   :  { %v5464_v34 = vrot.slane %v5463_v62, 4  ;;  %v5458_v7 = vadd.f32 %v5457_v3, %v5456_v28  ;;  %v5766_v13 = vrot.slane %v5756_v18, %v10644_v2  ;;  %v5739_v4 = vcombine.low %v5717_v39, %v5724_v45 }
 0x491   :  { %v5452_v47 = vrot.slane %v5451_v31, 2  ;;  %v5471_v63 = vrot.slane %v5470_v25, 4  ;;  %v5740_v14 = vcombine.low %v5731_v0, %v5738_v41  ;;  %v5773_v5 = vrot.slane %v5757_v36, %v10644_v2 }
 0x492   :  { %v5465_v46 = vadd.f32 %v5464_v34, %v5463_v62  ;;  %v5459_v24 = vrot.slane %v5458_v7, 2  ;;  %v5780_v26 = vrot.slane %v5758_v51, %v10644_v2  ;;  %v5747_v21 = vrot.slane %v5739_v4, %v10644_v2 }
 0x493   :  { %v5453_v37 = vadd.f32 %v5452_v47, %v5451_v31  ;;  %v5472_v54 = vadd.f32 %v5471_v63, %v5470_v25  ;;  %v5754_v50 = vrot.slane %v5740_v14, %v10644_v2  ;;  %v5787_v33 = vrot.slane %v5759_v59, %v10644_v2 }
 0x494   :  { %v5466_v12 = vrot.slane %v5465_v46, 2  ;;  %v5460_v16 = vadd.f32 %v5459_v24, %v5458_v7  ;;  %v5788_v22 = vcombine.low %v5766_v13, %v5773_v5  ;;  %v5815_v55 = vrot.slane %v5805_v40, %v10644_v2 }
 0x495   :  { %v5454_v53 = vrot.slane %v5453_v37, 1  ;;  %v5473_v58 = vrot.slane %v5472_v54, 2  ;;  %v5755_v27 = vcombine.low %v5747_v21, %v5754_v50  ;;  %v5789_v42 = vcombine.low %v5780_v26, %v5787_v33 }
 0x496   :  { %v5467_v30 = vadd.f32 %v5466_v12, %v5465_v46  ;;  %v5461_v9 = vrot.slane %v5460_v16, 1  ;;  %v5796_v29 = vrot.slane %v5788_v22, %v10644_v2  ;;  %v5822_v38 = vrot.slane %v5806_v44, %v10644_v2 }
 0x497   :  { %v5455_v32 = vadd.f32 %v5454_v53, %v5453_v37  ;;  %v5474_v8 = vadd.f32 %v5473_v58, %v5472_v54  ;;  %v5803_v19 = vrot.slane %v5789_v42, %v10644_v2  ;;  %v5829_v17 = vrot.slane %v5807_v20, %v10644_v2  ;;  %5907 = vst [vmem:[#allocation3] sm:$0xff] %v5755_v27 }
 0x498   :  { %v5468_v52 = vrot.slane %v5467_v30, 1  ;;  %v5462_v43 = vadd.f32 %v5461_v9, %v5460_v16  ;;  %v5836_v51 = vrot.slane %v5808_v60, %v10644_v2  ;;  %v5837_v3 = vcombine.low %v5815_v55, %v5822_v38 }
 0x499   :  { %v5539_v11 = vadd.f32 %v10362_v61, %v5455_v32  ;;  %v5475_v23 = vrot.slane %v5474_v8, 1  ;;  %v5804_v31 = vcombine.low %v5796_v29, %v5803_v19 }
 0x49a   :  { %v5469_v56 = vadd.f32 %v5468_v52, %v5467_v30  ;;  %v5540_v57 = vadd.f32 %v10362_v61, %v5462_v43  ;;  %v5838_v48 = vcombine.low %v5829_v17, %v5836_v51  ;;  %v5845_v34 = vrot.slane %v5837_v3, %v10644_v2 }
 0x49b   :  { %v5571_v6 = vmul.f32 0.5, %v5539_v11  ;;  %v5476_v18 = vadd.f32 %v5475_v23, %v5474_v8  ;;  %5908 = vst [vmem:[#allocation3 + $0x8] sm:$0xff] %v5804_v31 }
 0x49c   :  { %v5541_v28 = vadd.f32 %v10362_v61, %v5469_v56  ;;  %v5572_v62 = vmul.f32 0.5, %v5540_v57  ;;  %v5852_v40 = vrot.slane %v5838_v48, %v10644_v2 }
 0x49d   :  { %6040 = vtanh.f32 %v5571_v6  ;;  %v5542_v36 = vadd.f32 %v10362_v61, %v5476_v18 }
 0x49e   :  { %v5573_v59 = vmul.f32 0.5, %v5541_v28  ;;  %6042 = vtanh.f32 %v5572_v62  ;;  %v5853_v44 = vcombine.low %v5845_v34, %v5852_v40 }
 0x49f   :  { %v5574_v25 = vmul.f32 0.5, %v5542_v36 }
 0x4a0   :  { %6044 = vtanh.f32 %v5573_v59  ;;  %5909 = vst [vmem:[#allocation3 + $0x10] sm:$0xff] %v5853_v44 }
 0x4a1   :  { %6046 = vtanh.f32 %v5574_v25 }
 0x4a7   :  { %v6041_v20 = vpop.eup %6040 }
 0x4a8   :  { %v5635_v47 = vadd.f32 1.0, %v6041_v20  ;;  %v6043_v7 = vpop.eup %6042 }
 0x4a9   :  { %v5636_v46 = vadd.f32 1.0, %v6043_v7 }
 0x4aa   :  { %v6045_v63 = vpop.eup %6044  ;;  %v5667_v10 = vmul.f32 0.5, %v5635_v47 }
 0x4ab   :  { %v6047_v60 = vpop.eup %6046  ;;  %v5637_v37 = vadd.f32 1.0, %v6045_v63  ;;  %v5668_v24 = vmul.f32 0.5, %v5636_v46 }
 0x4ac   :  { %v5638_v54 = vadd.f32 1.0, %v6047_v60 }
 0x4ad   :  { %v5669_v39 = vmul.f32 0.5, %v5637_v37  ;;  %v5854_v45 = vcombine.low %v5667_v10, %v5668_v24 }
 0x4ae   :  { %v5670_v12 = vmul.f32 0.5, %v5638_v54 }
 0x4af   :  { %v10671_v41 = vrot.slane %v5854_v45, %v10644_v2 }
 0x4b0   :  { %v5855_v0 = vcombine.low %v5669_v39, %v5670_v12 }
 0x4b2   :  { %v10674_v53 = vrot.slane %v5855_v0, %v10644_v2 }
 0x4b4   :  { %v5886_v16 = vcombine.low %v10671_v41, %v10674_v53 }
 0x4dc   :  { %v5089_v58 = vpop.f32.mrb[92].mxu0 }
 0x4dd   :  { %v5090_v13 = vadd.f32 %v5089_v58, %v10288_v1  ;;  %v5091_v30 = vpop.f32.mrb[93].mxu0 }
 0x4de   :  { %v5132_v4 = vpop.f32.mrb[92].mxu1  ;;  %v5092_v14 = vadd.f32 %v5091_v30, %v10288_v1  ;;  %v5093_v5 = vpop.f32.mrb[94].mxu0 }
 0x4df   :  { %v5169_v32 = vmax.f32 %v5090_v13, 0.0  ;;  %v5133_v9 = vadd.f32 %v5132_v4, %v10288_v1  ;;  %v5134_v8 = vpop.f32.mrb[93].mxu1  ;;  %v5094_v26 = vadd.f32 %v5093_v5, %v10290_v15  ;;  %v5095_v52 = vpop.f32.mrb[95].mxu0 }
 0x4e0   :  { %v5170_v21 = vmax.f32 %v5092_v14, 0.0  ;;  %v5135_v50 = vadd.f32 %v5134_v8, %v10288_v1  ;;  %v5136_v33 = vpop.f32.mrb[94].mxu1  ;;  %v5096_v11 = vadd.f32 %v5095_v52, %v10290_v15 }
 0x4e1   :  { %v5171_v43 = vmax.f32 %v5133_v9, 0.0  ;;  %v5201_v23 = vmax.f32 %v5094_v26, 0.0  ;;  %v5137_v22 = vadd.f32 %v5136_v33, %v10290_v15  ;;  %v5138_v56 = vpop.f32.mrb[95].mxu1  ;;  %v5245_v6 = vmul.f32 %v10299_v35, %v5169_v32 }
 0x4e2   :  { %v5172_v27 = vmax.f32 %v5135_v50, 0.0  ;;  %v5202_v42 = vmax.f32 %v5096_v11, 0.0  ;;  %v5139_v55 = vadd.f32 %v5138_v56, %v10290_v15  ;;  %v5246_v29 = vmul.f32 %v10299_v35, %v5170_v21 }
 0x4e3   :  { %v5277_v57 = vmul.f32 %v10301_v49, %v5201_v23  ;;  %v5203_v18 = vmax.f32 %v5137_v22, 0.0  ;;  %v5247_v19 = vmul.f32 %v10299_v35, %v5171_v43 }
 0x4e4   :  { %v5278_v1 = vmul.f32 %v10301_v49, %v5202_v42  ;;  %v5204_v28 = vmax.f32 %v5139_v55, 0.0  ;;  %v5248_v62 = vmul.f32 %v10299_v35, %v5172_v27 }
 0x4e5   :  { %v5477_v38 = vadd.f32 %v5277_v57, %v5245_v6  ;;  %v5279_v17 = vmul.f32 %v10301_v49, %v5203_v18 }
 0x4e6   :  { %v5484_v36 = vadd.f32 %v5278_v1, %v5246_v29  ;;  %v5280_v15 = vmul.f32 %v10301_v49, %v5204_v28  ;;  %v5894_v29 = vrot.slane %v5886_v16, %v10644_v2 }
 0x4e7   :  { %v5478_v51 = vrot.slane %v5477_v38, 4  ;;  %v5491_v59 = vadd.f32 %v5279_v17, %v5247_v19 }
 0x4e8   :  { %v5485_v31 = vrot.slane %v5484_v36, 4  ;;  %v5498_v3 = vadd.f32 %v5280_v15, %v5248_v62 }
 0x4e9   :  { %v5479_v25 = vadd.f32 %v5478_v51, %v5477_v38  ;;  %v5492_v48 = vrot.slane %v5491_v59, 4 }
 0x4ea   :  { %v5486_v34 = vadd.f32 %v5485_v31, %v5484_v36  ;;  %v5499_v40 = vrot.slane %v5498_v3, 4 }
 0x4eb   :  { %v5480_v44 = vrot.slane %v5479_v25, 2  ;;  %v5493_v20 = vadd.f32 %v5492_v48, %v5491_v59 }
 0x4ec   :  { %v5487_v47 = vrot.slane %v5486_v34, 2  ;;  %v5500_v7 = vadd.f32 %v5499_v40, %v5498_v3 }
 0x4ed   :  { %v5481_v63 = vadd.f32 %v5480_v44, %v5479_v25  ;;  %v5494_v10 = vrot.slane %v5493_v20, 2 }
 0x4ee   :  { %v5488_v46 = vadd.f32 %v5487_v47, %v5486_v34  ;;  %v5501_v60 = vrot.slane %v5500_v7, 2 }
 0x4ef   :  { %v5482_v35 = vrot.slane %v5481_v63, 1  ;;  %v5495_v37 = vadd.f32 %v5494_v10, %v5493_v20 }
 0x4f0   :  { %v5489_v24 = vrot.slane %v5488_v46, 1  ;;  %v5502_v49 = vadd.f32 %v5501_v60, %v5500_v7 }
 0x4f1   :  { %v5483_v54 = vadd.f32 %v5482_v35, %v5481_v63  ;;  %v5496_v39 = vrot.slane %v5495_v37, 1 }
 0x4f2   :  { %v5490_v12 = vadd.f32 %v5489_v24, %v5488_v46  ;;  %v5503_v45 = vrot.slane %v5502_v49, 1 }
 0x4f3   :  { %v5543_v0 = vadd.f32 %v10362_v61, %v5483_v54  ;;  %v5497_v58 = vadd.f32 %v5496_v39, %v5495_v37 }
 0x4f4   :  { %v5544_v13 = vadd.f32 %v10362_v61, %v5490_v12  ;;  %v5504_v30 = vadd.f32 %v5503_v45, %v5502_v49 }
 0x4f5   :  { %v5575_v4 = vmul.f32 0.5, %v5543_v0  ;;  %v5545_v14 = vadd.f32 %v10362_v61, %v5497_v58 }
 0x4f6   :  { %v5576_v5 = vmul.f32 0.5, %v5544_v13  ;;  %v5546_v32 = vadd.f32 %v10362_v61, %v5504_v30 }
 0x4f7   :  { %6048 = vtanh.f32 %v5575_v4  ;;  %v5577_v9 = vmul.f32 0.5, %v5545_v14 }
 0x4f8   :  { %6050 = vtanh.f32 %v5576_v5  ;;  %v5578_v8 = vmul.f32 0.5, %v5546_v32 }
 0x4f9   :  { %6052 = vtanh.f32 %v5577_v9 }
 0x4fa   :  { %6054 = vtanh.f32 %v5578_v8 }
 0x501   :  { %v6049_v26 = vpop.eup %6048 }
 0x502   :  { %v6051_v52 = vpop.eup %6050  ;;  %v5639_v21 = vadd.f32 1.0, %v6049_v26 }
 0x503   :  { %v6053_v50 = vpop.eup %6052  ;;  %v5640_v33 = vadd.f32 1.0, %v6051_v52 }
 0x504   :  { %v6055_v11 = vpop.eup %6054  ;;  %v5671_v43 = vmul.f32 0.5, %v5639_v21  ;;  %v5641_v23 = vadd.f32 1.0, %v6053_v50 }
 0x505   :  { %v5672_v22 = vmul.f32 0.5, %v5640_v33  ;;  %v5642_v56 = vadd.f32 1.0, %v6055_v11 }
 0x506   :  { %v5673_v27 = vmul.f32 0.5, %v5641_v23 }
 0x507   :  { %v5674_v42 = vmul.f32 0.5, %v5642_v56  ;;  %v5856_v55 = vcombine.low %v5671_v43, %v5672_v22 }
 0x509   :  { %v5857_v61 = vcombine.low %v5673_v27, %v5674_v42  ;;  %v5878_v6 = vrot.slane %v5856_v55, %v10644_v2 }
 0x50b   :  { %v5885_v57 = vrot.slane %v5857_v61, %v10644_v2 }
 0x50d   :  { %v5887_v18 = vcombine.low %v5878_v6, %v5885_v57 }
 0x50f   :  { %v5901_v1 = vrot.slane %v5887_v18, %v10644_v2 }
 0x511   :  { %v5902_v28 = vcombine.low %v5894_v29, %v5901_v1 }
 0x513   :  { %5910 = vst [vmem:[#allocation3 + $0x18] sm:$0xff] %v5902_v28 }
 0x514   :  { %6067 = shalt.err (!%p6064_p4)
}
 0x515   :  { %s6068_s15 = scalar_lea.hbm %s10726_s9, 512 }
 0x516   :  { %p6069_p5 = scmp.ne.s32.totalorder %s10726_s9, %s6068_s15  ;;  %p6072_p6 = scmp.lt.u32.totalorder %s6068_s15, %s10726_s9 }
 0x518   :  { %p6074_p7 = pnand %p6072_p6, %p6069_p5 }
 0x51a   :  { %6077 = shalt.err (!%p6074_p7)
}
 0x51b   :  { %5920 = dma.vmem_to_hbm [thread:$0]  %s5918_s12, 512, %s10726_s9, [#allocation4]  }
 0x51c   :  { %6078 = dma.done.wait [#allocation4], 512  }
 0x51d   :  { %6079 = vsyncadd [#allocation4], 4294966784 }
 0x51e   :  { %5924 = vsyncpa [#allocation4], 1 }

</bundles_post_ra>
